<compile_context>
chip_gen: v7x
topology: tpu7x:2x2x1
jax: 0.10.0
libtpu: 0.0.40
codegen_flags: <defaults>
</compile_context>

<pallas_src>
import functools
import math

import jax
import jax.numpy as jnp
from jax.experimental import pallas as pl
from jax.experimental.pallas import tpu as pltpu

_BN_EPS = 1e-5
_VMEM_LIMIT = 32 * 1024 * 1024


# ------------------------------------------------------------ tile planning -
def _round_up(x, m):
    return (x + m - 1) // m * m


def _mxu_tile():
    """Output-tile width: 128 on v5e and older, 256 on v6e/v7x."""
    try:
        kind = jax.devices()[0].device_kind.lower()
    except Exception:
        return 128
    if any(v in kind for v in ("v2", "v3", "v4", "v5")):
        return 128
    return 256


def _plan_m(m, base):
    mp = _round_up(m, 8)
    if mp <= base:
        return mp, mp
    return _round_up(m, base), base


def _plan_n(n, base):
    if n <= base:
        return n, n
    return _round_up(n, base), base


def _plan_k(k):
    kp = k if k % 8 == 0 else _round_up(k, 128)
    if kp <= 1024:
        return kp, kp                        # single K block
    for t in (768, 640, 512, 384, 256, 128):
        if kp % t == 0:
            return kp, t                     # K-tiled without padding
    return _round_up(kp, 512), 512


def _row_tile(rows, target=512):
    for t in (target, 256, 128, 64, 32, 16, 8):
        if t <= rows and rows % t == 0:
            return t
    return rows                              # single full-extent block


# ----------------------------------------------------- K-tiled MXU matmuls --
def _mm_stats_kernel(a_ref, b_ref, o_ref, sum_ref, ssq_ref, acc_ref):
    """A @ B (bf16 operands, f32 accumulate) with per-column sum / sum-of-sq
    of the result emitted in the epilogue (fused BN statistics)."""
    k = pl.program_id(2)

    @pl.when(k == 0)
    def _():
        acc_ref[...] = jnp.zeros_like(acc_ref)

    acc_ref[...] += jnp.dot(a_ref[...], b_ref[...],
                            preferred_element_type=jnp.float32)

    @pl.when(k == pl.num_programs(2) - 1)
    def _():
        r = acc_ref[...]
        o_ref[...] = r
        sum_ref[...] = jnp.broadcast_to(
            jnp.sum(r, axis=0, keepdims=True), sum_ref.shape)
        ssq_ref[...] = jnp.broadcast_to(
            jnp.sum(r * r, axis=0, keepdims=True), ssq_ref.shape)


def _mm_bias_kernel(a_ref, b_ref, bias_ref, o_ref, acc_ref):
    k = pl.program_id(2)

    @pl.when(k == 0)
    def _():
        acc_ref[...] = jnp.zeros_like(acc_ref)

    acc_ref[...] += jnp.dot(a_ref[...], b_ref[...],
                            preferred_element_type=jnp.float32)

    @pl.when(k == pl.num_programs(2) - 1)
    def _():
        o_ref[...] = acc_ref[...] + bias_ref[...]


def _matmul(a, b, *, bias=None, with_stats=False):
    """f32-result (M,K)@(K,N) with bf16 MXU operands and f32 accumulation.

    with_stats=True additionally returns per-column sum and sum-of-squares of
    the result over the M valid rows, fused into the matmul epilogue.
    """
    M, K = a.shape
    K2, N = b.shape
    assert K == K2
    base = _mxu_tile()
    Mp, tm = _plan_m(M, base)
    Np, tn = _plan_n(N, base)
    Kp, tk = _plan_k(K)

    a = a.astype(jnp.bfloat16)
    b = b.astype(jnp.bfloat16)
    if (Mp, Kp) != (M, K):
        a = jnp.pad(a, ((0, Mp - M), (0, Kp - K)))
    if (Kp, Np) != (K, N):
        b = jnp.pad(b, ((0, Kp - K), (0, Np - N)))

    gm, gn, gk = Mp // tm, Np // tn, Kp // tk
    a_spec = pl.BlockSpec((tm, tk), lambda i, j, k: (i, k))
    b_spec = pl.BlockSpec((tk, tn), lambda i, j, k: (k, j))
    o_spec = pl.BlockSpec((tm, tn), lambda i, j, k: (i, j))
    s_spec = pl.BlockSpec((8, tn), lambda i, j, k: (i, j))
    cparams = pltpu.CompilerParams(
        dimension_semantics=("parallel", "parallel", "arbitrary"),
        vmem_limit_bytes=_VMEM_LIMIT)
    scratch = [pltpu.VMEM((tm, tn), jnp.float32)]

    if with_stats:
        out, psum, pssq = pl.pallas_call(
            _mm_stats_kernel,
            out_shape=(jax.ShapeDtypeStruct((Mp, Np), jnp.float32),
                       jax.ShapeDtypeStruct((8 * gm, Np), jnp.float32),
                       jax.ShapeDtypeStruct((8 * gm, Np), jnp.float32)),
            grid=(gm, gn, gk),
            in_specs=[a_spec, b_spec],
            out_specs=(o_spec, s_spec, s_spec),
            scratch_shapes=scratch,
            compiler_params=cparams,
        )(a, b)
        colsum = psum.reshape(gm, 8, Np)[:, 0, :].sum(axis=0)
        colssq = pssq.reshape(gm, 8, Np)[:, 0, :].sum(axis=0)
        if (Mp, Np) != (M, N):
            out = out[:M, :N]
        if Np != N:
            colsum, colssq = colsum[:N], colssq[:N]
        return out, colsum, colssq

    if bias is None:
        bias = jnp.zeros((N,), jnp.float32)
    bias2 = bias.reshape(1, N).astype(jnp.float32)
    if Np != N:
        bias2 = jnp.pad(bias2, ((0, 0), (0, Np - N)))
    out = pl.pallas_call(
        _mm_bias_kernel,
        out_shape=jax.ShapeDtypeStruct((Mp, Np), jnp.float32),
        grid=(gm, gn, gk),
        in_specs=[a_spec, b_spec,
                  pl.BlockSpec((1, tn), lambda i, j, k: (0, j))],
        out_specs=o_spec,
        scratch_shapes=scratch,
        compiler_params=cparams,
    )(a, b, bias2)
    if (Mp, Np) != (M, N):
        out = out[:M, :N]
    return out


# --------------------------------- BN normalize (+residual) (+ReLU) kernel --
def _norm_kernel(x_ref, s_ref, b_ref, o_ref, *, relu):
    y = x_ref[...] * s_ref[...] + b_ref[...]
    if relu:
        y = jnp.maximum(y, 0.0)
    o_ref[...] = y


def _norm_add_relu_kernel(x_ref, s_ref, b_ref, r_ref, o_ref):
    o_ref[...] = jnp.maximum(
        x_ref[...] * s_ref[...] + b_ref[...] + r_ref[...], 0.0)


def _bn_apply(x2d, colsum, colssq, gamma, beta, *, relu, residual=None):
    """Training-mode BN (biased batch variance) from fused per-channel sums,
    then optional residual add and ReLU.  Row-tiled so it scales past VMEM."""
    R, C = x2d.shape
    inv_n = 1.0 / float(R)
    mean = colsum * inv_n
    var = jnp.maximum(colssq * inv_n - mean * mean, 0.0)
    inv_std = jax.lax.rsqrt(var + _BN_EPS)
    scale = (gamma * inv_std).reshape(1, C).astype(jnp.float32)
    shift = (beta - mean * gamma * inv_std).reshape(1, C).astype(jnp.float32)

    tr = _row_tile(R)
    grid = (R // tr,)
    x_spec = pl.BlockSpec((tr, C), lambda i: (i, 0))
    v_spec = pl.BlockSpec((1, C), lambda i: (0, 0))
    cparams = pltpu.CompilerParams(dimension_semantics=("parallel",))
    out_shape = jax.ShapeDtypeStruct((R, C), jnp.float32)

    if residual is None:
        return pl.pallas_call(
            functools.partial(_norm_kernel, relu=relu),
            out_shape=out_shape, grid=grid,
            in_specs=[x_spec, v_spec, v_spec], out_specs=x_spec,
            compiler_params=cparams,
        )(x2d, scale, shift)
    return pl.pallas_call(
        _norm_add_relu_kernel,
        out_shape=out_shape, grid=grid,
        in_specs=[x_spec, v_spec, v_spec, x_spec], out_specs=x_spec,
        compiler_params=cparams,
    )(x2d, scale, shift, residual)


# ------------------------------------------------------- conv + BN (+act) ---
def conv_bn_act(x, w, gamma, beta, *, stride, padding, relu=True,
                residual=None):
    """x: NHWC f32; w: (Cout, Cin, kh, kw).  conv(bias=False) -> training-mode
    BN -> [+residual] -> [ReLU].  BN statistics come fused out of the conv
    matmul epilogue (no extra pass over the activation)."""
    N, H, W, Cin = x.shape
    Cout, _, kh, kw = w.shape
    Ho = (H + 2 * padding - kh) // stride + 1
    Wo = (W + 2 * padding - kw) // stride + 1

    if kh == 1 and kw == 1 and padding == 0:
        a = x[:, ::stride, ::stride, :].reshape(N * Ho * Wo, Cin)
    else:
        # TODO(synk): fuse the im2col gather into the matmul BlockSpecs / a
        # manual-DMA conv kernel instead of materializing patches in HBM.
        xp = jnp.pad(x, ((0, 0), (padding, padding), (padding, padding),
                         (0, 0)))
        cols = []
        for i in range(kh):
            for j in range(kw):
                cols.append(
                    xp[:, i: i + stride * (Ho - 1) + 1: stride,
                          j: j + stride * (Wo - 1) + 1: stride, :])
        a = jnp.concatenate(cols, axis=-1).reshape(N * Ho * Wo, kh * kw * Cin)

    wm = jnp.transpose(w, (2, 3, 1, 0)).reshape(kh * kw * Cin, Cout)
    out2d, colsum, colssq = _matmul(a, wm, with_stats=True)

    r2d = None if residual is None else residual.reshape(N * Ho * Wo, Cout)
    y = _bn_apply(out2d, colsum, colssq, gamma, beta, relu=relu, residual=r2d)
    return y.reshape(N, Ho, Wo, Cout)


# --------------------------------------------------------------- max pool ---
def _maxpool_kernel(e0_ref, e1_ref, e2_ref, o0_ref, o1_ref, o2_ref, out_ref):
    e = jnp.maximum(jnp.maximum(e0_ref[...], e1_ref[...]), e2_ref[...])
    o = jnp.maximum(jnp.maximum(o0_ref[...], o1_ref[...]), o2_ref[...])
    wo = out_ref.shape[2]
    out_ref[...] = jnp.maximum(
        jnp.maximum(e[:, :, :wo, :], o[:, :, :wo, :]), e[:, :, 1:wo + 1, :])


def maxpool_3x3_s2_p1(x):
    """3x3 / stride-2 / pad-1 max pool (NHWC).  Window maxima are computed in
    a Pallas kernel from row-views of the padded input (no 9x patch tensor);
    only the even/odd column split is XLA glue."""
    N, H, W, C = x.shape
    assert H % 2 == 0 and W % 2 == 0
    Ho, Wo = H // 2, W // 2
    xp = jnp.pad(x, ((0, 0), (1, 1), (1, 1), (0, 0)),
                 constant_values=-jnp.inf)
    xe = xp[:, :, 0::2, :]                 # (N, H+2, Wo+1, C) even columns
    xo = xp[:, :, 1::2, :]                 # (N, H+2, Wo+1, C) odd columns
    We = Wo + 1

    def row_spec(d):
        return pl.BlockSpec((1, 1, We, C),
                            lambda n, i, d=d: (n, 2 * i + d, 0, 0))

    out_spec = pl.BlockSpec((1, 1, Wo, C), lambda n, i: (n, i, 0, 0))
    return pl.pallas_call(
        _maxpool_kernel,
        out_shape=jax.ShapeDtypeStruct((N, Ho, Wo, C), jnp.float32),
        grid=(N, Ho),
        in_specs=[row_spec(0), row_spec(1), row_spec(2),
                  row_spec(0), row_spec(1), row_spec(2)],
        out_specs=out_spec,
        compiler_params=pltpu.CompilerParams(
            dimension_semantics=("parallel", "parallel")),
    )(xe, xe, xe, xo, xo, xo)


# ------------------------------------------------------------ global pool ---
def _avgpool_kernel(x_ref, o_ref):
    o_ref[...] = jnp.mean(x_ref[...], axis=1, keepdims=True)


def global_avgpool(x):  # NHWC -> (N, C)
    N, H, W, C = x.shape
    x3 = x.reshape(N, H * W, C)
    out = pl.pallas_call(
        _avgpool_kernel,
        out_shape=jax.ShapeDtypeStruct((N, 1, C), jnp.float32),
        grid=(N,),
        in_specs=[pl.BlockSpec((1, H * W, C), lambda n: (n, 0, 0))],
        out_specs=pl.BlockSpec((1, 1, C), lambda n: (n, 0, 0)),
        compiler_params=pltpu.CompilerParams(
            dimension_semantics=("parallel",)),
    )(x3)
    return out.reshape(N, C)


# --------------------------------------------------------------- network ----
def basic_block(x, p):
    stride = p["stride"]
    identity = x
    out = conv_bn_act(x, p["conv1_w"], p["bn1_g"], p["bn1_b"],
                      stride=stride, padding=1, relu=True)
    if "ds_w" in p:
        identity = conv_bn_act(x, p["ds_w"], p["ds_g"], p["ds_b"],
                               stride=stride, padding=0, relu=False)
    return conv_bn_act(out, p["conv2_w"], p["bn2_g"], p["bn2_b"],
                       stride=1, padding=1, relu=True, residual=identity)


def resnet18_forward(params, x_nchw):
    x = jnp.transpose(x_nchw, (0, 2, 3, 1)).astype(jnp.float32)   # -> NHWC
    x = conv_bn_act(x, params["conv1_w"], params["bn1_g"], params["bn1_b"],
                    stride=2, padding=3, relu=True)
    x = maxpool_3x3_s2_p1(x)
    for bp in params["blocks"]:
        x = basic_block(x, bp)
    feat = global_avgpool(x)                       # (N, 512) == torch.flatten
    return _matmul(feat, params["fc_w"].T, bias=params["fc_b"])


# ------------------------------------------------------------------ init ----
def _init_conv(key, cout, cin, k):
    # kaiming_normal_(mode='fan_out', nonlinearity='relu')
    fan_out = cout * k * k
    std = math.sqrt(2.0 / fan_out)
    return std * jax.random.normal(key, (cout, cin, k, k), jnp.float32)


def _init_basic_block(key, inplanes, planes, stride):
    k1, k2, k3 = jax.random.split(key, 3)
    p = {
        "stride": stride,
        "conv1_w": _init_conv(k1, planes, inplanes, 3),
        "bn1_g": jnp.ones((planes,), jnp.float32),
        "bn1_b": jnp.zeros((planes,), jnp.float32),
        "conv2_w": _init_conv(k2, planes, planes, 3),
        "bn2_g": jnp.ones((planes,), jnp.float32),
        "bn2_b": jnp.zeros((planes,), jnp.float32),
    }
    if stride != 1 or inplanes != planes:
        p["ds_w"] = _init_conv(k3, planes, inplanes, 1)
        p["ds_g"] = jnp.ones((planes,), jnp.float32)
        p["ds_b"] = jnp.zeros((planes,), jnp.float32)
    return p


def init_resnet18_params(key, num_classes=10):
    keys = jax.random.split(key, 16)
    params = {
        "conv1_w": _init_conv(keys[0], 64, 3, 7),
        "bn1_g": jnp.ones((64,), jnp.float32),
        "bn1_b": jnp.zeros((64,), jnp.float32),
    }
    blocks = []
    inplanes = 64
    ki = 1
    for planes, stride, nblocks in [(64, 1, 2), (128, 2, 2),
                                    (256, 2, 2), (512, 2, 2)]:
        for bi in range(nblocks):
            s = stride if bi == 0 else 1
            blocks.append(_init_basic_block(keys[ki], inplanes, planes, s))
            inplanes = planes
            ki += 1
    params["blocks"] = blocks
    kw, kb = jax.random.split(keys[ki])
    bound = 1.0 / math.sqrt(512)
    params["fc_w"] = jax.random.uniform(
        kw, (num_classes, 512), jnp.float32, -bound, bound)
    params["fc_b"] = jax.random.uniform(
        kb, (num_classes,), jnp.float32, -bound, bound)
    return params


# ------------------------------------------------------------------ main ----
if __name__ == "__main__":
    x = jax.random.normal(jax.random.PRNGKey(0), (2, 3, 32, 32), jnp.float32)
    params = init_resnet18_params(jax.random.PRNGKey(1), num_classes=10)
    fwd = jax.jit(functools.partial(resnet18_forward, params))
    logits = fwd(x)
    jax.block_until_ready(logits)
    assert logits.shape == (2, 10)
    assert bool(jnp.all(jnp.isfinite(logits)))
    print("KERNEL_OK")
</pallas_src>

<mosaic_0001>
module attributes {stable_mosaic.version = 11 : i64} {
  func.func @_mm_stats_kernel(%arg0: i32, %arg1: i32, %arg2: i32, %arg3: memref<256x256xbf16, #tpu.memory_space<vmem>>, %arg4: memref<256x64xbf16, #tpu.memory_space<vmem>>, %arg5: memref<256x64xf32, #tpu.memory_space<vmem>>, %arg6: memref<8x64xf32, #tpu.memory_space<vmem>>, %arg7: memref<8x64xf32, #tpu.memory_space<vmem>>, %arg8: memref<256x64xf32, #tpu.memory_space<vmem>>) attributes {dimension_semantics = [#tpu.dimension_semantics<parallel>, #tpu.dimension_semantics<parallel>, #tpu.dimension_semantics<arbitrary>], iteration_bounds = array<i64: 2, 1, 1>, scalar_prefetch = 0 : i64, scratch_operands = 1 : i64, tpu.core_type = #tpu.core_type<tc>, window_params = [{transform_indices = @transform_0, window_bounds = array<i64: 256, 256>}, {transform_indices = @transform_1, window_bounds = array<i64: 256, 64>}, {transform_indices = @transform_2, window_bounds = array<i64: 256, 64>}, {transform_indices = @transform_3, window_bounds = array<i64: 8, 64>}, {transform_indices = @transform_4, window_bounds = array<i64: 8, 64>}]} {
    %c0_i32 = arith.constant 0 : i32
    %0 = arith.cmpi eq, %arg2, %c0_i32 : i32
    %1 = arith.extui %0 : i1 to i32
    %c0_i32_0 = arith.constant 0 : i32
    %2 = arith.cmpi ne, %1, %c0_i32_0 : i32
    scf.if %2 {
      %cst_10 = arith.constant 0.000000e+00 : f32
      %12 = vector.broadcast %cst_10 : f32 to vector<256x64xf32>
      %c0_11 = arith.constant 0 : index
      %c0_12 = arith.constant 0 : index
      %13 = vector.load %arg8[%c0_11, %c0_12] : memref<256x64xf32, #tpu.memory_space<vmem>>, vector<256x64xf32>
      tpu.vector_store %arg8[%c0_11, %c0_12], %12 {strides = array<i32>} : memref<256x64xf32, #tpu.memory_space<vmem>>, vector<256x64xf32>,
    } else {
    }
    %c0 = arith.constant 0 : index
    %c0_1 = arith.constant 0 : index
    %3 = vector.load %arg8[%c0, %c0_1] : memref<256x64xf32, #tpu.memory_space<vmem>>, vector<256x64xf32>
    %c0_2 = arith.constant 0 : index
    %c0_3 = arith.constant 0 : index
    %4 = vector.load %arg3[%c0_2, %c0_3] : memref<256x256xbf16, #tpu.memory_space<vmem>>, vector<256x256xbf16>
    %c0_4 = arith.constant 0 : index
    %c0_5 = arith.constant 0 : index
    %5 = vector.load %arg4[%c0_4, %c0_5] : memref<256x64xbf16, #tpu.memory_space<vmem>>, vector<256x64xbf16>
    %cst = arith.constant dense<0.000000e+00> : vector<256x64xf32>
    %6 = tpu.matmul %4, %5, %cst {dimension_numbers = #tpu.dot_dimension_numbers<[1], [0], [0], [1], [0, 0, 1, 1], [], []>} : vector<256x256xbf16>, vector<256x64xbf16>, vector<256x64xf32> -> vector<256x64xf32>
    %7 = arith.addf %3, %6 : vector<256x64xf32>
    %c0_6 = arith.constant 0 : index
    %c0_7 = arith.constant 0 : index
    %8 = vector.load %arg8[%c0_6, %c0_7] : memref<256x64xf32, #tpu.memory_space<vmem>>, vector<256x64xf32>
    tpu.vector_store %arg8[%c0_6, %c0_7], %7 {strides = array<i32>} : memref<256x64xf32, #tpu.memory_space<vmem>>, vector<256x64xf32>,
    %c0_i32_8 = arith.constant 0 : i32
    %9 = arith.cmpi eq, %arg2, %c0_i32_8 : i32
    %10 = arith.extui %9 : i1 to i32
    %c0_i32_9 = arith.constant 0 : i32
    %11 = arith.cmpi ne, %10, %c0_i32_9 : i32
    scf.if %11 {
      %c0_10 = arith.constant 0 : index
      %c0_11 = arith.constant 0 : index
      %12 = vector.load %arg8[%c0_10, %c0_11] : memref<256x64xf32, #tpu.memory_space<vmem>>, vector<256x64xf32>
      %c0_12 = arith.constant 0 : index
      %c0_13 = arith.constant 0 : index
      %13 = vector.load %arg5[%c0_12, %c0_13] : memref<256x64xf32, #tpu.memory_space<vmem>>, vector<256x64xf32>
      tpu.vector_store %arg5[%c0_12, %c0_13], %12 {strides = array<i32>} : memref<256x64xf32, #tpu.memory_space<vmem>>, vector<256x64xf32>,
      %cst_14 = arith.constant dense<0.000000e+00> : vector<64xf32>
      %14 = vector.multi_reduction <add>, %12, %cst_14 [0] : vector<256x64xf32> to vector<64xf32>
      %15 = vector.shape_cast %14 : vector<64xf32> to vector<1x64xf32>
      %16 = vector.shape_cast %15 : vector<1x64xf32> to vector<1x64xf32>
      %17 = vector.broadcast %16 : vector<1x64xf32> to vector<8x64xf32>
      %c0_15 = arith.constant 0 : index
      %c0_16 = arith.constant 0 : index
      %18 = vector.load %arg6[%c0_15, %c0_16] : memref<8x64xf32, #tpu.memory_space<vmem>>, vector<8x64xf32>
      tpu.vector_store %arg6[%c0_15, %c0_16], %17 {strides = array<i32>} : memref<8x64xf32, #tpu.memory_space<vmem>>, vector<8x64xf32>,
      %19 = arith.mulf %12, %12 : vector<256x64xf32>
      %cst_17 = arith.constant dense<0.000000e+00> : vector<64xf32>
      %20 = vector.multi_reduction <add>, %19, %cst_17 [0] : vector<256x64xf32> to vector<64xf32>
      %21 = vector.shape_cast %20 : vector<64xf32> to vector<1x64xf32>
      %22 = vector.shape_cast %21 : vector<1x64xf32> to vector<1x64xf32>
      %23 = vector.broadcast %22 : vector<1x64xf32> to vector<8x64xf32>
      %c0_18 = arith.constant 0 : index
      %c0_19 = arith.constant 0 : index
      %24 = vector.load %arg7[%c0_18, %c0_19] : memref<8x64xf32, #tpu.memory_space<vmem>>, vector<8x64xf32>
      tpu.vector_store %arg7[%c0_18, %c0_19], %23 {strides = array<i32>} : memref<8x64xf32, #tpu.memory_space<vmem>>, vector<8x64xf32>,
    } else {
    }
    return
  }
  func.func @transform_0(%arg0: i32, %arg1: i32, %arg2: i32) -> (i32, i32) {
    %c0_i32 = arith.constant 0 : i32
    return %arg0, %arg2 : i32, i32
  }
  func.func @transform_1(%arg0: i32, %arg1: i32, %arg2: i32) -> (i32, i32) {
    %c0_i32 = arith.constant 0 : i32
    return %arg2, %arg1 : i32, i32
  }
  func.func @transform_2(%arg0: i32, %arg1: i32, %arg2: i32) -> (i32, i32) {
    %c0_i32 = arith.constant 0 : i32
    return %arg0, %arg1 : i32, i32
  }
  func.func @transform_3(%arg0: i32, %arg1: i32, %arg2: i32) -> (i32, i32) {
    %c0_i32 = arith.constant 0 : i32
    return %arg0, %arg1 : i32, i32
  }
  func.func @transform_4(%arg0: i32, %arg1: i32, %arg2: i32) -> (i32, i32) {
    %c0_i32 = arith.constant 0 : i32
    return %arg0, %arg1 : i32, i32
  }
}

module attributes {stable_mosaic.version = 11 : i64} {
  func.func @_norm_kernel(%arg0: i32, %arg1: memref<512x64xf32, #tpu.memory_space<vmem>>, %arg2: memref<1x64xf32, #tpu.memory_space<vmem>>, %arg3: memref<1x64xf32, #tpu.memory_space<vmem>>, %arg4: memref<512x64xf32, #tpu.memory_space<vmem>>) attributes {dimension_semantics = [#tpu.dimension_semantics<parallel>], iteration_bounds = array<i64: 1>, scalar_prefetch = 0 : i64, scratch_operands = 0 : i64, tpu.core_type = #tpu.core_type<tc>, window_params = [{transform_indices = @transform_0, window_bounds = array<i64: 512, 64>}, {pipeline_mode = #tpu.pipeline_mode<synchronous>, transform_indices = @transform_1, window_bounds = array<i64: 1, 64>}, {pipeline_mode = #tpu.pipeline_mode<synchronous>, transform_indices = @transform_2, window_bounds = array<i64: 1, 64>}, {transform_indices = @transform_3, window_bounds = array<i64: 512, 64>}]} {
    %c0 = arith.constant 0 : index
    %c0_0 = arith.constant 0 : index
    %0 = vector.load %arg1[%c0, %c0_0] : memref<512x64xf32, #tpu.memory_space<vmem>>, vector<512x64xf32>
    %c0_1 = arith.constant 0 : index
    %c0_2 = arith.constant 0 : index
    %1 = vector.load %arg2[%c0_1, %c0_2] : memref<1x64xf32, #tpu.memory_space<vmem>>, vector<1x64xf32>
    %2 = vector.broadcast %1 : vector<1x64xf32> to vector<512x64xf32>
    %3 = arith.mulf %0, %2 : vector<512x64xf32>
    %c0_3 = arith.constant 0 : index
    %c0_4 = arith.constant 0 : index
    %4 = vector.load %arg3[%c0_3, %c0_4] : memref<1x64xf32, #tpu.memory_space<vmem>>, vector<1x64xf32>
    %5 = vector.broadcast %4 : vector<1x64xf32> to vector<512x64xf32>
    %6 = arith.addf %3, %5 : vector<512x64xf32>
    %cst = arith.constant 0.000000e+00 : f32
    %7 = vector.broadcast %cst : f32 to vector<512x64xf32>
    %8 = arith.maximumf %6, %7 : vector<512x64xf32>
    %c0_5 = arith.constant 0 : index
    %c0_6 = arith.constant 0 : index
    %9 = vector.load %arg4[%c0_5, %c0_6] : memref<512x64xf32, #tpu.memory_space<vmem>>, vector<512x64xf32>
    tpu.vector_store %arg4[%c0_5, %c0_6], %8 {strides = array<i32>} : memref<512x64xf32, #tpu.memory_space<vmem>>, vector<512x64xf32>,
    return
  }
  func.func @transform_0(%arg0: i32) -> (i32, i32) {
    %c0_i32 = arith.constant 0 : i32
    %c0_i32_0 = arith.constant 0 : i32
    return %arg0, %c0_i32 : i32, i32
  }
  func.func @transform_1(%arg0: i32) -> (i32, i32) {
    %c0_i32 = arith.constant 0 : i32
    %c0_i32_0 = arith.constant 0 : i32
    %c0_i32_1 = arith.constant 0 : i32
    return %c0_i32, %c0_i32_0 : i32, i32
  }
  func.func @transform_2(%arg0: i32) -> (i32, i32) {
    %c0_i32 = arith.constant 0 : i32
    %c0_i32_0 = arith.constant 0 : i32
    %c0_i32_1 = arith.constant 0 : i32
    return %c0_i32, %c0_i32_0 : i32, i32
  }
  func.func @transform_3(%arg0: i32) -> (i32, i32) {
    %c0_i32 = arith.constant 0 : i32
    %c0_i32_0 = arith.constant 0 : i32
    return %arg0, %c0_i32 : i32, i32
  }
}

module attributes {stable_mosaic.version = 11 : i64} {
  func.func @_maxpool_kernel(%arg0: i32, %arg1: i32, %arg2: memref<1x1x9x64xf32, #tpu.memory_space<vmem>>, %arg3: memref<1x1x9x64xf32, #tpu.memory_space<vmem>>, %arg4: memref<1x1x9x64xf32, #tpu.memory_space<vmem>>, %arg5: memref<1x1x9x64xf32, #tpu.memory_space<vmem>>, %arg6: memref<1x1x9x64xf32, #tpu.memory_space<vmem>>, %arg7: memref<1x1x9x64xf32, #tpu.memory_space<vmem>>, %arg8: memref<1x1x8x64xf32, #tpu.memory_space<vmem>>) attributes {dimension_semantics = [#tpu.dimension_semantics<parallel>, #tpu.dimension_semantics<parallel>], iteration_bounds = array<i64: 2, 8>, scalar_prefetch = 0 : i64, scratch_operands = 0 : i64, tpu.core_type = #tpu.core_type<tc>, window_params = [{transform_indices = @transform_0, window_bounds = array<i64: 1, 1, 9, 64>}, {transform_indices = @transform_1, window_bounds = array<i64: 1, 1, 9, 64>}, {transform_indices = @transform_2, window_bounds = array<i64: 1, 1, 9, 64>}, {transform_indices = @transform_3, window_bounds = array<i64: 1, 1, 9, 64>}, {transform_indices = @transform_4, window_bounds = array<i64: 1, 1, 9, 64>}, {transform_indices = @transform_5, window_bounds = array<i64: 1, 1, 9, 64>}, {transform_indices = @transform_6, window_bounds = array<i64: 1, 1, 8, 64>}]} {
    %c0 = arith.constant 0 : index
    %c0_0 = arith.constant 0 : index
    %c0_1 = arith.constant 0 : index
    %c0_2 = arith.constant 0 : index
    %0 = vector.load %arg2[%c0, %c0_0, %c0_1, %c0_2] : memref<1x1x9x64xf32, #tpu.memory_space<vmem>>, vector<1x1x9x64xf32>
    %c0_3 = arith.constant 0 : index
    %c0_4 = arith.constant 0 : index
    %c0_5 = arith.constant 0 : index
    %c0_6 = arith.constant 0 : index
    %1 = vector.load %arg3[%c0_3, %c0_4, %c0_5, %c0_6] : memref<1x1x9x64xf32, #tpu.memory_space<vmem>>, vector<1x1x9x64xf32>
    %2 = arith.maximumf %0, %1 : vector<1x1x9x64xf32>
    %c0_7 = arith.constant 0 : index
    %c0_8 = arith.constant 0 : index
    %c0_9 = arith.constant 0 : index
    %c0_10 = arith.constant 0 : index
    %3 = vector.load %arg4[%c0_7, %c0_8, %c0_9, %c0_10] : memref<1x1x9x64xf32, #tpu.memory_space<vmem>>, vector<1x1x9x64xf32>
    %4 = arith.maximumf %2, %3 : vector<1x1x9x64xf32>
    %c0_11 = arith.constant 0 : index
    %c0_12 = arith.constant 0 : index
    %c0_13 = arith.constant 0 : index
    %c0_14 = arith.constant 0 : index
    %5 = vector.load %arg5[%c0_11, %c0_12, %c0_13, %c0_14] : memref<1x1x9x64xf32, #tpu.memory_space<vmem>>, vector<1x1x9x64xf32>
    %c0_15 = arith.constant 0 : index
    %c0_16 = arith.constant 0 : index
    %c0_17 = arith.constant 0 : index
    %c0_18 = arith.constant 0 : index
    %6 = vector.load %arg6[%c0_15, %c0_16, %c0_17, %c0_18] : memref<1x1x9x64xf32, #tpu.memory_space<vmem>>, vector<1x1x9x64xf32>
    %7 = arith.maximumf %5, %6 : vector<1x1x9x64xf32>
    %c0_19 = arith.constant 0 : index
    %c0_20 = arith.constant 0 : index
    %c0_21 = arith.constant 0 : index
    %c0_22 = arith.constant 0 : index
    %8 = vector.load %arg7[%c0_19, %c0_20, %c0_21, %c0_22] : memref<1x1x9x64xf32, #tpu.memory_space<vmem>>, vector<1x1x9x64xf32>
    %9 = arith.maximumf %7, %8 : vector<1x1x9x64xf32>
    %10 = vector.extract_strided_slice %4 {offsets = [0, 0, 0, 0], sizes = [1, 1, 8, 64], strides = [1, 1, 1, 1]} : vector<1x1x9x64xf32> to vector<1x1x8x64xf32>
    %11 = vector.extract_strided_slice %9 {offsets = [0, 0, 0, 0], sizes = [1, 1, 8, 64], strides = [1, 1, 1, 1]} : vector<1x1x9x64xf32> to vector<1x1x8x64xf32>
    %12 = arith.maximumf %10, %11 : vector<1x1x8x64xf32>
    %13 = vector.extract_strided_slice %4 {offsets = [0, 0, 1, 0], sizes = [1, 1, 8, 64], strides = [1, 1, 1, 1]} : vector<1x1x9x64xf32> to vector<1x1x8x64xf32>
    %14 = arith.maximumf %12, %13 : vector<1x1x8x64xf32>
    %c0_23 = arith.constant 0 : index
    %c0_24 = arith.constant 0 : index
    %c0_25 = arith.constant 0 : index
    %c0_26 = arith.constant 0 : index
    %15 = vector.load %arg8[%c0_23, %c0_24, %c0_25, %c0_26] : memref<1x1x8x64xf32, #tpu.memory_space<vmem>>, vector<1x1x8x64xf32>
    tpu.vector_store %arg8[%c0_23, %c0_24, %c0_25, %c0_26], %14 {strides = array<i32>} : memref<1x1x8x64xf32, #tpu.memory_space<vmem>>, vector<1x1x8x64xf32>,
    return
  }
  func.func @transform_0(%arg0: i32, %arg1: i32) -> (i32, i32, i32, i32) {
    %c2_i32 = arith.constant 2 : i32
    %0 = arith.muli %c2_i32, %arg1 : i32
    %c0_i32 = arith.constant 0 : i32
    %1 = arith.addi %0, %c0_i32 : i32
    %c0_i32_0 = arith.constant 0 : i32
    %c0_i32_1 = arith.constant 0 : i32
    %c0_i32_2 = arith.constant 0 : i32
    return %arg0, %1, %c0_i32_0, %c0_i32_1 : i32, i32, i32, i32
  }
  func.func @transform_1(%arg0: i32, %arg1: i32) -> (i32, i32, i32, i32) {
    %c2_i32 = arith.constant 2 : i32
    %0 = arith.muli %c2_i32, %arg1 : i32
    %c1_i32 = arith.constant 1 : i32
    %1 = arith.addi %0, %c1_i32 : i32
    %c0_i32 = arith.constant 0 : i32
    %c0_i32_0 = arith.constant 0 : i32
    %c0_i32_1 = arith.constant 0 : i32
    return %arg0, %1, %c0_i32, %c0_i32_0 : i32, i32, i32, i32
  }
  func.func @transform_2(%arg0: i32, %arg1: i32) -> (i32, i32, i32, i32) {
    %c2_i32 = arith.constant 2 : i32
    %0 = arith.muli %c2_i32, %arg1 : i32
    %c2_i32_0 = arith.constant 2 : i32
    %1 = arith.addi %0, %c2_i32_0 : i32
    %c0_i32 = arith.constant 0 : i32
    %c0_i32_1 = arith.constant 0 : i32
    %c0_i32_2 = arith.constant 0 : i32
    return %arg0, %1, %c0_i32, %c0_i32_1 : i32, i32, i32, i32
  }
  func.func @transform_3(%arg0: i32, %arg1: i32) -> (i32, i32, i32, i32) {
    %c2_i32 = arith.constant 2 : i32
    %0 = arith.muli %c2_i32, %arg1 : i32
    %c0_i32 = arith.constant 0 : i32
    %1 = arith.addi %0, %c0_i32 : i32
    %c0_i32_0 = arith.constant 0 : i32
    %c0_i32_1 = arith.constant 0 : i32
    %c0_i32_2 = arith.constant 0 : i32
    return %arg0, %1, %c0_i32_0, %c0_i32_1 : i32, i32, i32, i32
  }
  func.func @transform_4(%arg0: i32, %arg1: i32) -> (i32, i32, i32, i32) {
    %c2_i32 = arith.constant 2 : i32
    %0 = arith.muli %c2_i32, %arg1 : i32
    %c1_i32 = arith.constant 1 : i32
    %1 = arith.addi %0, %c1_i32 : i32
    %c0_i32 = arith.constant 0 : i32
    %c0_i32_0 = arith.constant 0 : i32
    %c0_i32_1 = arith.constant 0 : i32
    return %arg0, %1, %c0_i32, %c0_i32_0 : i32, i32, i32, i32
  }
  func.func @transform_5(%arg0: i32, %arg1: i32) -> (i32, i32, i32, i32) {
    %c2_i32 = arith.constant 2 : i32
    %0 = arith.muli %c2_i32, %arg1 : i32
    %c2_i32_0 = arith.constant 2 : i32
    %1 = arith.addi %0, %c2_i32_0 : i32
    %c0_i32 = arith.constant 0 : i32
    %c0_i32_1 = arith.constant 0 : i32
    %c0_i32_2 = arith.constant 0 : i32
    return %arg0, %1, %c0_i32, %c0_i32_1 : i32, i32, i32, i32
  }
  func.func @transform_6(%arg0: i32, %arg1: i32) -> (i32, i32, i32, i32) {
    %c0_i32 = arith.constant 0 : i32
    %c0_i32_0 = arith.constant 0 : i32
    %c0_i32_1 = arith.constant 0 : i32
    return %arg0, %arg1, %c0_i32, %c0_i32_0 : i32, i32, i32, i32
  }
}

module attributes {stable_mosaic.version = 11 : i64} {
  func.func @_mm_stats_kernel(%arg0: i32, %arg1: i32, %arg2: i32, %arg3: memref<128x576xbf16, #tpu.memory_space<vmem>>, %arg4: memref<576x64xbf16, #tpu.memory_space<vmem>>, %arg5: memref<128x64xf32, #tpu.memory_space<vmem>>, %arg6: memref<8x64xf32, #tpu.memory_space<vmem>>, %arg7: memref<8x64xf32, #tpu.memory_space<vmem>>, %arg8: memref<128x64xf32, #tpu.memory_space<vmem>>) attributes {dimension_semantics = [#tpu.dimension_semantics<parallel>, #tpu.dimension_semantics<parallel>, #tpu.dimension_semantics<arbitrary>], iteration_bounds = array<i64: 1, 1, 1>, scalar_prefetch = 0 : i64, scratch_operands = 1 : i64, tpu.core_type = #tpu.core_type<tc>, window_params = [{transform_indices = @transform_0, window_bounds = array<i64: 128, 576>}, {transform_indices = @transform_1, window_bounds = array<i64: 576, 64>}, {transform_indices = @transform_2, window_bounds = array<i64: 128, 64>}, {transform_indices = @transform_3, window_bounds = array<i64: 8, 64>}, {transform_indices = @transform_4, window_bounds = array<i64: 8, 64>}]} {
    %c0_i32 = arith.constant 0 : i32
    %0 = arith.cmpi eq, %arg2, %c0_i32 : i32
    %1 = arith.extui %0 : i1 to i32
    %c0_i32_0 = arith.constant 0 : i32
    %2 = arith.cmpi ne, %1, %c0_i32_0 : i32
    scf.if %2 {
      %cst_10 = arith.constant 0.000000e+00 : f32
      %12 = vector.broadcast %cst_10 : f32 to vector<128x64xf32>
      %c0_11 = arith.constant 0 : index
      %c0_12 = arith.constant 0 : index
      %13 = vector.load %arg8[%c0_11, %c0_12] : memref<128x64xf32, #tpu.memory_space<vmem>>, vector<128x64xf32>
      tpu.vector_store %arg8[%c0_11, %c0_12], %12 {strides = array<i32>} : memref<128x64xf32, #tpu.memory_space<vmem>>, vector<128x64xf32>,
    } else {
    }
    %c0 = arith.constant 0 : index
    %c0_1 = arith.constant 0 : index
    %3 = vector.load %arg8[%c0, %c0_1] : memref<128x64xf32, #tpu.memory_space<vmem>>, vector<128x64xf32>
    %c0_2 = arith.constant 0 : index
    %c0_3 = arith.constant 0 : index
    %4 = vector.load %arg3[%c0_2, %c0_3] : memref<128x576xbf16, #tpu.memory_space<vmem>>, vector<128x576xbf16>
    %c0_4 = arith.constant 0 : index
    %c0_5 = arith.constant 0 : index
    %5 = vector.load %arg4[%c0_4, %c0_5] : memref<576x64xbf16, #tpu.memory_space<vmem>>, vector<576x64xbf16>
    %cst = arith.constant dense<0.000000e+00> : vector<128x64xf32>
    %6 = tpu.matmul %4, %5, %cst {dimension_numbers = #tpu.dot_dimension_numbers<[1], [0], [0], [1], [0, 0, 1, 1], [], []>} : vector<128x576xbf16>, vector<576x64xbf16>, vector<128x64xf32> -> vector<128x64xf32>
    %7 = arith.addf %3, %6 : vector<128x64xf32>
    %c0_6 = arith.constant 0 : index
    %c0_7 = arith.constant 0 : index
    %8 = vector.load %arg8[%c0_6, %c0_7] : memref<128x64xf32, #tpu.memory_space<vmem>>, vector<128x64xf32>
    tpu.vector_store %arg8[%c0_6, %c0_7], %7 {strides = array<i32>} : memref<128x64xf32, #tpu.memory_space<vmem>>, vector<128x64xf32>,
    %c0_i32_8 = arith.constant 0 : i32
    %9 = arith.cmpi eq, %arg2, %c0_i32_8 : i32
    %10 = arith.extui %9 : i1 to i32
    %c0_i32_9 = arith.constant 0 : i32
    %11 = arith.cmpi ne, %10, %c0_i32_9 : i32
    scf.if %11 {
      %c0_10 = arith.constant 0 : index
      %c0_11 = arith.constant 0 : index
      %12 = vector.load %arg8[%c0_10, %c0_11] : memref<128x64xf32, #tpu.memory_space<vmem>>, vector<128x64xf32>
      %c0_12 = arith.constant 0 : index
      %c0_13 = arith.constant 0 : index
      %13 = vector.load %arg5[%c0_12, %c0_13] : memref<128x64xf32, #tpu.memory_space<vmem>>, vector<128x64xf32>
      tpu.vector_store %arg5[%c0_12, %c0_13], %12 {strides = array<i32>} : memref<128x64xf32, #tpu.memory_space<vmem>>, vector<128x64xf32>,
      %cst_14 = arith.constant dense<0.000000e+00> : vector<64xf32>
      %14 = vector.multi_reduction <add>, %12, %cst_14 [0] : vector<128x64xf32> to vector<64xf32>
      %15 = vector.shape_cast %14 : vector<64xf32> to vector<1x64xf32>
      %16 = vector.shape_cast %15 : vector<1x64xf32> to vector<1x64xf32>
      %17 = vector.broadcast %16 : vector<1x64xf32> to vector<8x64xf32>
      %c0_15 = arith.constant 0 : index
      %c0_16 = arith.constant 0 : index
      %18 = vector.load %arg6[%c0_15, %c0_16] : memref<8x64xf32, #tpu.memory_space<vmem>>, vector<8x64xf32>
      tpu.vector_store %arg6[%c0_15, %c0_16], %17 {strides = array<i32>} : memref<8x64xf32, #tpu.memory_space<vmem>>, vector<8x64xf32>,
      %19 = arith.mulf %12, %12 : vector<128x64xf32>
      %cst_17 = arith.constant dense<0.000000e+00> : vector<64xf32>
      %20 = vector.multi_reduction <add>, %19, %cst_17 [0] : vector<128x64xf32> to vector<64xf32>
      %21 = vector.shape_cast %20 : vector<64xf32> to vector<1x64xf32>
      %22 = vector.shape_cast %21 : vector<1x64xf32> to vector<1x64xf32>
      %23 = vector.broadcast %22 : vector<1x64xf32> to vector<8x64xf32>
      %c0_18 = arith.constant 0 : index
      %c0_19 = arith.constant 0 : index
      %24 = vector.load %arg7[%c0_18, %c0_19] : memref<8x64xf32, #tpu.memory_space<vmem>>, vector<8x64xf32>
      tpu.vector_store %arg7[%c0_18, %c0_19], %23 {strides = array<i32>} : memref<8x64xf32, #tpu.memory_space<vmem>>, vector<8x64xf32>,
    } else {
    }
    return
  }
  func.func @transform_0(%arg0: i32, %arg1: i32, %arg2: i32) -> (i32, i32) {
    %c0_i32 = arith.constant 0 : i32
    return %arg0, %arg2 : i32, i32
  }
  func.func @transform_1(%arg0: i32, %arg1: i32, %arg2: i32) -> (i32, i32) {
    %c0_i32 = arith.constant 0 : i32
    return %arg2, %arg1 : i32, i32
  }
  func.func @transform_2(%arg0: i32, %arg1: i32, %arg2: i32) -> (i32, i32) {
    %c0_i32 = arith.constant 0 : i32
    return %arg0, %arg1 : i32, i32
  }
  func.func @transform_3(%arg0: i32, %arg1: i32, %arg2: i32) -> (i32, i32) {
    %c0_i32 = arith.constant 0 : i32
    return %arg0, %arg1 : i32, i32
  }
  func.func @transform_4(%arg0: i32, %arg1: i32, %arg2: i32) -> (i32, i32) {
    %c0_i32 = arith.constant 0 : i32
    return %arg0, %arg1 : i32, i32
  }
}

module attributes {stable_mosaic.version = 11 : i64} {
  func.func @_norm_kernel(%arg0: i32, %arg1: memref<128x64xf32, #tpu.memory_space<vmem>>, %arg2: memref<1x64xf32, #tpu.memory_space<vmem>>, %arg3: memref<1x64xf32, #tpu.memory_space<vmem>>, %arg4: memref<128x64xf32, #tpu.memory_space<vmem>>) attributes {dimension_semantics = [#tpu.dimension_semantics<parallel>], iteration_bounds = array<i64: 1>, scalar_prefetch = 0 : i64, scratch_operands = 0 : i64, tpu.core_type = #tpu.core_type<tc>, window_params = [{transform_indices = @transform_0, window_bounds = array<i64: 128, 64>}, {pipeline_mode = #tpu.pipeline_mode<synchronous>, transform_indices = @transform_1, window_bounds = array<i64: 1, 64>}, {pipeline_mode = #tpu.pipeline_mode<synchronous>, transform_indices = @transform_2, window_bounds = array<i64: 1, 64>}, {transform_indices = @transform_3, window_bounds = array<i64: 128, 64>}]} {
    %c0 = arith.constant 0 : index
    %c0_0 = arith.constant 0 : index
    %0 = vector.load %arg1[%c0, %c0_0] : memref<128x64xf32, #tpu.memory_space<vmem>>, vector<128x64xf32>
    %c0_1 = arith.constant 0 : index
    %c0_2 = arith.constant 0 : index
    %1 = vector.load %arg2[%c0_1, %c0_2] : memref<1x64xf32, #tpu.memory_space<vmem>>, vector<1x64xf32>
    %2 = vector.broadcast %1 : vector<1x64xf32> to vector<128x64xf32>
    %3 = arith.mulf %0, %2 : vector<128x64xf32>
    %c0_3 = arith.constant 0 : index
    %c0_4 = arith.constant 0 : index
    %4 = vector.load %arg3[%c0_3, %c0_4] : memref<1x64xf32, #tpu.memory_space<vmem>>, vector<1x64xf32>
    %5 = vector.broadcast %4 : vector<1x64xf32> to vector<128x64xf32>
    %6 = arith.addf %3, %5 : vector<128x64xf32>
    %cst = arith.constant 0.000000e+00 : f32
    %7 = vector.broadcast %cst : f32 to vector<128x64xf32>
    %8 = arith.maximumf %6, %7 : vector<128x64xf32>
    %c0_5 = arith.constant 0 : index
    %c0_6 = arith.constant 0 : index
    %9 = vector.load %arg4[%c0_5, %c0_6] : memref<128x64xf32, #tpu.memory_space<vmem>>, vector<128x64xf32>
    tpu.vector_store %arg4[%c0_5, %c0_6], %8 {strides = array<i32>} : memref<128x64xf32, #tpu.memory_space<vmem>>, vector<128x64xf32>,
    return
  }
  func.func @transform_0(%arg0: i32) -> (i32, i32) {
    %c0_i32 = arith.constant 0 : i32
    %c0_i32_0 = arith.constant 0 : i32
    return %arg0, %c0_i32 : i32, i32
  }
  func.func @transform_1(%arg0: i32) -> (i32, i32) {
    %c0_i32 = arith.constant 0 : i32
    %c0_i32_0 = arith.constant 0 : i32
    %c0_i32_1 = arith.constant 0 : i32
    return %c0_i32, %c0_i32_0 : i32, i32
  }
  func.func @transform_2(%arg0: i32) -> (i32, i32) {
    %c0_i32 = arith.constant 0 : i32
    %c0_i32_0 = arith.constant 0 : i32
    %c0_i32_1 = arith.constant 0 : i32
    return %c0_i32, %c0_i32_0 : i32, i32
  }
  func.func @transform_3(%arg0: i32) -> (i32, i32) {
    %c0_i32 = arith.constant 0 : i32
    %c0_i32_0 = arith.constant 0 : i32
    return %arg0, %c0_i32 : i32, i32
  }
}

module attributes {stable_mosaic.version = 11 : i64} {
  func.func @_norm_add_relu_kernel(%arg0: i32, %arg1: memref<128x64xf32, #tpu.memory_space<vmem>>, %arg2: memref<1x64xf32, #tpu.memory_space<vmem>>, %arg3: memref<1x64xf32, #tpu.memory_space<vmem>>, %arg4: memref<128x64xf32, #tpu.memory_space<vmem>>, %arg5: memref<128x64xf32, #tpu.memory_space<vmem>>) attributes {dimension_semantics = [#tpu.dimension_semantics<parallel>], iteration_bounds = array<i64: 1>, scalar_prefetch = 0 : i64, scratch_operands = 0 : i64, tpu.core_type = #tpu.core_type<tc>, window_params = [{transform_indices = @transform_0, window_bounds = array<i64: 128, 64>}, {pipeline_mode = #tpu.pipeline_mode<synchronous>, transform_indices = @transform_1, window_bounds = array<i64: 1, 64>}, {pipeline_mode = #tpu.pipeline_mode<synchronous>, transform_indices = @transform_2, window_bounds = array<i64: 1, 64>}, {transform_indices = @transform_3, window_bounds = array<i64: 128, 64>}, {transform_indices = @transform_4, window_bounds = array<i64: 128, 64>}]} {
    %c0 = arith.constant 0 : index
    %c0_0 = arith.constant 0 : index
    %0 = vector.load %arg1[%c0, %c0_0] : memref<128x64xf32, #tpu.memory_space<vmem>>, vector<128x64xf32>
    %c0_1 = arith.constant 0 : index
    %c0_2 = arith.constant 0 : index
    %1 = vector.load %arg2[%c0_1, %c0_2] : memref<1x64xf32, #tpu.memory_space<vmem>>, vector<1x64xf32>
    %2 = vector.broadcast %1 : vector<1x64xf32> to vector<128x64xf32>
    %3 = arith.mulf %0, %2 : vector<128x64xf32>
    %c0_3 = arith.constant 0 : index
    %c0_4 = arith.constant 0 : index
    %4 = vector.load %arg3[%c0_3, %c0_4] : memref<1x64xf32, #tpu.memory_space<vmem>>, vector<1x64xf32>
    %5 = vector.broadcast %4 : vector<1x64xf32> to vector<128x64xf32>
    %6 = arith.addf %3, %5 : vector<128x64xf32>
    %c0_5 = arith.constant 0 : index
    %c0_6 = arith.constant 0 : index
    %7 = vector.load %arg4[%c0_5, %c0_6] : memref<128x64xf32, #tpu.memory_space<vmem>>, vector<128x64xf32>
    %8 = arith.addf %6, %7 : vector<128x64xf32>
    %cst = arith.constant 0.000000e+00 : f32
    %9 = vector.broadcast %cst : f32 to vector<128x64xf32>
    %10 = arith.maximumf %8, %9 : vector<128x64xf32>
    %c0_7 = arith.constant 0 : index
    %c0_8 = arith.constant 0 : index
    %11 = vector.load %arg5[%c0_7, %c0_8] : memref<128x64xf32, #tpu.memory_space<vmem>>, vector<128x64xf32>
    tpu.vector_store %arg5[%c0_7, %c0_8], %10 {strides = array<i32>} : memref<128x64xf32, #tpu.memory_space<vmem>>, vector<128x64xf32>,
    return
  }
  func.func @transform_0(%arg0: i32) -> (i32, i32) {
    %c0_i32 = arith.constant 0 : i32
    %c0_i32_0 = arith.constant 0 : i32
    return %arg0, %c0_i32 : i32, i32
  }
  func.func @transform_1(%arg0: i32) -> (i32, i32) {
    %c0_i32 = arith.constant 0 : i32
    %c0_i32_0 = arith.constant 0 : i32
    %c0_i32_1 = arith.constant 0 : i32
    return %c0_i32, %c0_i32_0 : i32, i32
  }
  func.func @transform_2(%arg0: i32) -> (i32, i32) {
    %c0_i32 = arith.constant 0 : i32
    %c0_i32_0 = arith.constant 0 : i32
    %c0_i32_1 = arith.constant 0 : i32
    return %c0_i32, %c0_i32_0 : i32, i32
  }
  func.func @transform_3(%arg0: i32) -> (i32, i32) {
    %c0_i32 = arith.constant 0 : i32
    %c0_i32_0 = arith.constant 0 : i32
    return %arg0, %c0_i32 : i32, i32
  }
  func.func @transform_4(%arg0: i32) -> (i32, i32) {
    %c0_i32 = arith.constant 0 : i32
    %c0_i32_0 = arith.constant 0 : i32
    return %arg0, %c0_i32 : i32, i32
  }
}

module attributes {stable_mosaic.version = 11 : i64} {
  func.func @_mm_stats_kernel(%arg0: i32, %arg1: i32, %arg2: i32, %arg3: memref<32x64xbf16, #tpu.memory_space<vmem>>, %arg4: memref<64x128xbf16, #tpu.memory_space<vmem>>, %arg5: memref<32x128xf32, #tpu.memory_space<vmem>>, %arg6: memref<8x128xf32, #tpu.memory_space<vmem>>, %arg7: memref<8x128xf32, #tpu.memory_space<vmem>>, %arg8: memref<32x128xf32, #tpu.memory_space<vmem>>) attributes {dimension_semantics = [#tpu.dimension_semantics<parallel>, #tpu.dimension_semantics<parallel>, #tpu.dimension_semantics<arbitrary>], iteration_bounds = array<i64: 1, 1, 1>, scalar_prefetch = 0 : i64, scratch_operands = 1 : i64, tpu.core_type = #tpu.core_type<tc>, window_params = [{transform_indices = @transform_0, window_bounds = array<i64: 32, 64>}, {transform_indices = @transform_1, window_bounds = array<i64: 64, 128>}, {transform_indices = @transform_2, window_bounds = array<i64: 32, 128>}, {transform_indices = @transform_3, window_bounds = array<i64: 8, 128>}, {transform_indices = @transform_4, window_bounds = array<i64: 8, 128>}]} {
    %c0_i32 = arith.constant 0 : i32
    %0 = arith.cmpi eq, %arg2, %c0_i32 : i32
    %1 = arith.extui %0 : i1 to i32
    %c0_i32_0 = arith.constant 0 : i32
    %2 = arith.cmpi ne, %1, %c0_i32_0 : i32
    scf.if %2 {
      %cst_10 = arith.constant 0.000000e+00 : f32
      %12 = vector.broadcast %cst_10 : f32 to vector<32x128xf32>
      %c0_11 = arith.constant 0 : index
      %c0_12 = arith.constant 0 : index
      %13 = vector.load %arg8[%c0_11, %c0_12] : memref<32x128xf32, #tpu.memory_space<vmem>>, vector<32x128xf32>
      tpu.vector_store %arg8[%c0_11, %c0_12], %12 {strides = array<i32>} : memref<32x128xf32, #tpu.memory_space<vmem>>, vector<32x128xf32>,
    } else {
    }
    %c0 = arith.constant 0 : index
    %c0_1 = arith.constant 0 : index
    %3 = vector.load %arg8[%c0, %c0_1] : memref<32x128xf32, #tpu.memory_space<vmem>>, vector<32x128xf32>
    %c0_2 = arith.constant 0 : index
    %c0_3 = arith.constant 0 : index
    %4 = vector.load %arg3[%c0_2, %c0_3] : memref<32x64xbf16, #tpu.memory_space<vmem>>, vector<32x64xbf16>
    %c0_4 = arith.constant 0 : index
    %c0_5 = arith.constant 0 : index
    %5 = vector.load %arg4[%c0_4, %c0_5] : memref<64x128xbf16, #tpu.memory_space<vmem>>, vector<64x128xbf16>
    %cst = arith.constant dense<0.000000e+00> : vector<32x128xf32>
    %6 = tpu.matmul %4, %5, %cst {dimension_numbers = #tpu.dot_dimension_numbers<[1], [0], [0], [1], [0, 0, 1, 1], [], []>} : vector<32x64xbf16>, vector<64x128xbf16>, vector<32x128xf32> -> vector<32x128xf32>
    %7 = arith.addf %3, %6 : vector<32x128xf32>
    %c0_6 = arith.constant 0 : index
    %c0_7 = arith.constant 0 : index
    %8 = vector.load %arg8[%c0_6, %c0_7] : memref<32x128xf32, #tpu.memory_space<vmem>>, vector<32x128xf32>
    tpu.vector_store %arg8[%c0_6, %c0_7], %7 {strides = array<i32>} : memref<32x128xf32, #tpu.memory_space<vmem>>, vector<32x128xf32>,
    %c0_i32_8 = arith.constant 0 : i32
    %9 = arith.cmpi eq, %arg2, %c0_i32_8 : i32
    %10 = arith.extui %9 : i1 to i32
    %c0_i32_9 = arith.constant 0 : i32
    %11 = arith.cmpi ne, %10, %c0_i32_9 : i32
    scf.if %11 {
      %c0_10 = arith.constant 0 : index
      %c0_11 = arith.constant 0 : index
      %12 = vector.load %arg8[%c0_10, %c0_11] : memref<32x128xf32, #tpu.memory_space<vmem>>, vector<32x128xf32>
      %c0_12 = arith.constant 0 : index
      %c0_13 = arith.constant 0 : index
      %13 = vector.load %arg5[%c0_12, %c0_13] : memref<32x128xf32, #tpu.memory_space<vmem>>, vector<32x128xf32>
      tpu.vector_store %arg5[%c0_12, %c0_13], %12 {strides = array<i32>} : memref<32x128xf32, #tpu.memory_space<vmem>>, vector<32x128xf32>,
      %cst_14 = arith.constant dense<0.000000e+00> : vector<128xf32>
      %14 = vector.multi_reduction <add>, %12, %cst_14 [0] : vector<32x128xf32> to vector<128xf32>
      %15 = vector.shape_cast %14 : vector<128xf32> to vector<1x128xf32>
      %16 = vector.shape_cast %15 : vector<1x128xf32> to vector<1x128xf32>
      %17 = vector.broadcast %16 : vector<1x128xf32> to vector<8x128xf32>
      %c0_15 = arith.constant 0 : index
      %c0_16 = arith.constant 0 : index
      %18 = vector.load %arg6[%c0_15, %c0_16] : memref<8x128xf32, #tpu.memory_space<vmem>>, vector<8x128xf32>
      tpu.vector_store %arg6[%c0_15, %c0_16], %17 {strides = array<i32>} : memref<8x128xf32, #tpu.memory_space<vmem>>, vector<8x128xf32>,
      %19 = arith.mulf %12, %12 : vector<32x128xf32>
      %cst_17 = arith.constant dense<0.000000e+00> : vector<128xf32>
      %20 = vector.multi_reduction <add>, %19, %cst_17 [0] : vector<32x128xf32> to vector<128xf32>
      %21 = vector.shape_cast %20 : vector<128xf32> to vector<1x128xf32>
      %22 = vector.shape_cast %21 : vector<1x128xf32> to vector<1x128xf32>
      %23 = vector.broadcast %22 : vector<1x128xf32> to vector<8x128xf32>
      %c0_18 = arith.constant 0 : index
      %c0_19 = arith.constant 0 : index
      %24 = vector.load %arg7[%c0_18, %c0_19] : memref<8x128xf32, #tpu.memory_space<vmem>>, vector<8x128xf32>
      tpu.vector_store %arg7[%c0_18, %c0_19], %23 {strides = array<i32>} : memref<8x128xf32, #tpu.memory_space<vmem>>, vector<8x128xf32>,
    } else {
    }
    return
  }
  func.func @transform_0(%arg0: i32, %arg1: i32, %arg2: i32) -> (i32, i32) {
    %c0_i32 = arith.constant 0 : i32
    return %arg0, %arg2 : i32, i32
  }
  func.func @transform_1(%arg0: i32, %arg1: i32, %arg2: i32) -> (i32, i32) {
    %c0_i32 = arith.constant 0 : i32
    return %arg2, %arg1 : i32, i32
  }
  func.func @transform_2(%arg0: i32, %arg1: i32, %arg2: i32) -> (i32, i32) {
    %c0_i32 = arith.constant 0 : i32
    return %arg0, %arg1 : i32, i32
  }
  func.func @transform_3(%arg0: i32, %arg1: i32, %arg2: i32) -> (i32, i32) {
    %c0_i32 = arith.constant 0 : i32
    return %arg0, %arg1 : i32, i32
  }
  func.func @transform_4(%arg0: i32, %arg1: i32, %arg2: i32) -> (i32, i32) {
    %c0_i32 = arith.constant 0 : i32
    return %arg0, %arg1 : i32, i32
  }
}

module attributes {stable_mosaic.version = 11 : i64} {
  func.func @_norm_kernel(%arg0: i32, %arg1: memref<32x128xf32, #tpu.memory_space<vmem>>, %arg2: memref<1x128xf32, #tpu.memory_space<vmem>>, %arg3: memref<1x128xf32, #tpu.memory_space<vmem>>, %arg4: memref<32x128xf32, #tpu.memory_space<vmem>>) attributes {dimension_semantics = [#tpu.dimension_semantics<parallel>], iteration_bounds = array<i64: 1>, scalar_prefetch = 0 : i64, scratch_operands = 0 : i64, tpu.core_type = #tpu.core_type<tc>, window_params = [{transform_indices = @transform_0, window_bounds = array<i64: 32, 128>}, {pipeline_mode = #tpu.pipeline_mode<synchronous>, transform_indices = @transform_1, window_bounds = array<i64: 1, 128>}, {pipeline_mode = #tpu.pipeline_mode<synchronous>, transform_indices = @transform_2, window_bounds = array<i64: 1, 128>}, {transform_indices = @transform_3, window_bounds = array<i64: 32, 128>}]} {
    %c0 = arith.constant 0 : index
    %c0_0 = arith.constant 0 : index
    %0 = vector.load %arg1[%c0, %c0_0] : memref<32x128xf32, #tpu.memory_space<vmem>>, vector<32x128xf32>
    %c0_1 = arith.constant 0 : index
    %c0_2 = arith.constant 0 : index
    %1 = vector.load %arg2[%c0_1, %c0_2] : memref<1x128xf32, #tpu.memory_space<vmem>>, vector<1x128xf32>
    %2 = vector.broadcast %1 : vector<1x128xf32> to vector<32x128xf32>
    %3 = arith.mulf %0, %2 : vector<32x128xf32>
    %c0_3 = arith.constant 0 : index
    %c0_4 = arith.constant 0 : index
    %4 = vector.load %arg3[%c0_3, %c0_4] : memref<1x128xf32, #tpu.memory_space<vmem>>, vector<1x128xf32>
    %5 = vector.broadcast %4 : vector<1x128xf32> to vector<32x128xf32>
    %6 = arith.addf %3, %5 : vector<32x128xf32>
    %c0_5 = arith.constant 0 : index
    %c0_6 = arith.constant 0 : index
    %7 = vector.load %arg4[%c0_5, %c0_6] : memref<32x128xf32, #tpu.memory_space<vmem>>, vector<32x128xf32>
    tpu.vector_store %arg4[%c0_5, %c0_6], %6 {strides = array<i32>} : memref<32x128xf32, #tpu.memory_space<vmem>>, vector<32x128xf32>,
    return
  }
  func.func @transform_0(%arg0: i32) -> (i32, i32) {
    %c0_i32 = arith.constant 0 : i32
    %c0_i32_0 = arith.constant 0 : i32
    return %arg0, %c0_i32 : i32, i32
  }
  func.func @transform_1(%arg0: i32) -> (i32, i32) {
    %c0_i32 = arith.constant 0 : i32
    %c0_i32_0 = arith.constant 0 : i32
    %c0_i32_1 = arith.constant 0 : i32
    return %c0_i32, %c0_i32_0 : i32, i32
  }
  func.func @transform_2(%arg0: i32) -> (i32, i32) {
    %c0_i32 = arith.constant 0 : i32
    %c0_i32_0 = arith.constant 0 : i32
    %c0_i32_1 = arith.constant 0 : i32
    return %c0_i32, %c0_i32_0 : i32, i32
  }
  func.func @transform_3(%arg0: i32) -> (i32, i32) {
    %c0_i32 = arith.constant 0 : i32
    %c0_i32_0 = arith.constant 0 : i32
    return %arg0, %c0_i32 : i32, i32
  }
}

module attributes {stable_mosaic.version = 11 : i64} {
  func.func @_norm_kernel(%arg0: i32, %arg1: memref<32x128xf32, #tpu.memory_space<vmem>>, %arg2: memref<1x128xf32, #tpu.memory_space<vmem>>, %arg3: memref<1x128xf32, #tpu.memory_space<vmem>>, %arg4: memref<32x128xf32, #tpu.memory_space<vmem>>) attributes {dimension_semantics = [#tpu.dimension_semantics<parallel>], iteration_bounds = array<i64: 1>, scalar_prefetch = 0 : i64, scratch_operands = 0 : i64, tpu.core_type = #tpu.core_type<tc>, window_params = [{transform_indices = @transform_0, window_bounds = array<i64: 32, 128>}, {pipeline_mode = #tpu.pipeline_mode<synchronous>, transform_indices = @transform_1, window_bounds = array<i64: 1, 128>}, {pipeline_mode = #tpu.pipeline_mode<synchronous>, transform_indices = @transform_2, window_bounds = array<i64: 1, 128>}, {transform_indices = @transform_3, window_bounds = array<i64: 32, 128>}]} {
    %c0 = arith.constant 0 : index
    %c0_0 = arith.constant 0 : index
    %0 = vector.load %arg1[%c0, %c0_0] : memref<32x128xf32, #tpu.memory_space<vmem>>, vector<32x128xf32>
    %c0_1 = arith.constant 0 : index
    %c0_2 = arith.constant 0 : index
    %1 = vector.load %arg2[%c0_1, %c0_2] : memref<1x128xf32, #tpu.memory_space<vmem>>, vector<1x128xf32>
    %2 = vector.broadcast %1 : vector<1x128xf32> to vector<32x128xf32>
    %3 = arith.mulf %0, %2 : vector<32x128xf32>
    %c0_3 = arith.constant 0 : index
    %c0_4 = arith.constant 0 : index
    %4 = vector.load %arg3[%c0_3, %c0_4] : memref<1x128xf32, #tpu.memory_space<vmem>>, vector<1x128xf32>
    %5 = vector.broadcast %4 : vector<1x128xf32> to vector<32x128xf32>
    %6 = arith.addf %3, %5 : vector<32x128xf32>
    %cst = arith.constant 0.000000e+00 : f32
    %7 = vector.broadcast %cst : f32 to vector<32x128xf32>
    %8 = arith.maximumf %6, %7 : vector<32x128xf32>
    %c0_5 = arith.constant 0 : index
    %c0_6 = arith.constant 0 : index
    %9 = vector.load %arg4[%c0_5, %c0_6] : memref<32x128xf32, #tpu.memory_space<vmem>>, vector<32x128xf32>
    tpu.vector_store %arg4[%c0_5, %c0_6], %8 {strides = array<i32>} : memref<32x128xf32, #tpu.memory_space<vmem>>, vector<32x128xf32>,
    return
  }
  func.func @transform_0(%arg0: i32) -> (i32, i32) {
    %c0_i32 = arith.constant 0 : i32
    %c0_i32_0 = arith.constant 0 : i32
    return %arg0, %c0_i32 : i32, i32
  }
  func.func @transform_1(%arg0: i32) -> (i32, i32) {
    %c0_i32 = arith.constant 0 : i32
    %c0_i32_0 = arith.constant 0 : i32
    %c0_i32_1 = arith.constant 0 : i32
    return %c0_i32, %c0_i32_0 : i32, i32
  }
  func.func @transform_2(%arg0: i32) -> (i32, i32) {
    %c0_i32 = arith.constant 0 : i32
    %c0_i32_0 = arith.constant 0 : i32
    %c0_i32_1 = arith.constant 0 : i32
    return %c0_i32, %c0_i32_0 : i32, i32
  }
  func.func @transform_3(%arg0: i32) -> (i32, i32) {
    %c0_i32 = arith.constant 0 : i32
    %c0_i32_0 = arith.constant 0 : i32
    return %arg0, %c0_i32 : i32, i32
  }
}

module attributes {stable_mosaic.version = 11 : i64} {
  func.func @_mm_stats_kernel(%arg0: i32, %arg1: i32, %arg2: i32, %arg3: memref<32x576xbf16, #tpu.memory_space<vmem>>, %arg4: memref<576x128xbf16, #tpu.memory_space<vmem>>, %arg5: memref<32x128xf32, #tpu.memory_space<vmem>>, %arg6: memref<8x128xf32, #tpu.memory_space<vmem>>, %arg7: memref<8x128xf32, #tpu.memory_space<vmem>>, %arg8: memref<32x128xf32, #tpu.memory_space<vmem>>) attributes {dimension_semantics = [#tpu.dimension_semantics<parallel>, #tpu.dimension_semantics<parallel>, #tpu.dimension_semantics<arbitrary>], iteration_bounds = array<i64: 1, 1, 1>, scalar_prefetch = 0 : i64, scratch_operands = 1 : i64, tpu.core_type = #tpu.core_type<tc>, window_params = [{transform_indices = @transform_0, window_bounds = array<i64: 32, 576>}, {transform_indices = @transform_1, window_bounds = array<i64: 576, 128>}, {transform_indices = @transform_2, window_bounds = array<i64: 32, 128>}, {transform_indices = @transform_3, window_bounds = array<i64: 8, 128>}, {transform_indices = @transform_4, window_bounds = array<i64: 8, 128>}]} {
    %c0_i32 = arith.constant 0 : i32
    %0 = arith.cmpi eq, %arg2, %c0_i32 : i32
    %1 = arith.extui %0 : i1 to i32
    %c0_i32_0 = arith.constant 0 : i32
    %2 = arith.cmpi ne, %1, %c0_i32_0 : i32
    scf.if %2 {
      %cst_10 = arith.constant 0.000000e+00 : f32
      %12 = vector.broadcast %cst_10 : f32 to vector<32x128xf32>
      %c0_11 = arith.constant 0 : index
      %c0_12 = arith.constant 0 : index
      %13 = vector.load %arg8[%c0_11, %c0_12] : memref<32x128xf32, #tpu.memory_space<vmem>>, vector<32x128xf32>
      tpu.vector_store %arg8[%c0_11, %c0_12], %12 {strides = array<i32>} : memref<32x128xf32, #tpu.memory_space<vmem>>, vector<32x128xf32>,
    } else {
    }
    %c0 = arith.constant 0 : index
    %c0_1 = arith.constant 0 : index
    %3 = vector.load %arg8[%c0, %c0_1] : memref<32x128xf32, #tpu.memory_space<vmem>>, vector<32x128xf32>
    %c0_2 = arith.constant 0 : index
    %c0_3 = arith.constant 0 : index
    %4 = vector.load %arg3[%c0_2, %c0_3] : memref<32x576xbf16, #tpu.memory_space<vmem>>, vector<32x576xbf16>
    %c0_4 = arith.constant 0 : index
    %c0_5 = arith.constant 0 : index
    %5 = vector.load %arg4[%c0_4, %c0_5] : memref<576x128xbf16, #tpu.memory_space<vmem>>, vector<576x128xbf16>
    %cst = arith.constant dense<0.000000e+00> : vector<32x128xf32>
    %6 = tpu.matmul %4, %5, %cst {dimension_numbers = #tpu.dot_dimension_numbers<[1], [0], [0], [1], [0, 0, 1, 1], [], []>} : vector<32x576xbf16>, vector<576x128xbf16>, vector<32x128xf32> -> vector<32x128xf32>
    %7 = arith.addf %3, %6 : vector<32x128xf32>
    %c0_6 = arith.constant 0 : index
    %c0_7 = arith.constant 0 : index
    %8 = vector.load %arg8[%c0_6, %c0_7] : memref<32x128xf32, #tpu.memory_space<vmem>>, vector<32x128xf32>
    tpu.vector_store %arg8[%c0_6, %c0_7], %7 {strides = array<i32>} : memref<32x128xf32, #tpu.memory_space<vmem>>, vector<32x128xf32>,
    %c0_i32_8 = arith.constant 0 : i32
    %9 = arith.cmpi eq, %arg2, %c0_i32_8 : i32
    %10 = arith.extui %9 : i1 to i32
    %c0_i32_9 = arith.constant 0 : i32
    %11 = arith.cmpi ne, %10, %c0_i32_9 : i32
    scf.if %11 {
      %c0_10 = arith.constant 0 : index
      %c0_11 = arith.constant 0 : index
      %12 = vector.load %arg8[%c0_10, %c0_11] : memref<32x128xf32, #tpu.memory_space<vmem>>, vector<32x128xf32>
      %c0_12 = arith.constant 0 : index
      %c0_13 = arith.constant 0 : index
      %13 = vector.load %arg5[%c0_12, %c0_13] : memref<32x128xf32, #tpu.memory_space<vmem>>, vector<32x128xf32>
      tpu.vector_store %arg5[%c0_12, %c0_13], %12 {strides = array<i32>} : memref<32x128xf32, #tpu.memory_space<vmem>>, vector<32x128xf32>,
      %cst_14 = arith.constant dense<0.000000e+00> : vector<128xf32>
      %14 = vector.multi_reduction <add>, %12, %cst_14 [0] : vector<32x128xf32> to vector<128xf32>
      %15 = vector.shape_cast %14 : vector<128xf32> to vector<1x128xf32>
      %16 = vector.shape_cast %15 : vector<1x128xf32> to vector<1x128xf32>
      %17 = vector.broadcast %16 : vector<1x128xf32> to vector<8x128xf32>
      %c0_15 = arith.constant 0 : index
      %c0_16 = arith.constant 0 : index
      %18 = vector.load %arg6[%c0_15, %c0_16] : memref<8x128xf32, #tpu.memory_space<vmem>>, vector<8x128xf32>
      tpu.vector_store %arg6[%c0_15, %c0_16], %17 {strides = array<i32>} : memref<8x128xf32, #tpu.memory_space<vmem>>, vector<8x128xf32>,
      %19 = arith.mulf %12, %12 : vector<32x128xf32>
      %cst_17 = arith.constant dense<0.000000e+00> : vector<128xf32>
      %20 = vector.multi_reduction <add>, %19, %cst_17 [0] : vector<32x128xf32> to vector<128xf32>
      %21 = vector.shape_cast %20 : vector<128xf32> to vector<1x128xf32>
      %22 = vector.shape_cast %21 : vector<1x128xf32> to vector<1x128xf32>
      %23 = vector.broadcast %22 : vector<1x128xf32> to vector<8x128xf32>
      %c0_18 = arith.constant 0 : index
      %c0_19 = arith.constant 0 : index
      %24 = vector.load %arg7[%c0_18, %c0_19] : memref<8x128xf32, #tpu.memory_space<vmem>>, vector<8x128xf32>
      tpu.vector_store %arg7[%c0_18, %c0_19], %23 {strides = array<i32>} : memref<8x128xf32, #tpu.memory_space<vmem>>, vector<8x128xf32>,
    } else {
    }
    return
  }
  func.func @transform_0(%arg0: i32, %arg1: i32, %arg2: i32) -> (i32, i32) {
    %c0_i32 = arith.constant 0 : i32
    return %arg0, %arg2 : i32, i32
  }
  func.func @transform_1(%arg0: i32, %arg1: i32, %arg2: i32) -> (i32, i32) {
    %c0_i32 = arith.constant 0 : i32
    return %arg2, %arg1 : i32, i32
  }
  func.func @transform_2(%arg0: i32, %arg1: i32, %arg2: i32) -> (i32, i32) {
    %c0_i32 = arith.constant 0 : i32
    return %arg0, %arg1 : i32, i32
  }
  func.func @transform_3(%arg0: i32, %arg1: i32, %arg2: i32) -> (i32, i32) {
    %c0_i32 = arith.constant 0 : i32
    return %arg0, %arg1 : i32, i32
  }
  func.func @transform_4(%arg0: i32, %arg1: i32, %arg2: i32) -> (i32, i32) {
    %c0_i32 = arith.constant 0 : i32
    return %arg0, %arg1 : i32, i32
  }
}

module attributes {stable_mosaic.version = 11 : i64} {
  func.func @_mm_stats_kernel(%arg0: i32, %arg1: i32, %arg2: i32, %arg3: memref<32x384xbf16, #tpu.memory_space<vmem>>, %arg4: memref<384x128xbf16, #tpu.memory_space<vmem>>, %arg5: memref<32x128xf32, #tpu.memory_space<vmem>>, %arg6: memref<8x128xf32, #tpu.memory_space<vmem>>, %arg7: memref<8x128xf32, #tpu.memory_space<vmem>>, %arg8: memref<32x128xf32, #tpu.memory_space<vmem>>) attributes {dimension_semantics = [#tpu.dimension_semantics<parallel>, #tpu.dimension_semantics<parallel>, #tpu.dimension_semantics<arbitrary>], iteration_bounds = array<i64: 1, 1, 3>, scalar_prefetch = 0 : i64, scratch_operands = 1 : i64, tpu.core_type = #tpu.core_type<tc>, window_params = [{transform_indices = @transform_0, window_bounds = array<i64: 32, 384>}, {transform_indices = @transform_1, window_bounds = array<i64: 384, 128>}, {transform_indices = @transform_2, window_bounds = array<i64: 32, 128>}, {transform_indices = @transform_3, window_bounds = array<i64: 8, 128>}, {transform_indices = @transform_4, window_bounds = array<i64: 8, 128>}]} {
    %c0_i32 = arith.constant 0 : i32
    %0 = arith.cmpi eq, %arg2, %c0_i32 : i32
    %1 = arith.extui %0 : i1 to i32
    %c0_i32_0 = arith.constant 0 : i32
    %2 = arith.cmpi ne, %1, %c0_i32_0 : i32
    scf.if %2 {
      %cst_9 = arith.constant 0.000000e+00 : f32
      %12 = vector.broadcast %cst_9 : f32 to vector<32x128xf32>
      %c0_10 = arith.constant 0 : index
      %c0_11 = arith.constant 0 : index
      %13 = vector.load %arg8[%c0_10, %c0_11] : memref<32x128xf32, #tpu.memory_space<vmem>>, vector<32x128xf32>
      tpu.vector_store %arg8[%c0_10, %c0_11], %12 {strides = array<i32>} : memref<32x128xf32, #tpu.memory_space<vmem>>, vector<32x128xf32>,
    } else {
    }
    %c0 = arith.constant 0 : index
    %c0_1 = arith.constant 0 : index
    %3 = vector.load %arg8[%c0, %c0_1] : memref<32x128xf32, #tpu.memory_space<vmem>>, vector<32x128xf32>
    %c0_2 = arith.constant 0 : index
    %c0_3 = arith.constant 0 : index
    %4 = vector.load %arg3[%c0_2, %c0_3] : memref<32x384xbf16, #tpu.memory_space<vmem>>, vector<32x384xbf16>
    %c0_4 = arith.constant 0 : index
    %c0_5 = arith.constant 0 : index
    %5 = vector.load %arg4[%c0_4, %c0_5] : memref<384x128xbf16, #tpu.memory_space<vmem>>, vector<384x128xbf16>
    %cst = arith.constant dense<0.000000e+00> : vector<32x128xf32>
    %6 = tpu.matmul %4, %5, %cst {dimension_numbers = #tpu.dot_dimension_numbers<[1], [0], [0], [1], [0, 0, 1, 1], [], []>} : vector<32x384xbf16>, vector<384x128xbf16>, vector<32x128xf32> -> vector<32x128xf32>
    %7 = arith.addf %3, %6 : vector<32x128xf32>
    %c0_6 = arith.constant 0 : index
    %c0_7 = arith.constant 0 : index
    %8 = vector.load %arg8[%c0_6, %c0_7] : memref<32x128xf32, #tpu.memory_space<vmem>>, vector<32x128xf32>
    tpu.vector_store %arg8[%c0_6, %c0_7], %7 {strides = array<i32>} : memref<32x128xf32, #tpu.memory_space<vmem>>, vector<32x128xf32>,
    %c2_i32 = arith.constant 2 : i32
    %9 = arith.cmpi eq, %arg2, %c2_i32 : i32
    %10 = arith.extui %9 : i1 to i32
    %c0_i32_8 = arith.constant 0 : i32
    %11 = arith.cmpi ne, %10, %c0_i32_8 : i32
    scf.if %11 {
      %c0_9 = arith.constant 0 : index
      %c0_10 = arith.constant 0 : index
      %12 = vector.load %arg8[%c0_9, %c0_10] : memref<32x128xf32, #tpu.memory_space<vmem>>, vector<32x128xf32>
      %c0_11 = arith.constant 0 : index
      %c0_12 = arith.constant 0 : index
      %13 = vector.load %arg5[%c0_11, %c0_12] : memref<32x128xf32, #tpu.memory_space<vmem>>, vector<32x128xf32>
      tpu.vector_store %arg5[%c0_11, %c0_12], %12 {strides = array<i32>} : memref<32x128xf32, #tpu.memory_space<vmem>>, vector<32x128xf32>,
      %cst_13 = arith.constant dense<0.000000e+00> : vector<128xf32>
      %14 = vector.multi_reduction <add>, %12, %cst_13 [0] : vector<32x128xf32> to vector<128xf32>
      %15 = vector.shape_cast %14 : vector<128xf32> to vector<1x128xf32>
      %16 = vector.shape_cast %15 : vector<1x128xf32> to vector<1x128xf32>
      %17 = vector.broadcast %16 : vector<1x128xf32> to vector<8x128xf32>
      %c0_14 = arith.constant 0 : index
      %c0_15 = arith.constant 0 : index
      %18 = vector.load %arg6[%c0_14, %c0_15] : memref<8x128xf32, #tpu.memory_space<vmem>>, vector<8x128xf32>
      tpu.vector_store %arg6[%c0_14, %c0_15], %17 {strides = array<i32>} : memref<8x128xf32, #tpu.memory_space<vmem>>, vector<8x128xf32>,
      %19 = arith.mulf %12, %12 : vector<32x128xf32>
      %cst_16 = arith.constant dense<0.000000e+00> : vector<128xf32>
      %20 = vector.multi_reduction <add>, %19, %cst_16 [0] : vector<32x128xf32> to vector<128xf32>
      %21 = vector.shape_cast %20 : vector<128xf32> to vector<1x128xf32>
      %22 = vector.shape_cast %21 : vector<1x128xf32> to vector<1x128xf32>
      %23 = vector.broadcast %22 : vector<1x128xf32> to vector<8x128xf32>
      %c0_17 = arith.constant 0 : index
      %c0_18 = arith.constant 0 : index
      %24 = vector.load %arg7[%c0_17, %c0_18] : memref<8x128xf32, #tpu.memory_space<vmem>>, vector<8x128xf32>
      tpu.vector_store %arg7[%c0_17, %c0_18], %23 {strides = array<i32>} : memref<8x128xf32, #tpu.memory_space<vmem>>, vector<8x128xf32>,
    } else {
    }
    return
  }
  func.func @transform_0(%arg0: i32, %arg1: i32, %arg2: i32) -> (i32, i32) {
    %c0_i32 = arith.constant 0 : i32
    return %arg0, %arg2 : i32, i32
  }
  func.func @transform_1(%arg0: i32, %arg1: i32, %arg2: i32) -> (i32, i32) {
    %c0_i32 = arith.constant 0 : i32
    return %arg2, %arg1 : i32, i32
  }
  func.func @transform_2(%arg0: i32, %arg1: i32, %arg2: i32) -> (i32, i32) {
    %c0_i32 = arith.constant 0 : i32
    return %arg0, %arg1 : i32, i32
  }
  func.func @transform_3(%arg0: i32, %arg1: i32, %arg2: i32) -> (i32, i32) {
    %c0_i32 = arith.constant 0 : i32
    return %arg0, %arg1 : i32, i32
  }
  func.func @transform_4(%arg0: i32, %arg1: i32, %arg2: i32) -> (i32, i32) {
    %c0_i32 = arith.constant 0 : i32
    return %arg0, %arg1 : i32, i32
  }
}

module attributes {stable_mosaic.version = 11 : i64} {
  func.func @_norm_add_relu_kernel(%arg0: i32, %arg1: memref<32x128xf32, #tpu.memory_space<vmem>>, %arg2: memref<1x128xf32, #tpu.memory_space<vmem>>, %arg3: memref<1x128xf32, #tpu.memory_space<vmem>>, %arg4: memref<32x128xf32, #tpu.memory_space<vmem>>, %arg5: memref<32x128xf32, #tpu.memory_space<vmem>>) attributes {dimension_semantics = [#tpu.dimension_semantics<parallel>], iteration_bounds = array<i64: 1>, scalar_prefetch = 0 : i64, scratch_operands = 0 : i64, tpu.core_type = #tpu.core_type<tc>, window_params = [{transform_indices = @transform_0, window_bounds = array<i64: 32, 128>}, {pipeline_mode = #tpu.pipeline_mode<synchronous>, transform_indices = @transform_1, window_bounds = array<i64: 1, 128>}, {pipeline_mode = #tpu.pipeline_mode<synchronous>, transform_indices = @transform_2, window_bounds = array<i64: 1, 128>}, {transform_indices = @transform_3, window_bounds = array<i64: 32, 128>}, {transform_indices = @transform_4, window_bounds = array<i64: 32, 128>}]} {
    %c0 = arith.constant 0 : index
    %c0_0 = arith.constant 0 : index
    %0 = vector.load %arg1[%c0, %c0_0] : memref<32x128xf32, #tpu.memory_space<vmem>>, vector<32x128xf32>
    %c0_1 = arith.constant 0 : index
    %c0_2 = arith.constant 0 : index
    %1 = vector.load %arg2[%c0_1, %c0_2] : memref<1x128xf32, #tpu.memory_space<vmem>>, vector<1x128xf32>
    %2 = vector.broadcast %1 : vector<1x128xf32> to vector<32x128xf32>
    %3 = arith.mulf %0, %2 : vector<32x128xf32>
    %c0_3 = arith.constant 0 : index
    %c0_4 = arith.constant 0 : index
    %4 = vector.load %arg3[%c0_3, %c0_4] : memref<1x128xf32, #tpu.memory_space<vmem>>, vector<1x128xf32>
    %5 = vector.broadcast %4 : vector<1x128xf32> to vector<32x128xf32>
    %6 = arith.addf %3, %5 : vector<32x128xf32>
    %c0_5 = arith.constant 0 : index
    %c0_6 = arith.constant 0 : index
    %7 = vector.load %arg4[%c0_5, %c0_6] : memref<32x128xf32, #tpu.memory_space<vmem>>, vector<32x128xf32>
    %8 = arith.addf %6, %7 : vector<32x128xf32>
    %cst = arith.constant 0.000000e+00 : f32
    %9 = vector.broadcast %cst : f32 to vector<32x128xf32>
    %10 = arith.maximumf %8, %9 : vector<32x128xf32>
    %c0_7 = arith.constant 0 : index
    %c0_8 = arith.constant 0 : index
    %11 = vector.load %arg5[%c0_7, %c0_8] : memref<32x128xf32, #tpu.memory_space<vmem>>, vector<32x128xf32>
    tpu.vector_store %arg5[%c0_7, %c0_8], %10 {strides = array<i32>} : memref<32x128xf32, #tpu.memory_space<vmem>>, vector<32x128xf32>,
    return
  }
  func.func @transform_0(%arg0: i32) -> (i32, i32) {
    %c0_i32 = arith.constant 0 : i32
    %c0_i32_0 = arith.constant 0 : i32
    return %arg0, %c0_i32 : i32, i32
  }
  func.func @transform_1(%arg0: i32) -> (i32, i32) {
    %c0_i32 = arith.constant 0 : i32
    %c0_i32_0 = arith.constant 0 : i32
    %c0_i32_1 = arith.constant 0 : i32
    return %c0_i32, %c0_i32_0 : i32, i32
  }
  func.func @transform_2(%arg0: i32) -> (i32, i32) {
    %c0_i32 = arith.constant 0 : i32
    %c0_i32_0 = arith.constant 0 : i32
    %c0_i32_1 = arith.constant 0 : i32
    return %c0_i32, %c0_i32_0 : i32, i32
  }
  func.func @transform_3(%arg0: i32) -> (i32, i32) {
    %c0_i32 = arith.constant 0 : i32
    %c0_i32_0 = arith.constant 0 : i32
    return %arg0, %c0_i32 : i32, i32
  }
  func.func @transform_4(%arg0: i32) -> (i32, i32) {
    %c0_i32 = arith.constant 0 : i32
    %c0_i32_0 = arith.constant 0 : i32
    return %arg0, %c0_i32 : i32, i32
  }
}

module attributes {stable_mosaic.version = 11 : i64} {
  func.func @_mm_stats_kernel(%arg0: i32, %arg1: i32, %arg2: i32, %arg3: memref<8x128xbf16, #tpu.memory_space<vmem>>, %arg4: memref<128x256xbf16, #tpu.memory_space<vmem>>, %arg5: memref<8x256xf32, #tpu.memory_space<vmem>>, %arg6: memref<8x256xf32, #tpu.memory_space<vmem>>, %arg7: memref<8x256xf32, #tpu.memory_space<vmem>>, %arg8: memref<8x256xf32, #tpu.memory_space<vmem>>) attributes {dimension_semantics = [#tpu.dimension_semantics<parallel>, #tpu.dimension_semantics<parallel>, #tpu.dimension_semantics<arbitrary>], iteration_bounds = array<i64: 1, 1, 1>, scalar_prefetch = 0 : i64, scratch_operands = 1 : i64, tpu.core_type = #tpu.core_type<tc>, window_params = [{transform_indices = @transform_0, window_bounds = array<i64: 8, 128>}, {transform_indices = @transform_1, window_bounds = array<i64: 128, 256>}, {transform_indices = @transform_2, window_bounds = array<i64: 8, 256>}, {transform_indices = @transform_3, window_bounds = array<i64: 8, 256>}, {transform_indices = @transform_4, window_bounds = array<i64: 8, 256>}]} {
    %c0_i32 = arith.constant 0 : i32
    %0 = arith.cmpi eq, %arg2, %c0_i32 : i32
    %1 = arith.extui %0 : i1 to i32
    %c0_i32_0 = arith.constant 0 : i32
    %2 = arith.cmpi ne, %1, %c0_i32_0 : i32
    scf.if %2 {
      %cst_10 = arith.constant 0.000000e+00 : f32
      %12 = vector.broadcast %cst_10 : f32 to vector<8x256xf32>
      %c0_11 = arith.constant 0 : index
      %c0_12 = arith.constant 0 : index
      %13 = vector.load %arg8[%c0_11, %c0_12] : memref<8x256xf32, #tpu.memory_space<vmem>>, vector<8x256xf32>
      tpu.vector_store %arg8[%c0_11, %c0_12], %12 {strides = array<i32>} : memref<8x256xf32, #tpu.memory_space<vmem>>, vector<8x256xf32>,
    } else {
    }
    %c0 = arith.constant 0 : index
    %c0_1 = arith.constant 0 : index
    %3 = vector.load %arg8[%c0, %c0_1] : memref<8x256xf32, #tpu.memory_space<vmem>>, vector<8x256xf32>
    %c0_2 = arith.constant 0 : index
    %c0_3 = arith.constant 0 : index
    %4 = vector.load %arg3[%c0_2, %c0_3] : memref<8x128xbf16, #tpu.memory_space<vmem>>, vector<8x128xbf16>
    %c0_4 = arith.constant 0 : index
    %c0_5 = arith.constant 0 : index
    %5 = vector.load %arg4[%c0_4, %c0_5] : memref<128x256xbf16, #tpu.memory_space<vmem>>, vector<128x256xbf16>
    %cst = arith.constant dense<0.000000e+00> : vector<8x256xf32>
    %6 = tpu.matmul %4, %5, %cst {dimension_numbers = #tpu.dot_dimension_numbers<[1], [0], [0], [1], [0, 0, 1, 1], [], []>} : vector<8x128xbf16>, vector<128x256xbf16>, vector<8x256xf32> -> vector<8x256xf32>
    %7 = arith.addf %3, %6 : vector<8x256xf32>
    %c0_6 = arith.constant 0 : index
    %c0_7 = arith.constant 0 : index
    %8 = vector.load %arg8[%c0_6, %c0_7] : memref<8x256xf32, #tpu.memory_space<vmem>>, vector<8x256xf32>
    tpu.vector_store %arg8[%c0_6, %c0_7], %7 {strides = array<i32>} : memref<8x256xf32, #tpu.memory_space<vmem>>, vector<8x256xf32>,
    %c0_i32_8 = arith.constant 0 : i32
    %9 = arith.cmpi eq, %arg2, %c0_i32_8 : i32
    %10 = arith.extui %9 : i1 to i32
    %c0_i32_9 = arith.constant 0 : i32
    %11 = arith.cmpi ne, %10, %c0_i32_9 : i32
    scf.if %11 {
      %c0_10 = arith.constant 0 : index
      %c0_11 = arith.constant 0 : index
      %12 = vector.load %arg8[%c0_10, %c0_11] : memref<8x256xf32, #tpu.memory_space<vmem>>, vector<8x256xf32>
      %c0_12 = arith.constant 0 : index
      %c0_13 = arith.constant 0 : index
      %13 = vector.load %arg5[%c0_12, %c0_13] : memref<8x256xf32, #tpu.memory_space<vmem>>, vector<8x256xf32>
      tpu.vector_store %arg5[%c0_12, %c0_13], %12 {strides = array<i32>} : memref<8x256xf32, #tpu.memory_space<vmem>>, vector<8x256xf32>,
      %cst_14 = arith.constant dense<0.000000e+00> : vector<256xf32>
      %14 = vector.multi_reduction <add>, %12, %cst_14 [0] : vector<8x256xf32> to vector<256xf32>
      %15 = vector.shape_cast %14 : vector<256xf32> to vector<1x256xf32>
      %16 = vector.shape_cast %15 : vector<1x256xf32> to vector<1x256xf32>
      %17 = vector.broadcast %16 : vector<1x256xf32> to vector<8x256xf32>
      %c0_15 = arith.constant 0 : index
      %c0_16 = arith.constant 0 : index
      %18 = vector.load %arg6[%c0_15, %c0_16] : memref<8x256xf32, #tpu.memory_space<vmem>>, vector<8x256xf32>
      tpu.vector_store %arg6[%c0_15, %c0_16], %17 {strides = array<i32>} : memref<8x256xf32, #tpu.memory_space<vmem>>, vector<8x256xf32>,
      %19 = arith.mulf %12, %12 : vector<8x256xf32>
      %cst_17 = arith.constant dense<0.000000e+00> : vector<256xf32>
      %20 = vector.multi_reduction <add>, %19, %cst_17 [0] : vector<8x256xf32> to vector<256xf32>
      %21 = vector.shape_cast %20 : vector<256xf32> to vector<1x256xf32>
      %22 = vector.shape_cast %21 : vector<1x256xf32> to vector<1x256xf32>
      %23 = vector.broadcast %22 : vector<1x256xf32> to vector<8x256xf32>
      %c0_18 = arith.constant 0 : index
      %c0_19 = arith.constant 0 : index
      %24 = vector.load %arg7[%c0_18, %c0_19] : memref<8x256xf32, #tpu.memory_space<vmem>>, vector<8x256xf32>
      tpu.vector_store %arg7[%c0_18, %c0_19], %23 {strides = array<i32>} : memref<8x256xf32, #tpu.memory_space<vmem>>, vector<8x256xf32>,
    } else {
    }
    return
  }
  func.func @transform_0(%arg0: i32, %arg1: i32, %arg2: i32) -> (i32, i32) {
    %c0_i32 = arith.constant 0 : i32
    return %arg0, %arg2 : i32, i32
  }
  func.func @transform_1(%arg0: i32, %arg1: i32, %arg2: i32) -> (i32, i32) {
    %c0_i32 = arith.constant 0 : i32
    return %arg2, %arg1 : i32, i32
  }
  func.func @transform_2(%arg0: i32, %arg1: i32, %arg2: i32) -> (i32, i32) {
    %c0_i32 = arith.constant 0 : i32
    return %arg0, %arg1 : i32, i32
  }
  func.func @transform_3(%arg0: i32, %arg1: i32, %arg2: i32) -> (i32, i32) {
    %c0_i32 = arith.constant 0 : i32
    return %arg0, %arg1 : i32, i32
  }
  func.func @transform_4(%arg0: i32, %arg1: i32, %arg2: i32) -> (i32, i32) {
    %c0_i32 = arith.constant 0 : i32
    return %arg0, %arg1 : i32, i32
  }
}

module attributes {stable_mosaic.version = 11 : i64} {
  func.func @_norm_kernel(%arg0: i32, %arg1: memref<8x256xf32, #tpu.memory_space<vmem>>, %arg2: memref<1x256xf32, #tpu.memory_space<vmem>>, %arg3: memref<1x256xf32, #tpu.memory_space<vmem>>, %arg4: memref<8x256xf32, #tpu.memory_space<vmem>>) attributes {dimension_semantics = [#tpu.dimension_semantics<parallel>], iteration_bounds = array<i64: 1>, scalar_prefetch = 0 : i64, scratch_operands = 0 : i64, tpu.core_type = #tpu.core_type<tc>, window_params = [{transform_indices = @transform_0, window_bounds = array<i64: 8, 256>}, {pipeline_mode = #tpu.pipeline_mode<synchronous>, transform_indices = @transform_1, window_bounds = array<i64: 1, 256>}, {pipeline_mode = #tpu.pipeline_mode<synchronous>, transform_indices = @transform_2, window_bounds = array<i64: 1, 256>}, {transform_indices = @transform_3, window_bounds = array<i64: 8, 256>}]} {
    %c0 = arith.constant 0 : index
    %c0_0 = arith.constant 0 : index
    %0 = vector.load %arg1[%c0, %c0_0] : memref<8x256xf32, #tpu.memory_space<vmem>>, vector<8x256xf32>
    %c0_1 = arith.constant 0 : index
    %c0_2 = arith.constant 0 : index
    %1 = vector.load %arg2[%c0_1, %c0_2] : memref<1x256xf32, #tpu.memory_space<vmem>>, vector<1x256xf32>
    %2 = vector.broadcast %1 : vector<1x256xf32> to vector<8x256xf32>
    %3 = arith.mulf %0, %2 : vector<8x256xf32>
    %c0_3 = arith.constant 0 : index
    %c0_4 = arith.constant 0 : index
    %4 = vector.load %arg3[%c0_3, %c0_4] : memref<1x256xf32, #tpu.memory_space<vmem>>, vector<1x256xf32>
    %5 = vector.broadcast %4 : vector<1x256xf32> to vector<8x256xf32>
    %6 = arith.addf %3, %5 : vector<8x256xf32>
    %c0_5 = arith.constant 0 : index
    %c0_6 = arith.constant 0 : index
    %7 = vector.load %arg4[%c0_5, %c0_6] : memref<8x256xf32, #tpu.memory_space<vmem>>, vector<8x256xf32>
    tpu.vector_store %arg4[%c0_5, %c0_6], %6 {strides = array<i32>} : memref<8x256xf32, #tpu.memory_space<vmem>>, vector<8x256xf32>,
    return
  }
  func.func @transform_0(%arg0: i32) -> (i32, i32) {
    %c0_i32 = arith.constant 0 : i32
    %c0_i32_0 = arith.constant 0 : i32
    return %arg0, %c0_i32 : i32, i32
  }
  func.func @transform_1(%arg0: i32) -> (i32, i32) {
    %c0_i32 = arith.constant 0 : i32
    %c0_i32_0 = arith.constant 0 : i32
    %c0_i32_1 = arith.constant 0 : i32
    return %c0_i32, %c0_i32_0 : i32, i32
  }
  func.func @transform_2(%arg0: i32) -> (i32, i32) {
    %c0_i32 = arith.constant 0 : i32
    %c0_i32_0 = arith.constant 0 : i32
    %c0_i32_1 = arith.constant 0 : i32
    return %c0_i32, %c0_i32_0 : i32, i32
  }
  func.func @transform_3(%arg0: i32) -> (i32, i32) {
    %c0_i32 = arith.constant 0 : i32
    %c0_i32_0 = arith.constant 0 : i32
    return %arg0, %c0_i32 : i32, i32
  }
}

module attributes {stable_mosaic.version = 11 : i64} {
  func.func @_mm_stats_kernel(%arg0: i32, %arg1: i32, %arg2: i32, %arg3: memref<8x384xbf16, #tpu.memory_space<vmem>>, %arg4: memref<384x256xbf16, #tpu.memory_space<vmem>>, %arg5: memref<8x256xf32, #tpu.memory_space<vmem>>, %arg6: memref<8x256xf32, #tpu.memory_space<vmem>>, %arg7: memref<8x256xf32, #tpu.memory_space<vmem>>, %arg8: memref<8x256xf32, #tpu.memory_space<vmem>>) attributes {dimension_semantics = [#tpu.dimension_semantics<parallel>, #tpu.dimension_semantics<parallel>, #tpu.dimension_semantics<arbitrary>], iteration_bounds = array<i64: 1, 1, 3>, scalar_prefetch = 0 : i64, scratch_operands = 1 : i64, tpu.core_type = #tpu.core_type<tc>, window_params = [{transform_indices = @transform_0, window_bounds = array<i64: 8, 384>}, {transform_indices = @transform_1, window_bounds = array<i64: 384, 256>}, {transform_indices = @transform_2, window_bounds = array<i64: 8, 256>}, {transform_indices = @transform_3, window_bounds = array<i64: 8, 256>}, {transform_indices = @transform_4, window_bounds = array<i64: 8, 256>}]} {
    %c0_i32 = arith.constant 0 : i32
    %0 = arith.cmpi eq, %arg2, %c0_i32 : i32
    %1 = arith.extui %0 : i1 to i32
    %c0_i32_0 = arith.constant 0 : i32
    %2 = arith.cmpi ne, %1, %c0_i32_0 : i32
    scf.if %2 {
      %cst_9 = arith.constant 0.000000e+00 : f32
      %12 = vector.broadcast %cst_9 : f32 to vector<8x256xf32>
      %c0_10 = arith.constant 0 : index
      %c0_11 = arith.constant 0 : index
      %13 = vector.load %arg8[%c0_10, %c0_11] : memref<8x256xf32, #tpu.memory_space<vmem>>, vector<8x256xf32>
      tpu.vector_store %arg8[%c0_10, %c0_11], %12 {strides = array<i32>} : memref<8x256xf32, #tpu.memory_space<vmem>>, vector<8x256xf32>,
    } else {
    }
    %c0 = arith.constant 0 : index
    %c0_1 = arith.constant 0 : index
    %3 = vector.load %arg8[%c0, %c0_1] : memref<8x256xf32, #tpu.memory_space<vmem>>, vector<8x256xf32>
    %c0_2 = arith.constant 0 : index
    %c0_3 = arith.constant 0 : index
    %4 = vector.load %arg3[%c0_2, %c0_3] : memref<8x384xbf16, #tpu.memory_space<vmem>>, vector<8x384xbf16>
    %c0_4 = arith.constant 0 : index
    %c0_5 = arith.constant 0 : index
    %5 = vector.load %arg4[%c0_4, %c0_5] : memref<384x256xbf16, #tpu.memory_space<vmem>>, vector<384x256xbf16>
    %cst = arith.constant dense<0.000000e+00> : vector<8x256xf32>
    %6 = tpu.matmul %4, %5, %cst {dimension_numbers = #tpu.dot_dimension_numbers<[1], [0], [0], [1], [0, 0, 1, 1], [], []>} : vector<8x384xbf16>, vector<384x256xbf16>, vector<8x256xf32> -> vector<8x256xf32>
    %7 = arith.addf %3, %6 : vector<8x256xf32>
    %c0_6 = arith.constant 0 : index
    %c0_7 = arith.constant 0 : index
    %8 = vector.load %arg8[%c0_6, %c0_7] : memref<8x256xf32, #tpu.memory_space<vmem>>, vector<8x256xf32>
    tpu.vector_store %arg8[%c0_6, %c0_7], %7 {strides = array<i32>} : memref<8x256xf32, #tpu.memory_space<vmem>>, vector<8x256xf32>,
    %c2_i32 = arith.constant 2 : i32
    %9 = arith.cmpi eq, %arg2, %c2_i32 : i32
    %10 = arith.extui %9 : i1 to i32
    %c0_i32_8 = arith.constant 0 : i32
    %11 = arith.cmpi ne, %10, %c0_i32_8 : i32
    scf.if %11 {
      %c0_9 = arith.constant 0 : index
      %c0_10 = arith.constant 0 : index
      %12 = vector.load %arg8[%c0_9, %c0_10] : memref<8x256xf32, #tpu.memory_space<vmem>>, vector<8x256xf32>
      %c0_11 = arith.constant 0 : index
      %c0_12 = arith.constant 0 : index
      %13 = vector.load %arg5[%c0_11, %c0_12] : memref<8x256xf32, #tpu.memory_space<vmem>>, vector<8x256xf32>
      tpu.vector_store %arg5[%c0_11, %c0_12], %12 {strides = array<i32>} : memref<8x256xf32, #tpu.memory_space<vmem>>, vector<8x256xf32>,
      %cst_13 = arith.constant dense<0.000000e+00> : vector<256xf32>
      %14 = vector.multi_reduction <add>, %12, %cst_13 [0] : vector<8x256xf32> to vector<256xf32>
      %15 = vector.shape_cast %14 : vector<256xf32> to vector<1x256xf32>
      %16 = vector.shape_cast %15 : vector<1x256xf32> to vector<1x256xf32>
      %17 = vector.broadcast %16 : vector<1x256xf32> to vector<8x256xf32>
      %c0_14 = arith.constant 0 : index
      %c0_15 = arith.constant 0 : index
      %18 = vector.load %arg6[%c0_14, %c0_15] : memref<8x256xf32, #tpu.memory_space<vmem>>, vector<8x256xf32>
      tpu.vector_store %arg6[%c0_14, %c0_15], %17 {strides = array<i32>} : memref<8x256xf32, #tpu.memory_space<vmem>>, vector<8x256xf32>,
      %19 = arith.mulf %12, %12 : vector<8x256xf32>
      %cst_16 = arith.constant dense<0.000000e+00> : vector<256xf32>
      %20 = vector.multi_reduction <add>, %19, %cst_16 [0] : vector<8x256xf32> to vector<256xf32>
      %21 = vector.shape_cast %20 : vector<256xf32> to vector<1x256xf32>
      %22 = vector.shape_cast %21 : vector<1x256xf32> to vector<1x256xf32>
      %23 = vector.broadcast %22 : vector<1x256xf32> to vector<8x256xf32>
      %c0_17 = arith.constant 0 : index
      %c0_18 = arith.constant 0 : index
      %24 = vector.load %arg7[%c0_17, %c0_18] : memref<8x256xf32, #tpu.memory_space<vmem>>, vector<8x256xf32>
      tpu.vector_store %arg7[%c0_17, %c0_18], %23 {strides = array<i32>} : memref<8x256xf32, #tpu.memory_space<vmem>>, vector<8x256xf32>,
    } else {
    }
    return
  }
  func.func @transform_0(%arg0: i32, %arg1: i32, %arg2: i32) -> (i32, i32) {
    %c0_i32 = arith.constant 0 : i32
    return %arg0, %arg2 : i32, i32
  }
  func.func @transform_1(%arg0: i32, %arg1: i32, %arg2: i32) -> (i32, i32) {
    %c0_i32 = arith.constant 0 : i32
    return %arg2, %arg1 : i32, i32
  }
  func.func @transform_2(%arg0: i32, %arg1: i32, %arg2: i32) -> (i32, i32) {
    %c0_i32 = arith.constant 0 : i32
    return %arg0, %arg1 : i32, i32
  }
  func.func @transform_3(%arg0: i32, %arg1: i32, %arg2: i32) -> (i32, i32) {
    %c0_i32 = arith.constant 0 : i32
    return %arg0, %arg1 : i32, i32
  }
  func.func @transform_4(%arg0: i32, %arg1: i32, %arg2: i32) -> (i32, i32) {
    %c0_i32 = arith.constant 0 : i32
    return %arg0, %arg1 : i32, i32
  }
}

module attributes {stable_mosaic.version = 11 : i64} {
  func.func @_norm_kernel(%arg0: i32, %arg1: memref<8x256xf32, #tpu.memory_space<vmem>>, %arg2: memref<1x256xf32, #tpu.memory_space<vmem>>, %arg3: memref<1x256xf32, #tpu.memory_space<vmem>>, %arg4: memref<8x256xf32, #tpu.memory_space<vmem>>) attributes {dimension_semantics = [#tpu.dimension_semantics<parallel>], iteration_bounds = array<i64: 1>, scalar_prefetch = 0 : i64, scratch_operands = 0 : i64, tpu.core_type = #tpu.core_type<tc>, window_params = [{transform_indices = @transform_0, window_bounds = array<i64: 8, 256>}, {pipeline_mode = #tpu.pipeline_mode<synchronous>, transform_indices = @transform_1, window_bounds = array<i64: 1, 256>}, {pipeline_mode = #tpu.pipeline_mode<synchronous>, transform_indices = @transform_2, window_bounds = array<i64: 1, 256>}, {transform_indices = @transform_3, window_bounds = array<i64: 8, 256>}]} {
    %c0 = arith.constant 0 : index
    %c0_0 = arith.constant 0 : index
    %0 = vector.load %arg1[%c0, %c0_0] : memref<8x256xf32, #tpu.memory_space<vmem>>, vector<8x256xf32>
    %c0_1 = arith.constant 0 : index
    %c0_2 = arith.constant 0 : index
    %1 = vector.load %arg2[%c0_1, %c0_2] : memref<1x256xf32, #tpu.memory_space<vmem>>, vector<1x256xf32>
    %2 = vector.broadcast %1 : vector<1x256xf32> to vector<8x256xf32>
    %3 = arith.mulf %0, %2 : vector<8x256xf32>
    %c0_3 = arith.constant 0 : index
    %c0_4 = arith.constant 0 : index
    %4 = vector.load %arg3[%c0_3, %c0_4] : memref<1x256xf32, #tpu.memory_space<vmem>>, vector<1x256xf32>
    %5 = vector.broadcast %4 : vector<1x256xf32> to vector<8x256xf32>
    %6 = arith.addf %3, %5 : vector<8x256xf32>
    %cst = arith.constant 0.000000e+00 : f32
    %7 = vector.broadcast %cst : f32 to vector<8x256xf32>
    %8 = arith.maximumf %6, %7 : vector<8x256xf32>
    %c0_5 = arith.constant 0 : index
    %c0_6 = arith.constant 0 : index
    %9 = vector.load %arg4[%c0_5, %c0_6] : memref<8x256xf32, #tpu.memory_space<vmem>>, vector<8x256xf32>
    tpu.vector_store %arg4[%c0_5, %c0_6], %8 {strides = array<i32>} : memref<8x256xf32, #tpu.memory_space<vmem>>, vector<8x256xf32>,
    return
  }
  func.func @transform_0(%arg0: i32) -> (i32, i32) {
    %c0_i32 = arith.constant 0 : i32
    %c0_i32_0 = arith.constant 0 : i32
    return %arg0, %c0_i32 : i32, i32
  }
  func.func @transform_1(%arg0: i32) -> (i32, i32) {
    %c0_i32 = arith.constant 0 : i32
    %c0_i32_0 = arith.constant 0 : i32
    %c0_i32_1 = arith.constant 0 : i32
    return %c0_i32, %c0_i32_0 : i32, i32
  }
  func.func @transform_2(%arg0: i32) -> (i32, i32) {
    %c0_i32 = arith.constant 0 : i32
    %c0_i32_0 = arith.constant 0 : i32
    %c0_i32_1 = arith.constant 0 : i32
    return %c0_i32, %c0_i32_0 : i32, i32
  }
  func.func @transform_3(%arg0: i32) -> (i32, i32) {
    %c0_i32 = arith.constant 0 : i32
    %c0_i32_0 = arith.constant 0 : i32
    return %arg0, %c0_i32 : i32, i32
  }
}

module attributes {stable_mosaic.version = 11 : i64} {
  func.func @_mm_stats_kernel(%arg0: i32, %arg1: i32, %arg2: i32, %arg3: memref<8x768xbf16, #tpu.memory_space<vmem>>, %arg4: memref<768x256xbf16, #tpu.memory_space<vmem>>, %arg5: memref<8x256xf32, #tpu.memory_space<vmem>>, %arg6: memref<8x256xf32, #tpu.memory_space<vmem>>, %arg7: memref<8x256xf32, #tpu.memory_space<vmem>>, %arg8: memref<8x256xf32, #tpu.memory_space<vmem>>) attributes {dimension_semantics = [#tpu.dimension_semantics<parallel>, #tpu.dimension_semantics<parallel>, #tpu.dimension_semantics<arbitrary>], iteration_bounds = array<i64: 1, 1, 3>, scalar_prefetch = 0 : i64, scratch_operands = 1 : i64, tpu.core_type = #tpu.core_type<tc>, window_params = [{transform_indices = @transform_0, window_bounds = array<i64: 8, 768>}, {transform_indices = @transform_1, window_bounds = array<i64: 768, 256>}, {transform_indices = @transform_2, window_bounds = array<i64: 8, 256>}, {transform_indices = @transform_3, window_bounds = array<i64: 8, 256>}, {transform_indices = @transform_4, window_bounds = array<i64: 8, 256>}]} {
    %c0_i32 = arith.constant 0 : i32
    %0 = arith.cmpi eq, %arg2, %c0_i32 : i32
    %1 = arith.extui %0 : i1 to i32
    %c0_i32_0 = arith.constant 0 : i32
    %2 = arith.cmpi ne, %1, %c0_i32_0 : i32
    scf.if %2 {
      %cst_9 = arith.constant 0.000000e+00 : f32
      %12 = vector.broadcast %cst_9 : f32 to vector<8x256xf32>
      %c0_10 = arith.constant 0 : index
      %c0_11 = arith.constant 0 : index
      %13 = vector.load %arg8[%c0_10, %c0_11] : memref<8x256xf32, #tpu.memory_space<vmem>>, vector<8x256xf32>
      tpu.vector_store %arg8[%c0_10, %c0_11], %12 {strides = array<i32>} : memref<8x256xf32, #tpu.memory_space<vmem>>, vector<8x256xf32>,
    } else {
    }
    %c0 = arith.constant 0 : index
    %c0_1 = arith.constant 0 : index
    %3 = vector.load %arg8[%c0, %c0_1] : memref<8x256xf32, #tpu.memory_space<vmem>>, vector<8x256xf32>
    %c0_2 = arith.constant 0 : index
    %c0_3 = arith.constant 0 : index
    %4 = vector.load %arg3[%c0_2, %c0_3] : memref<8x768xbf16, #tpu.memory_space<vmem>>, vector<8x768xbf16>
    %c0_4 = arith.constant 0 : index
    %c0_5 = arith.constant 0 : index
    %5 = vector.load %arg4[%c0_4, %c0_5] : memref<768x256xbf16, #tpu.memory_space<vmem>>, vector<768x256xbf16>
    %cst = arith.constant dense<0.000000e+00> : vector<8x256xf32>
    %6 = tpu.matmul %4, %5, %cst {dimension_numbers = #tpu.dot_dimension_numbers<[1], [0], [0], [1], [0, 0, 1, 1], [], []>} : vector<8x768xbf16>, vector<768x256xbf16>, vector<8x256xf32> -> vector<8x256xf32>
    %7 = arith.addf %3, %6 : vector<8x256xf32>
    %c0_6 = arith.constant 0 : index
    %c0_7 = arith.constant 0 : index
    %8 = vector.load %arg8[%c0_6, %c0_7] : memref<8x256xf32, #tpu.memory_space<vmem>>, vector<8x256xf32>
    tpu.vector_store %arg8[%c0_6, %c0_7], %7 {strides = array<i32>} : memref<8x256xf32, #tpu.memory_space<vmem>>, vector<8x256xf32>,
    %c2_i32 = arith.constant 2 : i32
    %9 = arith.cmpi eq, %arg2, %c2_i32 : i32
    %10 = arith.extui %9 : i1 to i32
    %c0_i32_8 = arith.constant 0 : i32
    %11 = arith.cmpi ne, %10, %c0_i32_8 : i32
    scf.if %11 {
      %c0_9 = arith.constant 0 : index
      %c0_10 = arith.constant 0 : index
      %12 = vector.load %arg8[%c0_9, %c0_10] : memref<8x256xf32, #tpu.memory_space<vmem>>, vector<8x256xf32>
      %c0_11 = arith.constant 0 : index
      %c0_12 = arith.constant 0 : index
      %13 = vector.load %arg5[%c0_11, %c0_12] : memref<8x256xf32, #tpu.memory_space<vmem>>, vector<8x256xf32>
      tpu.vector_store %arg5[%c0_11, %c0_12], %12 {strides = array<i32>} : memref<8x256xf32, #tpu.memory_space<vmem>>, vector<8x256xf32>,
      %cst_13 = arith.constant dense<0.000000e+00> : vector<256xf32>
      %14 = vector.multi_reduction <add>, %12, %cst_13 [0] : vector<8x256xf32> to vector<256xf32>
      %15 = vector.shape_cast %14 : vector<256xf32> to vector<1x256xf32>
      %16 = vector.shape_cast %15 : vector<1x256xf32> to vector<1x256xf32>
      %17 = vector.broadcast %16 : vector<1x256xf32> to vector<8x256xf32>
      %c0_14 = arith.constant 0 : index
      %c0_15 = arith.constant 0 : index
      %18 = vector.load %arg6[%c0_14, %c0_15] : memref<8x256xf32, #tpu.memory_space<vmem>>, vector<8x256xf32>
      tpu.vector_store %arg6[%c0_14, %c0_15], %17 {strides = array<i32>} : memref<8x256xf32, #tpu.memory_space<vmem>>, vector<8x256xf32>,
      %19 = arith.mulf %12, %12 : vector<8x256xf32>
      %cst_16 = arith.constant dense<0.000000e+00> : vector<256xf32>
      %20 = vector.multi_reduction <add>, %19, %cst_16 [0] : vector<8x256xf32> to vector<256xf32>
      %21 = vector.shape_cast %20 : vector<256xf32> to vector<1x256xf32>
      %22 = vector.shape_cast %21 : vector<1x256xf32> to vector<1x256xf32>
      %23 = vector.broadcast %22 : vector<1x256xf32> to vector<8x256xf32>
      %c0_17 = arith.constant 0 : index
      %c0_18 = arith.constant 0 : index
      %24 = vector.load %arg7[%c0_17, %c0_18] : memref<8x256xf32, #tpu.memory_space<vmem>>, vector<8x256xf32>
      tpu.vector_store %arg7[%c0_17, %c0_18], %23 {strides = array<i32>} : memref<8x256xf32, #tpu.memory_space<vmem>>, vector<8x256xf32>,
    } else {
    }
    return
  }
  func.func @transform_0(%arg0: i32, %arg1: i32, %arg2: i32) -> (i32, i32) {
    %c0_i32 = arith.constant 0 : i32
    return %arg0, %arg2 : i32, i32
  }
  func.func @transform_1(%arg0: i32, %arg1: i32, %arg2: i32) -> (i32, i32) {
    %c0_i32 = arith.constant 0 : i32
    return %arg2, %arg1 : i32, i32
  }
  func.func @transform_2(%arg0: i32, %arg1: i32, %arg2: i32) -> (i32, i32) {
    %c0_i32 = arith.constant 0 : i32
    return %arg0, %arg1 : i32, i32
  }
  func.func @transform_3(%arg0: i32, %arg1: i32, %arg2: i32) -> (i32, i32) {
    %c0_i32 = arith.constant 0 : i32
    return %arg0, %arg1 : i32, i32
  }
  func.func @transform_4(%arg0: i32, %arg1: i32, %arg2: i32) -> (i32, i32) {
    %c0_i32 = arith.constant 0 : i32
    return %arg0, %arg1 : i32, i32
  }
}

module attributes {stable_mosaic.version = 11 : i64} {
  func.func @_norm_add_relu_kernel(%arg0: i32, %arg1: memref<8x256xf32, #tpu.memory_space<vmem>>, %arg2: memref<1x256xf32, #tpu.memory_space<vmem>>, %arg3: memref<1x256xf32, #tpu.memory_space<vmem>>, %arg4: memref<8x256xf32, #tpu.memory_space<vmem>>, %arg5: memref<8x256xf32, #tpu.memory_space<vmem>>) attributes {dimension_semantics = [#tpu.dimension_semantics<parallel>], iteration_bounds = array<i64: 1>, scalar_prefetch = 0 : i64, scratch_operands = 0 : i64, tpu.core_type = #tpu.core_type<tc>, window_params = [{transform_indices = @transform_0, window_bounds = array<i64: 8, 256>}, {pipeline_mode = #tpu.pipeline_mode<synchronous>, transform_indices = @transform_1, window_bounds = array<i64: 1, 256>}, {pipeline_mode = #tpu.pipeline_mode<synchronous>, transform_indices = @transform_2, window_bounds = array<i64: 1, 256>}, {transform_indices = @transform_3, window_bounds = array<i64: 8, 256>}, {transform_indices = @transform_4, window_bounds = array<i64: 8, 256>}]} {
    %c0 = arith.constant 0 : index
    %c0_0 = arith.constant 0 : index
    %0 = vector.load %arg1[%c0, %c0_0] : memref<8x256xf32, #tpu.memory_space<vmem>>, vector<8x256xf32>
    %c0_1 = arith.constant 0 : index
    %c0_2 = arith.constant 0 : index
    %1 = vector.load %arg2[%c0_1, %c0_2] : memref<1x256xf32, #tpu.memory_space<vmem>>, vector<1x256xf32>
    %2 = vector.broadcast %1 : vector<1x256xf32> to vector<8x256xf32>
    %3 = arith.mulf %0, %2 : vector<8x256xf32>
    %c0_3 = arith.constant 0 : index
    %c0_4 = arith.constant 0 : index
    %4 = vector.load %arg3[%c0_3, %c0_4] : memref<1x256xf32, #tpu.memory_space<vmem>>, vector<1x256xf32>
    %5 = vector.broadcast %4 : vector<1x256xf32> to vector<8x256xf32>
    %6 = arith.addf %3, %5 : vector<8x256xf32>
    %c0_5 = arith.constant 0 : index
    %c0_6 = arith.constant 0 : index
    %7 = vector.load %arg4[%c0_5, %c0_6] : memref<8x256xf32, #tpu.memory_space<vmem>>, vector<8x256xf32>
    %8 = arith.addf %6, %7 : vector<8x256xf32>
    %cst = arith.constant 0.000000e+00 : f32
    %9 = vector.broadcast %cst : f32 to vector<8x256xf32>
    %10 = arith.maximumf %8, %9 : vector<8x256xf32>
    %c0_7 = arith.constant 0 : index
    %c0_8 = arith.constant 0 : index
    %11 = vector.load %arg5[%c0_7, %c0_8] : memref<8x256xf32, #tpu.memory_space<vmem>>, vector<8x256xf32>
    tpu.vector_store %arg5[%c0_7, %c0_8], %10 {strides = array<i32>} : memref<8x256xf32, #tpu.memory_space<vmem>>, vector<8x256xf32>,
    return
  }
  func.func @transform_0(%arg0: i32) -> (i32, i32) {
    %c0_i32 = arith.constant 0 : i32
    %c0_i32_0 = arith.constant 0 : i32
    return %arg0, %c0_i32 : i32, i32
  }
  func.func @transform_1(%arg0: i32) -> (i32, i32) {
    %c0_i32 = arith.constant 0 : i32
    %c0_i32_0 = arith.constant 0 : i32
    %c0_i32_1 = arith.constant 0 : i32
    return %c0_i32, %c0_i32_0 : i32, i32
  }
  func.func @transform_2(%arg0: i32) -> (i32, i32) {
    %c0_i32 = arith.constant 0 : i32
    %c0_i32_0 = arith.constant 0 : i32
    %c0_i32_1 = arith.constant 0 : i32
    return %c0_i32, %c0_i32_0 : i32, i32
  }
  func.func @transform_3(%arg0: i32) -> (i32, i32) {
    %c0_i32 = arith.constant 0 : i32
    %c0_i32_0 = arith.constant 0 : i32
    return %arg0, %c0_i32 : i32, i32
  }
  func.func @transform_4(%arg0: i32) -> (i32, i32) {
    %c0_i32 = arith.constant 0 : i32
    %c0_i32_0 = arith.constant 0 : i32
    return %arg0, %c0_i32 : i32, i32
  }
}

module attributes {stable_mosaic.version = 11 : i64} {
  func.func @_mm_stats_kernel(%arg0: i32, %arg1: i32, %arg2: i32, %arg3: memref<8x256xbf16, #tpu.memory_space<vmem>>, %arg4: memref<256x256xbf16, #tpu.memory_space<vmem>>, %arg5: memref<8x256xf32, #tpu.memory_space<vmem>>, %arg6: memref<8x256xf32, #tpu.memory_space<vmem>>, %arg7: memref<8x256xf32, #tpu.memory_space<vmem>>, %arg8: memref<8x256xf32, #tpu.memory_space<vmem>>) attributes {dimension_semantics = [#tpu.dimension_semantics<parallel>, #tpu.dimension_semantics<parallel>, #tpu.dimension_semantics<arbitrary>], iteration_bounds = array<i64: 1, 2, 1>, scalar_prefetch = 0 : i64, scratch_operands = 1 : i64, tpu.core_type = #tpu.core_type<tc>, window_params = [{transform_indices = @transform_0, window_bounds = array<i64: 8, 256>}, {transform_indices = @transform_1, window_bounds = array<i64: 256, 256>}, {transform_indices = @transform_2, window_bounds = array<i64: 8, 256>}, {transform_indices = @transform_3, window_bounds = array<i64: 8, 256>}, {transform_indices = @transform_4, window_bounds = array<i64: 8, 256>}]} {
    %c0_i32 = arith.constant 0 : i32
    %0 = arith.cmpi eq, %arg2, %c0_i32 : i32
    %1 = arith.extui %0 : i1 to i32
    %c0_i32_0 = arith.constant 0 : i32
    %2 = arith.cmpi ne, %1, %c0_i32_0 : i32
    scf.if %2 {
      %cst_10 = arith.constant 0.000000e+00 : f32
      %12 = vector.broadcast %cst_10 : f32 to vector<8x256xf32>
      %c0_11 = arith.constant 0 : index
      %c0_12 = arith.constant 0 : index
      %13 = vector.load %arg8[%c0_11, %c0_12] : memref<8x256xf32, #tpu.memory_space<vmem>>, vector<8x256xf32>
      tpu.vector_store %arg8[%c0_11, %c0_12], %12 {strides = array<i32>} : memref<8x256xf32, #tpu.memory_space<vmem>>, vector<8x256xf32>,
    } else {
    }
    %c0 = arith.constant 0 : index
    %c0_1 = arith.constant 0 : index
    %3 = vector.load %arg8[%c0, %c0_1] : memref<8x256xf32, #tpu.memory_space<vmem>>, vector<8x256xf32>
    %c0_2 = arith.constant 0 : index
    %c0_3 = arith.constant 0 : index
    %4 = vector.load %arg3[%c0_2, %c0_3] : memref<8x256xbf16, #tpu.memory_space<vmem>>, vector<8x256xbf16>
    %c0_4 = arith.constant 0 : index
    %c0_5 = arith.constant 0 : index
    %5 = vector.load %arg4[%c0_4, %c0_5] : memref<256x256xbf16, #tpu.memory_space<vmem>>, vector<256x256xbf16>
    %cst = arith.constant dense<0.000000e+00> : vector<8x256xf32>
    %6 = tpu.matmul %4, %5, %cst {dimension_numbers = #tpu.dot_dimension_numbers<[1], [0], [0], [1], [0, 0, 1, 1], [], []>} : vector<8x256xbf16>, vector<256x256xbf16>, vector<8x256xf32> -> vector<8x256xf32>
    %7 = arith.addf %3, %6 : vector<8x256xf32>
    %c0_6 = arith.constant 0 : index
    %c0_7 = arith.constant 0 : index
    %8 = vector.load %arg8[%c0_6, %c0_7] : memref<8x256xf32, #tpu.memory_space<vmem>>, vector<8x256xf32>
    tpu.vector_store %arg8[%c0_6, %c0_7], %7 {strides = array<i32>} : memref<8x256xf32, #tpu.memory_space<vmem>>, vector<8x256xf32>,
    %c0_i32_8 = arith.constant 0 : i32
    %9 = arith.cmpi eq, %arg2, %c0_i32_8 : i32
    %10 = arith.extui %9 : i1 to i32
    %c0_i32_9 = arith.constant 0 : i32
    %11 = arith.cmpi ne, %10, %c0_i32_9 : i32
    scf.if %11 {
      %c0_10 = arith.constant 0 : index
      %c0_11 = arith.constant 0 : index
      %12 = vector.load %arg8[%c0_10, %c0_11] : memref<8x256xf32, #tpu.memory_space<vmem>>, vector<8x256xf32>
      %c0_12 = arith.constant 0 : index
      %c0_13 = arith.constant 0 : index
      %13 = vector.load %arg5[%c0_12, %c0_13] : memref<8x256xf32, #tpu.memory_space<vmem>>, vector<8x256xf32>
      tpu.vector_store %arg5[%c0_12, %c0_13], %12 {strides = array<i32>} : memref<8x256xf32, #tpu.memory_space<vmem>>, vector<8x256xf32>,
      %cst_14 = arith.constant dense<0.000000e+00> : vector<256xf32>
      %14 = vector.multi_reduction <add>, %12, %cst_14 [0] : vector<8x256xf32> to vector<256xf32>
      %15 = vector.shape_cast %14 : vector<256xf32> to vector<1x256xf32>
      %16 = vector.shape_cast %15 : vector<1x256xf32> to vector<1x256xf32>
      %17 = vector.broadcast %16 : vector<1x256xf32> to vector<8x256xf32>
      %c0_15 = arith.constant 0 : index
      %c0_16 = arith.constant 0 : index
      %18 = vector.load %arg6[%c0_15, %c0_16] : memref<8x256xf32, #tpu.memory_space<vmem>>, vector<8x256xf32>
      tpu.vector_store %arg6[%c0_15, %c0_16], %17 {strides = array<i32>} : memref<8x256xf32, #tpu.memory_space<vmem>>, vector<8x256xf32>,
      %19 = arith.mulf %12, %12 : vector<8x256xf32>
      %cst_17 = arith.constant dense<0.000000e+00> : vector<256xf32>
      %20 = vector.multi_reduction <add>, %19, %cst_17 [0] : vector<8x256xf32> to vector<256xf32>
      %21 = vector.shape_cast %20 : vector<256xf32> to vector<1x256xf32>
      %22 = vector.shape_cast %21 : vector<1x256xf32> to vector<1x256xf32>
      %23 = vector.broadcast %22 : vector<1x256xf32> to vector<8x256xf32>
      %c0_18 = arith.constant 0 : index
      %c0_19 = arith.constant 0 : index
      %24 = vector.load %arg7[%c0_18, %c0_19] : memref<8x256xf32, #tpu.memory_space<vmem>>, vector<8x256xf32>
      tpu.vector_store %arg7[%c0_18, %c0_19], %23 {strides = array<i32>} : memref<8x256xf32, #tpu.memory_space<vmem>>, vector<8x256xf32>,
    } else {
    }
    return
  }
  func.func @transform_0(%arg0: i32, %arg1: i32, %arg2: i32) -> (i32, i32) {
    %c0_i32 = arith.constant 0 : i32
    return %arg0, %arg2 : i32, i32
  }
  func.func @transform_1(%arg0: i32, %arg1: i32, %arg2: i32) -> (i32, i32) {
    %c0_i32 = arith.constant 0 : i32
    return %arg2, %arg1 : i32, i32
  }
  func.func @transform_2(%arg0: i32, %arg1: i32, %arg2: i32) -> (i32, i32) {
    %c0_i32 = arith.constant 0 : i32
    return %arg0, %arg1 : i32, i32
  }
  func.func @transform_3(%arg0: i32, %arg1: i32, %arg2: i32) -> (i32, i32) {
    %c0_i32 = arith.constant 0 : i32
    return %arg0, %arg1 : i32, i32
  }
  func.func @transform_4(%arg0: i32, %arg1: i32, %arg2: i32) -> (i32, i32) {
    %c0_i32 = arith.constant 0 : i32
    return %arg0, %arg1 : i32, i32
  }
}

module attributes {stable_mosaic.version = 11 : i64} {
  func.func @_norm_kernel(%arg0: i32, %arg1: memref<2x512xf32, #tpu.memory_space<vmem>>, %arg2: memref<1x512xf32, #tpu.memory_space<vmem>>, %arg3: memref<1x512xf32, #tpu.memory_space<vmem>>, %arg4: memref<2x512xf32, #tpu.memory_space<vmem>>) attributes {dimension_semantics = [#tpu.dimension_semantics<parallel>], iteration_bounds = array<i64: 1>, scalar_prefetch = 0 : i64, scratch_operands = 0 : i64, tpu.core_type = #tpu.core_type<tc>, window_params = [{transform_indices = @transform_0, window_bounds = array<i64: 2, 512>}, {pipeline_mode = #tpu.pipeline_mode<synchronous>, transform_indices = @transform_1, window_bounds = array<i64: 1, 512>}, {pipeline_mode = #tpu.pipeline_mode<synchronous>, transform_indices = @transform_2, window_bounds = array<i64: 1, 512>}, {transform_indices = @transform_3, window_bounds = array<i64: 2, 512>}]} {
    %c0 = arith.constant 0 : index
    %c0_0 = arith.constant 0 : index
    %0 = vector.load %arg1[%c0, %c0_0] : memref<2x512xf32, #tpu.memory_space<vmem>>, vector<2x512xf32>
    %c0_1 = arith.constant 0 : index
    %c0_2 = arith.constant 0 : index
    %1 = vector.load %arg2[%c0_1, %c0_2] : memref<1x512xf32, #tpu.memory_space<vmem>>, vector<1x512xf32>
    %2 = vector.broadcast %1 : vector<1x512xf32> to vector<2x512xf32>
    %3 = arith.mulf %0, %2 : vector<2x512xf32>
    %c0_3 = arith.constant 0 : index
    %c0_4 = arith.constant 0 : index
    %4 = vector.load %arg3[%c0_3, %c0_4] : memref<1x512xf32, #tpu.memory_space<vmem>>, vector<1x512xf32>
    %5 = vector.broadcast %4 : vector<1x512xf32> to vector<2x512xf32>
    %6 = arith.addf %3, %5 : vector<2x512xf32>
    %c0_5 = arith.constant 0 : index
    %c0_6 = arith.constant 0 : index
    %7 = vector.load %arg4[%c0_5, %c0_6] : memref<2x512xf32, #tpu.memory_space<vmem>>, vector<2x512xf32>
    tpu.vector_store %arg4[%c0_5, %c0_6], %6 {strides = array<i32>} : memref<2x512xf32, #tpu.memory_space<vmem>>, vector<2x512xf32>,
    return
  }
  func.func @transform_0(%arg0: i32) -> (i32, i32) {
    %c0_i32 = arith.constant 0 : i32
    %c0_i32_0 = arith.constant 0 : i32
    return %arg0, %c0_i32 : i32, i32
  }
  func.func @transform_1(%arg0: i32) -> (i32, i32) {
    %c0_i32 = arith.constant 0 : i32
    %c0_i32_0 = arith.constant 0 : i32
    %c0_i32_1 = arith.constant 0 : i32
    return %c0_i32, %c0_i32_0 : i32, i32
  }
  func.func @transform_2(%arg0: i32) -> (i32, i32) {
    %c0_i32 = arith.constant 0 : i32
    %c0_i32_0 = arith.constant 0 : i32
    %c0_i32_1 = arith.constant 0 : i32
    return %c0_i32, %c0_i32_0 : i32, i32
  }
  func.func @transform_3(%arg0: i32) -> (i32, i32) {
    %c0_i32 = arith.constant 0 : i32
    %c0_i32_0 = arith.constant 0 : i32
    return %arg0, %c0_i32 : i32, i32
  }
}

module attributes {stable_mosaic.version = 11 : i64} {
  func.func @_mm_stats_kernel(%arg0: i32, %arg1: i32, %arg2: i32, %arg3: memref<8x768xbf16, #tpu.memory_space<vmem>>, %arg4: memref<768x256xbf16, #tpu.memory_space<vmem>>, %arg5: memref<8x256xf32, #tpu.memory_space<vmem>>, %arg6: memref<8x256xf32, #tpu.memory_space<vmem>>, %arg7: memref<8x256xf32, #tpu.memory_space<vmem>>, %arg8: memref<8x256xf32, #tpu.memory_space<vmem>>) attributes {dimension_semantics = [#tpu.dimension_semantics<parallel>, #tpu.dimension_semantics<parallel>, #tpu.dimension_semantics<arbitrary>], iteration_bounds = array<i64: 1, 2, 3>, scalar_prefetch = 0 : i64, scratch_operands = 1 : i64, tpu.core_type = #tpu.core_type<tc>, window_params = [{transform_indices = @transform_0, window_bounds = array<i64: 8, 768>}, {transform_indices = @transform_1, window_bounds = array<i64: 768, 256>}, {transform_indices = @transform_2, window_bounds = array<i64: 8, 256>}, {transform_indices = @transform_3, window_bounds = array<i64: 8, 256>}, {transform_indices = @transform_4, window_bounds = array<i64: 8, 256>}]} {
    %c0_i32 = arith.constant 0 : i32
    %0 = arith.cmpi eq, %arg2, %c0_i32 : i32
    %1 = arith.extui %0 : i1 to i32
    %c0_i32_0 = arith.constant 0 : i32
    %2 = arith.cmpi ne, %1, %c0_i32_0 : i32
    scf.if %2 {
      %cst_9 = arith.constant 0.000000e+00 : f32
      %12 = vector.broadcast %cst_9 : f32 to vector<8x256xf32>
      %c0_10 = arith.constant 0 : index
      %c0_11 = arith.constant 0 : index
      %13 = vector.load %arg8[%c0_10, %c0_11] : memref<8x256xf32, #tpu.memory_space<vmem>>, vector<8x256xf32>
      tpu.vector_store %arg8[%c0_10, %c0_11], %12 {strides = array<i32>} : memref<8x256xf32, #tpu.memory_space<vmem>>, vector<8x256xf32>,
    } else {
    }
    %c0 = arith.constant 0 : index
    %c0_1 = arith.constant 0 : index
    %3 = vector.load %arg8[%c0, %c0_1] : memref<8x256xf32, #tpu.memory_space<vmem>>, vector<8x256xf32>
    %c0_2 = arith.constant 0 : index
    %c0_3 = arith.constant 0 : index
    %4 = vector.load %arg3[%c0_2, %c0_3] : memref<8x768xbf16, #tpu.memory_space<vmem>>, vector<8x768xbf16>
    %c0_4 = arith.constant 0 : index
    %c0_5 = arith.constant 0 : index
    %5 = vector.load %arg4[%c0_4, %c0_5] : memref<768x256xbf16, #tpu.memory_space<vmem>>, vector<768x256xbf16>
    %cst = arith.constant dense<0.000000e+00> : vector<8x256xf32>
    %6 = tpu.matmul %4, %5, %cst {dimension_numbers = #tpu.dot_dimension_numbers<[1], [0], [0], [1], [0, 0, 1, 1], [], []>} : vector<8x768xbf16>, vector<768x256xbf16>, vector<8x256xf32> -> vector<8x256xf32>
    %7 = arith.addf %3, %6 : vector<8x256xf32>
    %c0_6 = arith.constant 0 : index
    %c0_7 = arith.constant 0 : index
    %8 = vector.load %arg8[%c0_6, %c0_7] : memref<8x256xf32, #tpu.memory_space<vmem>>, vector<8x256xf32>
    tpu.vector_store %arg8[%c0_6, %c0_7], %7 {strides = array<i32>} : memref<8x256xf32, #tpu.memory_space<vmem>>, vector<8x256xf32>,
    %c2_i32 = arith.constant 2 : i32
    %9 = arith.cmpi eq, %arg2, %c2_i32 : i32
    %10 = arith.extui %9 : i1 to i32
    %c0_i32_8 = arith.constant 0 : i32
    %11 = arith.cmpi ne, %10, %c0_i32_8 : i32
    scf.if %11 {
      %c0_9 = arith.constant 0 : index
      %c0_10 = arith.constant 0 : index
      %12 = vector.load %arg8[%c0_9, %c0_10] : memref<8x256xf32, #tpu.memory_space<vmem>>, vector<8x256xf32>
      %c0_11 = arith.constant 0 : index
      %c0_12 = arith.constant 0 : index
      %13 = vector.load %arg5[%c0_11, %c0_12] : memref<8x256xf32, #tpu.memory_space<vmem>>, vector<8x256xf32>
      tpu.vector_store %arg5[%c0_11, %c0_12], %12 {strides = array<i32>} : memref<8x256xf32, #tpu.memory_space<vmem>>, vector<8x256xf32>,
      %cst_13 = arith.constant dense<0.000000e+00> : vector<256xf32>
      %14 = vector.multi_reduction <add>, %12, %cst_13 [0] : vector<8x256xf32> to vector<256xf32>
      %15 = vector.shape_cast %14 : vector<256xf32> to vector<1x256xf32>
      %16 = vector.shape_cast %15 : vector<1x256xf32> to vector<1x256xf32>
      %17 = vector.broadcast %16 : vector<1x256xf32> to vector<8x256xf32>
      %c0_14 = arith.constant 0 : index
      %c0_15 = arith.constant 0 : index
      %18 = vector.load %arg6[%c0_14, %c0_15] : memref<8x256xf32, #tpu.memory_space<vmem>>, vector<8x256xf32>
      tpu.vector_store %arg6[%c0_14, %c0_15], %17 {strides = array<i32>} : memref<8x256xf32, #tpu.memory_space<vmem>>, vector<8x256xf32>,
      %19 = arith.mulf %12, %12 : vector<8x256xf32>
      %cst_16 = arith.constant dense<0.000000e+00> : vector<256xf32>
      %20 = vector.multi_reduction <add>, %19, %cst_16 [0] : vector<8x256xf32> to vector<256xf32>
      %21 = vector.shape_cast %20 : vector<256xf32> to vector<1x256xf32>
      %22 = vector.shape_cast %21 : vector<1x256xf32> to vector<1x256xf32>
      %23 = vector.broadcast %22 : vector<1x256xf32> to vector<8x256xf32>
      %c0_17 = arith.constant 0 : index
      %c0_18 = arith.constant 0 : index
      %24 = vector.load %arg7[%c0_17, %c0_18] : memref<8x256xf32, #tpu.memory_space<vmem>>, vector<8x256xf32>
      tpu.vector_store %arg7[%c0_17, %c0_18], %23 {strides = array<i32>} : memref<8x256xf32, #tpu.memory_space<vmem>>, vector<8x256xf32>,
    } else {
    }
    return
  }
  func.func @transform_0(%arg0: i32, %arg1: i32, %arg2: i32) -> (i32, i32) {
    %c0_i32 = arith.constant 0 : i32
    return %arg0, %arg2 : i32, i32
  }
  func.func @transform_1(%arg0: i32, %arg1: i32, %arg2: i32) -> (i32, i32) {
    %c0_i32 = arith.constant 0 : i32
    return %arg2, %arg1 : i32, i32
  }
  func.func @transform_2(%arg0: i32, %arg1: i32, %arg2: i32) -> (i32, i32) {
    %c0_i32 = arith.constant 0 : i32
    return %arg0, %arg1 : i32, i32
  }
  func.func @transform_3(%arg0: i32, %arg1: i32, %arg2: i32) -> (i32, i32) {
    %c0_i32 = arith.constant 0 : i32
    return %arg0, %arg1 : i32, i32
  }
  func.func @transform_4(%arg0: i32, %arg1: i32, %arg2: i32) -> (i32, i32) {
    %c0_i32 = arith.constant 0 : i32
    return %arg0, %arg1 : i32, i32
  }
}

module attributes {stable_mosaic.version = 11 : i64} {
  func.func @_norm_kernel(%arg0: i32, %arg1: memref<2x512xf32, #tpu.memory_space<vmem>>, %arg2: memref<1x512xf32, #tpu.memory_space<vmem>>, %arg3: memref<1x512xf32, #tpu.memory_space<vmem>>, %arg4: memref<2x512xf32, #tpu.memory_space<vmem>>) attributes {dimension_semantics = [#tpu.dimension_semantics<parallel>], iteration_bounds = array<i64: 1>, scalar_prefetch = 0 : i64, scratch_operands = 0 : i64, tpu.core_type = #tpu.core_type<tc>, window_params = [{transform_indices = @transform_0, window_bounds = array<i64: 2, 512>}, {pipeline_mode = #tpu.pipeline_mode<synchronous>, transform_indices = @transform_1, window_bounds = array<i64: 1, 512>}, {pipeline_mode = #tpu.pipeline_mode<synchronous>, transform_indices = @transform_2, window_bounds = array<i64: 1, 512>}, {transform_indices = @transform_3, window_bounds = array<i64: 2, 512>}]} {
    %c0 = arith.constant 0 : index
    %c0_0 = arith.constant 0 : index
    %0 = vector.load %arg1[%c0, %c0_0] : memref<2x512xf32, #tpu.memory_space<vmem>>, vector<2x512xf32>
    %c0_1 = arith.constant 0 : index
    %c0_2 = arith.constant 0 : index
    %1 = vector.load %arg2[%c0_1, %c0_2] : memref<1x512xf32, #tpu.memory_space<vmem>>, vector<1x512xf32>
    %2 = vector.broadcast %1 : vector<1x512xf32> to vector<2x512xf32>
    %3 = arith.mulf %0, %2 : vector<2x512xf32>
    %c0_3 = arith.constant 0 : index
    %c0_4 = arith.constant 0 : index
    %4 = vector.load %arg3[%c0_3, %c0_4] : memref<1x512xf32, #tpu.memory_space<vmem>>, vector<1x512xf32>
    %5 = vector.broadcast %4 : vector<1x512xf32> to vector<2x512xf32>
    %6 = arith.addf %3, %5 : vector<2x512xf32>
    %cst = arith.constant 0.000000e+00 : f32
    %7 = vector.broadcast %cst : f32 to vector<2x512xf32>
    %8 = arith.maximumf %6, %7 : vector<2x512xf32>
    %c0_5 = arith.constant 0 : index
    %c0_6 = arith.constant 0 : index
    %9 = vector.load %arg4[%c0_5, %c0_6] : memref<2x512xf32, #tpu.memory_space<vmem>>, vector<2x512xf32>
    tpu.vector_store %arg4[%c0_5, %c0_6], %8 {strides = array<i32>} : memref<2x512xf32, #tpu.memory_space<vmem>>, vector<2x512xf32>,
    return
  }
  func.func @transform_0(%arg0: i32) -> (i32, i32) {
    %c0_i32 = arith.constant 0 : i32
    %c0_i32_0 = arith.constant 0 : i32
    return %arg0, %c0_i32 : i32, i32
  }
  func.func @transform_1(%arg0: i32) -> (i32, i32) {
    %c0_i32 = arith.constant 0 : i32
    %c0_i32_0 = arith.constant 0 : i32
    %c0_i32_1 = arith.constant 0 : i32
    return %c0_i32, %c0_i32_0 : i32, i32
  }
  func.func @transform_2(%arg0: i32) -> (i32, i32) {
    %c0_i32 = arith.constant 0 : i32
    %c0_i32_0 = arith.constant 0 : i32
    %c0_i32_1 = arith.constant 0 : i32
    return %c0_i32, %c0_i32_0 : i32, i32
  }
  func.func @transform_3(%arg0: i32) -> (i32, i32) {
    %c0_i32 = arith.constant 0 : i32
    %c0_i32_0 = arith.constant 0 : i32
    return %arg0, %c0_i32 : i32, i32
  }
}

module attributes {stable_mosaic.version = 11 : i64} {
  func.func @_mm_stats_kernel(%arg0: i32, %arg1: i32, %arg2: i32, %arg3: memref<8x768xbf16, #tpu.memory_space<vmem>>, %arg4: memref<768x256xbf16, #tpu.memory_space<vmem>>, %arg5: memref<8x256xf32, #tpu.memory_space<vmem>>, %arg6: memref<8x256xf32, #tpu.memory_space<vmem>>, %arg7: memref<8x256xf32, #tpu.memory_space<vmem>>, %arg8: memref<8x256xf32, #tpu.memory_space<vmem>>) attributes {dimension_semantics = [#tpu.dimension_semantics<parallel>, #tpu.dimension_semantics<parallel>, #tpu.dimension_semantics<arbitrary>], iteration_bounds = array<i64: 1, 2, 6>, scalar_prefetch = 0 : i64, scratch_operands = 1 : i64, tpu.core_type = #tpu.core_type<tc>, window_params = [{transform_indices = @transform_0, window_bounds = array<i64: 8, 768>}, {transform_indices = @transform_1, window_bounds = array<i64: 768, 256>}, {transform_indices = @transform_2, window_bounds = array<i64: 8, 256>}, {transform_indices = @transform_3, window_bounds = array<i64: 8, 256>}, {transform_indices = @transform_4, window_bounds = array<i64: 8, 256>}]} {
    %c0_i32 = arith.constant 0 : i32
    %0 = arith.cmpi eq, %arg2, %c0_i32 : i32
    %1 = arith.extui %0 : i1 to i32
    %c0_i32_0 = arith.constant 0 : i32
    %2 = arith.cmpi ne, %1, %c0_i32_0 : i32
    scf.if %2 {
      %cst_9 = arith.constant 0.000000e+00 : f32
      %12 = vector.broadcast %cst_9 : f32 to vector<8x256xf32>
      %c0_10 = arith.constant 0 : index
      %c0_11 = arith.constant 0 : index
      %13 = vector.load %arg8[%c0_10, %c0_11] : memref<8x256xf32, #tpu.memory_space<vmem>>, vector<8x256xf32>
      tpu.vector_store %arg8[%c0_10, %c0_11], %12 {strides = array<i32>} : memref<8x256xf32, #tpu.memory_space<vmem>>, vector<8x256xf32>,
    } else {
    }
    %c0 = arith.constant 0 : index
    %c0_1 = arith.constant 0 : index
    %3 = vector.load %arg8[%c0, %c0_1] : memref<8x256xf32, #tpu.memory_space<vmem>>, vector<8x256xf32>
    %c0_2 = arith.constant 0 : index
    %c0_3 = arith.constant 0 : index
    %4 = vector.load %arg3[%c0_2, %c0_3] : memref<8x768xbf16, #tpu.memory_space<vmem>>, vector<8x768xbf16>
    %c0_4 = arith.constant 0 : index
    %c0_5 = arith.constant 0 : index
    %5 = vector.load %arg4[%c0_4, %c0_5] : memref<768x256xbf16, #tpu.memory_space<vmem>>, vector<768x256xbf16>
    %cst = arith.constant dense<0.000000e+00> : vector<8x256xf32>
    %6 = tpu.matmul %4, %5, %cst {dimension_numbers = #tpu.dot_dimension_numbers<[1], [0], [0], [1], [0, 0, 1, 1], [], []>} : vector<8x768xbf16>, vector<768x256xbf16>, vector<8x256xf32> -> vector<8x256xf32>
    %7 = arith.addf %3, %6 : vector<8x256xf32>
    %c0_6 = arith.constant 0 : index
    %c0_7 = arith.constant 0 : index
    %8 = vector.load %arg8[%c0_6, %c0_7] : memref<8x256xf32, #tpu.memory_space<vmem>>, vector<8x256xf32>
    tpu.vector_store %arg8[%c0_6, %c0_7], %7 {strides = array<i32>} : memref<8x256xf32, #tpu.memory_space<vmem>>, vector<8x256xf32>,
    %c5_i32 = arith.constant 5 : i32
    %9 = arith.cmpi eq, %arg2, %c5_i32 : i32
    %10 = arith.extui %9 : i1 to i32
    %c0_i32_8 = arith.constant 0 : i32
    %11 = arith.cmpi ne, %10, %c0_i32_8 : i32
    scf.if %11 {
      %c0_9 = arith.constant 0 : index
      %c0_10 = arith.constant 0 : index
      %12 = vector.load %arg8[%c0_9, %c0_10] : memref<8x256xf32, #tpu.memory_space<vmem>>, vector<8x256xf32>
      %c0_11 = arith.constant 0 : index
      %c0_12 = arith.constant 0 : index
      %13 = vector.load %arg5[%c0_11, %c0_12] : memref<8x256xf32, #tpu.memory_space<vmem>>, vector<8x256xf32>
      tpu.vector_store %arg5[%c0_11, %c0_12], %12 {strides = array<i32>} : memref<8x256xf32, #tpu.memory_space<vmem>>, vector<8x256xf32>,
      %cst_13 = arith.constant dense<0.000000e+00> : vector<256xf32>
      %14 = vector.multi_reduction <add>, %12, %cst_13 [0] : vector<8x256xf32> to vector<256xf32>
      %15 = vector.shape_cast %14 : vector<256xf32> to vector<1x256xf32>
      %16 = vector.shape_cast %15 : vector<1x256xf32> to vector<1x256xf32>
      %17 = vector.broadcast %16 : vector<1x256xf32> to vector<8x256xf32>
      %c0_14 = arith.constant 0 : index
      %c0_15 = arith.constant 0 : index
      %18 = vector.load %arg6[%c0_14, %c0_15] : memref<8x256xf32, #tpu.memory_space<vmem>>, vector<8x256xf32>
      tpu.vector_store %arg6[%c0_14, %c0_15], %17 {strides = array<i32>} : memref<8x256xf32, #tpu.memory_space<vmem>>, vector<8x256xf32>,
      %19 = arith.mulf %12, %12 : vector<8x256xf32>
      %cst_16 = arith.constant dense<0.000000e+00> : vector<256xf32>
      %20 = vector.multi_reduction <add>, %19, %cst_16 [0] : vector<8x256xf32> to vector<256xf32>
      %21 = vector.shape_cast %20 : vector<256xf32> to vector<1x256xf32>
      %22 = vector.shape_cast %21 : vector<1x256xf32> to vector<1x256xf32>
      %23 = vector.broadcast %22 : vector<1x256xf32> to vector<8x256xf32>
      %c0_17 = arith.constant 0 : index
      %c0_18 = arith.constant 0 : index
      %24 = vector.load %arg7[%c0_17, %c0_18] : memref<8x256xf32, #tpu.memory_space<vmem>>, vector<8x256xf32>
      tpu.vector_store %arg7[%c0_17, %c0_18], %23 {strides = array<i32>} : memref<8x256xf32, #tpu.memory_space<vmem>>, vector<8x256xf32>,
    } else {
    }
    return
  }
  func.func @transform_0(%arg0: i32, %arg1: i32, %arg2: i32) -> (i32, i32) {
    %c0_i32 = arith.constant 0 : i32
    return %arg0, %arg2 : i32, i32
  }
  func.func @transform_1(%arg0: i32, %arg1: i32, %arg2: i32) -> (i32, i32) {
    %c0_i32 = arith.constant 0 : i32
    return %arg2, %arg1 : i32, i32
  }
  func.func @transform_2(%arg0: i32, %arg1: i32, %arg2: i32) -> (i32, i32) {
    %c0_i32 = arith.constant 0 : i32
    return %arg0, %arg1 : i32, i32
  }
  func.func @transform_3(%arg0: i32, %arg1: i32, %arg2: i32) -> (i32, i32) {
    %c0_i32 = arith.constant 0 : i32
    return %arg0, %arg1 : i32, i32
  }
  func.func @transform_4(%arg0: i32, %arg1: i32, %arg2: i32) -> (i32, i32) {
    %c0_i32 = arith.constant 0 : i32
    return %arg0, %arg1 : i32, i32
  }
}

module attributes {stable_mosaic.version = 11 : i64} {
  func.func @_norm_add_relu_kernel(%arg0: i32, %arg1: memref<2x512xf32, #tpu.memory_space<vmem>>, %arg2: memref<1x512xf32, #tpu.memory_space<vmem>>, %arg3: memref<1x512xf32, #tpu.memory_space<vmem>>, %arg4: memref<2x512xf32, #tpu.memory_space<vmem>>, %arg5: memref<2x512xf32, #tpu.memory_space<vmem>>) attributes {dimension_semantics = [#tpu.dimension_semantics<parallel>], iteration_bounds = array<i64: 1>, scalar_prefetch = 0 : i64, scratch_operands = 0 : i64, tpu.core_type = #tpu.core_type<tc>, window_params = [{transform_indices = @transform_0, window_bounds = array<i64: 2, 512>}, {pipeline_mode = #tpu.pipeline_mode<synchronous>, transform_indices = @transform_1, window_bounds = array<i64: 1, 512>}, {pipeline_mode = #tpu.pipeline_mode<synchronous>, transform_indices = @transform_2, window_bounds = array<i64: 1, 512>}, {transform_indices = @transform_3, window_bounds = array<i64: 2, 512>}, {transform_indices = @transform_4, window_bounds = array<i64: 2, 512>}]} {
    %c0 = arith.constant 0 : index
    %c0_0 = arith.constant 0 : index
    %0 = vector.load %arg1[%c0, %c0_0] : memref<2x512xf32, #tpu.memory_space<vmem>>, vector<2x512xf32>
    %c0_1 = arith.constant 0 : index
    %c0_2 = arith.constant 0 : index
    %1 = vector.load %arg2[%c0_1, %c0_2] : memref<1x512xf32, #tpu.memory_space<vmem>>, vector<1x512xf32>
    %2 = vector.broadcast %1 : vector<1x512xf32> to vector<2x512xf32>
    %3 = arith.mulf %0, %2 : vector<2x512xf32>
    %c0_3 = arith.constant 0 : index
    %c0_4 = arith.constant 0 : index
    %4 = vector.load %arg3[%c0_3, %c0_4] : memref<1x512xf32, #tpu.memory_space<vmem>>, vector<1x512xf32>
    %5 = vector.broadcast %4 : vector<1x512xf32> to vector<2x512xf32>
    %6 = arith.addf %3, %5 : vector<2x512xf32>
    %c0_5 = arith.constant 0 : index
    %c0_6 = arith.constant 0 : index
    %7 = vector.load %arg4[%c0_5, %c0_6] : memref<2x512xf32, #tpu.memory_space<vmem>>, vector<2x512xf32>
    %8 = arith.addf %6, %7 : vector<2x512xf32>
    %cst = arith.constant 0.000000e+00 : f32
    %9 = vector.broadcast %cst : f32 to vector<2x512xf32>
    %10 = arith.maximumf %8, %9 : vector<2x512xf32>
    %c0_7 = arith.constant 0 : index
    %c0_8 = arith.constant 0 : index
    %11 = vector.load %arg5[%c0_7, %c0_8] : memref<2x512xf32, #tpu.memory_space<vmem>>, vector<2x512xf32>
    tpu.vector_store %arg5[%c0_7, %c0_8], %10 {strides = array<i32>} : memref<2x512xf32, #tpu.memory_space<vmem>>, vector<2x512xf32>,
    return
  }
  func.func @transform_0(%arg0: i32) -> (i32, i32) {
    %c0_i32 = arith.constant 0 : i32
    %c0_i32_0 = arith.constant 0 : i32
    return %arg0, %c0_i32 : i32, i32
  }
  func.func @transform_1(%arg0: i32) -> (i32, i32) {
    %c0_i32 = arith.constant 0 : i32
    %c0_i32_0 = arith.constant 0 : i32
    %c0_i32_1 = arith.constant 0 : i32
    return %c0_i32, %c0_i32_0 : i32, i32
  }
  func.func @transform_2(%arg0: i32) -> (i32, i32) {
    %c0_i32 = arith.constant 0 : i32
    %c0_i32_0 = arith.constant 0 : i32
    %c0_i32_1 = arith.constant 0 : i32
    return %c0_i32, %c0_i32_0 : i32, i32
  }
  func.func @transform_3(%arg0: i32) -> (i32, i32) {
    %c0_i32 = arith.constant 0 : i32
    %c0_i32_0 = arith.constant 0 : i32
    return %arg0, %c0_i32 : i32, i32
  }
  func.func @transform_4(%arg0: i32) -> (i32, i32) {
    %c0_i32 = arith.constant 0 : i32
    %c0_i32_0 = arith.constant 0 : i32
    return %arg0, %c0_i32 : i32, i32
  }
}

module attributes {stable_mosaic.version = 11 : i64} {
  func.func @_avgpool_kernel(%arg0: i32, %arg1: memref<1x1x512xf32, #tpu.memory_space<vmem>>, %arg2: memref<1x1x512xf32, #tpu.memory_space<vmem>>) attributes {dimension_semantics = [#tpu.dimension_semantics<parallel>], iteration_bounds = array<i64: 2>, scalar_prefetch = 0 : i64, scratch_operands = 0 : i64, tpu.core_type = #tpu.core_type<tc>, window_params = [{transform_indices = @transform_0, window_bounds = array<i64: 1, 1, 512>}, {transform_indices = @transform_1, window_bounds = array<i64: 1, 1, 512>}]} {
    %c0 = arith.constant 0 : index
    %c0_0 = arith.constant 0 : index
    %c0_1 = arith.constant 0 : index
    %0 = vector.load %arg1[%c0, %c0_0, %c0_1] : memref<1x1x512xf32, #tpu.memory_space<vmem>>, vector<1x1x512xf32>
    %cst = arith.constant dense<0.000000e+00> : vector<1x512xf32>
    %1 = vector.multi_reduction <add>, %0, %cst [1] : vector<1x1x512xf32> to vector<1x512xf32>
    %2 = vector.shape_cast %1 : vector<1x512xf32> to vector<1x1x512xf32>
    %cst_2 = arith.constant 1.000000e+00 : f32
    %3 = vector.broadcast %cst_2 : f32 to vector<1x1x512xf32>
    %4 = arith.divf %2, %3 : vector<1x1x512xf32>
    %c0_3 = arith.constant 0 : index
    %c0_4 = arith.constant 0 : index
    %c0_5 = arith.constant 0 : index
    %5 = vector.load %arg2[%c0_3, %c0_4, %c0_5] : memref<1x1x512xf32, #tpu.memory_space<vmem>>, vector<1x1x512xf32>
    tpu.vector_store %arg2[%c0_3, %c0_4, %c0_5], %4 {strides = array<i32>} : memref<1x1x512xf32, #tpu.memory_space<vmem>>, vector<1x1x512xf32>,
    return
  }
  func.func @transform_0(%arg0: i32) -> (i32, i32, i32) {
    %c0_i32 = arith.constant 0 : i32
    %c0_i32_0 = arith.constant 0 : i32
    %c0_i32_1 = arith.constant 0 : i32
    return %arg0, %c0_i32, %c0_i32_0 : i32, i32, i32
  }
  func.func @transform_1(%arg0: i32) -> (i32, i32, i32) {
    %c0_i32 = arith.constant 0 : i32
    %c0_i32_0 = arith.constant 0 : i32
    %c0_i32_1 = arith.constant 0 : i32
    return %arg0, %c0_i32, %c0_i32_0 : i32, i32, i32
  }
}

module attributes {stable_mosaic.version = 11 : i64} {
  func.func @_mm_bias_kernel(%arg0: i32, %arg1: i32, %arg2: i32, %arg3: memref<8x512xbf16, #tpu.memory_space<vmem>>, %arg4: memref<512x10xbf16, #tpu.memory_space<vmem>>, %arg5: memref<1x10xf32, #tpu.memory_space<vmem>>, %arg6: memref<8x10xf32, #tpu.memory_space<vmem>>, %arg7: memref<8x10xf32, #tpu.memory_space<vmem>>) attributes {dimension_semantics = [#tpu.dimension_semantics<parallel>, #tpu.dimension_semantics<parallel>, #tpu.dimension_semantics<arbitrary>], iteration_bounds = array<i64: 1, 1, 1>, scalar_prefetch = 0 : i64, scratch_operands = 1 : i64, tpu.core_type = #tpu.core_type<tc>, window_params = [{transform_indices = @transform_0, window_bounds = array<i64: 8, 512>}, {transform_indices = @transform_1, window_bounds = array<i64: 512, 10>}, {transform_indices = @transform_2, window_bounds = array<i64: 1, 10>}, {transform_indices = @transform_3, window_bounds = array<i64: 8, 10>}]} {
    %c0_i32 = arith.constant 0 : i32
    %0 = arith.cmpi eq, %arg2, %c0_i32 : i32
    %1 = arith.extui %0 : i1 to i32
    %c0_i32_0 = arith.constant 0 : i32
    %2 = arith.cmpi ne, %1, %c0_i32_0 : i32
    scf.if %2 {
      %cst_10 = arith.constant 0.000000e+00 : f32
      %12 = vector.broadcast %cst_10 : f32 to vector<8x10xf32>
      %c0_11 = arith.constant 0 : index
      %c0_12 = arith.constant 0 : index
      %13 = vector.load %arg7[%c0_11, %c0_12] : memref<8x10xf32, #tpu.memory_space<vmem>>, vector<8x10xf32>
      tpu.vector_store %arg7[%c0_11, %c0_12], %12 {strides = array<i32>} : memref<8x10xf32, #tpu.memory_space<vmem>>, vector<8x10xf32>,
    } else {
    }
    %c0 = arith.constant 0 : index
    %c0_1 = arith.constant 0 : index
    %3 = vector.load %arg7[%c0, %c0_1] : memref<8x10xf32, #tpu.memory_space<vmem>>, vector<8x10xf32>
    %c0_2 = arith.constant 0 : index
    %c0_3 = arith.constant 0 : index
    %4 = vector.load %arg3[%c0_2, %c0_3] : memref<8x512xbf16, #tpu.memory_space<vmem>>, vector<8x512xbf16>
    %c0_4 = arith.constant 0 : index
    %c0_5 = arith.constant 0 : index
    %5 = vector.load %arg4[%c0_4, %c0_5] : memref<512x10xbf16, #tpu.memory_space<vmem>>, vector<512x10xbf16>
    %cst = arith.constant dense<0.000000e+00> : vector<8x10xf32>
    %6 = tpu.matmul %4, %5, %cst {dimension_numbers = #tpu.dot_dimension_numbers<[1], [0], [0], [1], [0, 0, 1, 1], [], []>} : vector<8x512xbf16>, vector<512x10xbf16>, vector<8x10xf32> -> vector<8x10xf32>
    %7 = arith.addf %3, %6 : vector<8x10xf32>
    %c0_6 = arith.constant 0 : index
    %c0_7 = arith.constant 0 : index
    %8 = vector.load %arg7[%c0_6, %c0_7] : memref<8x10xf32, #tpu.memory_space<vmem>>, vector<8x10xf32>
    tpu.vector_store %arg7[%c0_6, %c0_7], %7 {strides = array<i32>} : memref<8x10xf32, #tpu.memory_space<vmem>>, vector<8x10xf32>,
    %c0_i32_8 = arith.constant 0 : i32
    %9 = arith.cmpi eq, %arg2, %c0_i32_8 : i32
    %10 = arith.extui %9 : i1 to i32
    %c0_i32_9 = arith.constant 0 : i32
    %11 = arith.cmpi ne, %10, %c0_i32_9 : i32
    scf.if %11 {
      %c0_10 = arith.constant 0 : index
      %c0_11 = arith.constant 0 : index
      %12 = vector.load %arg7[%c0_10, %c0_11] : memref<8x10xf32, #tpu.memory_space<vmem>>, vector<8x10xf32>
      %c0_12 = arith.constant 0 : index
      %c0_13 = arith.constant 0 : index
      %13 = vector.load %arg5[%c0_12, %c0_13] : memref<1x10xf32, #tpu.memory_space<vmem>>, vector<1x10xf32>
      %14 = vector.broadcast %13 : vector<1x10xf32> to vector<8x10xf32>
      %15 = arith.addf %12, %14 : vector<8x10xf32>
      %c0_14 = arith.constant 0 : index
      %c0_15 = arith.constant 0 : index
      %16 = vector.load %arg6[%c0_14, %c0_15] : memref<8x10xf32, #tpu.memory_space<vmem>>, vector<8x10xf32>
      tpu.vector_store %arg6[%c0_14, %c0_15], %15 {strides = array<i32>} : memref<8x10xf32, #tpu.memory_space<vmem>>, vector<8x10xf32>,
    } else {
    }
    return
  }
  func.func @transform_0(%arg0: i32, %arg1: i32, %arg2: i32) -> (i32, i32) {
    %c0_i32 = arith.constant 0 : i32
    return %arg0, %arg2 : i32, i32
  }
  func.func @transform_1(%arg0: i32, %arg1: i32, %arg2: i32) -> (i32, i32) {
    %c0_i32 = arith.constant 0 : i32
    return %arg2, %arg1 : i32, i32
  }
  func.func @transform_2(%arg0: i32, %arg1: i32, %arg2: i32) -> (i32, i32) {
    %c0_i32 = arith.constant 0 : i32
    %c0_i32_0 = arith.constant 0 : i32
    return %c0_i32, %arg1 : i32, i32
  }
  func.func @transform_3(%arg0: i32, %arg1: i32, %arg2: i32) -> (i32, i32) {
    %c0_i32 = arith.constant 0 : i32
    return %arg0, %arg1 : i32, i32
  }
}

</mosaic_0001>

<bundles_post_ra>
// kernel: resnet18_forward.44
= control target key start
LH: loop header
LB: loop body
LE: loop exit
PB: predicated region body
PF: predicated region fallthrough
CT: control target
= control target key end

     0   :  { %vm284_vm0 = vcmask 523264   ;;  %s961_s0 = inlined_call_operand.vmem [shape: f32[512,64], index: 0, kind: input, shape index: {}]   ;;  %s962_s1 = inlined_call_operand.vmem [shape: f32[1,64], index: 1, kind: input, shape index: {}]   ;;  %s963_s2 = inlined_call_operand.vmem [shape: f32[1,64], index: 2, kind: input, shape index: {}]   ;;  %s964_s3 = inlined_call_operand.vmem [shape: f32[512,64], index: 3, kind: output, shape index: {}]  }
   0x1   :  { %v14_v0 = vld [vmem:[%s961_s0] sm:$0xff]  ;;  %v15_v4 = vld [vmem:[%s961_s0 + $0x8] sm:$0xff]  ;;  %v16_v5 = vld [vmem:[%s961_s0 + $0x10] sm:$0xff] }
   0x2   :  { %v381_v1 = vld [vmem:[%s962_s1] ss:$0 sm:$0xff]  ;;  %v17_v6 = vld [vmem:[%s961_s0 + $0x18] sm:$0xff]  ;;  %v19_v11 = vld [vmem:[%s961_s0 + $0x28] sm:$0xff] }
   0x3   :  { %v386_v2 = vld [vmem:[%s963_s2] ss:$0 sm:$0xff]  ;;  %v85_v3 = vmul.f32 %v381_v1, %v14_v0  ;;  %v86_v7 = vmul.f32 %v381_v1, %v15_v4  ;;  %v87_v8 = vmul.f32 %v381_v1, %v16_v5  ;;  %v88_v9 = vmul.f32 %v381_v1, %v17_v6  ;;  %v20_v12 = vld [vmem:[%s961_s0 + $0x30] sm:$0xff]  ;;  %v21_v17 = vld [vmem:[%s961_s0 + $0x38] sm:$0xff] }
   0x4   :  { %v18_v10 = vld [vmem:[%s961_s0 + $0x20] sm:$0xff]  ;;  %v90_v15 = vmul.f32 %v381_v1, %v19_v11  ;;  %v91_v16 = vmul.f32 %v381_v1, %v20_v12  ;;  %v92_v21 = vmul.f32 %v381_v1, %v21_v17  ;;  %v23_v27 = vld [vmem:[%s961_s0 + $0x48] sm:$0xff]  ;;  %v24_v28 = vld [vmem:[%s961_s0 + $0x50] sm:$0xff] }
   0x5   :  { %v156_v13 = vadd.f32 %v386_v2, %v85_v3  ;;  %v89_v14 = vmul.f32 %v381_v1, %v18_v10  ;;  %v157_v18 = vadd.f32 %v386_v2, %v86_v7  ;;  %v158_v19 = vadd.f32 %v386_v2, %v87_v8  ;;  %v22_v22 = vld [vmem:[%s961_s0 + $0x40] sm:$0xff]  ;;  %v25_v29 = vld [vmem:[%s961_s0 + $0x58] sm:$0xff]  ;;  %v27_v35 = vld [vmem:[%s961_s0 + $0x68] sm:$0xff] }
   0x6   :  { %v159_v20 = vadd.f32 %v386_v2, %v88_v9  ;;  %v161_v25 = vadd.f32 %v386_v2, %v90_v15  ;;  %v162_v26 = vadd.f32 %v386_v2, %v91_v16  ;;  %v163_v33 = vadd.f32 %v386_v2, %v92_v21  ;;  %v26_v34 = vld [vmem:[%s961_s0 + $0x60] sm:$0xff]  ;;  %v28_v36 = vld [vmem:[%s961_s0 + $0x70] sm:$0xff]  ;;  %v29_v41 = vld [vmem:[%s961_s0 + $0x78] sm:$0xff] }
   0x7   :  { %v220_v23 = vmax.f32 %v156_v13, 0.0  ;;  %v160_v24 = vadd.f32 %v386_v2, %v89_v14  ;;  %v221_v30 = vmax.f32 %v157_v18, 0.0  ;;  %v222_v31 = vmax.f32 %v158_v19, 0.0  ;;  %v30_v54 = vld [vmem:[%s961_s0 + $0x80] sm:$0xff]  ;;  %v31_v59 = vld [vmem:[%s961_s0 + $0x88] sm:$0xff]  ;;  %v32_v60 = vld [vmem:[%s961_s0 + $0x90] sm:$0xff] }
   0x8   :  { %v223_v32 = vmax.f32 %v159_v20, 0.0  ;;  %v225_v38 = vmax.f32 %v161_v25, 0.0  ;;  %v226_v39 = vmax.f32 %v162_v26, 0.0  ;;  %v93_v40 = vmul.f32 %v381_v1, %v22_v22  ;;  %v33_v61 = vld [vmem:[%s961_s0 + $0x98] sm:$0xff]  ;;  %v34_v4 = vld [vmem:[%s961_s0 + $0xa0] sm:$0xff]  ;;  %v35_v5 = vld [vmem:[%s961_s0 + $0xa8] sm:$0xff] }
   0x9   :  { %285 = vst.msk [vmem:[%s964_s3] sm:$0xff] %vm284_vm0, %v220_v23  ;;  %v224_v37 = vmax.f32 %v160_v24, 0.0  ;;  %286 = vst.msk [vmem:[%s964_s3 + $0x8] sm:$0xff] %vm284_vm0, %v221_v30  ;;  %v227_v42 = vmax.f32 %v163_v33, 0.0  ;;  %v94_v43 = vmul.f32 %v381_v1, %v23_v27  ;;  %v95_v44 = vmul.f32 %v381_v1, %v24_v28  ;;  %v36_v6 = vld [vmem:[%s961_s0 + $0xb0] sm:$0xff]  ;;  %v37_v11 = vld [vmem:[%s961_s0 + $0xb8] sm:$0xff] }
   0xa   :  { %287 = vst.msk [vmem:[%s964_s3 + $0x10] sm:$0xff] %vm284_vm0, %v222_v31  ;;  %288 = vst.msk [vmem:[%s964_s3 + $0x18] sm:$0xff] %vm284_vm0, %v223_v32  ;;  %v96_v45 = vmul.f32 %v381_v1, %v25_v29  ;;  %v164_v46 = vadd.f32 %v386_v2, %v93_v40  ;;  %v97_v47 = vmul.f32 %v381_v1, %v26_v34  ;;  %v38_v24 = vld [vmem:[%s961_s0 + $0xc0] sm:$0xff]  ;;  %v39_v29 = vld [vmem:[%s961_s0 + $0xc8] sm:$0xff] }
   0xb   :  { %289 = vst.msk [vmem:[%s964_s3 + $0x20] sm:$0xff] %vm284_vm0, %v224_v37  ;;  %290 = vst.msk [vmem:[%s964_s3 + $0x28] sm:$0xff] %vm284_vm0, %v225_v38  ;;  %v98_v48 = vmul.f32 %v381_v1, %v27_v35  ;;  %v99_v49 = vmul.f32 %v381_v1, %v28_v36  ;;  %v165_v50 = vadd.f32 %v386_v2, %v94_v43  ;;  %v40_v30 = vld [vmem:[%s961_s0 + $0xd0] sm:$0xff]  ;;  %v41_v31 = vld [vmem:[%s961_s0 + $0xd8] sm:$0xff] }
   0xc   :  { %291 = vst.msk [vmem:[%s964_s3 + $0x30] sm:$0xff] %vm284_vm0, %v226_v39  ;;  %292 = vst.msk [vmem:[%s964_s3 + $0x38] sm:$0xff] %vm284_vm0, %v227_v42  ;;  %v166_v51 = vadd.f32 %v386_v2, %v95_v44  ;;  %v167_v52 = vadd.f32 %v386_v2, %v96_v45  ;;  %v100_v53 = vmul.f32 %v381_v1, %v29_v41  ;;  %v228_v55 = vmax.f32 %v164_v46, 0.0  ;;  %v42_v36 = vld [vmem:[%s961_s0 + $0xe0] sm:$0xff]  ;;  %v43_v37 = vld [vmem:[%s961_s0 + $0xe8] sm:$0xff] }
   0xd   :  { %v168_v56 = vadd.f32 %v386_v2, %v97_v47  ;;  %v169_v57 = vadd.f32 %v386_v2, %v98_v48  ;;  %v170_v58 = vadd.f32 %v386_v2, %v99_v49  ;;  %v229_v62 = vmax.f32 %v165_v50, 0.0  ;;  %v44_v38 = vld [vmem:[%s961_s0 + $0xf0] sm:$0xff]  ;;  %v45_v43 = vld [vmem:[%s961_s0 + $0xf8] sm:$0xff] }
   0xe   :  { %v230_v63 = vmax.f32 %v166_v51, 0.0  ;;  %v231_v0 = vmax.f32 %v167_v52, 0.0  ;;  %v171_v3 = vadd.f32 %v386_v2, %v100_v53  ;;  %293 = vst.msk [vmem:[%s964_s3 + $0x40] sm:$0xff] %vm284_vm0, %v228_v55  ;;  %v101_v10 = vmul.f32 %v381_v1, %v30_v54 }
   0xf   :  { %v232_v7 = vmax.f32 %v168_v56, 0.0  ;;  %v233_v8 = vmax.f32 %v169_v57, 0.0  ;;  %v234_v9 = vmax.f32 %v170_v58, 0.0  ;;  %294 = vst.msk [vmem:[%s964_s3 + $0x48] sm:$0xff] %vm284_vm0, %v229_v62  ;;  %v102_v13 = vmul.f32 %v381_v1, %v31_v59  ;;  %v46_v56 = vld [vmem:[%s961_s0 + $0x100] sm:$0xff]  ;;  %v48_v62 = vld [vmem:[%s961_s0 + $0x110] sm:$0xff] }
  0x10   :  { %295 = vst.msk [vmem:[%s964_s3 + $0x50] sm:$0xff] %vm284_vm0, %v230_v63  ;;  %296 = vst.msk [vmem:[%s964_s3 + $0x58] sm:$0xff] %vm284_vm0, %v231_v0  ;;  %v235_v12 = vmax.f32 %v171_v3, 0.0  ;;  %v103_v14 = vmul.f32 %v381_v1, %v32_v60  ;;  %v104_v15 = vmul.f32 %v381_v1, %v33_v61  ;;  %v172_v16 = vadd.f32 %v386_v2, %v101_v10  ;;  %v47_v61 = vld [vmem:[%s961_s0 + $0x108] sm:$0xff]  ;;  %v49_v63 = vld [vmem:[%s961_s0 + $0x118] sm:$0xff] }
  0x11   :  { %297 = vst.msk [vmem:[%s964_s3 + $0x60] sm:$0xff] %vm284_vm0, %v232_v7  ;;  %298 = vst.msk [vmem:[%s964_s3 + $0x68] sm:$0xff] %vm284_vm0, %v233_v8  ;;  %v105_v17 = vmul.f32 %v381_v1, %v34_v4  ;;  %v106_v18 = vmul.f32 %v381_v1, %v35_v5  ;;  %v107_v19 = vmul.f32 %v381_v1, %v36_v6  ;;  %v50_v6 = vld [vmem:[%s961_s0 + $0x120] sm:$0xff]  ;;  %v51_v7 = vld [vmem:[%s961_s0 + $0x128] sm:$0xff] }
  0x12   :  { %299 = vst.msk [vmem:[%s964_s3 + $0x70] sm:$0xff] %vm284_vm0, %v234_v9  ;;  %300 = vst.msk [vmem:[%s964_s3 + $0x78] sm:$0xff] %vm284_vm0, %v235_v12  ;;  %v173_v20 = vadd.f32 %v386_v2, %v102_v13  ;;  %v174_v21 = vadd.f32 %v386_v2, %v103_v14  ;;  %v175_v22 = vadd.f32 %v386_v2, %v104_v15  ;;  %v236_v25 = vmax.f32 %v172_v16, 0.0  ;;  %v52_v8 = vld [vmem:[%s961_s0 + $0x130] sm:$0xff]  ;;  %v53_v13 = vld [vmem:[%s961_s0 + $0x138] sm:$0xff] }
  0x13   :  { %v108_v23 = vmul.f32 %v381_v1, %v37_v11  ;;  %v176_v26 = vadd.f32 %v386_v2, %v105_v17  ;;  %v177_v27 = vadd.f32 %v386_v2, %v106_v18  ;;  %v178_v28 = vadd.f32 %v386_v2, %v107_v19 }
  0x14   :  { %v237_v32 = vmax.f32 %v173_v20, 0.0  ;;  %v238_v33 = vmax.f32 %v174_v21, 0.0  ;;  %v239_v34 = vmax.f32 %v175_v22, 0.0  ;;  %301 = vst.msk [vmem:[%s964_s3 + $0x80] sm:$0xff] %vm284_vm0, %v236_v25  ;;  %v109_v42 = vmul.f32 %v381_v1, %v38_v24 }
  0x15   :  { %v179_v35 = vadd.f32 %v386_v2, %v108_v23  ;;  %v240_v39 = vmax.f32 %v176_v26, 0.0  ;;  %v241_v40 = vmax.f32 %v177_v27, 0.0  ;;  %v242_v41 = vmax.f32 %v178_v28, 0.0  ;;  %v54_v26 = vld [vmem:[%s961_s0 + $0x140] sm:$0xff] }
  0x16   :  { %302 = vst.msk [vmem:[%s964_s3 + $0x88] sm:$0xff] %vm284_vm0, %v237_v32  ;;  %303 = vst.msk [vmem:[%s964_s3 + $0x90] sm:$0xff] %vm284_vm0, %v238_v33  ;;  %v110_v45 = vmul.f32 %v381_v1, %v39_v29  ;;  %v111_v46 = vmul.f32 %v381_v1, %v40_v30  ;;  %v112_v47 = vmul.f32 %v381_v1, %v41_v31  ;;  %v55_v31 = vld [vmem:[%s961_s0 + $0x148] sm:$0xff]  ;;  %v56_v32 = vld [vmem:[%s961_s0 + $0x150] sm:$0xff] }
  0x17   :  { %304 = vst.msk [vmem:[%s964_s3 + $0x98] sm:$0xff] %vm284_vm0, %v239_v34  ;;  %v243_v44 = vmax.f32 %v179_v35, 0.0  ;;  %305 = vst.msk [vmem:[%s964_s3 + $0xa0] sm:$0xff] %vm284_vm0, %v240_v39  ;;  %v180_v48 = vadd.f32 %v386_v2, %v109_v42  ;;  %v113_v49 = vmul.f32 %v381_v1, %v42_v36  ;;  %v114_v50 = vmul.f32 %v381_v1, %v43_v37  ;;  %v57_v33 = vld [vmem:[%s961_s0 + $0x158] sm:$0xff]  ;;  %v59_v39 = vld [vmem:[%s961_s0 + $0x168] sm:$0xff] }
  0x18   :  { %306 = vst.msk [vmem:[%s964_s3 + $0xa8] sm:$0xff] %vm284_vm0, %v241_v40  ;;  %307 = vst.msk [vmem:[%s964_s3 + $0xb0] sm:$0xff] %vm284_vm0, %v242_v41  ;;  %v115_v51 = vmul.f32 %v381_v1, %v44_v38  ;;  %v181_v52 = vadd.f32 %v386_v2, %v110_v45  ;;  %v182_v53 = vadd.f32 %v386_v2, %v111_v46  ;;  %v58_v38 = vld [vmem:[%s961_s0 + $0x160] sm:$0xff]  ;;  %v60_v40 = vld [vmem:[%s961_s0 + $0x170] sm:$0xff] }
  0x19   :  { %308 = vst.msk [vmem:[%s964_s3 + $0xb8] sm:$0xff] %vm284_vm0, %v243_v44  ;;  %v183_v54 = vadd.f32 %v386_v2, %v112_v47  ;;  %v116_v55 = vmul.f32 %v381_v1, %v45_v43  ;;  %v244_v57 = vmax.f32 %v180_v48, 0.0  ;;  %v184_v58 = vadd.f32 %v386_v2, %v113_v49  ;;  %v61_v45 = vld [vmem:[%s961_s0 + $0x178] sm:$0xff] }
  0x1a   :  { %v185_v59 = vadd.f32 %v386_v2, %v114_v50  ;;  %v186_v60 = vadd.f32 %v386_v2, %v115_v51  ;;  %v245_v0 = vmax.f32 %v181_v52, 0.0  ;;  %v246_v3 = vmax.f32 %v182_v53, 0.0 }
  0x1b   :  { %v247_v4 = vmax.f32 %v183_v54, 0.0  ;;  %v187_v5 = vadd.f32 %v386_v2, %v116_v55  ;;  %309 = vst.msk [vmem:[%s964_s3 + $0xc0] sm:$0xff] %vm284_vm0, %v244_v57  ;;  %v248_v9 = vmax.f32 %v184_v58, 0.0  ;;  %v117_v12 = vmul.f32 %v381_v1, %v46_v56  ;;  %v62_v58 = vld [vmem:[%s961_s0 + $0x180] sm:$0xff] }
  0x1c   :  { %v249_v10 = vmax.f32 %v185_v59, 0.0  ;;  %v250_v11 = vmax.f32 %v186_v60, 0.0  ;;  %310 = vst.msk [vmem:[%s964_s3 + $0xc8] sm:$0xff] %vm284_vm0, %v245_v0  ;;  %311 = vst.msk [vmem:[%s964_s3 + $0xd0] sm:$0xff] %vm284_vm0, %v246_v3  ;;  %v118_v15 = vmul.f32 %v381_v1, %v47_v61  ;;  %v119_v16 = vmul.f32 %v381_v1, %v48_v62  ;;  %v64_v0 = vld [vmem:[%s961_s0 + $0x190] sm:$0xff]  ;;  %v65_v3 = vld [vmem:[%s961_s0 + $0x198] sm:$0xff] }
  0x1d   :  { %312 = vst.msk [vmem:[%s964_s3 + $0xd8] sm:$0xff] %vm284_vm0, %v247_v4  ;;  %v251_v14 = vmax.f32 %v187_v5, 0.0  ;;  %v120_v17 = vmul.f32 %v381_v1, %v49_v63  ;;  %313 = vst.msk [vmem:[%s964_s3 + $0xe0] sm:$0xff] %vm284_vm0, %v248_v9  ;;  %v188_v18 = vadd.f32 %v386_v2, %v117_v12  ;;  %v121_v19 = vmul.f32 %v381_v1, %v50_v6  ;;  %v63_v63 = vld [vmem:[%s961_s0 + $0x188] sm:$0xff] }
  0x1e   :  { %314 = vst.msk [vmem:[%s964_s3 + $0xe8] sm:$0xff] %vm284_vm0, %v249_v10  ;;  %315 = vst.msk [vmem:[%s964_s3 + $0xf0] sm:$0xff] %vm284_vm0, %v250_v11  ;;  %v122_v20 = vmul.f32 %v381_v1, %v51_v7  ;;  %v123_v21 = vmul.f32 %v381_v1, %v52_v8  ;;  %v189_v22 = vadd.f32 %v386_v2, %v118_v15  ;;  %v66_v8 = vld [vmem:[%s961_s0 + $0x1a0] sm:$0xff]  ;;  %v67_v9 = vld [vmem:[%s961_s0 + $0x1a8] sm:$0xff] }
  0x1f   :  { %316 = vst.msk [vmem:[%s964_s3 + $0xf8] sm:$0xff] %vm284_vm0, %v251_v14  ;;  %v190_v23 = vadd.f32 %v386_v2, %v119_v16  ;;  %v191_v24 = vadd.f32 %v386_v2, %v120_v17  ;;  %v124_v25 = vmul.f32 %v381_v1, %v53_v13  ;;  %v252_v27 = vmax.f32 %v188_v18, 0.0  ;;  %v68_v10 = vld [vmem:[%s961_s0 + $0x1b0] sm:$0xff]  ;;  %v69_v15 = vld [vmem:[%s961_s0 + $0x1b8] sm:$0xff] }
  0x20   :  { %v192_v28 = vadd.f32 %v386_v2, %v121_v19  ;;  %v193_v29 = vadd.f32 %v386_v2, %v122_v20  ;;  %v194_v30 = vadd.f32 %v386_v2, %v123_v21  ;;  %v253_v34 = vmax.f32 %v189_v22, 0.0 }
  0x21   :  { %v254_v35 = vmax.f32 %v190_v23, 0.0  ;;  %v255_v36 = vmax.f32 %v191_v24, 0.0  ;;  %v195_v37 = vadd.f32 %v386_v2, %v124_v25  ;;  %317 = vst.msk [vmem:[%s964_s3 + $0x100] sm:$0xff] %vm284_vm0, %v252_v27  ;;  %v125_v44 = vmul.f32 %v381_v1, %v54_v26 }
  0x22   :  { %v256_v41 = vmax.f32 %v192_v28, 0.0  ;;  %v257_v42 = vmax.f32 %v193_v29, 0.0  ;;  %v258_v43 = vmax.f32 %v194_v30, 0.0  ;;  %318 = vst.msk [vmem:[%s964_s3 + $0x108] sm:$0xff] %vm284_vm0, %v253_v34  ;;  %v126_v47 = vmul.f32 %v381_v1, %v55_v31  ;;  %v70_v28 = vld [vmem:[%s961_s0 + $0x1c0] sm:$0xff]  ;;  %v72_v34 = vld [vmem:[%s961_s0 + $0x1d0] sm:$0xff] }
  0x23   :  { %319 = vst.msk [vmem:[%s964_s3 + $0x110] sm:$0xff] %vm284_vm0, %v254_v35  ;;  %320 = vst.msk [vmem:[%s964_s3 + $0x118] sm:$0xff] %vm284_vm0, %v255_v36  ;;  %v259_v46 = vmax.f32 %v195_v37, 0.0  ;;  %v127_v48 = vmul.f32 %v381_v1, %v56_v32  ;;  %v128_v49 = vmul.f32 %v381_v1, %v57_v33  ;;  %v196_v50 = vadd.f32 %v386_v2, %v125_v44  ;;  %v71_v33 = vld [vmem:[%s961_s0 + $0x1c8] sm:$0xff]  ;;  %v73_v35 = vld [vmem:[%s961_s0 + $0x1d8] sm:$0xff] }
  0x24   :  { %321 = vst.msk [vmem:[%s964_s3 + $0x120] sm:$0xff] %vm284_vm0, %v256_v41  ;;  %322 = vst.msk [vmem:[%s964_s3 + $0x128] sm:$0xff] %vm284_vm0, %v257_v42  ;;  %v129_v51 = vmul.f32 %v381_v1, %v58_v38  ;;  %v130_v52 = vmul.f32 %v381_v1, %v59_v39  ;;  %v131_v53 = vmul.f32 %v381_v1, %v60_v40  ;;  %v74_v40 = vld [vmem:[%s961_s0 + $0x1e0] sm:$0xff]  ;;  %v75_v41 = vld [vmem:[%s961_s0 + $0x1e8] sm:$0xff] }
  0x25   :  { %323 = vst.msk [vmem:[%s964_s3 + $0x130] sm:$0xff] %vm284_vm0, %v258_v43  ;;  %324 = vst.msk [vmem:[%s964_s3 + $0x138] sm:$0xff] %vm284_vm0, %v259_v46  ;;  %v197_v54 = vadd.f32 %v386_v2, %v126_v47  ;;  %v198_v55 = vadd.f32 %v386_v2, %v127_v48  ;;  %v199_v56 = vadd.f32 %v386_v2, %v128_v49  ;;  %v260_v59 = vmax.f32 %v196_v50, 0.0  ;;  %v76_v42 = vld [vmem:[%s961_s0 + $0x1f0] sm:$0xff]  ;;  %v77_v47 = vld [vmem:[%s961_s0 + $0x1f8] sm:$0xff] }
  0x26   :  { %v132_v57 = vmul.f32 %v381_v1, %v61_v45  ;;  %v200_v60 = vadd.f32 %v386_v2, %v129_v51  ;;  %v201_v61 = vadd.f32 %v386_v2, %v130_v52  ;;  %v202_v62 = vadd.f32 %v386_v2, %v131_v53 }
  0x27   :  { %v261_v4 = vmax.f32 %v197_v54, 0.0  ;;  %v262_v5 = vmax.f32 %v198_v55, 0.0  ;;  %v263_v6 = vmax.f32 %v199_v56, 0.0  ;;  %325 = vst.msk [vmem:[%s964_s3 + $0x140] sm:$0xff] %vm284_vm0, %v260_v59  ;;  %v133_v14 = vmul.f32 %v381_v1, %v62_v58 }
  0x28   :  { %v203_v7 = vadd.f32 %v386_v2, %v132_v57  ;;  %v264_v11 = vmax.f32 %v200_v60, 0.0  ;;  %v265_v12 = vmax.f32 %v201_v61, 0.0  ;;  %v266_v13 = vmax.f32 %v202_v62, 0.0 }
  0x29   :  { %326 = vst.msk [vmem:[%s964_s3 + $0x148] sm:$0xff] %vm284_vm0, %v261_v4  ;;  %327 = vst.msk [vmem:[%s964_s3 + $0x150] sm:$0xff] %vm284_vm0, %v262_v5  ;;  %v134_v17 = vmul.f32 %v381_v1, %v63_v63  ;;  %v135_v18 = vmul.f32 %v381_v1, %v64_v0  ;;  %v136_v19 = vmul.f32 %v381_v1, %v65_v3 }
  0x2a   :  { %328 = vst.msk [vmem:[%s964_s3 + $0x158] sm:$0xff] %vm284_vm0, %v263_v6  ;;  %v267_v16 = vmax.f32 %v203_v7, 0.0  ;;  %329 = vst.msk [vmem:[%s964_s3 + $0x160] sm:$0xff] %vm284_vm0, %v264_v11  ;;  %v204_v20 = vadd.f32 %v386_v2, %v133_v14  ;;  %v137_v21 = vmul.f32 %v381_v1, %v66_v8  ;;  %v138_v22 = vmul.f32 %v381_v1, %v67_v9 }
  0x2b   :  { %330 = vst.msk [vmem:[%s964_s3 + $0x168] sm:$0xff] %vm284_vm0, %v265_v12  ;;  %331 = vst.msk [vmem:[%s964_s3 + $0x170] sm:$0xff] %vm284_vm0, %v266_v13  ;;  %v139_v23 = vmul.f32 %v381_v1, %v68_v10  ;;  %v205_v24 = vadd.f32 %v386_v2, %v134_v17  ;;  %v206_v25 = vadd.f32 %v386_v2, %v135_v18 }
  0x2c   :  { %332 = vst.msk [vmem:[%s964_s3 + $0x178] sm:$0xff] %vm284_vm0, %v267_v16  ;;  %v207_v26 = vadd.f32 %v386_v2, %v136_v19  ;;  %v140_v27 = vmul.f32 %v381_v1, %v69_v15  ;;  %v268_v29 = vmax.f32 %v204_v20, 0.0  ;;  %v208_v30 = vadd.f32 %v386_v2, %v137_v21 }
  0x2d   :  { %v209_v31 = vadd.f32 %v386_v2, %v138_v22  ;;  %v210_v32 = vadd.f32 %v386_v2, %v139_v23  ;;  %v269_v36 = vmax.f32 %v205_v24, 0.0  ;;  %v270_v37 = vmax.f32 %v206_v25, 0.0 }
  0x2e   :  { %v271_v38 = vmax.f32 %v207_v26, 0.0  ;;  %v211_v39 = vadd.f32 %v386_v2, %v140_v27  ;;  %333 = vst.msk [vmem:[%s964_s3 + $0x180] sm:$0xff] %vm284_vm0, %v268_v29  ;;  %v272_v43 = vmax.f32 %v208_v30, 0.0  ;;  %v141_v46 = vmul.f32 %v381_v1, %v70_v28 }
  0x2f   :  { %v273_v44 = vmax.f32 %v209_v31, 0.0  ;;  %v274_v45 = vmax.f32 %v210_v32, 0.0  ;;  %334 = vst.msk [vmem:[%s964_s3 + $0x188] sm:$0xff] %vm284_vm0, %v269_v36  ;;  %335 = vst.msk [vmem:[%s964_s3 + $0x190] sm:$0xff] %vm284_vm0, %v270_v37  ;;  %v142_v49 = vmul.f32 %v381_v1, %v71_v33  ;;  %v143_v50 = vmul.f32 %v381_v1, %v72_v34 }
  0x30   :  { %336 = vst.msk [vmem:[%s964_s3 + $0x198] sm:$0xff] %vm284_vm0, %v271_v38  ;;  %v275_v48 = vmax.f32 %v211_v39, 0.0  ;;  %v144_v51 = vmul.f32 %v381_v1, %v73_v35  ;;  %337 = vst.msk [vmem:[%s964_s3 + $0x1a0] sm:$0xff] %vm284_vm0, %v272_v43  ;;  %v212_v52 = vadd.f32 %v386_v2, %v141_v46  ;;  %v145_v53 = vmul.f32 %v381_v1, %v74_v40 }
  0x31   :  { %338 = vst.msk [vmem:[%s964_s3 + $0x1a8] sm:$0xff] %vm284_vm0, %v273_v44  ;;  %339 = vst.msk [vmem:[%s964_s3 + $0x1b0] sm:$0xff] %vm284_vm0, %v274_v45  ;;  %v146_v54 = vmul.f32 %v381_v1, %v75_v41  ;;  %v147_v55 = vmul.f32 %v381_v1, %v76_v42  ;;  %v213_v56 = vadd.f32 %v386_v2, %v142_v49 }
  0x32   :  { %340 = vst.msk [vmem:[%s964_s3 + $0x1b8] sm:$0xff] %vm284_vm0, %v275_v48  ;;  %v214_v57 = vadd.f32 %v386_v2, %v143_v50  ;;  %v215_v58 = vadd.f32 %v386_v2, %v144_v51  ;;  %v148_v59 = vmul.f32 %v381_v1, %v77_v47  ;;  %v276_v60 = vmax.f32 %v212_v52, 0.0 }
  0x33   :  { %v216_v61 = vadd.f32 %v386_v2, %v145_v53  ;;  %v217_v62 = vadd.f32 %v386_v2, %v146_v54  ;;  %v218_v63 = vadd.f32 %v386_v2, %v147_v55  ;;  %v277_v0 = vmax.f32 %v213_v56, 0.0 }
  0x34   :  { %v278_v3 = vmax.f32 %v214_v57, 0.0  ;;  %v279_v4 = vmax.f32 %v215_v58, 0.0  ;;  %v219_v5 = vadd.f32 %v386_v2, %v148_v59  ;;  %341 = vst.msk [vmem:[%s964_s3 + $0x1c0] sm:$0xff] %vm284_vm0, %v276_v60 }
  0x35   :  { %v280_v6 = vmax.f32 %v216_v61, 0.0  ;;  %v281_v7 = vmax.f32 %v217_v62, 0.0  ;;  %v282_v1 = vmax.f32 %v218_v63, 0.0  ;;  %342 = vst.msk [vmem:[%s964_s3 + $0x1c8] sm:$0xff] %vm284_vm0, %v277_v0 }
  0x36   :  { %343 = vst.msk [vmem:[%s964_s3 + $0x1d0] sm:$0xff] %vm284_vm0, %v278_v3  ;;  %344 = vst.msk [vmem:[%s964_s3 + $0x1d8] sm:$0xff] %vm284_vm0, %v279_v4  ;;  %v283_v2 = vmax.f32 %v219_v5, 0.0 }
  0x37   :  { %345 = vst.msk [vmem:[%s964_s3 + $0x1e0] sm:$0xff] %vm284_vm0, %v280_v6  ;;  %346 = vst.msk [vmem:[%s964_s3 + $0x1e8] sm:$0xff] %vm284_vm0, %v281_v7 }
  0x38   :  { %347 = vst.msk [vmem:[%s964_s3 + $0x1f0] sm:$0xff] %vm284_vm0, %v282_v1  ;;  %348 = vst.msk [vmem:[%s964_s3 + $0x1f8] sm:$0xff] %vm284_vm0, %v283_v2 }

// kernel: resnet18_forward.43
= control target key start
LH: loop header
LB: loop body
LE: loop exit
PB: predicated region body
PF: predicated region fallthrough
CT: control target
= control target key end

     0   :  { %s1687_s15 = smov 0   ;;  %s1689_s16 = smov 0   ;;  %s2130_s0 = inlined_call_operand.vmem [shape: bf16[512,256], index: 0, kind: input, shape index: {}]   ;;  %s2131_s1 = inlined_call_operand.vmem [shape: bf16[256,64], index: 1, kind: input, shape index: {}]   ;;  %s2132_s2 = inlined_call_operand.vmem [shape: f32[512,64], index: 2, kind: output, shape index: {0}]   ;;  %s2133_s3 = inlined_call_operand.vmem [shape: f32[16,64], index: 3, kind: output, shape index: {1}]   ;;  %s2134_s4 = inlined_call_operand.vmem [shape: f32[16,64], index: 4, kind: output, shape index: {2}]  }
   0x1   :  { %s1691_s17 = smov 0  }
   0x2 LB: > { %s34_s18 = sadd.s32 1, %s1655_s16  ;;  %p1361_p0 = scmp.ge.s32.totalorder %s1659_s17, 1  ;;  %s1659_s17 = sphi %s1691_s17, %s15_s17   ;;  %s1655_s16 = sphi %s1689_s16, %s2136_s16   ;;  %s1651_s15 = sphi %s1687_s15, %s2135_s15  }
   0x3   : > { %p36_p1 = scmp.ge.s32.totalorder %s34_s18, 2  ;;  %p217_p2 = scmp.lt.s32.totalorder %s1659_s17, 3 }
   0x5   : > { %s2138_s18 = smov (%p36_p1, %s34_s18), 0  ;;  %p218_p3 = pnand %p1361_p0, %p217_p2 }
   0x6   : > { %v1573_v0 = vld [vmem:[%s2131_s1 + $0x40] sm:$0xff] (!%p218_p3)   ;;  %s1362_s21 = sshll.u32 (!%p218_p3), %s1651_s15, 5  ;;  %v1575_v2 = vld [vmem:[%s2131_s1 + $0x48] sm:$0xff] (!%p218_p3)   ;;  %v1577_v4 = vld [vmem:[%s2131_s1 + $0x50] sm:$0xff] (!%p218_p3)   ;;  %vm322_vm0 = vcmask (!%p218_p3), 523264   ;;  %v1661_v48 = vmov (!%p218_p3), 0.0  }
   0x7   : > { %221 = sbr.rel (%p218_p3) target bundleno = 372 (0x174), region = 28  ;;  %v1574_v1 = vld [vmem:[%s2131_s1] sm:$0xff] (!%p218_p3)   ;;  %1420 = vmatprep.subr.bf16.mxu0 (!%p218_p3), %v1573_v0  ;;  %1532 = vmatprep.subr.bf16.mxu1 (!%p218_p3), %v1573_v0  ;;  %v1576_v3 = vld [vmem:[%s2131_s1 + $0x8] sm:$0xff] (!%p218_p3)   ;;  %p275_p4 = scmp.lt.s32.totalorder (!%p218_p3), %s1362_s21, 63  ;;  %v1578_v5 = vld [vmem:[%s2131_s1 + $0x10] sm:$0xff] (!%p218_p3)   ;;  %323 = vst.msk [vmem:[#allocation2] sm:$0xff] (!%p218_p3), %vm322_vm0, %v1661_v48 }
   0x8   : > { %1421 = vmatpush3.bf16.msra.mxu0 (!%p218_p3), %v1574_v1  ;;  %1540 = vmatpush3.bf16.msra.mxu1 (!%p218_p3), %v1574_v1  ;;  %v1579_v6 = vld [vmem:[%s2131_s1 + $0x58] sm:$0xff] (!%p218_p3)   ;;  %v1581_v8 = vld [vmem:[%s2131_s1 + $0x60] sm:$0xff] (!%p218_p3)   ;;  %v1583_v10 = vld [vmem:[%s2131_s1 + $0x68] sm:$0xff] (!%p218_p3)   ;;  %324 = vst.msk [vmem:[#allocation2 + $0x8] sm:$0xff] (!%p218_p3), %vm322_vm0, %v1661_v48  ;;  %p303_p5 = scmp.lt.s32.totalorder (!%p218_p3), %s1651_s15, 1 }
   0x9   : > { %1422 = vmatprep.subr.bf16.mxu0 (!%p218_p3), %v1575_v2  ;;  %1533 = vmatprep.subr.bf16.mxu1 (!%p218_p3), %v1575_v2  ;;  %v1580_v7 = vld [vmem:[%s2131_s1 + $0x18] sm:$0xff] (!%p218_p3)   ;;  %v1582_v9 = vld [vmem:[%s2131_s1 + $0x20] sm:$0xff] (!%p218_p3)   ;;  %v1584_v12 = vld [vmem:[%s2131_s1 + $0x28] sm:$0xff] (!%p218_p3)   ;;  %325 = vst.msk [vmem:[#allocation2 + $0x10] sm:$0xff] (!%p218_p3), %vm322_vm0, %v1661_v48 }
   0xa   : > { %v1585_v13 = vld [vmem:[%s2131_s1 + $0x70] sm:$0xff] (!%p218_p3)   ;;  %v1587_v16 = vld [vmem:[%s2131_s1 + $0x78] sm:$0xff] (!%p218_p3)   ;;  %326 = vst.msk [vmem:[#allocation2 + $0x18] sm:$0xff] (!%p218_p3), %vm322_vm0, %v1661_v48  ;;  %327 = vst.msk [vmem:[#allocation2 + $0x20] sm:$0xff] (!%p218_p3), %vm322_vm0, %v1661_v48 }
   0xb   : > { %v1586_v15 = vld [vmem:[%s2131_s1 + $0x30] sm:$0xff] (!%p218_p3)   ;;  %v1588_v17 = vld [vmem:[%s2131_s1 + $0x38] sm:$0xff] (!%p218_p3)   ;;  %328 = vst.msk [vmem:[#allocation2 + $0x28] sm:$0xff] (!%p218_p3), %vm322_vm0, %v1661_v48  ;;  %329 = vst.msk [vmem:[#allocation2 + $0x30] sm:$0xff] (!%p218_p3), %vm322_vm0, %v1661_v48 }
   0xc   : > { %1423 = vmatpush3.bf16.msra.mxu0 (!%p218_p3), %v1576_v3  ;;  %1541 = vmatpush3.bf16.msra.mxu1 (!%p218_p3), %v1576_v3  ;;  %330 = vst.msk [vmem:[#allocation2 + $0x38] sm:$0xff] (!%p218_p3), %vm322_vm0, %v1661_v48  ;;  %331 = vst.msk [vmem:[#allocation2 + $0x40] sm:$0xff] (!%p218_p3), %vm322_vm0, %v1661_v48 }
   0xd   : > { %1424 = vmatprep.subr.bf16.mxu0 (!%p218_p3), %v1577_v4  ;;  %1534 = vmatprep.subr.bf16.mxu1 (!%p218_p3), %v1577_v4  ;;  %332 = vst.msk [vmem:[#allocation2 + $0x48] sm:$0xff] (!%p218_p3), %vm322_vm0, %v1661_v48  ;;  %333 = vst.msk [vmem:[#allocation2 + $0x50] sm:$0xff] (!%p218_p3), %vm322_vm0, %v1661_v48 }
   0xe   : > { %s2140_s21 = smov (!%p275_p4, %s1362_s21), 63  ;;  %334 = vst.msk [vmem:[#allocation2 + $0x58] sm:$0xff] %vm322_vm0, %v1661_v48  ;;  %335 = vst.msk [vmem:[#allocation2 + $0x60] sm:$0xff] %vm322_vm0, %v1661_v48  ;;  %v355_v50 = vld [vmem:[#allocation2] sm:$0xff]  ;;  %s2142_s15 = smov (!%p303_p5, %s1651_s15), 1 }
   0xf   : > { %s1419_s10 = sshll.u32 %s2140_s21, 3  ;;  %336 = vst.msk [vmem:[#allocation2 + $0x68] sm:$0xff] %vm322_vm0, %v1661_v48  ;;  %337 = vst.msk [vmem:[#allocation2 + $0x70] sm:$0xff] %vm322_vm0, %v1661_v48  ;;  %v356_v57 = vld [vmem:[#allocation2 + $0x8] sm:$0xff]  ;;  %s1367_s21 = sshll.u32 %s2142_s15, 3 }
  0x10   : > { %1425 = vmatpush3.bf16.msra.mxu0 %v1578_v5  ;;  %1542 = vmatpush3.bf16.msra.mxu1 %v1578_v5  ;;  %s1743_s19 = scalar_lea.vmem %s2130_s0, %s1419_s10  ;;  %338 = vst.msk [vmem:[#allocation2 + $0x78] sm:$0xff] %vm322_vm0, %v1661_v48  ;;  %339 = vst.msk [vmem:[#allocation2 + $0x80] sm:$0xff] %vm322_vm0, %v1661_v48  ;;  %s1839_s12 = scalar_lea.vmem %s2132_s2, %s1419_s10 }
  0x11   : > { %1426 = vmatprep.subr.bf16.mxu0 %v1579_v6  ;;  %1535 = vmatprep.subr.bf16.mxu1 %v1579_v6  ;;  %v1591_v11 = vld [vmem:[%s1743_s19 + $0x4] ss:$8 sps:$4 sm:$0xff]   ;;  %v1589_v18 = vld [vmem:[%s1743_s19] ss:$8 sps:$4 sm:$0xff]   ;;  %v1592_v19 = vld [vmem:[%s1743_s19 + $0x14] ss:$8 sps:$4 sm:$0xff]   ;;  %s309_s14 = scalar_lea.vmem %s2133_s3, %s1367_s21  ;;  %s316_s22 = scalar_lea.vmem %s2134_s4, %s1367_s21 }
  0x12   : > { %739 = vmatprep.mubr.bf16.mxu0 %v1591_v11  ;;  %v1603_v14 = vld [vmem:[%s1743_s19 + $0x84] ss:$8 sps:$4 sm:$0xff]   ;;  %v1601_v20 = vld [vmem:[%s1743_s19 + $0x80] ss:$8 sps:$4 sm:$0xff]   ;;  %v1607_v21 = vld [vmem:[%s1743_s19 + $0x94] ss:$8 sps:$4 sm:$0xff]  }
  0x13   : > { %803 = vmatprep.mubr.bf16.mxu1 %v1603_v14  ;;  %v1594_v22 = vld [vmem:[%s1743_s19 + $0x10] ss:$8 sps:$4 sm:$0xff]   ;;  %v1595_v23 = vld [vmem:[%s1743_s19 + $0x24] ss:$8 sps:$4 sm:$0xff]   ;;  %v1597_v26 = vld [vmem:[%s1743_s19 + $0x20] ss:$8 sps:$4 sm:$0xff]  }
  0x14   : > { %1427 = vmatpush3.bf16.msra.mxu0 %v1580_v7  ;;  %1543 = vmatpush3.bf16.msra.mxu1 %v1580_v7  ;;  %v1609_v24 = vld [vmem:[%s1743_s19 + $0x90] ss:$8 sps:$4 sm:$0xff]   ;;  %v1613_v25 = vld [vmem:[%s1743_s19 + $0xa4] ss:$8 sps:$4 sm:$0xff]   ;;  %v1598_v27 = vld [vmem:[%s1743_s19 + $0x34] ss:$8 sps:$4 sm:$0xff]  }
  0x15   : > { %1428 = vmatprep.subr.bf16.mxu0 %v1581_v8  ;;  %1536 = vmatprep.subr.bf16.mxu1 %v1581_v8  ;;  %v1615_v28 = vld [vmem:[%s1743_s19 + $0xa0] ss:$8 sps:$4 sm:$0xff]   ;;  %v1619_v29 = vld [vmem:[%s1743_s19 + $0xb4] ss:$8 sps:$4 sm:$0xff]   ;;  %v1600_v30 = vld [vmem:[%s1743_s19 + $0x30] ss:$8 sps:$4 sm:$0xff]  }
  0x16   : > { %v1604_v31 = vld [vmem:[%s1743_s19 + $0x44] ss:$8 sps:$4 sm:$0xff]   ;;  %v1621_v32 = vld [vmem:[%s1743_s19 + $0xb0] ss:$8 sps:$4 sm:$0xff]   ;;  %v1606_v34 = vld [vmem:[%s1743_s19 + $0x40] ss:$8 sps:$4 sm:$0xff]  }
  0x17   : > { %v1625_v33 = vld [vmem:[%s1743_s19 + $0xc4] ss:$8 sps:$4 sm:$0xff]   ;;  %v1610_v35 = vld [vmem:[%s1743_s19 + $0x54] ss:$8 sps:$4 sm:$0xff]   ;;  %v1627_v36 = vld [vmem:[%s1743_s19 + $0xc0] ss:$8 sps:$4 sm:$0xff]  }
  0x18   : > { %1429 = vmatpush3.bf16.msra.mxu0 %v1582_v9  ;;  %1544 = vmatpush3.bf16.msra.mxu1 %v1582_v9  ;;  %v1628_v37 = vld [vmem:[%s1743_s19 + $0xd4] ss:$8 sps:$4 sm:$0xff]   ;;  %v1612_v38 = vld [vmem:[%s1743_s19 + $0x50] ss:$8 sps:$4 sm:$0xff]   ;;  %v1616_v39 = vld [vmem:[%s1743_s19 + $0x64] ss:$8 sps:$4 sm:$0xff]  }
  0x19   : > { %1430 = vmatprep.subr.bf16.mxu0 %v1583_v10  ;;  %1537 = vmatprep.subr.bf16.mxu1 %v1583_v10  ;;  %v1630_v40 = vld [vmem:[%s1743_s19 + $0xd0] ss:$8 sps:$4 sm:$0xff]   ;;  %v1631_v41 = vld [vmem:[%s1743_s19 + $0xe4] ss:$8 sps:$4 sm:$0xff]   ;;  %v1618_v42 = vld [vmem:[%s1743_s19 + $0x60] ss:$8 sps:$4 sm:$0xff]  }
  0x1a   : > { %v1622_v43 = vld [vmem:[%s1743_s19 + $0x74] ss:$8 sps:$4 sm:$0xff]   ;;  %v1633_v44 = vld [vmem:[%s1743_s19 + $0xe0] ss:$8 sps:$4 sm:$0xff]   ;;  %v1624_v46 = vld [vmem:[%s1743_s19 + $0x70] ss:$8 sps:$4 sm:$0xff]  }
  0x1b   : > { %v1634_v45 = vld [vmem:[%s1743_s19 + $0xf4] ss:$8 sps:$4 sm:$0xff]   ;;  %v1636_v47 = vld [vmem:[%s1743_s19 + $0xf0] ss:$8 sps:$4 sm:$0xff]   ;;  %340 = vst.msk [vmem:[#allocation2 + $0x88] sm:$0xff] %vm322_vm0, %v1661_v48  ;;  %341 = vst.msk [vmem:[#allocation2 + $0x90] sm:$0xff] %vm322_vm0, %v1661_v48 }
  0x1c   : > { %1431 = vmatpush3.bf16.msra.mxu0 %v1584_v12  ;;  %1545 = vmatpush3.bf16.msra.mxu1 %v1584_v12  ;;  %342 = vst.msk [vmem:[#allocation2 + $0x98] sm:$0xff] %vm322_vm0, %v1661_v48  ;;  %343 = vst.msk [vmem:[#allocation2 + $0xa0] sm:$0xff] %vm322_vm0, %v1661_v48  ;;  %v371_v55 = vld [vmem:[#allocation2 + $0x80] sm:$0xff]  ;;  %v357_v6 = vld [vmem:[#allocation2 + $0x10] sm:$0xff] }
  0x1d   : > { %1432 = vmatprep.subr.bf16.mxu0 %v1585_v13  ;;  %1538 = vmatprep.subr.bf16.mxu1 %v1585_v13  ;;  %344 = vst.msk [vmem:[#allocation2 + $0xa8] sm:$0xff] %vm322_vm0, %v1661_v48  ;;  %345 = vst.msk [vmem:[#allocation2 + $0xb0] sm:$0xff] %vm322_vm0, %v1661_v48  ;;  %v358_v13 = vld [vmem:[#allocation2 + $0x18] sm:$0xff] }
  0x1e   : > { %346 = vst.msk [vmem:[#allocation2 + $0xb8] sm:$0xff] %vm322_vm0, %v1661_v48  ;;  %347 = vst.msk [vmem:[#allocation2 + $0xc0] sm:$0xff] %vm322_vm0, %v1661_v48 }
  0x1f   : > { %348 = vst.msk [vmem:[#allocation2 + $0xc8] sm:$0xff] %vm322_vm0, %v1661_v48  ;;  %349 = vst.msk [vmem:[#allocation2 + $0xd0] sm:$0xff] %vm322_vm0, %v1661_v48 }
  0x20   : > { %1433 = vmatpush3.bf16.msra.mxu0 %v1586_v15  ;;  %1546 = vmatpush3.bf16.msra.mxu1 %v1586_v15  ;;  %350 = vst.msk [vmem:[#allocation2 + $0xd8] sm:$0xff] %vm322_vm0, %v1661_v48  ;;  %351 = vst.msk [vmem:[#allocation2 + $0xe0] sm:$0xff] %vm322_vm0, %v1661_v48 }
  0x21   : > { %1434 = vmatprep.subr.bf16.mxu0 %v1587_v16  ;;  %1539 = vmatprep.subr.bf16.mxu1 %v1587_v16  ;;  %352 = vst.msk [vmem:[#allocation2 + $0xe8] sm:$0xff] %vm322_vm0, %v1661_v48  ;;  %353 = vst.msk [vmem:[#allocation2 + $0xf0] sm:$0xff] %vm322_vm0, %v1661_v48 }
  0x22   : > { %354 = vst.msk [vmem:[#allocation2 + $0xf8] sm:$0xff] %vm322_vm0, %v1661_v48  ;;  %v372_v63 = vld [vmem:[#allocation2 + $0x88] sm:$0xff]  ;;  %v373_v11 = vld [vmem:[#allocation2 + $0x90] sm:$0xff] }
  0x24   : > { %1435 = vmatpush3.bf16.msra.mxu0 %v1588_v17  ;;  %1547 = vmatpush3.bf16.msra.mxu1 %v1588_v17 }
  0x27   : > { %740 = vmatmul.mubr.bf16.vlgmr.msra.gmra.mrb[0].mxu0 %v1589_v18  ;;  %804 = vmatmul.mubr.bf16.vlgmr.msra.gmra.mrb[0].mxu1 %v1601_v20 }
  0x28   : > { %747 = vmatprep.mubr.bf16.mxu0 %v1592_v19  ;;  %811 = vmatprep.mubr.bf16.mxu1 %v1607_v21  ;;  %v374_v19 = vld [vmem:[#allocation2 + $0x98] sm:$0xff] }
  0x2f   : > { %748 = vmatmul.mubr.bf16.gmra.mrb[4].mxu0 %v1594_v22  ;;  %812 = vmatmul.mubr.bf16.gmra.mrb[4].mxu1 %v1609_v24 }
  0x30   : > { %755 = vmatprep.mubr.bf16.mxu0 %v1595_v23  ;;  %819 = vmatprep.mubr.bf16.mxu1 %v1613_v25 }
  0x37   : > { %756 = vmatmul.mubr.bf16.gmra.mrb[8].mxu0 %v1597_v26  ;;  %820 = vmatmul.mubr.bf16.gmra.mrb[8].mxu1 %v1615_v28 }
  0x38   : > { %763 = vmatprep.mubr.bf16.mxu0 %v1598_v27  ;;  %827 = vmatprep.mubr.bf16.mxu1 %v1619_v29 }
  0x3f   : > { %764 = vmatmul.mubr.bf16.gmra.mrb[12].mxu0 %v1600_v30  ;;  %828 = vmatmul.mubr.bf16.gmra.mrb[12].mxu1 %v1621_v32  ;;  %v359_v30 = vld [vmem:[#allocation2 + $0x20] sm:$0xff] }
  0x40   : > { %771 = vmatprep.mubr.bf16.mxu0 %v1604_v31  ;;  %835 = vmatprep.mubr.bf16.mxu1 %v1625_v33 }
  0x47   : > { %772 = vmatmul.mubr.bf16.gmra.mrb[16].mxu0 %v1606_v34  ;;  %836 = vmatmul.mubr.bf16.gmra.mrb[16].mxu1 %v1627_v36 }
  0x48   : > { %779 = vmatprep.mubr.bf16.mxu0 %v1610_v35  ;;  %843 = vmatprep.mubr.bf16.mxu1 %v1628_v37  ;;  %v375_v35 = vld [vmem:[#allocation2 + $0xa0] sm:$0xff]  ;;  %v360_v37 = vld [vmem:[#allocation2 + $0x28] sm:$0xff] }
  0x4f   : > { %780 = vmatmul.mubr.bf16.gmra.mrb[20].mxu0 %v1612_v38  ;;  %844 = vmatmul.mubr.bf16.gmra.mrb[20].mxu1 %v1630_v40 }
  0x50   : > { %787 = vmatprep.mubr.bf16.mxu0 %v1616_v39  ;;  %851 = vmatprep.mubr.bf16.mxu1 %v1631_v41 }
  0x57   : > { %788 = vmatmul.mubr.bf16.gmra.mrb[24].mxu0 %v1618_v42  ;;  %852 = vmatmul.mubr.bf16.gmra.mrb[24].mxu1 %v1633_v44 }
  0x58   : > { %795 = vmatprep.mubr.bf16.mxu0 %v1622_v43  ;;  %859 = vmatprep.mubr.bf16.mxu1 %v1634_v45  ;;  %v376_v43 = vld [vmem:[#allocation2 + $0xa8] sm:$0xff] }
  0x5f   : > { %796 = vmatmul.mubr.bf16.gmra.mrb[28].mxu0 %v1624_v46  ;;  %860 = vmatmul.mubr.bf16.gmra.mrb[28].mxu1 %v1636_v47 }
  0xfa   : > { %v1436_v49 = vpop.f32.mrb[0].mxu0  ;;  %v1484_v52 = vpop.f32.mrb[0].mxu1 }
  0xfb   : > { %v1437_v51 = vpop.f32.mrb[1].mxu0  ;;  %v1485_v56 = vpop.f32.mrb[1].mxu1 }
  0xfc   : > { %v1438_v53 = vadd.f32 %v1437_v51, %v1436_v49  ;;  %v1439_v54 = vpop.f32.mrb[2].mxu0  ;;  %v1486_v59 = vadd.f32 %v1485_v56, %v1484_v52  ;;  %v1487_v60 = vpop.f32.mrb[2].mxu1 }
  0xfd   : > { %v1440_v58 = vpop.f32.mrb[3].mxu0  ;;  %v1488_v0 = vpop.f32.mrb[3].mxu1 }
  0xfe   : > { %v868_v61 = vadd.f32 %v1438_v53, %v355_v50  ;;  %v1441_v62 = vadd.f32 %v1440_v58, %v1439_v54  ;;  %v884_v1 = vadd.f32 %v1486_v59, %v371_v55  ;;  %v1489_v2 = vadd.f32 %v1488_v0, %v1487_v60  ;;  %v361_v54 = vld [vmem:[#allocation2 + $0x30] sm:$0xff] }
  0xff   : > { %v377_v59 = vld [vmem:[#allocation2 + $0xb0] sm:$0xff] }
 0x100   : > { %901 = vst.msk [vmem:[#allocation2] sm:$0xff] %vm322_vm0, %v868_v61  ;;  %v869_v3 = vadd.f32 %v1441_v62, %v356_v57  ;;  %917 = vst.msk [vmem:[#allocation2 + $0x80] sm:$0xff] %vm322_vm0, %v884_v1  ;;  %v885_v4 = vadd.f32 %v1489_v2, %v372_v63  ;;  %v362_v61 = vld [vmem:[#allocation2 + $0x38] sm:$0xff] }
 0x102   : > { %902 = vst.msk [vmem:[#allocation2 + $0x8] sm:$0xff] %vm322_vm0, %v869_v3  ;;  %v1442_v5 = vpop.f32.mrb[4].mxu0  ;;  %918 = vst.msk [vmem:[#allocation2 + $0x88] sm:$0xff] %vm322_vm0, %v885_v4  ;;  %v1490_v8 = vpop.f32.mrb[4].mxu1  ;;  %v378_v4 = vld [vmem:[#allocation2 + $0xb8] sm:$0xff] }
 0x103   : > { %v1443_v7 = vpop.f32.mrb[5].mxu0  ;;  %v1491_v12 = vpop.f32.mrb[5].mxu1 }
 0x104   : > { %v1444_v9 = vadd.f32 %v1443_v7, %v1442_v5  ;;  %v1445_v10 = vpop.f32.mrb[6].mxu0  ;;  %v1492_v15 = vadd.f32 %v1491_v12, %v1490_v8  ;;  %v1493_v16 = vpop.f32.mrb[6].mxu1 }
 0x105   : > { %v1446_v14 = vpop.f32.mrb[7].mxu0  ;;  %v1494_v20 = vpop.f32.mrb[7].mxu1 }
 0x106   : > { %v870_v17 = vadd.f32 %v1444_v9, %v357_v6  ;;  %v1447_v18 = vadd.f32 %v1446_v14, %v1445_v10  ;;  %v886_v22 = vadd.f32 %v1492_v15, %v373_v11  ;;  %v1495_v23 = vadd.f32 %v1494_v20, %v1493_v16 }
 0x107   : > { %v1841_v21 = vld [vmem:[#allocation2] sm:$0xff] }
 0x108   : > { %968 = vst.msk [vmem:[%s1839_s12] sm:$0xff] %vm322_vm0, %v1841_v21  ;;  %903 = vst.msk [vmem:[#allocation2 + $0x10] sm:$0xff] %vm322_vm0, %v870_v17  ;;  %v871_v24 = vadd.f32 %v1447_v18, %v358_v13  ;;  %v1847_v25 = vld [vmem:[#allocation2 + $0x80] sm:$0xff]  ;;  %v887_v27 = vadd.f32 %v1495_v23, %v374_v19  ;;  %v1070_v9 = vmul.f32 %v1841_v21, %v1841_v21  ;;  %v1000_v16 = vsel %vm322_vm0, %v1841_v21, 0.0 }
 0x109   : > { %v937_v26 = vld [vmem:[#allocation2 + $0x8] sm:$0xff]  ;;  %984 = vst.msk [vmem:[%s1839_s12 + $0x80] sm:$0xff] %vm322_vm0, %v1847_v25  ;;  %919 = vst.msk [vmem:[#allocation2 + $0x90] sm:$0xff] %vm322_vm0, %v886_v22  ;;  %v363_v23 = vld [vmem:[#allocation2 + $0x40] sm:$0xff] }
 0x10a   : > { %969 = vst.msk [vmem:[%s1839_s12 + $0x8] sm:$0xff] %vm322_vm0, %v937_v26  ;;  %904 = vst.msk [vmem:[#allocation2 + $0x18] sm:$0xff] %vm322_vm0, %v871_v24  ;;  %v1448_v28 = vpop.f32.mrb[8].mxu0  ;;  %v1856_v29 = vld [vmem:[#allocation2 + $0x88] sm:$0xff]  ;;  %v1496_v32 = vpop.f32.mrb[8].mxu1  ;;  %v1071_v1 = vmul.f32 %v937_v26, %v937_v26  ;;  %v1001_v10 = vsel %vm322_vm0, %v937_v26, 0.0 }
 0x10b   : > { %v1449_v31 = vpop.f32.mrb[9].mxu0  ;;  %985 = vst.msk [vmem:[%s1839_s12 + $0x88] sm:$0xff] %vm322_vm0, %v1856_v29  ;;  %920 = vst.msk [vmem:[#allocation2 + $0x98] sm:$0xff] %vm322_vm0, %v887_v27  ;;  %v1497_v36 = vpop.f32.mrb[9].mxu1  ;;  %v1002_v22 = vadd.f32 %v1001_v10, %v1000_v16  ;;  %v1102_v26 = vsel %vm322_vm0, %v1070_v9, 0.0 }
 0x10c   : > { %v1450_v33 = vadd.f32 %v1449_v31, %v1448_v28  ;;  %v1451_v34 = vpop.f32.mrb[10].mxu0  ;;  %v1498_v39 = vadd.f32 %v1497_v36, %v1496_v32  ;;  %v1499_v40 = vpop.f32.mrb[10].mxu1  ;;  %v1103_v17 = vsel %vm322_vm0, %v1071_v1, 0.0  ;;  %v379_v32 = vld [vmem:[#allocation2 + $0xc0] sm:$0xff]  ;;  %v364_v36 = vld [vmem:[#allocation2 + $0x48] sm:$0xff]  ;;  %v365_v1 = vld [vmem:[#allocation2 + $0x50] sm:$0xff] }
 0x10d   : > { %v1452_v38 = vpop.f32.mrb[11].mxu0  ;;  %v1500_v44 = vpop.f32.mrb[11].mxu1 }
 0x10e   : > { %v872_v41 = vadd.f32 %v1450_v33, %v359_v30  ;;  %v1453_v42 = vadd.f32 %v1452_v38, %v1451_v34  ;;  %v888_v46 = vadd.f32 %v1498_v39, %v375_v35  ;;  %v1501_v47 = vadd.f32 %v1500_v44, %v1499_v40  ;;  %v380_v44 = vld [vmem:[#allocation2 + $0xc8] sm:$0xff] }
 0x10f   : > { %v938_v45 = vld [vmem:[#allocation2 + $0x10] sm:$0xff]  ;;  %v1104_v34 = vadd.f32 %v1103_v17, %v1102_v26 }
 0x110   : > { %970 = vst.msk [vmem:[%s1839_s12 + $0x10] sm:$0xff] %vm322_vm0, %v938_v45  ;;  %905 = vst.msk [vmem:[#allocation2 + $0x20] sm:$0xff] %vm322_vm0, %v872_v41  ;;  %v873_v48 = vadd.f32 %v1453_v42, %v360_v37  ;;  %v1865_v49 = vld [vmem:[#allocation2 + $0x90] sm:$0xff]  ;;  %v889_v51 = vadd.f32 %v1501_v47, %v376_v43  ;;  %v1072_v11 = vmul.f32 %v938_v45, %v938_v45  ;;  %v1003_v18 = vsel %vm322_vm0, %v938_v45, 0.0 }
 0x111   : > { %v1867_v50 = vld [vmem:[#allocation2 + $0x18] sm:$0xff]  ;;  %986 = vst.msk [vmem:[%s1839_s12 + $0x90] sm:$0xff] %vm322_vm0, %v1865_v49  ;;  %921 = vst.msk [vmem:[#allocation2 + $0xa0] sm:$0xff] %vm322_vm0, %v888_v46  ;;  %v1004_v35 = vadd.f32 %v1003_v18, %v1002_v22 }
 0x112   : > { %971 = vst.msk [vmem:[%s1839_s12 + $0x18] sm:$0xff] %vm322_vm0, %v1867_v50  ;;  %906 = vst.msk [vmem:[#allocation2 + $0x28] sm:$0xff] %vm322_vm0, %v873_v48  ;;  %v1454_v52 = vpop.f32.mrb[12].mxu0  ;;  %v1877_v53 = vld [vmem:[#allocation2 + $0x98] sm:$0xff]  ;;  %v1502_v56 = vpop.f32.mrb[12].mxu1  ;;  %v1105_v27 = vsel %vm322_vm0, %v1072_v11, 0.0  ;;  %v1073_v28 = vmul.f32 %v1867_v50, %v1867_v50 }
 0x113   : > { %v1455_v55 = vpop.f32.mrb[13].mxu0  ;;  %987 = vst.msk [vmem:[%s1839_s12 + $0x98] sm:$0xff] %vm322_vm0, %v1877_v53  ;;  %922 = vst.msk [vmem:[#allocation2 + $0xa8] sm:$0xff] %vm322_vm0, %v889_v51  ;;  %v1503_v60 = vpop.f32.mrb[13].mxu1  ;;  %v1005_v40 = vsel %vm322_vm0, %v1867_v50, 0.0  ;;  %v1106_v46 = vadd.f32 %v1105_v27, %v1104_v34  ;;  %v366_v11 = vld [vmem:[#allocation2 + $0x58] sm:$0xff] }
 0x114   : > { %v1456_v57 = vadd.f32 %v1455_v55, %v1454_v52  ;;  %v1457_v58 = vpop.f32.mrb[14].mxu0  ;;  %v1504_v63 = vadd.f32 %v1503_v60, %v1502_v56  ;;  %v1505_v0 = vpop.f32.mrb[14].mxu1  ;;  %v1107_v52 = vsel %vm322_vm0, %v1073_v28, 0.0  ;;  %v1006_v56 = vadd.f32 %v1005_v40, %v1004_v35 }
 0x115   : > { %v1458_v62 = vpop.f32.mrb[15].mxu0  ;;  %v1506_v5 = vpop.f32.mrb[15].mxu1 }
 0x116   : > { %v874_v2 = vadd.f32 %v1456_v57, %v361_v54  ;;  %v1459_v3 = vadd.f32 %v1458_v62, %v1457_v58  ;;  %v890_v7 = vadd.f32 %v1504_v63, %v377_v59  ;;  %v1507_v8 = vadd.f32 %v1506_v5, %v1505_v0 }
 0x117   : > { %v940_v6 = vld [vmem:[#allocation2 + $0x20] sm:$0xff]  ;;  %v1108_v63 = vadd.f32 %v1107_v52, %v1106_v46 }
 0x118   : > { %972 = vst.msk [vmem:[%s1839_s12 + $0x20] sm:$0xff] %vm322_vm0, %v940_v6  ;;  %907 = vst.msk [vmem:[#allocation2 + $0x30] sm:$0xff] %vm322_vm0, %v874_v2  ;;  %v875_v12 = vadd.f32 %v1459_v3, %v362_v61  ;;  %v1889_v13 = vld [vmem:[#allocation2 + $0xa0] sm:$0xff]  ;;  %v891_v15 = vadd.f32 %v1507_v8, %v378_v4  ;;  %v1074_v41 = vmul.f32 %v940_v6, %v940_v6  ;;  %v1007_v54 = vsel %vm322_vm0, %v940_v6, 0.0  ;;  %v381_v8 = vld [vmem:[#allocation2 + $0xd0] sm:$0xff] }
 0x119   : > { %v1891_v14 = vld [vmem:[#allocation2 + $0x28] sm:$0xff]  ;;  %988 = vst.msk [vmem:[%s1839_s12 + $0xa0] sm:$0xff] %vm322_vm0, %v1889_v13  ;;  %923 = vst.msk [vmem:[#allocation2 + $0xb0] sm:$0xff] %vm322_vm0, %v890_v7  ;;  %v1008_v0 = vadd.f32 %v1007_v54, %v1006_v56 }
 0x11a   : > { %973 = vst.msk [vmem:[%s1839_s12 + $0x28] sm:$0xff] %vm322_vm0, %v1891_v14  ;;  %908 = vst.msk [vmem:[#allocation2 + $0x38] sm:$0xff] %vm322_vm0, %v875_v12  ;;  %v1460_v19 = vpop.f32.mrb[16].mxu0  ;;  %v1905_v20 = vld [vmem:[#allocation2 + $0xa8] sm:$0xff]  ;;  %v1508_v21 = vpop.f32.mrb[16].mxu1  ;;  %v1109_v59 = vsel %vm322_vm0, %v1074_v41, 0.0  ;;  %v1075_v60 = vmul.f32 %v1891_v14, %v1891_v14 }
 0x11b   : > { %v1461_v24 = vpop.f32.mrb[17].mxu0  ;;  %989 = vst.msk [vmem:[%s1839_s12 + $0xa8] sm:$0xff] %vm322_vm0, %v1905_v20  ;;  %924 = vst.msk [vmem:[#allocation2 + $0xb8] sm:$0xff] %vm322_vm0, %v891_v15  ;;  %v1509_v33 = vpop.f32.mrb[17].mxu1  ;;  %v1009_v4 = vsel %vm322_vm0, %v1891_v14, 0.0  ;;  %v1110_v10 = vadd.f32 %v1109_v59, %v1108_v63 }
 0x11c   : > { %v1462_v30 = vadd.f32 %v1461_v24, %v1460_v19  ;;  %v1463_v31 = vpop.f32.mrb[18].mxu0  ;;  %v1510_v38 = vadd.f32 %v1509_v33, %v1508_v21  ;;  %v1511_v39 = vpop.f32.mrb[18].mxu1  ;;  %v1111_v17 = vsel %vm322_vm0, %v1075_v60, 0.0  ;;  %v1010_v24 = vadd.f32 %v1009_v4, %v1008_v0  ;;  %v384_v0 = vld [vmem:[#allocation2 + $0xe8] sm:$0xff] }
 0x11d   : > { %v1464_v37 = vpop.f32.mrb[19].mxu0  ;;  %v1512_v45 = vpop.f32.mrb[19].mxu1  ;;  %v1112_v33 = vadd.f32 %v1111_v17, %v1110_v10 }
 0x11e   : > { %v876_v42 = vadd.f32 %v1462_v30, %v363_v23  ;;  %v1465_v43 = vadd.f32 %v1464_v37, %v1463_v31  ;;  %v892_v48 = vadd.f32 %v1510_v38, %v379_v32  ;;  %v1513_v51 = vadd.f32 %v1512_v45, %v1511_v39  ;;  %v382_v23 = vld [vmem:[#allocation2 + $0xd8] sm:$0xff] }
 0x11f   : > { %v942_v47 = vld [vmem:[#allocation2 + $0x30] sm:$0xff] }
 0x120   : > { %974 = vst.msk [vmem:[%s1839_s12 + $0x30] sm:$0xff] %vm322_vm0, %v942_v47  ;;  %909 = vst.msk [vmem:[#allocation2 + $0x40] sm:$0xff] %vm322_vm0, %v876_v42  ;;  %v877_v50 = vadd.f32 %v1465_v43, %v364_v36  ;;  %v1922_v55 = vld [vmem:[#allocation2 + $0xb0] sm:$0xff]  ;;  %v893_v58 = vadd.f32 %v1513_v51, %v380_v44  ;;  %v1076_v5 = vmul.f32 %v942_v47, %v942_v47  ;;  %v1011_v18 = vsel %vm322_vm0, %v942_v47, 0.0  ;;  %v367_v42 = vld [vmem:[#allocation2 + $0x60] sm:$0xff] }
 0x121   : > { %v943_v57 = vld [vmem:[#allocation2 + $0x38] sm:$0xff]  ;;  %990 = vst.msk [vmem:[%s1839_s12 + $0xb0] sm:$0xff] %vm322_vm0, %v1922_v55  ;;  %925 = vst.msk [vmem:[#allocation2 + $0xc0] sm:$0xff] %vm322_vm0, %v892_v48  ;;  %v1012_v34 = vadd.f32 %v1011_v18, %v1010_v24  ;;  %v383_v51 = vld [vmem:[#allocation2 + $0xe0] sm:$0xff] }
 0x122   : > { %975 = vst.msk [vmem:[%s1839_s12 + $0x38] sm:$0xff] %vm322_vm0, %v943_v57  ;;  %910 = vst.msk [vmem:[#allocation2 + $0x48] sm:$0xff] %vm322_vm0, %v877_v50  ;;  %v1466_v61 = vpop.f32.mrb[20].mxu0  ;;  %v1934_v62 = vld [vmem:[#allocation2 + $0xb8] sm:$0xff]  ;;  %v1514_v3 = vpop.f32.mrb[20].mxu1  ;;  %v1113_v28 = vsel %vm322_vm0, %v1076_v5, 0.0  ;;  %v1077_v30 = vmul.f32 %v943_v57, %v943_v57 }
 0x123   : > { %v1467_v2 = vpop.f32.mrb[21].mxu0  ;;  %991 = vst.msk [vmem:[%s1839_s12 + $0xb8] sm:$0xff] %vm322_vm0, %v1934_v62  ;;  %926 = vst.msk [vmem:[#allocation2 + $0xc8] sm:$0xff] %vm322_vm0, %v893_v58  ;;  %v1515_v9 = vpop.f32.mrb[21].mxu1  ;;  %v1013_v37 = vsel %vm322_vm0, %v943_v57, 0.0  ;;  %v1114_v41 = vadd.f32 %v1113_v28, %v1112_v33  ;;  %v368_v50 = vld [vmem:[#allocation2 + $0x68] sm:$0xff] }
 0x124   : > { %v1468_v6 = vadd.f32 %v1467_v2, %v1466_v61  ;;  %v1469_v7 = vpop.f32.mrb[22].mxu0  ;;  %v1516_v15 = vadd.f32 %v1515_v9, %v1514_v3  ;;  %v1517_v16 = vpop.f32.mrb[22].mxu1  ;;  %v1115_v45 = vsel %vm322_vm0, %v1077_v30, 0.0  ;;  %v1014_v54 = vadd.f32 %v1013_v37, %v1012_v34  ;;  %v385_v30 = vld [vmem:[#allocation2 + $0xf0] sm:$0xff] }
 0x125   : > { %v1470_v12 = vpop.f32.mrb[23].mxu0  ;;  %v1518_v14 = vpop.f32.mrb[23].mxu1  ;;  %v1116_v2 = vadd.f32 %v1115_v45, %v1114_v41 }
 0x126   : > { %v878_v19 = vadd.f32 %v1468_v6, %v365_v1  ;;  %v1471_v22 = vadd.f32 %v1470_v12, %v1469_v7  ;;  %v894_v26 = vadd.f32 %v1516_v15, %v381_v8  ;;  %v1519_v27 = vadd.f32 %v1518_v14, %v1517_v16 }
 0x127   : > { %v944_v21 = vld [vmem:[#allocation2 + $0x40] sm:$0xff] }
 0x128   : > { %976 = vst.msk [vmem:[%s1839_s12 + $0x40] sm:$0xff] %vm322_vm0, %v944_v21  ;;  %911 = vst.msk [vmem:[#allocation2 + $0x50] sm:$0xff] %vm322_vm0, %v878_v19  ;;  %v879_v31 = vadd.f32 %v1471_v22, %v366_v11  ;;  %v1948_v32 = vld [vmem:[#allocation2 + $0xc0] sm:$0xff]  ;;  %v895_v36 = vadd.f32 %v1519_v27, %v382_v23  ;;  %v1078_v38 = vmul.f32 %v944_v21, %v944_v21  ;;  %v1015_v46 = vsel %vm322_vm0, %v944_v21, 0.0  ;;  %v369_v23 = vld [vmem:[#allocation2 + $0x70] sm:$0xff] }
 0x129   : > { %v945_v35 = vld [vmem:[#allocation2 + $0x48] sm:$0xff]  ;;  %992 = vst.msk [vmem:[%s1839_s12 + $0xc0] sm:$0xff] %vm322_vm0, %v1948_v32  ;;  %927 = vst.msk [vmem:[#allocation2 + $0xd0] sm:$0xff] %vm322_vm0, %v894_v26  ;;  %v1016_v3 = vadd.f32 %v1015_v46, %v1014_v54 }
 0x12a   : > { %977 = vst.msk [vmem:[%s1839_s12 + $0x48] sm:$0xff] %vm322_vm0, %v945_v35  ;;  %912 = vst.msk [vmem:[#allocation2 + $0x58] sm:$0xff] %vm322_vm0, %v879_v31  ;;  %v1472_v39 = vpop.f32.mrb[24].mxu0  ;;  %v1958_v40 = vld [vmem:[#allocation2 + $0xc8] sm:$0xff]  ;;  %v1520_v44 = vpop.f32.mrb[24].mxu1  ;;  %v1117_v59 = vsel %vm322_vm0, %v1078_v38, 0.0  ;;  %v1079_v60 = vmul.f32 %v945_v35, %v945_v35 }
 0x12b   : > { %v1473_v43 = vpop.f32.mrb[25].mxu0  ;;  %993 = vst.msk [vmem:[%s1839_s12 + $0xc8] sm:$0xff] %vm322_vm0, %v1958_v40  ;;  %928 = vst.msk [vmem:[#allocation2 + $0xd8] sm:$0xff] %vm322_vm0, %v895_v36  ;;  %v1521_v52 = vpop.f32.mrb[25].mxu1  ;;  %v1017_v7 = vsel %vm322_vm0, %v945_v35, 0.0  ;;  %v1118_v11 = vadd.f32 %v1117_v59, %v1116_v2  ;;  %v370_v35 = vld [vmem:[#allocation2 + $0x78] sm:$0xff] }
 0x12c   : > { %v1474_v47 = vadd.f32 %v1473_v43, %v1472_v39  ;;  %v1475_v48 = vpop.f32.mrb[26].mxu0  ;;  %v1522_v57 = vadd.f32 %v1521_v52, %v1520_v44  ;;  %v1523_v58 = vpop.f32.mrb[26].mxu1  ;;  %v1119_v16 = vsel %vm322_vm0, %v1079_v60, 0.0  ;;  %v1018_v22 = vadd.f32 %v1017_v7, %v1016_v3  ;;  %v386_v43 = vld [vmem:[#allocation2 + $0xf8] sm:$0xff] }
 0x12d   : > { %v1476_v56 = vpop.f32.mrb[27].mxu0  ;;  %v1524_v1 = vpop.f32.mrb[27].mxu1  ;;  %v1120_v33 = vadd.f32 %v1119_v16, %v1118_v11  ;;  %v1086_v16 = vmul.f32 %v1847_v25, %v1847_v25 }
 0x12e   : > { %v880_v61 = vadd.f32 %v1474_v47, %v367_v42  ;;  %v1477_v63 = vadd.f32 %v1476_v56, %v1475_v48  ;;  %v896_v5 = vadd.f32 %v1522_v57, %v383_v51  ;;  %v1525_v6 = vadd.f32 %v1524_v1, %v1523_v58 }
 0x12f   : > { %v946_v4 = vld [vmem:[#allocation2 + $0x50] sm:$0xff] }
 0x130   : > { %978 = vst.msk [vmem:[%s1839_s12 + $0x50] sm:$0xff] %vm322_vm0, %v946_v4  ;;  %v1080_v8 = vmul.f32 %v946_v4, %v946_v4  ;;  %913 = vst.msk [vmem:[#allocation2 + $0x60] sm:$0xff] %vm322_vm0, %v880_v61  ;;  %v881_v9 = vadd.f32 %v1477_v63, %v368_v50  ;;  %v1971_v10 = vld [vmem:[#allocation2 + $0xd0] sm:$0xff]  ;;  %v897_v15 = vadd.f32 %v1525_v6, %v384_v0  ;;  %v1019_v17 = vsel %vm322_vm0, %v946_v4, 0.0 }
 0x131   : > { %v947_v12 = vld [vmem:[#allocation2 + $0x58] sm:$0xff]  ;;  %994 = vst.msk [vmem:[%s1839_s12 + $0xd0] sm:$0xff] %vm322_vm0, %v1971_v10  ;;  %929 = vst.msk [vmem:[#allocation2 + $0xe0] sm:$0xff] %vm322_vm0, %v896_v5  ;;  %v1020_v34 = vadd.f32 %v1019_v17, %v1018_v22 }
 0x132   : > { %979 = vst.msk [vmem:[%s1839_s12 + $0x58] sm:$0xff] %vm322_vm0, %v947_v12  ;;  %914 = vst.msk [vmem:[#allocation2 + $0x68] sm:$0xff] %vm322_vm0, %v881_v9  ;;  %v1478_v18 = vpop.f32.mrb[28].mxu0  ;;  %v1982_v19 = vld [vmem:[#allocation2 + $0xd8] sm:$0xff]  ;;  %v1526_v24 = vpop.f32.mrb[28].mxu1  ;;  %v1121_v21 = vsel %vm322_vm0, %v1080_v8, 0.0  ;;  %v1081_v26 = vmul.f32 %v947_v12, %v947_v12 }
 0x133   : > { %v1479_v14 = vpop.f32.mrb[29].mxu0  ;;  %995 = vst.msk [vmem:[%s1839_s12 + $0xd8] sm:$0xff] %vm322_vm0, %v1982_v19  ;;  %930 = vst.msk [vmem:[#allocation2 + $0xe8] sm:$0xff] %vm322_vm0, %v897_v15  ;;  %v1527_v31 = vpop.f32.mrb[29].mxu1  ;;  %v1021_v39 = vsel %vm322_vm0, %v947_v12, 0.0  ;;  %v1122_v45 = vadd.f32 %v1121_v21, %v1120_v33  ;;  %v1031_v21 = vsel %vm322_vm0, %v1847_v25, 0.0 }
 0x134   : > { %v1480_v27 = vadd.f32 %v1479_v14, %v1478_v18  ;;  %v1481_v28 = vpop.f32.mrb[30].mxu0  ;;  %v1528_v37 = vadd.f32 %v1527_v31, %v1526_v24  ;;  %v1529_v38 = vpop.f32.mrb[30].mxu1  ;;  %v1123_v51 = vsel %vm322_vm0, %v1081_v26, 0.0  ;;  %v1022_v57 = vadd.f32 %v1021_v39, %v1020_v34 }
 0x135   : > { %v1482_v36 = vpop.f32.mrb[31].mxu0  ;;  %v1530_v44 = vpop.f32.mrb[31].mxu1  ;;  %v1124_v0 = vadd.f32 %v1123_v51, %v1122_v45  ;;  %v1087_v26 = vmul.f32 %v1856_v29, %v1856_v29  ;;  %v1133_v31 = vsel %vm322_vm0, %v1086_v16, 0.0  ;;  %v1033_v33 = vsel %vm322_vm0, %v1856_v29, 0.0 }
 0x136   : > { %v882_v41 = vadd.f32 %v1480_v27, %v369_v23  ;;  %v1483_v42 = vadd.f32 %v1482_v36, %v1481_v28  ;;  %v898_v47 = vadd.f32 %v1528_v37, %v385_v30  ;;  %v1531_v48 = vadd.f32 %v1530_v44, %v1529_v38 }
 0x137   : > { %v948_v46 = vld [vmem:[#allocation2 + $0x60] sm:$0xff]  ;;  %v1088_v34 = vmul.f32 %v1865_v49, %v1865_v49  ;;  %v1135_v37 = vsel %vm322_vm0, %v1087_v26, 0.0  ;;  %v1035_v25 = vsel %vm322_vm0, %v1865_v49, 0.0  ;;  %v1089_v38 = vmul.f32 %v1877_v53, %v1877_v53 }
 0x138   : > { %980 = vst.msk [vmem:[%s1839_s12 + $0x60] sm:$0xff] %vm322_vm0, %v948_v46  ;;  %v1023_v52 = vsel %vm322_vm0, %v948_v46, 0.0  ;;  %v1082_v54 = vmul.f32 %v948_v46, %v948_v46  ;;  %915 = vst.msk [vmem:[#allocation2 + $0x70] sm:$0xff] %vm322_vm0, %v882_v41  ;;  %v883_v50 = vadd.f32 %v1483_v42, %v370_v35  ;;  %v1995_v56 = vld [vmem:[#allocation2 + $0xe0] sm:$0xff]  ;;  %v899_v59 = vadd.f32 %v1531_v48, %v386_v43 }
 0x139   : > { %v949_v58 = vld [vmem:[#allocation2 + $0x68] sm:$0xff]  ;;  %996 = vst.msk [vmem:[%s1839_s12 + $0xe0] sm:$0xff] %vm322_vm0, %v1995_v56  ;;  %931 = vst.msk [vmem:[#allocation2 + $0xf0] sm:$0xff] %vm322_vm0, %v898_v47  ;;  %v1024_v1 = vadd.f32 %v1023_v52, %v1022_v57  ;;  %v1137_v42 = vsel %vm322_vm0, %v1088_v34, 0.0  ;;  %v1037_v29 = vsel %vm322_vm0, %v1877_v53, 0.0  ;;  %v1090_v43 = vmul.f32 %v1889_v13, %v1889_v13 }
 0x13a   : > { %v1125_v60 = vsel %vm322_vm0, %v1082_v54, 0.0  ;;  %981 = vst.msk [vmem:[%s1839_s12 + $0x68] sm:$0xff] %vm322_vm0, %v949_v58  ;;  %v1083_v61 = vmul.f32 %v949_v58, %v949_v58  ;;  %916 = vst.msk [vmem:[#allocation2 + $0x78] sm:$0xff] %vm322_vm0, %v883_v50  ;;  %v2005_v63 = vld [vmem:[#allocation2 + $0xe8] sm:$0xff]  ;;  %v1025_v2 = vsel %vm322_vm0, %v949_v58, 0.0  ;;  %v1139_v46 = vsel %vm322_vm0, %v1089_v38, 0.0 }
 0x13b   : > { %997 = vst.msk [vmem:[%s1839_s12 + $0xe8] sm:$0xff] %vm322_vm0, %v2005_v63  ;;  %932 = vst.msk [vmem:[#allocation2 + $0xf8] sm:$0xff] %vm322_vm0, %v899_v59  ;;  %v1126_v3 = vadd.f32 %v1125_v60, %v1124_v0  ;;  %v1026_v5 = vadd.f32 %v1025_v2, %v1024_v1  ;;  %v1039_v49 = vsel %vm322_vm0, %v1889_v13, 0.0  ;;  %v1091_v47 = vmul.f32 %v1905_v20, %v1905_v20 }
 0x13c   : > { %v1127_v4 = vsel %vm322_vm0, %v1083_v61, 0.0  ;;  %v1141_v52 = vsel %vm322_vm0, %v1090_v43, 0.0  ;;  %v1041_v53 = vsel %vm322_vm0, %v1905_v20, 0.0  ;;  %v1092_v54 = vmul.f32 %v1922_v55, %v1922_v55 }
 0x13d   : > { %v1128_v11 = vadd.f32 %v1127_v4, %v1126_v3  ;;  %v1143_v58 = vsel %vm322_vm0, %v1091_v47, 0.0  ;;  %v1043_v13 = vsel %vm322_vm0, %v1922_v55, 0.0  ;;  %v1093_v59 = vmul.f32 %v1934_v62, %v1934_v62 }
 0x13e   : > { %v1145_v0 = vsel %vm322_vm0, %v1092_v54, 0.0  ;;  %v1045_v20 = vsel %vm322_vm0, %v1934_v62, 0.0  ;;  %v1094_v1 = vmul.f32 %v1948_v32, %v1948_v32  ;;  %v1047_v55 = vsel %vm322_vm0, %v1948_v32, 0.0 }
 0x13f   : > { %v950_v6 = vld [vmem:[#allocation2 + $0x70] sm:$0xff]  ;;  %v1147_v4 = vsel %vm322_vm0, %v1093_v59, 0.0  ;;  %v1049_v62 = vsel %vm322_vm0, %v1958_v40, 0.0  ;;  %v1051_v32 = vsel %vm322_vm0, %v1971_v10, 0.0  ;;  %v1057_v34 = vsel %vm322_vm0, %v2005_v63, 0.0 }
 0x140   : > { %982 = vst.msk [vmem:[%s1839_s12 + $0x70] sm:$0xff] %vm322_vm0, %v950_v6  ;;  %v1027_v7 = vsel %vm322_vm0, %v950_v6, 0.0  ;;  %v1084_v8 = vmul.f32 %v950_v6, %v950_v6  ;;  %v2016_v9 = vld [vmem:[#allocation2 + $0xf0] sm:$0xff] }
 0x141   : > { %v1028_v12 = vadd.f32 %v1027_v7, %v1026_v5  ;;  %v951_v15 = vld [vmem:[#allocation2 + $0x78] sm:$0xff]  ;;  %998 = vst.msk [vmem:[%s1839_s12 + $0xf0] sm:$0xff] %vm322_vm0, %v2016_v9  ;;  %v1095_v5 = vmul.f32 %v1958_v40, %v1958_v40  ;;  %v1053_v40 = vsel %vm322_vm0, %v1982_v19, 0.0 }
 0x142   : > { %v1129_v17 = vsel %vm322_vm0, %v1084_v8, 0.0  ;;  %983 = vst.msk [vmem:[%s1839_s12 + $0x78] sm:$0xff] %vm322_vm0, %v951_v15  ;;  %v1029_v18 = vsel %vm322_vm0, %v951_v15, 0.0  ;;  %v1085_v22 = vmul.f32 %v951_v15, %v951_v15  ;;  %v2027_v23 = vld [vmem:[#allocation2 + $0xf8] sm:$0xff]  ;;  %v1149_v8 = vsel %vm322_vm0, %v1094_v1, 0.0 }
 0x143   : > { %v1130_v14 = vadd.f32 %v1129_v17, %v1128_v11  ;;  %v1030_v24 = vadd.f32 %v1029_v18, %v1028_v12  ;;  %999 = vst.msk [vmem:[%s1839_s12 + $0xf8] sm:$0xff] %vm322_vm0, %v2027_v23  ;;  %v1096_v11 = vmul.f32 %v1971_v10, %v1971_v10  ;;  %v1151_v16 = vsel %vm322_vm0, %v1095_v5, 0.0 }
 0x144   : > { %v1131_v27 = vsel %vm322_vm0, %v1085_v22, 0.0  ;;  %v1097_v17 = vmul.f32 %v1982_v19, %v1982_v19  ;;  %v1055_v10 = vsel %vm322_vm0, %v1995_v56, 0.0  ;;  %v1101_v38 = vmul.f32 %v2027_v23, %v2027_v23 }
 0x145   : > { %v1032_v28 = vadd.f32 %v1031_v21, %v1030_v24  ;;  %v1132_v30 = vadd.f32 %v1131_v27, %v1130_v14  ;;  %v1153_v14 = vsel %vm322_vm0, %v1096_v11, 0.0  ;;  %v1098_v24 = vmul.f32 %v1995_v56, %v1995_v56 }
 0x146   : > { %v1155_v27 = vsel %vm322_vm0, %v1097_v17, 0.0  ;;  %v1163_v43 = vsel %vm322_vm0, %v1101_v38, 0.0 }
 0x147   : > { %v1034_v35 = vadd.f32 %v1033_v33, %v1032_v28  ;;  %v1134_v36 = vadd.f32 %v1133_v31, %v1132_v30  ;;  %v1099_v28 = vmul.f32 %v2005_v63, %v2005_v63  ;;  %v1100_v30 = vmul.f32 %v2016_v9, %v2016_v9 }
 0x148   : > { %v1157_v19 = vsel %vm322_vm0, %v1098_v24, 0.0 }
 0x149   : > { %v1036_v39 = vadd.f32 %v1035_v25, %v1034_v35  ;;  %v1136_v41 = vadd.f32 %v1135_v37, %v1134_v36  ;;  %v1059_v35 = vsel %vm322_vm0, %v2016_v9, 0.0  ;;  %v1159_v37 = vsel %vm322_vm0, %v1099_v28, 0.0 }
 0x14a   : > { %v1161_v25 = vsel %vm322_vm0, %v1100_v30, 0.0 }
 0x14b   : > { %v1038_v44 = vadd.f32 %v1037_v29, %v1036_v39  ;;  %v1138_v45 = vadd.f32 %v1137_v42, %v1136_v41  ;;  %v1061_v42 = vsel %vm322_vm0, %v2027_v23, 0.0 }
 0x14d   : > { %v1140_v48 = vadd.f32 %v1139_v46, %v1138_v45  ;;  %v1040_v51 = vadd.f32 %v1039_v49, %v1038_v44 }
 0x14f   : > { %v1042_v50 = vadd.f32 %v1041_v53, %v1040_v51  ;;  %v1142_v57 = vadd.f32 %v1141_v52, %v1140_v48 }
 0x151   : > { %v1044_v60 = vadd.f32 %v1043_v13, %v1042_v50  ;;  %v1144_v61 = vadd.f32 %v1143_v58, %v1142_v57 }
 0x153   : > { %v1046_v2 = vadd.f32 %v1045_v20, %v1044_v60  ;;  %v1146_v3 = vadd.f32 %v1145_v0, %v1144_v61 }
 0x155   : > { %v1048_v6 = vadd.f32 %v1047_v55, %v1046_v2  ;;  %v1148_v7 = vadd.f32 %v1147_v4, %v1146_v3 }
 0x157   : > { %v1150_v12 = vadd.f32 %v1149_v8, %v1148_v7  ;;  %v1050_v15 = vadd.f32 %v1049_v62, %v1048_v6 }
 0x159   : > { %v1152_v18 = vadd.f32 %v1151_v16, %v1150_v12  ;;  %v1052_v22 = vadd.f32 %v1051_v32, %v1050_v15 }
 0x15b   : > { %v1154_v21 = vadd.f32 %v1153_v14, %v1152_v18  ;;  %v1054_v26 = vadd.f32 %v1053_v40, %v1052_v22 }
 0x15d   : > { %v1156_v31 = vadd.f32 %v1155_v27, %v1154_v21  ;;  %v1056_v33 = vadd.f32 %v1055_v10, %v1054_v26 }
 0x15f   : > { %v1158_v36 = vadd.f32 %v1157_v19, %v1156_v31  ;;  %v1058_v56 = vadd.f32 %v1057_v34, %v1056_v33 }
 0x161   : > { %v1160_v39 = vadd.f32 %v1159_v37, %v1158_v36  ;;  %v1060_v41 = vadd.f32 %v1059_v35, %v1058_v56 }
 0x163   : > { %v1162_v29 = vadd.f32 %v1161_v25, %v1160_v39  ;;  %v1062_v63 = vadd.f32 %v1061_v42, %v1060_v41 }
 0x165   : > { %v1063_v9 = vrot.slane %v1062_v63, 4  ;;  %v1164_v44 = vadd.f32 %v1163_v43, %v1162_v29 }
 0x167   : > { %v1064_v45 = vadd.f32 %v1063_v9, %v1062_v63  ;;  %v1165_v46 = vrot.slane %v1164_v44, 4 }
 0x169   : > { %v1065_v49 = vrot.slane %v1064_v45, 2  ;;  %v1166_v47 = vadd.f32 %v1165_v46, %v1164_v44 }
 0x16b   : > { %v1066_v48 = vadd.f32 %v1065_v49, %v1064_v45  ;;  %v1167_v51 = vrot.slane %v1166_v47, 2 }
 0x16d   : > { %v1067_v52 = vrot.slane %v1066_v48, 1  ;;  %v1168_v53 = vadd.f32 %v1167_v51, %v1166_v47 }
 0x16f   : > { %v1068_v23 = vadd.f32 %v1067_v52, %v1066_v48  ;;  %v1169_v54 = vrot.slane %v1168_v53, 1 }
 0x171   : > { %1069 = vst.msk [vmem:[%s309_s14] sm:$0xff] %vm322_vm0, %v1068_v23  ;;  %v1170_v50 = vadd.f32 %v1169_v54, %v1168_v53 }
 0x173   : > { %1171 = vst.msk [vmem:[%s316_s22] sm:$0xff] %vm322_vm0, %v1170_v50 }
 0x174 PF: > { %s15_s17 = sadd.s32 1, %s1659_s17   ;;  %s2135_s15 = smov %s1655_s16 }
 0x175   : > { %p12_p6 = scmp.ge.s32.totalorder %s15_s17, 4   ;;  %s2136_s16 = smov %s2138_s18 }
 0x177   :  { %14 = sbr.rel (!%p12_p6) target bundleno = 2 (0x2), region = 93 }

// kernel: resnet18_forward.45
= control target key start
LH: loop header
LB: loop body
LE: loop exit
PB: predicated region body
PF: predicated region fallthrough
CT: control target
= control target key end

     0   :  { %s901_s21 = smov 0   ;;  %s903_s22 = smov 0   ;;  %s978_s0 = inlined_call_operand.vmem [shape: f32[2,18,9,64], index: 0, kind: input, shape index: {}, may-alias: {0,1,2}]   ;;  %s979_s1 = inlined_call_operand.vmem [shape: f32[2,18,9,64], index: 1, kind: input, shape index: {}, may-alias: {0,1,2}]   ;;  %s980_s2 = inlined_call_operand.vmem [shape: f32[2,18,9,64], index: 2, kind: input, shape index: {}, may-alias: {0,1,2}]   ;;  %s981_s3 = inlined_call_operand.vmem [shape: f32[2,18,9,64], index: 3, kind: input, shape index: {}, may-alias: {3,4,5}]   ;;  %s982_s4 = inlined_call_operand.vmem [shape: f32[2,18,9,64], index: 4, kind: input, shape index: {}, may-alias: {3,4,5}]   ;;  %s983_s5 = inlined_call_operand.vmem [shape: f32[2,18,9,64], index: 5, kind: input, shape index: {}, may-alias: {3,4,5}]   ;;  %s984_s6 = inlined_call_operand.vmem [shape: f32[2,8,8,64], index: 6, kind: output, shape index: {}]  }
   0x1   :  { %985 = sst [smem:[#allocation2_spill]] %s978_s0  ;;  %s905_s23 = smov 0  }
   0x2   :  { %s907_s24 = smov 0   ;;  %s909_s25 = smov 0  }
   0x3 LB: > { %s25_s26 = sadd.s32 1, %s856_s23  ;;  %s28_s27 = sadd.s32 1, %s860_s24  ;;  %s864_s25 = sphi %s909_s25, %s16_s25   ;;  %s860_s24 = sphi %s907_s24, %s990_s24   ;;  %s856_s23 = sphi %s905_s23, %s989_s23   ;;  %s852_s22 = sphi %s903_s22, %s988_s22   ;;  %s848_s21 = sphi %s901_s21, %s987_s21  }
   0x4   : > { %p26_p0 = scmp.ge.s32.totalorder %s25_s26, 8  ;;  %p762_p1 = scmp.ge.s32.totalorder %s864_s25, 1 }
   0x5   : > { %p352_p2 = scmp.lt.s32.totalorder %s864_s25, 17 }
   0x6   : > { %s992_s26 = smov (%p26_p0, %s25_s26), 0  ;;  %s994_s27 = smov (!%p26_p0, %s28_s27), %s860_s24 }
   0x7   : > { %p353_p3 = pnand %p762_p1, %p352_p2  ;;  %p30_p4 = scmp.ge.s32.totalorder %s994_s27, 2 }
   0x8   : > { %s763_s28 = sshll.u32 (!%p353_p3), %s848_s21, 1  ;;  %p445_p5 = scmp.lt.s32.totalorder (!%p353_p3), %s852_s22, 1  ;;  %vm544_vm0 = vcmask (!%p353_p3), 1046528   ;;  %vm550_vm1 = vcmask (!%p353_p3), 523264  }
   0x9   : > { %s996_s27 = smov (%p30_p4, %s994_s27), 0  ;;  %356 = sbr.rel (%p353_p3) target bundleno = 37 (0x25), region = 44 }
   0xa   : > { %p447_p6 = scmp.lt.s32.totalorder (!%p353_p3), %s763_s28, 17  ;;  %s456_s29 = sadd.s32 (!%p353_p3), 1, %s763_s28 }
   0xb   : > { %p459_p7 = scmp.lt.s32.totalorder (!%p353_p3), %s456_s29, 17  ;;  %s469_s9 = sadd.s32 (!%p353_p3), 2, %s763_s28 }
   0xc   : > { %p472_p8 = scmp.lt.s32.totalorder (!%p353_p3), %s469_s9, 17  ;;  %s986_s0 = sld [smem:[#allocation2_spill]] (!%p353_p3) }
   0xd   : > { %p520_p9 = scmp.lt.s32.totalorder (!%p353_p3), %s848_s21, 7 }
  0x10   : > { %s998_s22 = smov (!%p445_p5, %s852_s22), 1  ;;  %s1000_s29 = smov (!%p459_p7, %s456_s29), 17 }
  0x11   : > { %s448_s30 = scalar_select %p447_p6, %s763_s28, 17 }
  0x12   : > { %s785_s7 = smul.u32 36, %s998_s22  ;;  %s1002_s9 = smov (!%p472_p8, %s469_s9), 17 }
  0x13   : > { %s764_s8 = sshll.u32 %s448_s30, 1  ;;  %s767_s15 = sshll.u32 %s1000_s29, 1 }
  0x14   : > { %s451_s10 = sadd.s32 %s785_s7, %s764_s8  ;;  %s463_s19 = sadd.s32 %s785_s7, %s767_s15 }
  0x15   : > { %s765_s11 = sshll.u32 %s451_s10, 3  ;;  %s770_s20 = sshll.u32 %s1002_s9, 1 }
  0x16   : > { %s453_s14 = scalar_lea.vmem %s986_s0, %s765_s11  ;;  %s490_s18 = scalar_lea.vmem %s981_s3, %s765_s11 }
  0x17   : > { %s768_s30 = sshll.u32 %s463_s19, 3  ;;  %s476_s28 = sadd.s32 %s785_s7, %s770_s20  ;;  %v526_v0 = vld [vmem:[%s453_s14] sm:$0xff]  ;;  %v527_v1 = vld [vmem:[%s453_s14 + $0x8] sm:$0x1] }
  0x18   : > { %s465_s12 = scalar_lea.vmem %s979_s1, %s768_s30  ;;  %s771_s13 = sshll.u32 %s476_s28, 3  ;;  %v536_v2 = vld [vmem:[%s490_s18] sm:$0xff] }
  0x19   : > { %s478_s16 = scalar_lea.vmem %s980_s2, %s771_s13  ;;  %s502_s9 = scalar_lea.vmem %s982_s4, %s768_s30  ;;  %v528_v3 = vld [vmem:[%s465_s12] sm:$0xff]  ;;  %v529_v4 = vld [vmem:[%s465_s12 + $0x8] sm:$0x1] }
  0x1a   : > { %s515_s14 = scalar_lea.vmem %s983_s5, %s771_s13  ;;  %s781_s19 = sshll.u32 %s998_s22, 3  ;;  %v530_v5 = vmax.f32 %v526_v0, %v528_v3  ;;  %v531_v6 = vmax.f32 %v527_v1, %v529_v4  ;;  %v532_v7 = vld [vmem:[%s478_s16] sm:$0xff]  ;;  %v533_v8 = vld [vmem:[%s478_s16 + $0x8] sm:$0x1] }
  0x1b   : > { %v537_v9 = vld [vmem:[%s502_s9] sm:$0xff]  ;;  %s1004_s21 = smov (!%p520_p9, %s848_s21), 7 }
  0x1c   : > { %v538_v10 = vmax.f32 %v536_v2, %v537_v9  ;;  %v539_v11 = vld [vmem:[%s515_s14] sm:$0xff]  ;;  %v534_v12 = vmax.f32 %v530_v5, %v532_v7  ;;  %v535_v13 = vmax.f32 %v531_v6, %v533_v8  ;;  %s523_s0 = sadd.s32 %s781_s19, %s1004_s21 }
  0x1d   : > { %s782_s18 = sshll.u32 %s523_s0, 3 }
  0x1e   : > { %v540_v14 = vmax.f32 %v538_v10, %v539_v11  ;;  %v545_v15 = vrot.slane %v534_v12, 1  ;;  %v546_v16 = vrot.slane %v535_v13, 1  ;;  %s525_s30 = scalar_lea.vmem %s984_s6, %s782_s18 }
  0x20   : > { %v541_v17 = vmax.f32 %v534_v12, %v540_v14  ;;  %v547_v18 = vsel %vm544_vm0, %v545_v15, %v546_v16 }
  0x22   : > { %v549_v19 = vmax.f32 %v541_v17, %v547_v18 }
  0x24   : > { %551 = vst.msk [vmem:[%s525_s30] sm:$0xff] %vm550_vm1, %v549_v19 }
  0x25 PF: > { %s16_s25 = sadd.s32 1, %s864_s25   ;;  %s987_s21 = smov %s856_s23 }
  0x26   : > { %p13_p10 = scmp.ge.s32.totalorder %s16_s25, 18   ;;  %s988_s22 = smov %s860_s24 }
  0x27   : > { %s989_s23 = smov %s992_s26  ;;  %s990_s24 = smov %s996_s27 }
  0x28   :  { %15 = sbr.rel (!%p13_p10) target bundleno = 3 (0x3), region = 89 }

// kernel: resnet18_forward.47
= control target key start
LH: loop header
LB: loop body
LE: loop exit
PB: predicated region body
PF: predicated region fallthrough
CT: control target
= control target key end

     0   :  { %vm92_vm0 = vcmask 523264   ;;  %s271_s0 = inlined_call_operand.vmem [shape: f32[128,64], index: 0, kind: input, shape index: {}]   ;;  %s272_s1 = inlined_call_operand.vmem [shape: f32[1,64], index: 1, kind: input, shape index: {}]   ;;  %s273_s2 = inlined_call_operand.vmem [shape: f32[1,64], index: 2, kind: input, shape index: {}]   ;;  %s274_s3 = inlined_call_operand.vmem [shape: f32[128,64], index: 3, kind: output, shape index: {}]  }
   0x1   :  { %v14_v0 = vld [vmem:[%s271_s0] sm:$0xff]  ;;  %v15_v4 = vld [vmem:[%s271_s0 + $0x8] sm:$0xff]  ;;  %v16_v5 = vld [vmem:[%s271_s0 + $0x10] sm:$0xff] }
   0x2   :  { %v113_v1 = vld [vmem:[%s272_s1] ss:$0 sm:$0xff]  ;;  %v17_v6 = vld [vmem:[%s271_s0 + $0x18] sm:$0xff]  ;;  %v19_v11 = vld [vmem:[%s271_s0 + $0x28] sm:$0xff] }
   0x3   :  { %v144_v2 = vld [vmem:[%s273_s2] ss:$0 sm:$0xff]  ;;  %v37_v3 = vmul.f32 %v113_v1, %v14_v0  ;;  %v38_v7 = vmul.f32 %v113_v1, %v15_v4  ;;  %v39_v8 = vmul.f32 %v113_v1, %v16_v5  ;;  %v40_v9 = vmul.f32 %v113_v1, %v17_v6  ;;  %v20_v12 = vld [vmem:[%s271_s0 + $0x30] sm:$0xff]  ;;  %v21_v17 = vld [vmem:[%s271_s0 + $0x38] sm:$0xff] }
   0x4   :  { %v18_v10 = vld [vmem:[%s271_s0 + $0x20] sm:$0xff]  ;;  %v42_v15 = vmul.f32 %v113_v1, %v19_v11  ;;  %v43_v16 = vmul.f32 %v113_v1, %v20_v12  ;;  %v44_v21 = vmul.f32 %v113_v1, %v21_v17  ;;  %v23_v27 = vld [vmem:[%s271_s0 + $0x48] sm:$0xff]  ;;  %v24_v28 = vld [vmem:[%s271_s0 + $0x50] sm:$0xff] }
   0x5   :  { %v60_v13 = vadd.f32 %v144_v2, %v37_v3  ;;  %v41_v14 = vmul.f32 %v113_v1, %v18_v10  ;;  %v61_v18 = vadd.f32 %v144_v2, %v38_v7  ;;  %v62_v19 = vadd.f32 %v144_v2, %v39_v8  ;;  %v22_v22 = vld [vmem:[%s271_s0 + $0x40] sm:$0xff]  ;;  %v25_v29 = vld [vmem:[%s271_s0 + $0x58] sm:$0xff]  ;;  %v27_v35 = vld [vmem:[%s271_s0 + $0x68] sm:$0xff] }
   0x6   :  { %v63_v20 = vadd.f32 %v144_v2, %v40_v9  ;;  %v65_v25 = vadd.f32 %v144_v2, %v42_v15  ;;  %v66_v26 = vadd.f32 %v144_v2, %v43_v16  ;;  %v67_v33 = vadd.f32 %v144_v2, %v44_v21  ;;  %v26_v34 = vld [vmem:[%s271_s0 + $0x60] sm:$0xff]  ;;  %v28_v36 = vld [vmem:[%s271_s0 + $0x70] sm:$0xff]  ;;  %v29_v41 = vld [vmem:[%s271_s0 + $0x78] sm:$0xff] }
   0x7   :  { %v76_v23 = vmax.f32 %v60_v13, 0.0  ;;  %v64_v24 = vadd.f32 %v144_v2, %v41_v14  ;;  %v77_v30 = vmax.f32 %v61_v18, 0.0  ;;  %v78_v31 = vmax.f32 %v62_v19, 0.0 }
   0x8   :  { %v79_v32 = vmax.f32 %v63_v20, 0.0  ;;  %v81_v38 = vmax.f32 %v65_v25, 0.0  ;;  %v82_v39 = vmax.f32 %v66_v26, 0.0  ;;  %v45_v40 = vmul.f32 %v113_v1, %v22_v22 }
   0x9   :  { %93 = vst.msk [vmem:[%s274_s3] sm:$0xff] %vm92_vm0, %v76_v23  ;;  %v80_v37 = vmax.f32 %v64_v24, 0.0  ;;  %94 = vst.msk [vmem:[%s274_s3 + $0x8] sm:$0xff] %vm92_vm0, %v77_v30  ;;  %v83_v42 = vmax.f32 %v67_v33, 0.0  ;;  %v46_v43 = vmul.f32 %v113_v1, %v23_v27  ;;  %v47_v44 = vmul.f32 %v113_v1, %v24_v28 }
   0xa   :  { %95 = vst.msk [vmem:[%s274_s3 + $0x10] sm:$0xff] %vm92_vm0, %v78_v31  ;;  %96 = vst.msk [vmem:[%s274_s3 + $0x18] sm:$0xff] %vm92_vm0, %v79_v32  ;;  %v48_v45 = vmul.f32 %v113_v1, %v25_v29  ;;  %v68_v46 = vadd.f32 %v144_v2, %v45_v40  ;;  %v49_v47 = vmul.f32 %v113_v1, %v26_v34 }
   0xb   :  { %97 = vst.msk [vmem:[%s274_s3 + $0x20] sm:$0xff] %vm92_vm0, %v80_v37  ;;  %98 = vst.msk [vmem:[%s274_s3 + $0x28] sm:$0xff] %vm92_vm0, %v81_v38  ;;  %v50_v48 = vmul.f32 %v113_v1, %v27_v35  ;;  %v51_v49 = vmul.f32 %v113_v1, %v28_v36  ;;  %v69_v50 = vadd.f32 %v144_v2, %v46_v43 }
   0xc   :  { %99 = vst.msk [vmem:[%s274_s3 + $0x30] sm:$0xff] %vm92_vm0, %v82_v39  ;;  %100 = vst.msk [vmem:[%s274_s3 + $0x38] sm:$0xff] %vm92_vm0, %v83_v42  ;;  %v70_v51 = vadd.f32 %v144_v2, %v47_v44  ;;  %v71_v52 = vadd.f32 %v144_v2, %v48_v45  ;;  %v52_v53 = vmul.f32 %v113_v1, %v29_v41  ;;  %v84_v54 = vmax.f32 %v68_v46, 0.0 }
   0xd   :  { %v72_v55 = vadd.f32 %v144_v2, %v49_v47  ;;  %v73_v56 = vadd.f32 %v144_v2, %v50_v48  ;;  %v74_v57 = vadd.f32 %v144_v2, %v51_v49  ;;  %v85_v58 = vmax.f32 %v69_v50, 0.0 }
   0xe   :  { %v86_v59 = vmax.f32 %v70_v51, 0.0  ;;  %v87_v60 = vmax.f32 %v71_v52, 0.0  ;;  %v75_v61 = vadd.f32 %v144_v2, %v52_v53  ;;  %101 = vst.msk [vmem:[%s274_s3 + $0x40] sm:$0xff] %vm92_vm0, %v84_v54 }
   0xf   :  { %v88_v62 = vmax.f32 %v72_v55, 0.0  ;;  %v89_v63 = vmax.f32 %v73_v56, 0.0  ;;  %v90_v0 = vmax.f32 %v74_v57, 0.0  ;;  %102 = vst.msk [vmem:[%s274_s3 + $0x48] sm:$0xff] %vm92_vm0, %v85_v58 }
  0x10   :  { %103 = vst.msk [vmem:[%s274_s3 + $0x50] sm:$0xff] %vm92_vm0, %v86_v59  ;;  %104 = vst.msk [vmem:[%s274_s3 + $0x58] sm:$0xff] %vm92_vm0, %v87_v60  ;;  %v91_v1 = vmax.f32 %v75_v61, 0.0 }
  0x11   :  { %105 = vst.msk [vmem:[%s274_s3 + $0x60] sm:$0xff] %vm92_vm0, %v88_v62  ;;  %106 = vst.msk [vmem:[%s274_s3 + $0x68] sm:$0xff] %vm92_vm0, %v89_v63 }
  0x12   :  { %107 = vst.msk [vmem:[%s274_s3 + $0x70] sm:$0xff] %vm92_vm0, %v90_v0  ;;  %108 = vst.msk [vmem:[%s274_s3 + $0x78] sm:$0xff] %vm92_vm0, %v91_v1 }

// kernel: resnet18_forward.46
= control target key start
LH: loop header
LB: loop body
LE: loop exit
PB: predicated region body
PF: predicated region fallthrough
CT: control target
= control target key end

     0   :  { %vm19_vm0 = vcmask 523264   ;;  %s1888_s1 = inlined_call_operand.vmem [shape: bf16[576,64], index: 1, kind: input, shape index: {}]   ;;  %s1889_s0 = inlined_call_operand.vmem [shape: bf16[128,576], index: 0, kind: input, shape index: {}]   ;;  %s1890_s2 = inlined_call_operand.vmem [shape: f32[128,64], index: 2, kind: output, shape index: {0}]   ;;  %s1891_s3 = inlined_call_operand.vmem [shape: f32[8,64], index: 3, kind: output, shape index: {1}]   ;;  %s1892_s4 = inlined_call_operand.vmem [shape: f32[8,64], index: 4, kind: output, shape index: {2}]  }
   0x1   :  { %v1332_v0 = vld [vmem:[%s1888_s1 + $0x40] sm:$0xff]   ;;  %v1336_v4 = vld [vmem:[%s1888_s1 + $0x48] sm:$0xff]   ;;  %v1340_v8 = vld [vmem:[%s1888_s1 + $0x50] sm:$0xff]  }
   0x2   :  { %v1333_v1 = vld [vmem:[%s1888_s1 + $0xc0] sm:$0xff]   ;;  %1159 = vmatprep.subr.bf16.mxu0 %v1332_v0  ;;  %v1337_v5 = vld [vmem:[%s1888_s1 + $0xc8] sm:$0xff]   ;;  %v1341_v9 = vld [vmem:[%s1888_s1 + $0xd0] sm:$0xff]  }
   0x3   :  { %v1334_v2 = vld [vmem:[%s1888_s1] sm:$0xff]   ;;  %1223 = vmatprep.subr.bf16.mxu1 %v1333_v1  ;;  %v1338_v6 = vld [vmem:[%s1888_s1 + $0x8] sm:$0xff]   ;;  %v1342_v10 = vld [vmem:[%s1888_s1 + $0x10] sm:$0xff]  }
   0x4   :  { %v1335_v3 = vld [vmem:[%s1888_s1 + $0x80] sm:$0xff]   ;;  %1160 = vmatpush3.bf16.msra.mxu0 %v1334_v2  ;;  %v1339_v7 = vld [vmem:[%s1888_s1 + $0x88] sm:$0xff]   ;;  %v1343_v11 = vld [vmem:[%s1888_s1 + $0x90] sm:$0xff]  }
   0x5   :  { %1224 = vmatpush3.bf16.msra.mxu1 %v1335_v3  ;;  %1161 = vmatprep.subr.bf16.mxu0 %v1336_v4  ;;  %v1344_v12 = vld [vmem:[%s1888_s1 + $0x58] sm:$0xff]   ;;  %v1348_v16 = vld [vmem:[%s1888_s1 + $0x60] sm:$0xff]   ;;  %v1352_v20 = vld [vmem:[%s1888_s1 + $0x68] sm:$0xff]  }
   0x6   :  { %1225 = vmatprep.subr.bf16.mxu1 %v1337_v5  ;;  %v1345_v13 = vld [vmem:[%s1888_s1 + $0xd8] sm:$0xff]   ;;  %v1349_v17 = vld [vmem:[%s1888_s1 + $0xe0] sm:$0xff]   ;;  %v1353_v21 = vld [vmem:[%s1888_s1 + $0xe8] sm:$0xff]  }
   0x7   :  { %v1346_v14 = vld [vmem:[%s1888_s1 + $0x18] sm:$0xff]   ;;  %v1350_v18 = vld [vmem:[%s1888_s1 + $0x20] sm:$0xff]   ;;  %v1354_v22 = vld [vmem:[%s1888_s1 + $0x28] sm:$0xff]  }
   0x8   :  { %1162 = vmatpush3.bf16.msra.mxu0 %v1338_v6  ;;  %v1347_v15 = vld [vmem:[%s1888_s1 + $0x98] sm:$0xff]   ;;  %v1351_v19 = vld [vmem:[%s1888_s1 + $0xa0] sm:$0xff]   ;;  %v1355_v23 = vld [vmem:[%s1888_s1 + $0xa8] sm:$0xff]  }
   0x9   :  { %1226 = vmatpush3.bf16.msra.mxu1 %v1339_v7  ;;  %1163 = vmatprep.subr.bf16.mxu0 %v1340_v8  ;;  %v1356_v24 = vld [vmem:[%s1888_s1 + $0x70] sm:$0xff]   ;;  %v1360_v28 = vld [vmem:[%s1888_s1 + $0x78] sm:$0xff]   ;;  %v1369_v35 = vld [vmem:[%s1889_s0 + $0xc] ss:$20 sps:$4 sm:$0xff]  }
   0xa   :  { %1227 = vmatprep.subr.bf16.mxu1 %v1341_v9  ;;  %v1357_v25 = vld [vmem:[%s1888_s1 + $0xf0] sm:$0xff]   ;;  %v1361_v29 = vld [vmem:[%s1888_s1 + $0xf8] sm:$0xff]   ;;  %v1370_v36 = vld [vmem:[%s1888_s1 + $0x100] sm:$0xff]   ;;  %742 = vmatprep.mubr.bf16.mxu1 %v1369_v35 }
   0xb   :  { %v1358_v26 = vld [vmem:[%s1888_s1 + $0x30] sm:$0xff]   ;;  %v1362_v30 = vld [vmem:[%s1888_s1 + $0x38] sm:$0xff]   ;;  %v1371_v37 = vld [vmem:[%s1889_s0 + $0x2c] ss:$20 sps:$4 sm:$0xff]  }
   0xc   :  { %1164 = vmatpush3.bf16.msra.mxu0 %v1342_v10  ;;  %v1359_v27 = vld [vmem:[%s1888_s1 + $0xb0] sm:$0xff]   ;;  %v1363_v31 = vld [vmem:[%s1888_s1 + $0xb8] sm:$0xff]   ;;  %v1383_v42 = vld [vmem:[%s1888_s1 + $0x108] sm:$0xff]  }
   0xd   :  { %1228 = vmatpush3.bf16.msra.mxu1 %v1343_v11  ;;  %1165 = vmatprep.subr.bf16.mxu0 %v1344_v12  ;;  %v1364_v32 = vld [vmem:[%s1889_s0] ss:$20 sps:$4 sm:$0xff]   ;;  %v1366_v33 = vld [vmem:[%s1889_s0 + $0x4] ss:$20 sps:$4 sm:$0xff]   ;;  %v1367_v34 = vld [vmem:[%s1889_s0 + $0x8] ss:$20 sps:$4 sm:$0xff]  }
   0xe   :  { %1229 = vmatprep.subr.bf16.mxu1 %v1345_v13  ;;  %645 = vmatprep.mubr.bf16.mxu0 %v1366_v33  ;;  %v1373_v38 = vld [vmem:[%s1889_s0 + $0x34] ss:$20 sps:$4 sm:$0xff]   ;;  %v1376_v40 = vld [vmem:[%s1889_s0 + $0x30] ss:$20 sps:$4 sm:$0xff]   ;;  %v1382_v45 = vld [vmem:[%s1889_s0 + $0x58] ss:$20 sps:$4 sm:$0xff]  }
   0xf   :  { %v1375_v39 = vld [vmem:[%s1889_s0 + $0x28] ss:$20 sps:$4 sm:$0xff]   ;;  %v1381_v44 = vld [vmem:[%s1889_s0 + $0x50] ss:$20 sps:$4 sm:$0xff]   ;;  %v1388_v50 = vld [vmem:[%s1889_s0 + $0x78] ss:$20 sps:$4 sm:$0xff]  }
  0x10   :  { %1166 = vmatpush3.bf16.msra.mxu0 %v1346_v14  ;;  %v1377_v41 = vld [vmem:[%s1889_s0 + $0x54] ss:$20 sps:$4 sm:$0xff]   ;;  %v1379_v43 = vld [vmem:[%s1889_s0 + $0x5c] ss:$20 sps:$4 sm:$0xff]   ;;  %v1386_v48 = vld [vmem:[%s1889_s0 + $0x84] ss:$20 sps:$4 sm:$0xff]  }
  0x11   :  { %1230 = vmatpush3.bf16.msra.mxu1 %v1347_v15  ;;  %1167 = vmatprep.subr.bf16.mxu0 %v1348_v16  ;;  %v1396_v46 = vld [vmem:[%s1888_s1 + $0x110] sm:$0xff]   ;;  %v1409_v49 = vld [vmem:[%s1888_s1 + $0x118] sm:$0xff]   ;;  %v1392_v53 = vld [vmem:[%s1889_s0 + $0xac] ss:$20 sps:$4 sm:$0xff]   ;;  %v1424_v12 = vmov 0.0  }
  0x12   :  { %1231 = vmatprep.subr.bf16.mxu1 %v1349_v17  ;;  %v1384_v47 = vld [vmem:[%s1889_s0 + $0x7c] ss:$20 sps:$4 sm:$0xff]   ;;  %v1389_v51 = vld [vmem:[%s1889_s0 + $0x80] ss:$20 sps:$4 sm:$0xff]   ;;  %v1390_v52 = vld [vmem:[%s1889_s0 + $0xa4] ss:$20 sps:$4 sm:$0xff]  }
  0x13   :  { %v1394_v54 = vld [vmem:[%s1889_s0 + $0xa0] ss:$20 sps:$4 sm:$0xff]   ;;  %v1395_v55 = vld [vmem:[%s1889_s0 + $0xa8] ss:$20 sps:$4 sm:$0xff]   ;;  %v1402_v59 = vld [vmem:[%s1889_s0 + $0xd0] ss:$20 sps:$4 sm:$0xff]  }
  0x14   :  { %1168 = vmatpush3.bf16.msra.mxu0 %v1350_v18  ;;  %v1397_v56 = vld [vmem:[%s1889_s0 + $0xcc] ss:$20 sps:$4 sm:$0xff]   ;;  %v1399_v57 = vld [vmem:[%s1889_s0 + $0xd4] ss:$20 sps:$4 sm:$0xff]   ;;  %v1405_v61 = vld [vmem:[%s1889_s0 + $0xfc] ss:$20 sps:$4 sm:$0xff]  }
  0x15   :  { %1232 = vmatpush3.bf16.msra.mxu1 %v1351_v19  ;;  %1169 = vmatprep.subr.bf16.mxu0 %v1352_v20  ;;  %v1401_v58 = vld [vmem:[%s1889_s0 + $0xc8] ss:$20 sps:$4 sm:$0xff]   ;;  %v1407_v62 = vld [vmem:[%s1889_s0 + $0xf0] ss:$20 sps:$4 sm:$0xff]   ;;  %v1408_v63 = vld [vmem:[%s1889_s0 + $0xf8] ss:$20 sps:$4 sm:$0xff]  }
  0x16   :  { %1233 = vmatprep.subr.bf16.mxu1 %v1353_v21  ;;  %v1403_v60 = vld [vmem:[%s1889_s0 + $0xf4] ss:$20 sps:$4 sm:$0xff]   ;;  %v1410_v0 = vld [vmem:[%s1889_s0 + $0x11c] ss:$20 sps:$4 sm:$0xff]   ;;  %v1412_v1 = vld [vmem:[%s1889_s0 + $0x124] ss:$20 sps:$4 sm:$0xff]  }
  0x17   :  { %v1414_v2 = vld [vmem:[%s1889_s0 + $0x118] ss:$20 sps:$4 sm:$0xff]   ;;  %v1415_v3 = vld [vmem:[%s1889_s0 + $0x120] ss:$20 sps:$4 sm:$0xff]   ;;  %v1416_v4 = vld [vmem:[%s1889_s0 + $0x10] ss:$20 sps:$4 sm:$0xff]  }
  0x18   :  { %1170 = vmatpush3.bf16.msra.mxu0 %v1354_v22  ;;  %v1417_v5 = vld [vmem:[%s1889_s0 + $0xb0] ss:$20 sps:$4 sm:$0xff]   ;;  %v1418_v6 = vld [vmem:[%s1889_s0 + $0x38] ss:$20 sps:$4 sm:$0xff]   ;;  %v1420_v8 = vld [vmem:[%s1889_s0 + $0x60] ss:$20 sps:$4 sm:$0xff]  }
  0x19   :  { %1234 = vmatpush3.bf16.msra.mxu1 %v1355_v23  ;;  %1171 = vmatprep.subr.bf16.mxu0 %v1356_v24  ;;  %v1419_v7 = vld [vmem:[%s1889_s0 + $0xd8] ss:$20 sps:$4 sm:$0xff]   ;;  %v1421_v9 = vld [vmem:[%s1889_s0 + $0x100] ss:$20 sps:$4 sm:$0xff]   ;;  %v1422_v10 = vld [vmem:[%s1889_s0 + $0x88] ss:$20 sps:$4 sm:$0xff]  }
  0x1a   :  { %1235 = vmatprep.subr.bf16.mxu1 %v1357_v25  ;;  %v1423_v11 = vld [vmem:[%s1889_s0 + $0x128] ss:$20 sps:$4 sm:$0xff]   ;;  %22 = vst.msk [vmem:[#allocation2 + $0x10] sm:$0xff] %vm19_vm0, %v1424_v12  ;;  %20 = vst.msk [vmem:[#allocation2] sm:$0xff] %vm19_vm0, %v1424_v12 }
  0x1b   :  { %21 = vst.msk [vmem:[#allocation2 + $0x8] sm:$0xff] %vm19_vm0, %v1424_v12  ;;  %23 = vst.msk [vmem:[#allocation2 + $0x18] sm:$0xff] %vm19_vm0, %v1424_v12 }
  0x1c   :  { %1172 = vmatpush3.bf16.msra.mxu0 %v1358_v26  ;;  %24 = vst.msk [vmem:[#allocation2 + $0x20] sm:$0xff] %vm19_vm0, %v1424_v12  ;;  %25 = vst.msk [vmem:[#allocation2 + $0x28] sm:$0xff] %vm19_vm0, %v1424_v12 }
  0x1d   :  { %1236 = vmatpush3.bf16.msra.mxu1 %v1359_v27  ;;  %1173 = vmatprep.subr.bf16.mxu0 %v1360_v28  ;;  %26 = vst.msk [vmem:[#allocation2 + $0x30] sm:$0xff] %vm19_vm0, %v1424_v12  ;;  %27 = vst.msk [vmem:[#allocation2 + $0x38] sm:$0xff] %vm19_vm0, %v1424_v12 }
  0x1e   :  { %1237 = vmatprep.subr.bf16.mxu1 %v1361_v29  ;;  %28 = vst.msk [vmem:[#allocation2 + $0x40] sm:$0xff] %vm19_vm0, %v1424_v12  ;;  %29 = vst.msk [vmem:[#allocation2 + $0x48] sm:$0xff] %vm19_vm0, %v1424_v12 }
  0x1f   :  { %30 = vst.msk [vmem:[#allocation2 + $0x50] sm:$0xff] %vm19_vm0, %v1424_v12  ;;  %31 = vst.msk [vmem:[#allocation2 + $0x58] sm:$0xff] %vm19_vm0, %v1424_v12 }
  0x20   :  { %1174 = vmatpush3.bf16.msra.mxu0 %v1362_v30  ;;  %32 = vst.msk [vmem:[#allocation2 + $0x60] sm:$0xff] %vm19_vm0, %v1424_v12  ;;  %33 = vst.msk [vmem:[#allocation2 + $0x68] sm:$0xff] %vm19_vm0, %v1424_v12 }
  0x21   :  { %1238 = vmatpush3.bf16.msra.mxu1 %v1363_v31  ;;  %1299 = vmatprep.subr.bf16.mxu0 %v1370_v36  ;;  %34 = vst.msk [vmem:[#allocation2 + $0x70] sm:$0xff] %vm19_vm0, %v1424_v12  ;;  %35 = vst.msk [vmem:[#allocation2 + $0x78] sm:$0xff] %vm19_vm0, %v1424_v12 }
  0x22   :  { %1323 = vmatprep.subr.bf16.mxu1 %v1370_v36 }
  0x23   :  { %646 = vmatmul.mubr.bf16.vlgmr.msra.gmra.mrb[0].mxu0 %v1364_v32 }
  0x24   :  { %743 = vmatmul.mubr.bf16.vlgmr.msra.gmra.mrb[0].mxu1 %v1367_v34  ;;  %1300 = vmatpush3.bf16.msra.mxu0 %v1370_v36 }
  0x25   :  { %653 = vmatprep.mubr.bf16.mxu0 %v1371_v37  ;;  %750 = vmatprep.mubr.bf16.mxu1 %v1373_v38 }
  0x26   :  { %1327 = vmatpush3.bf16.msra.mxu1 %v1370_v36  ;;  %1301 = vmatprep.subr.bf16.mxu0 %v1383_v42 }
  0x27   :  { %1324 = vmatprep.subr.bf16.mxu1 %v1383_v42 }
  0x28   :  { %1302 = vmatpush3.bf16.msra.mxu0 %v1383_v42 }
  0x29   :  { %1303 = vmatprep.subr.bf16.mxu0 %v1396_v46 }
  0x2a   :  { %1328 = vmatpush3.bf16.msra.mxu1 %v1383_v42 }
  0x2b   :  { %654 = vmatmul.mubr.bf16.gmra.mrb[4].mxu0 %v1375_v39  ;;  %1325 = vmatprep.subr.bf16.mxu1 %v1396_v46 }
  0x2c   :  { %751 = vmatmul.mubr.bf16.gmra.mrb[4].mxu1 %v1376_v40  ;;  %661 = vmatprep.mubr.bf16.mxu0 %v1377_v41 }
  0x2d   :  { %758 = vmatprep.mubr.bf16.mxu1 %v1379_v43  ;;  %1304 = vmatpush3.bf16.msra.mxu0 %v1396_v46 }
  0x2e   :  { %1329 = vmatpush3.bf16.msra.mxu1 %v1396_v46  ;;  %1305 = vmatprep.subr.bf16.mxu0 %v1409_v49 }
  0x2f   :  { %1326 = vmatprep.subr.bf16.mxu1 %v1409_v49 }
  0x31   :  { %1306 = vmatpush3.bf16.msra.mxu0 %v1409_v49 }
  0x32   :  { %1330 = vmatpush3.bf16.msra.mxu1 %v1409_v49 }
  0x33   :  { %662 = vmatmul.mubr.bf16.gmra.mrb[8].mxu0 %v1381_v44 }
  0x34   :  { %759 = vmatmul.mubr.bf16.gmra.mrb[8].mxu1 %v1382_v45  ;;  %669 = vmatprep.mubr.bf16.mxu0 %v1384_v47 }
  0x35   :  { %766 = vmatprep.mubr.bf16.mxu1 %v1386_v48 }
  0x3b   :  { %670 = vmatmul.mubr.bf16.gmra.mrb[12].mxu0 %v1388_v50 }
  0x3c   :  { %767 = vmatmul.mubr.bf16.gmra.mrb[12].mxu1 %v1389_v51  ;;  %677 = vmatprep.mubr.bf16.mxu0 %v1390_v52 }
  0x3d   :  { %774 = vmatprep.mubr.bf16.mxu1 %v1392_v53 }
  0x43   :  { %678 = vmatmul.mubr.bf16.gmra.mrb[16].mxu0 %v1394_v54 }
  0x44   :  { %775 = vmatmul.mubr.bf16.gmra.mrb[16].mxu1 %v1395_v55  ;;  %685 = vmatprep.mubr.bf16.mxu0 %v1397_v56 }
  0x45   :  { %782 = vmatprep.mubr.bf16.mxu1 %v1399_v57 }
  0x4b   :  { %686 = vmatmul.mubr.bf16.gmra.mrb[20].mxu0 %v1401_v58 }
  0x4c   :  { %783 = vmatmul.mubr.bf16.gmra.mrb[20].mxu1 %v1402_v59  ;;  %693 = vmatprep.mubr.bf16.mxu0 %v1403_v60 }
  0x4d   :  { %790 = vmatprep.mubr.bf16.mxu1 %v1405_v61 }
  0x53   :  { %694 = vmatmul.mubr.bf16.gmra.mrb[24].mxu0 %v1407_v62 }
  0x54   :  { %791 = vmatmul.mubr.bf16.gmra.mrb[24].mxu1 %v1408_v63  ;;  %701 = vmatprep.mubr.bf16.mxu0 %v1410_v0 }
  0x55   :  { %798 = vmatprep.mubr.bf16.mxu1 %v1412_v1 }
  0x5b   :  { %702 = vmatmul.mubr.bf16.gmra.mrb[28].mxu0 %v1414_v2 }
  0x5c   :  { %799 = vmatmul.mubr.bf16.gmra.mrb[28].mxu1 %v1415_v3  ;;  %1307 = vmatprep.mubr.msk.bf16.mxu0 %vm19_vm0, %v1416_v4 }
  0x5d   :  { %1315 = vmatprep.mubr.msk.bf16.mxu1 %vm19_vm0, %v1417_v5 }
  0x63   :  { %1308 = vmatmul.mubr.msk.bf16.vlgmr.msra.gmra.mrb[32].mxu0 %vm19_vm0, %v1418_v6 }
  0x64   :  { %1316 = vmatmul.mubr.msk.bf16.vlgmr.msra.gmra.mrb[32].mxu1 %vm19_vm0, %v1419_v7  ;;  %1311 = vmatprep.mubr.msk.bf16.mxu0 %vm19_vm0, %v1420_v8 }
  0x65   :  { %1319 = vmatprep.mubr.msk.bf16.mxu1 %vm19_vm0, %v1421_v9 }
  0x6b   :  { %1312 = vmatmul.mubr.msk.bf16.gmra.mrb[36].mxu0 %vm19_vm0, %v1422_v10 }
  0x6c   :  { %1320 = vmatmul.mubr.msk.bf16.gmra.mrb[36].mxu1 %vm19_vm0, %v1423_v11 }
  0xf6   :  { %v1175_v13 = vpop.f32.mrb[0].mxu0 }
  0xf7   :  { %v1239_v14 = vpop.f32.mrb[0].mxu1  ;;  %v1176_v15 = vpop.f32.mrb[1].mxu0 }
  0xf8   :  { %v1177_v16 = vadd.f32 %v1176_v15, %v1175_v13  ;;  %v1240_v17 = vpop.f32.mrb[1].mxu1  ;;  %v1178_v18 = vpop.f32.mrb[2].mxu0 }
  0xf9   :  { %v1241_v19 = vadd.f32 %v1240_v17, %v1239_v14  ;;  %v1242_v20 = vpop.f32.mrb[2].mxu1  ;;  %v1179_v21 = vpop.f32.mrb[3].mxu0 }
  0xfa   :  { %v1180_v22 = vadd.f32 %v1179_v21, %v1178_v18  ;;  %v1243_v23 = vpop.f32.mrb[3].mxu1 }
  0xfb   :  { %v1244_v24 = vadd.f32 %v1243_v23, %v1242_v20  ;;  %v1702_v25 = vadd.f32 %v1241_v19, %v1177_v16 }
  0xfd   :  { %v1704_v26 = vadd.f32 %v1244_v24, %v1180_v22 }
  0xfe   :  { %v1181_v27 = vpop.f32.mrb[4].mxu0 }
  0xff   :  { %v1245_v28 = vpop.f32.mrb[4].mxu1  ;;  %v1182_v29 = vpop.f32.mrb[5].mxu0 }
 0x100   :  { %v1183_v30 = vadd.f32 %v1182_v29, %v1181_v27  ;;  %v1246_v31 = vpop.f32.mrb[5].mxu1  ;;  %v1184_v32 = vpop.f32.mrb[6].mxu0 }
 0x101   :  { %v1247_v33 = vadd.f32 %v1246_v31, %v1245_v28  ;;  %v1248_v34 = vpop.f32.mrb[6].mxu1  ;;  %v1185_v35 = vpop.f32.mrb[7].mxu0 }
 0x102   :  { %v1186_v36 = vadd.f32 %v1185_v35, %v1184_v32  ;;  %v1249_v37 = vpop.f32.mrb[7].mxu1 }
 0x103   :  { %v1250_v38 = vadd.f32 %v1249_v37, %v1248_v34  ;;  %v1706_v39 = vadd.f32 %v1247_v33, %v1183_v30 }
 0x105   :  { %v1708_v40 = vadd.f32 %v1250_v38, %v1186_v36 }
 0x106   :  { %v1187_v41 = vpop.f32.mrb[8].mxu0 }
 0x107   :  { %v1251_v42 = vpop.f32.mrb[8].mxu1  ;;  %v1188_v43 = vpop.f32.mrb[9].mxu0 }
 0x108   :  { %v1189_v44 = vadd.f32 %v1188_v43, %v1187_v41  ;;  %v1252_v45 = vpop.f32.mrb[9].mxu1  ;;  %v1190_v46 = vpop.f32.mrb[10].mxu0 }
 0x109   :  { %v1253_v47 = vadd.f32 %v1252_v45, %v1251_v42  ;;  %v1254_v48 = vpop.f32.mrb[10].mxu1  ;;  %v1191_v49 = vpop.f32.mrb[11].mxu0 }
 0x10a   :  { %v1192_v50 = vadd.f32 %v1191_v49, %v1190_v46  ;;  %v1255_v51 = vpop.f32.mrb[11].mxu1 }
 0x10b   :  { %v1256_v52 = vadd.f32 %v1255_v51, %v1254_v48  ;;  %v1710_v53 = vadd.f32 %v1253_v47, %v1189_v44 }
 0x10d   :  { %v1712_v54 = vadd.f32 %v1256_v52, %v1192_v50 }
 0x10e   :  { %v1193_v55 = vpop.f32.mrb[12].mxu0 }
 0x10f   :  { %v1257_v56 = vpop.f32.mrb[12].mxu1  ;;  %v1194_v57 = vpop.f32.mrb[13].mxu0 }
 0x110   :  { %v1195_v58 = vadd.f32 %v1194_v57, %v1193_v55  ;;  %v1258_v59 = vpop.f32.mrb[13].mxu1  ;;  %v1196_v60 = vpop.f32.mrb[14].mxu0 }
 0x111   :  { %v1259_v61 = vadd.f32 %v1258_v59, %v1257_v56  ;;  %v1260_v62 = vpop.f32.mrb[14].mxu1  ;;  %v1197_v63 = vpop.f32.mrb[15].mxu0 }
 0x112   :  { %v1198_v0 = vadd.f32 %v1197_v63, %v1196_v60  ;;  %v1261_v1 = vpop.f32.mrb[15].mxu1 }
 0x113   :  { %v1262_v2 = vadd.f32 %v1261_v1, %v1260_v62  ;;  %v1714_v3 = vadd.f32 %v1259_v61, %v1195_v58 }
 0x115   :  { %v1716_v4 = vadd.f32 %v1262_v2, %v1198_v0 }
 0x116   :  { %v1199_v5 = vpop.f32.mrb[16].mxu0 }
 0x117   :  { %v1263_v6 = vpop.f32.mrb[16].mxu1  ;;  %v1200_v7 = vpop.f32.mrb[17].mxu0 }
 0x118   :  { %v1201_v8 = vadd.f32 %v1200_v7, %v1199_v5  ;;  %v1264_v9 = vpop.f32.mrb[17].mxu1  ;;  %v1202_v10 = vpop.f32.mrb[18].mxu0  ;;  %v38_v5 = vld [vmem:[#allocation2 + $0x10] sm:$0xff] }
 0x119   :  { %v1265_v11 = vadd.f32 %v1264_v9, %v1263_v6  ;;  %v1266_v12 = vpop.f32.mrb[18].mxu1  ;;  %v1203_v13 = vpop.f32.mrb[19].mxu0 }
 0x11a   :  { %v1204_v14 = vadd.f32 %v1203_v13, %v1202_v10  ;;  %v1267_v15 = vpop.f32.mrb[19].mxu1  ;;  %v36_v10 = vld [vmem:[#allocation2] sm:$0xff] }
 0x11b   :  { %v1268_v16 = vadd.f32 %v1267_v15, %v1266_v12  ;;  %v777_v17 = vadd.f32 %v1265_v11, %v1201_v8  ;;  %v46_v8 = vld [vmem:[#allocation2 + $0x50] sm:$0xff] }
 0x11d   :  { %v1718_v18 = vadd.f32 %v1268_v16, %v1204_v14  ;;  %v44_v14 = vld [vmem:[#allocation2 + $0x40] sm:$0xff]  ;;  %v39_v16 = vld [vmem:[#allocation2 + $0x18] sm:$0xff] }
 0x11e   :  { %v1205_v19 = vpop.f32.mrb[20].mxu0 }
 0x11f   :  { %v1269_v20 = vpop.f32.mrb[20].mxu1  ;;  %v1206_v21 = vpop.f32.mrb[21].mxu0 }
 0x120   :  { %v1207_v22 = vadd.f32 %v1206_v21, %v1205_v19  ;;  %v1270_v23 = vpop.f32.mrb[21].mxu1  ;;  %v1208_v24 = vpop.f32.mrb[22].mxu0 }
 0x121   :  { %v1271_v27 = vadd.f32 %v1270_v23, %v1269_v20  ;;  %v1272_v28 = vpop.f32.mrb[22].mxu1  ;;  %v1209_v29 = vpop.f32.mrb[23].mxu0  ;;  %v47_v23 = vld [vmem:[#allocation2 + $0x58] sm:$0xff] }
 0x122   :  { %v1210_v30 = vadd.f32 %v1209_v29, %v1208_v24  ;;  %v1273_v31 = vpop.f32.mrb[23].mxu1 }
 0x123   :  { %v1274_v32 = vadd.f32 %v1273_v31, %v1272_v28  ;;  %v785_v33 = vadd.f32 %v1271_v27, %v1207_v22  ;;  %v37_v27 = vld [vmem:[#allocation2 + $0x8] sm:$0xff] }
 0x125   :  { %v788_v34 = vadd.f32 %v1274_v32, %v1210_v30  ;;  %v45_v32 = vld [vmem:[#allocation2 + $0x48] sm:$0xff] }
 0x126   :  { %v1211_v35 = vpop.f32.mrb[24].mxu0 }
 0x127   :  { %v1275_v36 = vpop.f32.mrb[24].mxu1  ;;  %v1212_v37 = vpop.f32.mrb[25].mxu0 }
 0x128   :  { %v1213_v38 = vadd.f32 %v1212_v37, %v1211_v35  ;;  %v1276_v41 = vpop.f32.mrb[25].mxu1  ;;  %v1214_v42 = vpop.f32.mrb[26].mxu0 }
 0x129   :  { %v1277_v43 = vadd.f32 %v1276_v41, %v1275_v36  ;;  %v1278_v44 = vpop.f32.mrb[26].mxu1  ;;  %v1215_v45 = vpop.f32.mrb[27].mxu0 }
 0x12a   :  { %v1216_v46 = vadd.f32 %v1215_v45, %v1214_v42  ;;  %v1279_v47 = vpop.f32.mrb[27].mxu1  ;;  %v40_v42 = vld [vmem:[#allocation2 + $0x20] sm:$0xff] }
 0x12b   :  { %v1280_v48 = vadd.f32 %v1279_v47, %v1278_v44  ;;  %v1720_v49 = vadd.f32 %v1277_v43, %v1213_v38  ;;  %v50_v38 = vld [vmem:[#allocation2 + $0x70] sm:$0xff] }
 0x12d   :  { %v1722_v50 = vadd.f32 %v1280_v48, %v1216_v46  ;;  %v48_v46 = vld [vmem:[#allocation2 + $0x60] sm:$0xff]  ;;  %v43_v48 = vld [vmem:[#allocation2 + $0x38] sm:$0xff] }
 0x12e   :  { %v1217_v51 = vpop.f32.mrb[28].mxu0 }
 0x12f   :  { %v1281_v52 = vpop.f32.mrb[28].mxu1  ;;  %v1218_v55 = vpop.f32.mrb[29].mxu0 }
 0x130   :  { %v1219_v56 = vadd.f32 %v1218_v55, %v1217_v51  ;;  %v1282_v57 = vpop.f32.mrb[29].mxu1  ;;  %v1220_v58 = vpop.f32.mrb[30].mxu0 }
 0x131   :  { %v1283_v59 = vadd.f32 %v1282_v57, %v1281_v52  ;;  %v1284_v60 = vpop.f32.mrb[30].mxu1  ;;  %v1221_v61 = vpop.f32.mrb[31].mxu0 }
 0x132   :  { %v1222_v62 = vadd.f32 %v1221_v61, %v1220_v58  ;;  %v1285_v63 = vpop.f32.mrb[31].mxu1 }
 0x133   :  { %v1286_v0 = vadd.f32 %v1285_v63, %v1284_v60  ;;  %v801_v1 = vadd.f32 %v1283_v59, %v1219_v56 }
 0x135   :  { %v1724_v2 = vadd.f32 %v1286_v0, %v1222_v62 }
 0x136   :  { %v1309_v6 = vpop.f32.mrb[32].mxu0 }
 0x137   :  { %v850_v7 = vadd.f32 %v1309_v6, %v1706_v39  ;;  %v1317_v9 = vpop.f32.mrb[32].mxu1  ;;  %v841_v11 = vpop.f32.mrb[33].mxu0 }
 0x138   :  { %v882_v12 = vadd.f32 %v1317_v9, %v785_v33  ;;  %v842_v13 = vadd.f32 %v841_v11, %v1702_v25  ;;  %v873_v15 = vpop.f32.mrb[33].mxu1  ;;  %v1310_v19 = vpop.f32.mrb[34].mxu0  ;;  %v41_v9 = vld [vmem:[#allocation2 + $0x28] sm:$0xff] }
 0x139   :  { %v906_v20 = vadd.f32 %v850_v7, %v38_v5  ;;  %v874_v21 = vadd.f32 %v873_v15, %v777_v17  ;;  %v853_v22 = vadd.f32 %v1310_v19, %v1708_v40  ;;  %v1318_v24 = vpop.f32.mrb[34].mxu1  ;;  %v844_v28 = vpop.f32.mrb[35].mxu0 }
 0x13a   :  { %v914_v39 = vadd.f32 %v882_v12, %v46_v8  ;;  %v904_v29 = vadd.f32 %v842_v13, %v36_v10  ;;  %v885_v30 = vadd.f32 %v1318_v24, %v788_v34  ;;  %v845_v31 = vadd.f32 %v844_v28, %v1704_v26  ;;  %v876_v33 = vpop.f32.mrb[35].mxu1  ;;  %v42_v26 = vld [vmem:[#allocation2 + $0x30] sm:$0xff]  ;;  %v51_v8 = vld [vmem:[#allocation2 + $0x78] sm:$0xff] }
 0x13b   :  { %922 = vst.msk [vmem:[#allocation2 + $0x10] sm:$0xff] %vm19_vm0, %v906_v20  ;;  %v912_v25 = vadd.f32 %v874_v21, %v44_v14  ;;  %v907_v35 = vadd.f32 %v853_v22, %v39_v16  ;;  %v877_v36 = vadd.f32 %v876_v33, %v1718_v18 }
 0x13c   :  { %930 = vst.msk [vmem:[#allocation2 + $0x50] sm:$0xff] %vm19_vm0, %v914_v39  ;;  %920 = vst.msk [vmem:[#allocation2] sm:$0xff] %vm19_vm0, %v904_v29  ;;  %v915_v40 = vadd.f32 %v885_v30, %v47_v23  ;;  %v905_v17 = vadd.f32 %v845_v31, %v37_v27 }
 0x13d   :  { %928 = vst.msk [vmem:[#allocation2 + $0x40] sm:$0xff] %vm19_vm0, %v912_v25  ;;  %923 = vst.msk [vmem:[#allocation2 + $0x18] sm:$0xff] %vm19_vm0, %v907_v35  ;;  %v913_v34 = vadd.f32 %v877_v36, %v45_v32  ;;  %v49_v35 = vld [vmem:[#allocation2 + $0x68] sm:$0xff] }
 0x13e   :  { %931 = vst.msk [vmem:[#allocation2 + $0x58] sm:$0xff] %vm19_vm0, %v915_v40  ;;  %921 = vst.msk [vmem:[#allocation2 + $0x8] sm:$0xff] %vm19_vm0, %v905_v17  ;;  %v1313_v37 = vpop.f32.mrb[36].mxu0 }
 0x13f   :  { %929 = vst.msk [vmem:[#allocation2 + $0x48] sm:$0xff] %vm19_vm0, %v913_v34  ;;  %v866_v18 = vadd.f32 %v1313_v37, %v1714_v3  ;;  %v1321_v41 = vpop.f32.mrb[36].mxu1  ;;  %v857_v43 = vpop.f32.mrb[37].mxu0 }
 0x140   :  { %v898_v44 = vadd.f32 %v1321_v41, %v801_v1  ;;  %v858_v45 = vadd.f32 %v857_v43, %v1710_v53  ;;  %v889_v47 = vpop.f32.mrb[37].mxu1  ;;  %v1314_v51 = vpop.f32.mrb[38].mxu0 }
 0x141   :  { %v910_v52 = vadd.f32 %v866_v18, %v42_v26  ;;  %v890_v55 = vadd.f32 %v889_v47, %v1720_v49  ;;  %v869_v56 = vadd.f32 %v1314_v51, %v1716_v4  ;;  %v1322_v57 = vpop.f32.mrb[38].mxu1  ;;  %v860_v58 = vpop.f32.mrb[39].mxu0 }
 0x142   :  { %v941_v59 = vld [vmem:[#allocation2 + $0x10] sm:$0xff]  ;;  %v918_v3 = vadd.f32 %v898_v44, %v50_v38  ;;  %v908_v60 = vadd.f32 %v858_v45, %v40_v42  ;;  %v901_v61 = vadd.f32 %v1322_v57, %v1724_v2  ;;  %v861_v62 = vadd.f32 %v860_v58, %v1712_v54  ;;  %v892_v63 = vpop.f32.mrb[39].mxu1 }
 0x143   :  { %957 = vst.msk [vmem:[%s1890_s2 + $0x10] sm:$0xff] %vm19_vm0, %v941_v59  ;;  %v1749_v53 = vld [vmem:[#allocation2 + $0x50] sm:$0xff]  ;;  %v939_v49 = vld [vmem:[#allocation2] sm:$0xff]  ;;  %926 = vst.msk [vmem:[#allocation2 + $0x30] sm:$0xff] %vm19_vm0, %v910_v52  ;;  %v916_v4 = vadd.f32 %v890_v55, %v48_v46  ;;  %v911_v0 = vadd.f32 %v869_v56, %v43_v48  ;;  %v1011_v10 = vmul.f32 %v941_v59, %v941_v59  ;;  %v974_v14 = vsel %vm19_vm0, %v941_v59, 0.0 }
 0x144   :  { %965 = vst.msk [vmem:[%s1890_s2 + $0x50] sm:$0xff] %vm19_vm0, %v1749_v53  ;;  %955 = vst.msk [vmem:[%s1890_s2] sm:$0xff] %vm19_vm0, %v939_v49  ;;  %v1009_v54 = vmul.f32 %v939_v49, %v939_v49  ;;  %v1761_v1 = vld [vmem:[#allocation2 + $0x40] sm:$0xff]  ;;  %v942_v2 = vld [vmem:[#allocation2 + $0x18] sm:$0xff]  ;;  %v971_v11 = vsel %vm19_vm0, %v939_v49, 0.0  ;;  %v919_v21 = vadd.f32 %v901_v61, %v51_v8  ;;  %v909_v22 = vadd.f32 %v861_v62, %v41_v9 }
 0x145   :  { %934 = vst.msk [vmem:[#allocation2 + $0x70] sm:$0xff] %vm19_vm0, %v918_v3  ;;  %924 = vst.msk [vmem:[#allocation2 + $0x20] sm:$0xff] %vm19_vm0, %v908_v60  ;;  %v1774_v5 = vld [vmem:[#allocation2 + $0x58] sm:$0xff]  ;;  %v940_v6 = vld [vmem:[#allocation2 + $0x8] sm:$0xff]  ;;  %v1012_v19 = vmul.f32 %v942_v2, %v942_v2  ;;  %v893_v28 = vadd.f32 %v892_v63, %v1722_v50  ;;  %v1028_v39 = vsel %vm19_vm0, %v1011_v10, 0.0  ;;  %v976_v29 = vsel %vm19_vm0, %v942_v2, 0.0 }
 0x146   :  { %963 = vst.msk [vmem:[%s1890_s2 + $0x40] sm:$0xff] %vm19_vm0, %v1761_v1  ;;  %958 = vst.msk [vmem:[%s1890_s2 + $0x18] sm:$0xff] %vm19_vm0, %v942_v2  ;;  %v1787_v7 = vld [vmem:[#allocation2 + $0x48] sm:$0xff]  ;;  %v972_v12 = vsel %vm19_vm0, %v940_v6, 0.0  ;;  %v1010_v13 = vmul.f32 %v940_v6, %v940_v6  ;;  %v1025_v15 = vsel %vm19_vm0, %v1009_v54, 0.0  ;;  %v1017_v56 = vmul.f32 %v1761_v1, %v1761_v1 }
 0x147   :  { %932 = vst.msk [vmem:[#allocation2 + $0x60] sm:$0xff] %vm19_vm0, %v916_v4  ;;  %927 = vst.msk [vmem:[#allocation2 + $0x38] sm:$0xff] %vm19_vm0, %v911_v0  ;;  %v973_v16 = vadd.f32 %v972_v12, %v971_v11  ;;  %v1030_v36 = vsel %vm19_vm0, %v1012_v19, 0.0  ;;  %v917_v37 = vadd.f32 %v893_v28, %v49_v35  ;;  %v986_v61 = vsel %vm19_vm0, %v1761_v1, 0.0 }
 0x148   :  { %966 = vst.msk [vmem:[%s1890_s2 + $0x58] sm:$0xff] %vm19_vm0, %v1774_v5  ;;  %956 = vst.msk [vmem:[%s1890_s2 + $0x8] sm:$0xff] %vm19_vm0, %v940_v6  ;;  %v1026_v20 = vsel %vm19_vm0, %v1010_v13, 0.0  ;;  %v1018_v62 = vmul.f32 %v1787_v7, %v1787_v7  ;;  %v1019_v0 = vmul.f32 %v1749_v53, %v1749_v53  ;;  %v1040_v54 = vsel %vm19_vm0, %v1017_v56, 0.0 }
 0x149   :  { %964 = vst.msk [vmem:[%s1890_s2 + $0x48] sm:$0xff] %vm19_vm0, %v1787_v7  ;;  %v975_v23 = vadd.f32 %v974_v14, %v973_v16  ;;  %v1027_v24 = vadd.f32 %v1026_v20, %v1025_v15  ;;  %935 = vst.msk [vmem:[#allocation2 + $0x78] sm:$0xff] %vm19_vm0, %v919_v21  ;;  %v988_v1 = vsel %vm19_vm0, %v1787_v7, 0.0  ;;  %v990_v8 = vsel %vm19_vm0, %v1749_v53, 0.0 }
 0x14a   :  { %v945_v27 = vld [vmem:[#allocation2 + $0x30] sm:$0xff]  ;;  %925 = vst.msk [vmem:[#allocation2 + $0x28] sm:$0xff] %vm19_vm0, %v909_v22  ;;  %933 = vst.msk [vmem:[#allocation2 + $0x68] sm:$0xff] %vm19_vm0, %v917_v37  ;;  %v1020_v9 = vmul.f32 %v1774_v5, %v1774_v5  ;;  %v1042_v10 = vsel %vm19_vm0, %v1018_v62, 0.0  ;;  %v1044_v13 = vsel %vm19_vm0, %v1019_v0, 0.0  ;;  %v992_v14 = vsel %vm19_vm0, %v1774_v5, 0.0 }
 0x14b   :  { %961 = vst.msk [vmem:[%s1890_s2 + $0x30] sm:$0xff] %vm19_vm0, %v945_v27  ;;  %v1029_v32 = vadd.f32 %v1028_v39, %v1027_v24  ;;  %v977_v50 = vadd.f32 %v976_v29, %v975_v23  ;;  %v1015_v43 = vmul.f32 %v945_v27, %v945_v27  ;;  %v982_v47 = vsel %vm19_vm0, %v945_v27, 0.0 }
 0x14c   :  { %v1806_v30 = vld [vmem:[#allocation2 + $0x70] sm:$0xff]  ;;  %v943_v31 = vld [vmem:[#allocation2 + $0x20] sm:$0xff]  ;;  %v1046_v19 = vsel %vm19_vm0, %v1020_v9, 0.0 }
 0x14d   :  { %969 = vst.msk [vmem:[%s1890_s2 + $0x70] sm:$0xff] %vm19_vm0, %v1806_v30  ;;  %959 = vst.msk [vmem:[%s1890_s2 + $0x20] sm:$0xff] %vm19_vm0, %v943_v31  ;;  %v978_v40 = vsel %vm19_vm0, %v943_v31, 0.0  ;;  %v1013_v17 = vmul.f32 %v943_v31, %v943_v31  ;;  %v1031_v34 = vadd.f32 %v1030_v36, %v1029_v32  ;;  %v1036_v57 = vsel %vm19_vm0, %v1015_v43, 0.0 }
 0x14e   :  { %v951_v33 = vld [vmem:[#allocation2 + $0x60] sm:$0xff]  ;;  %v946_v25 = vld [vmem:[#allocation2 + $0x38] sm:$0xff]  ;;  %v979_v18 = vadd.f32 %v978_v40, %v977_v50  ;;  %v1023_v23 = vmul.f32 %v1806_v30, %v1806_v30  ;;  %v998_v5 = vsel %vm19_vm0, %v1806_v30, 0.0 }
 0x14f   :  { %967 = vst.msk [vmem:[%s1890_s2 + $0x60] sm:$0xff] %vm19_vm0, %v951_v33  ;;  %962 = vst.msk [vmem:[%s1890_s2 + $0x38] sm:$0xff] %vm19_vm0, %v946_v25  ;;  %v1032_v26 = vsel %vm19_vm0, %v1013_v17, 0.0  ;;  %v1016_v48 = vmul.f32 %v946_v25, %v946_v25  ;;  %v984_v58 = vsel %vm19_vm0, %v946_v25, 0.0  ;;  %v1021_v15 = vmul.f32 %v951_v33, %v951_v33 }
 0x150   :  { %v1033_v38 = vadd.f32 %v1032_v26, %v1031_v34  ;;  %v954_v41 = vld [vmem:[#allocation2 + $0x78] sm:$0xff]  ;;  %v994_v20 = vsel %vm19_vm0, %v951_v33, 0.0  ;;  %v1052_v33 = vsel %vm19_vm0, %v1023_v23, 0.0 }
 0x151   :  { %v944_v42 = vld [vmem:[#allocation2 + $0x28] sm:$0xff]  ;;  %970 = vst.msk [vmem:[%s1890_s2 + $0x78] sm:$0xff] %vm19_vm0, %v954_v41  ;;  %v1038_v63 = vsel %vm19_vm0, %v1016_v48, 0.0  ;;  %v1048_v24 = vsel %vm19_vm0, %v1021_v15, 0.0  ;;  %v1024_v29 = vmul.f32 %v954_v41, %v954_v41  ;;  %v1000_v25 = vsel %vm19_vm0, %v954_v41, 0.0 }
 0x152   :  { %960 = vst.msk [vmem:[%s1890_s2 + $0x28] sm:$0xff] %vm19_vm0, %v944_v42  ;;  %v980_v44 = vsel %vm19_vm0, %v944_v42, 0.0  ;;  %v1014_v45 = vmul.f32 %v944_v42, %v944_v42  ;;  %v952_v60 = vld [vmem:[#allocation2 + $0x68] sm:$0xff] }
 0x153   :  { %v981_v46 = vadd.f32 %v980_v44, %v979_v18  ;;  %968 = vst.msk [vmem:[%s1890_s2 + $0x68] sm:$0xff] %vm19_vm0, %v952_v60  ;;  %v1022_v53 = vmul.f32 %v952_v60, %v952_v60  ;;  %v996_v27 = vsel %vm19_vm0, %v952_v60, 0.0  ;;  %v1054_v40 = vsel %vm19_vm0, %v1024_v29, 0.0 }
 0x154   :  { %v1034_v51 = vsel %vm19_vm0, %v1014_v45, 0.0 }
 0x155   :  { %v983_v52 = vadd.f32 %v982_v47, %v981_v46  ;;  %v1035_v55 = vadd.f32 %v1034_v51, %v1033_v38  ;;  %v1050_v31 = vsel %vm19_vm0, %v1022_v53, 0.0 }
 0x157   :  { %v985_v59 = vadd.f32 %v984_v58, %v983_v52  ;;  %v1037_v3 = vadd.f32 %v1036_v57, %v1035_v55 }
 0x159   :  { %v987_v49 = vadd.f32 %v986_v61, %v985_v59  ;;  %v1039_v4 = vadd.f32 %v1038_v63, %v1037_v3 }
 0x15b   :  { %v1041_v2 = vadd.f32 %v1040_v54, %v1039_v4  ;;  %v989_v6 = vadd.f32 %v988_v1, %v987_v49 }
 0x15d   :  { %v991_v11 = vadd.f32 %v990_v8, %v989_v6  ;;  %v1043_v12 = vadd.f32 %v1042_v10, %v1041_v2 }
 0x15f   :  { %v993_v16 = vadd.f32 %v992_v14, %v991_v11  ;;  %v1045_v7 = vadd.f32 %v1044_v13, %v1043_v12 }
 0x161   :  { %v995_v21 = vadd.f32 %v994_v20, %v993_v16  ;;  %v1047_v22 = vadd.f32 %v1046_v19, %v1045_v7 }
 0x163   :  { %v997_v28 = vadd.f32 %v996_v27, %v995_v21  ;;  %v1049_v39 = vadd.f32 %v1048_v24, %v1047_v22 }
 0x165   :  { %v999_v32 = vadd.f32 %v998_v5, %v997_v28  ;;  %v1051_v50 = vadd.f32 %v1050_v31, %v1049_v39 }
 0x167   :  { %v1001_v35 = vadd.f32 %v1000_v25, %v999_v32  ;;  %v1053_v36 = vadd.f32 %v1052_v33, %v1051_v50 }
 0x169   :  { %v1002_v17 = vrot.slane %v1001_v35, 4  ;;  %v1055_v34 = vadd.f32 %v1054_v40, %v1053_v36 }
 0x16b   :  { %v1003_v26 = vadd.f32 %v1002_v17, %v1001_v35  ;;  %v1056_v37 = vrot.slane %v1055_v34, 4 }
 0x16d   :  { %v1004_v18 = vrot.slane %v1003_v26, 2  ;;  %v1057_v38 = vadd.f32 %v1056_v37, %v1055_v34 }
 0x16f   :  { %v1005_v30 = vadd.f32 %v1004_v18, %v1003_v26  ;;  %v1058_v42 = vrot.slane %v1057_v38, 2 }
 0x171   :  { %v1006_v43 = vrot.slane %v1005_v30, 1  ;;  %v1059_v44 = vadd.f32 %v1058_v42, %v1057_v38 }
 0x173   :  { %v1007_v45 = vadd.f32 %v1006_v43, %v1005_v30  ;;  %v1060_v46 = vrot.slane %v1059_v44, 1 }
 0x175   :  { %1008 = vst.msk [vmem:[%s1891_s3] sm:$0xff] %vm19_vm0, %v1007_v45  ;;  %v1061_v41 = vadd.f32 %v1060_v46, %v1059_v44 }
 0x177   :  { %1062 = vst.msk [vmem:[%s1892_s4] sm:$0xff] %vm19_vm0, %v1061_v41 }

// kernel: resnet18_forward.49
= control target key start
LH: loop header
LB: loop body
LE: loop exit
PB: predicated region body
PF: predicated region fallthrough
CT: control target
= control target key end

     0   :  { %vm127_vm0 = vcmask 523264   ;;  %s377_s0 = inlined_call_operand.vmem [shape: f32[128,64], index: 0, kind: input, shape index: {}]   ;;  %s378_s1 = inlined_call_operand.vmem [shape: f32[1,64], index: 1, kind: input, shape index: {}]   ;;  %s379_s2 = inlined_call_operand.vmem [shape: f32[1,64], index: 2, kind: input, shape index: {}]   ;;  %s380_s3 = inlined_call_operand.vmem [shape: f32[128,64], index: 3, kind: input, shape index: {}]   ;;  %s381_s4 = inlined_call_operand.vmem [shape: f32[128,64], index: 4, kind: output, shape index: {}]  }
   0x1   :  { %v17_v0 = vld [vmem:[%s377_s0] sm:$0xff]  ;;  %v18_v4 = vld [vmem:[%s377_s0 + $0x8] sm:$0xff]  ;;  %v19_v7 = vld [vmem:[%s377_s0 + $0x10] sm:$0xff] }
   0x2   :  { %v181_v1 = vld [vmem:[%s378_s1] ss:$0 sm:$0xff]  ;;  %v20_v8 = vld [vmem:[%s377_s0 + $0x18] sm:$0xff]  ;;  %v80_v10 = vld [vmem:[%s380_s3 + $0x8] sm:$0xff] }
   0x3   :  { %v186_v2 = vld [vmem:[%s379_s2] ss:$0 sm:$0xff]  ;;  %v40_v3 = vmul.f32 %v181_v1, %v17_v0  ;;  %v41_v6 = vmul.f32 %v181_v1, %v18_v4  ;;  %v42_v11 = vmul.f32 %v181_v1, %v19_v7  ;;  %v81_v12 = vld [vmem:[%s380_s3 + $0x10] sm:$0xff]  ;;  %v43_v13 = vmul.f32 %v181_v1, %v20_v8  ;;  %v82_v16 = vld [vmem:[%s380_s3 + $0x18] sm:$0xff] }
   0x4   :  { %v79_v5 = vld [vmem:[%s380_s3] sm:$0xff]  ;;  %v22_v18 = vld [vmem:[%s377_s0 + $0x28] sm:$0xff]  ;;  %v23_v19 = vld [vmem:[%s377_s0 + $0x30] sm:$0xff] }
   0x5   :  { %v63_v9 = vadd.f32 %v186_v2, %v40_v3  ;;  %v21_v14 = vld [vmem:[%s377_s0 + $0x20] sm:$0xff]  ;;  %v64_v15 = vadd.f32 %v186_v2, %v41_v6  ;;  %v65_v21 = vadd.f32 %v186_v2, %v42_v11  ;;  %v66_v22 = vadd.f32 %v186_v2, %v43_v13  ;;  %v24_v25 = vld [vmem:[%s377_s0 + $0x38] sm:$0xff]  ;;  %v84_v28 = vld [vmem:[%s380_s3 + $0x28] sm:$0xff] }
   0x6   :  { %v44_v17 = vmul.f32 %v181_v1, %v21_v14  ;;  %v83_v23 = vld [vmem:[%s380_s3 + $0x20] sm:$0xff]  ;;  %v45_v24 = vmul.f32 %v181_v1, %v22_v18  ;;  %v46_v29 = vmul.f32 %v181_v1, %v23_v19  ;;  %v47_v30 = vmul.f32 %v181_v1, %v24_v25  ;;  %v85_v36 = vld [vmem:[%s380_s3 + $0x30] sm:$0xff]  ;;  %v86_v37 = vld [vmem:[%s380_s3 + $0x38] sm:$0xff] }
   0x7   :  { %v95_v20 = vadd.f32 %v79_v5, %v63_v9  ;;  %v96_v26 = vadd.f32 %v80_v10, %v64_v15  ;;  %v25_v31 = vld [vmem:[%s377_s0 + $0x40] sm:$0xff]  ;;  %v97_v33 = vadd.f32 %v81_v12, %v65_v21  ;;  %v98_v34 = vadd.f32 %v82_v16, %v66_v22  ;;  %v26_v38 = vld [vmem:[%s377_s0 + $0x48] sm:$0xff]  ;;  %v27_v43 = vld [vmem:[%s377_s0 + $0x50] sm:$0xff] }
   0x8   :  { %v67_v27 = vadd.f32 %v186_v2, %v44_v17  ;;  %v68_v35 = vadd.f32 %v186_v2, %v45_v24  ;;  %v69_v41 = vadd.f32 %v186_v2, %v46_v29  ;;  %v70_v42 = vadd.f32 %v186_v2, %v47_v30  ;;  %v28_v44 = vld [vmem:[%s377_s0 + $0x58] sm:$0xff]  ;;  %v29_v49 = vld [vmem:[%s377_s0 + $0x60] sm:$0xff]  ;;  %v30_v55 = vld [vmem:[%s377_s0 + $0x68] sm:$0xff] }
   0x9   :  { %v111_v32 = vmax.f32 %v95_v20, 0.0  ;;  %v112_v39 = vmax.f32 %v96_v26, 0.0  ;;  %v113_v45 = vmax.f32 %v97_v33, 0.0  ;;  %v114_v46 = vmax.f32 %v98_v34, 0.0  ;;  %v87_v53 = vld [vmem:[%s380_s3 + $0x40] sm:$0xff]  ;;  %v88_v58 = vld [vmem:[%s380_s3 + $0x48] sm:$0xff] }
   0xa   :  { %v99_v40 = vadd.f32 %v83_v23, %v67_v27  ;;  %v100_v47 = vadd.f32 %v84_v28, %v68_v35  ;;  %v48_v48 = vmul.f32 %v181_v1, %v25_v31  ;;  %v101_v51 = vadd.f32 %v85_v36, %v69_v41  ;;  %v31_v61 = vld [vmem:[%s377_s0 + $0x70] sm:$0xff]  ;;  %v32_v62 = vld [vmem:[%s377_s0 + $0x78] sm:$0xff]  ;;  %v91_v10 = vld [vmem:[%s380_s3 + $0x60] sm:$0xff] }
   0xb   :  { %128 = vst.msk [vmem:[%s381_s4] sm:$0xff] %vm127_vm0, %v111_v32  ;;  %129 = vst.msk [vmem:[%s381_s4 + $0x8] sm:$0xff] %vm127_vm0, %v112_v39  ;;  %v102_v52 = vadd.f32 %v86_v37, %v70_v42  ;;  %v49_v54 = vmul.f32 %v181_v1, %v26_v38  ;;  %v50_v59 = vmul.f32 %v181_v1, %v27_v43  ;;  %v89_v4 = vld [vmem:[%s380_s3 + $0x50] sm:$0xff]  ;;  %v90_v5 = vld [vmem:[%s380_s3 + $0x58] sm:$0xff] }
   0xc   :  { %v115_v50 = vmax.f32 %v99_v40, 0.0  ;;  %130 = vst.msk [vmem:[%s381_s4 + $0x10] sm:$0xff] %vm127_vm0, %v113_v45  ;;  %131 = vst.msk [vmem:[%s381_s4 + $0x18] sm:$0xff] %vm127_vm0, %v114_v46  ;;  %v116_v56 = vmax.f32 %v100_v47, 0.0  ;;  %v71_v57 = vadd.f32 %v186_v2, %v48_v48  ;;  %v51_v60 = vmul.f32 %v181_v1, %v28_v44  ;;  %v92_v14 = vld [vmem:[%s380_s3 + $0x68] sm:$0xff]  ;;  %v93_v21 = vld [vmem:[%s380_s3 + $0x70] sm:$0xff] }
   0xd   :  { %v117_v63 = vmax.f32 %v101_v51, 0.0  ;;  %v118_v0 = vmax.f32 %v102_v52, 0.0  ;;  %v72_v3 = vadd.f32 %v186_v2, %v49_v54  ;;  %v52_v6 = vmul.f32 %v181_v1, %v29_v49  ;;  %v94_v22 = vld [vmem:[%s380_s3 + $0x78] sm:$0xff] }
   0xe   :  { %132 = vst.msk [vmem:[%s381_s4 + $0x20] sm:$0xff] %vm127_vm0, %v115_v50  ;;  %133 = vst.msk [vmem:[%s381_s4 + $0x28] sm:$0xff] %vm127_vm0, %v116_v56  ;;  %v103_v7 = vadd.f32 %v87_v53, %v71_v57  ;;  %v73_v8 = vadd.f32 %v186_v2, %v50_v59  ;;  %v74_v9 = vadd.f32 %v186_v2, %v51_v60 }
   0xf   :  { %v53_v11 = vmul.f32 %v181_v1, %v30_v55  ;;  %134 = vst.msk [vmem:[%s381_s4 + $0x30] sm:$0xff] %vm127_vm0, %v117_v63  ;;  %135 = vst.msk [vmem:[%s381_s4 + $0x38] sm:$0xff] %vm127_vm0, %v118_v0  ;;  %v104_v12 = vadd.f32 %v88_v58, %v72_v3  ;;  %v75_v13 = vadd.f32 %v186_v2, %v52_v6 }
  0x10   :  { %v54_v15 = vmul.f32 %v181_v1, %v31_v61  ;;  %v55_v16 = vmul.f32 %v181_v1, %v32_v62  ;;  %v119_v17 = vmax.f32 %v103_v7, 0.0  ;;  %v105_v18 = vadd.f32 %v89_v4, %v73_v8 }
  0x11   :  { %v106_v19 = vadd.f32 %v90_v5, %v74_v9  ;;  %v76_v20 = vadd.f32 %v186_v2, %v53_v11  ;;  %v120_v23 = vmax.f32 %v104_v12, 0.0  ;;  %v107_v24 = vadd.f32 %v91_v10, %v75_v13 }
  0x12   :  { %v77_v25 = vadd.f32 %v186_v2, %v54_v15  ;;  %v78_v26 = vadd.f32 %v186_v2, %v55_v16  ;;  %136 = vst.msk [vmem:[%s381_s4 + $0x40] sm:$0xff] %vm127_vm0, %v119_v17  ;;  %v121_v1 = vmax.f32 %v105_v18, 0.0 }
  0x13   :  { %v122_v27 = vmax.f32 %v106_v19, 0.0  ;;  %v108_v28 = vadd.f32 %v92_v14, %v76_v20  ;;  %137 = vst.msk [vmem:[%s381_s4 + $0x48] sm:$0xff] %vm127_vm0, %v120_v23  ;;  %v123_v29 = vmax.f32 %v107_v24, 0.0 }
  0x14   :  { %v109_v30 = vadd.f32 %v93_v21, %v77_v25  ;;  %v110_v31 = vadd.f32 %v94_v22, %v78_v26  ;;  %138 = vst.msk [vmem:[%s381_s4 + $0x50] sm:$0xff] %vm127_vm0, %v121_v1 }
  0x15   :  { %139 = vst.msk [vmem:[%s381_s4 + $0x58] sm:$0xff] %vm127_vm0, %v122_v27  ;;  %v124_v2 = vmax.f32 %v108_v28, 0.0  ;;  %140 = vst.msk [vmem:[%s381_s4 + $0x60] sm:$0xff] %vm127_vm0, %v123_v29 }
  0x16   :  { %v125_v32 = vmax.f32 %v109_v30, 0.0  ;;  %v126_v33 = vmax.f32 %v110_v31, 0.0 }
  0x17   :  { %141 = vst.msk [vmem:[%s381_s4 + $0x68] sm:$0xff] %vm127_vm0, %v124_v2 }
  0x18   :  { %142 = vst.msk [vmem:[%s381_s4 + $0x70] sm:$0xff] %vm127_vm0, %v125_v32  ;;  %143 = vst.msk [vmem:[%s381_s4 + $0x78] sm:$0xff] %vm127_vm0, %v126_v33 }

// kernel: resnet18_forward.56
= control target key start
LH: loop header
LB: loop body
LE: loop exit
PB: predicated region body
PF: predicated region fallthrough
CT: control target
= control target key end

     0   :  { %vm73_vm0 = vcmask 523264   ;;  %s277_s1 = inlined_call_operand.vmem [shape: bf16[64,128], index: 1, kind: input, shape index: {}]   ;;  %s278_s0 = inlined_call_operand.vmem [shape: bf16[32,64], index: 0, kind: input, shape index: {}]   ;;  %s279_s2 = inlined_call_operand.vmem [shape: f32[32,128], index: 2, kind: output, shape index: {0}]   ;;  %s280_s3 = inlined_call_operand.vmem [shape: f32[8,128], index: 3, kind: output, shape index: {1}]   ;;  %s281_s4 = inlined_call_operand.vmem [shape: f32[8,128], index: 4, kind: output, shape index: {2}]  }
   0x1   :  { %v210_v0 = vld [vmem:[%s277_s1] sm:$0xff]   ;;  %v211_v1 = vld [vmem:[%s277_s1 + $0x8] sm:$0xff]   ;;  %v212_v2 = vld [vmem:[%s277_s1 + $0x10] sm:$0xff]  }
   0x2   :  { %198 = vmatprep.subr.bf16.mxu0 %v210_v0  ;;  %v214_v3 = vld [vmem:[%s278_s0] sm:$0xff]   ;;  %v213_v4 = vld [vmem:[%s277_s1 + $0x18] sm:$0xff]   ;;  %v215_v5 = vld [vmem:[%s278_s0 + $0x8] sm:$0xff]  }
   0x3   :  { %199 = vmatpush3.bf16.msra.mxu0 %v210_v0  ;;  %206 = vmatprep.mubr.msk.bf16.mxu0 %vm73_vm0, %v214_v3 }
   0x4   :  { %200 = vmatprep.subr.bf16.mxu0 %v211_v1 }
   0x7   :  { %201 = vmatpush3.bf16.msra.mxu0 %v211_v1 }
   0x8   :  { %202 = vmatprep.subr.bf16.mxu0 %v212_v2 }
   0xb   :  { %203 = vmatpush3.bf16.msra.mxu0 %v212_v2 }
   0xc   :  { %204 = vmatprep.subr.bf16.mxu0 %v213_v4 }
   0xf   :  { %205 = vmatpush3.bf16.msra.mxu0 %v213_v4 }
  0x12   :  { %207 = vmatmul.mubr.msk.bf16.vlgmr.msra.gmra.mrb[0].mxu0 %vm73_vm0, %v215_v5 }
  0xe5   :  { %v208_v6 = vpop.f32.mrb[0].mxu0 }
  0xe6   :  { %146 = vst [vmem:[%s279_s2 + $0x10] sm:$0xff] %v208_v6  ;;  %v114_v7 = vpop.f32.mrb[1].mxu0  ;;  %v160_v13 = vmul.f32 %v208_v6, %v208_v6 }
  0xe7   :  { %144 = vst [vmem:[%s279_s2] sm:$0xff] %v114_v7  ;;  %v209_v8 = vpop.f32.mrb[2].mxu0  ;;  %v158_v10 = vmul.f32 %v114_v7, %v114_v7 }
  0xe8   :  { %147 = vst [vmem:[%s279_s2 + $0x18] sm:$0xff] %v209_v8  ;;  %v117_v9 = vpop.f32.mrb[3].mxu0  ;;  %v161_v16 = vmul.f32 %v209_v8, %v209_v8 }
  0xe9   :  { %145 = vst [vmem:[%s279_s2 + $0x8] sm:$0xff] %v117_v9  ;;  %v148_v11 = vadd.f32 %v117_v9, %v114_v7  ;;  %v159_v12 = vmul.f32 %v117_v9, %v117_v9 }
  0xeb   :  { %v149_v14 = vadd.f32 %v208_v6, %v148_v11  ;;  %v162_v15 = vadd.f32 %v159_v12, %v158_v10 }
  0xed   :  { %v150_v17 = vadd.f32 %v209_v8, %v149_v14  ;;  %v163_v18 = vadd.f32 %v162_v15, %v160_v13 }
  0xef   :  { %v151_v19 = vrot.slane %v150_v17, 4  ;;  %v164_v20 = vadd.f32 %v163_v18, %v161_v16 }
  0xf1   :  { %v152_v21 = vadd.f32 %v151_v19, %v150_v17  ;;  %v165_v22 = vrot.slane %v164_v20, 4 }
  0xf3   :  { %v153_v23 = vrot.slane %v152_v21, 2  ;;  %v166_v24 = vadd.f32 %v165_v22, %v164_v20 }
  0xf5   :  { %v154_v25 = vadd.f32 %v153_v23, %v152_v21  ;;  %v167_v26 = vrot.slane %v166_v24, 2 }
  0xf7   :  { %v155_v27 = vrot.slane %v154_v25, 1  ;;  %v168_v28 = vadd.f32 %v167_v26, %v166_v24 }
  0xf9   :  { %v156_v29 = vadd.f32 %v155_v27, %v154_v25  ;;  %v169_v30 = vrot.slane %v168_v28, 1 }
  0xfb   :  { %157 = vst [vmem:[%s280_s3] sm:$0xff] %v156_v29  ;;  %v170_v31 = vadd.f32 %v169_v30, %v168_v28 }
  0xfd   :  { %171 = vst [vmem:[%s281_s4] sm:$0xff] %v170_v31 }

// kernel: resnet18_forward.57
= control target key start
LH: loop header
LB: loop body
LE: loop exit
PB: predicated region body
PF: predicated region fallthrough
CT: control target
= control target key end

     0   :  { %s100_s0 = inlined_call_operand.vmem [shape: f32[32,128], index: 0, kind: input, shape index: {}]   ;;  %s101_s1 = inlined_call_operand.vmem [shape: f32[1,128], index: 1, kind: input, shape index: {}]   ;;  %s102_s2 = inlined_call_operand.vmem [shape: f32[1,128], index: 2, kind: input, shape index: {}]   ;;  %s103_s3 = inlined_call_operand.vmem [shape: f32[32,128], index: 3, kind: output, shape index: {}]  }
   0x1   :  { %v14_v0 = vld [vmem:[%s100_s0] sm:$0xff]  ;;  %v15_v4 = vld [vmem:[%s100_s0 + $0x8] sm:$0xff]  ;;  %v16_v5 = vld [vmem:[%s100_s0 + $0x10] sm:$0xff] }
   0x2   :  { %v48_v1 = vld [vmem:[%s101_s1] ss:$0 sm:$0xff]  ;;  %v17_v6 = vld [vmem:[%s100_s0 + $0x18] sm:$0xff] }
   0x3   :  { %v49_v2 = vld [vmem:[%s102_s2] ss:$0 sm:$0xff]  ;;  %v25_v3 = vmul.f32 %v48_v1, %v14_v0  ;;  %v26_v7 = vmul.f32 %v48_v1, %v15_v4  ;;  %v27_v8 = vmul.f32 %v48_v1, %v16_v5  ;;  %v28_v9 = vmul.f32 %v48_v1, %v17_v6 }
   0x5   :  { %v36_v10 = vadd.f32 %v49_v2, %v25_v3  ;;  %v37_v11 = vadd.f32 %v49_v2, %v26_v7  ;;  %v38_v12 = vadd.f32 %v49_v2, %v27_v8  ;;  %v39_v13 = vadd.f32 %v49_v2, %v28_v9 }
   0x7   :  { %40 = vst [vmem:[%s103_s3] sm:$0xff] %v36_v10  ;;  %41 = vst [vmem:[%s103_s3 + $0x8] sm:$0xff] %v37_v11 }
   0x8   :  { %42 = vst [vmem:[%s103_s3 + $0x10] sm:$0xff] %v38_v12  ;;  %43 = vst [vmem:[%s103_s3 + $0x18] sm:$0xff] %v39_v13 }

// kernel: resnet18_forward.55
= control target key start
LH: loop header
LB: loop body
LE: loop exit
PB: predicated region body
PF: predicated region fallthrough
CT: control target
= control target key end

     0   :  { %s104_s0 = inlined_call_operand.vmem [shape: f32[32,128], index: 0, kind: input, shape index: {}]   ;;  %s105_s1 = inlined_call_operand.vmem [shape: f32[1,128], index: 1, kind: input, shape index: {}]   ;;  %s106_s2 = inlined_call_operand.vmem [shape: f32[1,128], index: 2, kind: input, shape index: {}]   ;;  %s107_s3 = inlined_call_operand.vmem [shape: f32[32,128], index: 3, kind: output, shape index: {}]  }
   0x1   :  { %v14_v0 = vld [vmem:[%s104_s0] sm:$0xff]  ;;  %v15_v4 = vld [vmem:[%s104_s0 + $0x8] sm:$0xff]  ;;  %v16_v5 = vld [vmem:[%s104_s0 + $0x10] sm:$0xff] }
   0x2   :  { %v52_v1 = vld [vmem:[%s105_s1] ss:$0 sm:$0xff]  ;;  %v17_v6 = vld [vmem:[%s104_s0 + $0x18] sm:$0xff] }
   0x3   :  { %v53_v2 = vld [vmem:[%s106_s2] ss:$0 sm:$0xff]  ;;  %v25_v3 = vmul.f32 %v52_v1, %v14_v0  ;;  %v26_v7 = vmul.f32 %v52_v1, %v15_v4  ;;  %v27_v8 = vmul.f32 %v52_v1, %v16_v5  ;;  %v28_v9 = vmul.f32 %v52_v1, %v17_v6 }
   0x5   :  { %v36_v10 = vadd.f32 %v53_v2, %v25_v3  ;;  %v37_v11 = vadd.f32 %v53_v2, %v26_v7  ;;  %v38_v12 = vadd.f32 %v53_v2, %v27_v8  ;;  %v39_v13 = vadd.f32 %v53_v2, %v28_v9 }
   0x7   :  { %v40_v14 = vmax.f32 %v36_v10, 0.0  ;;  %v41_v15 = vmax.f32 %v37_v11, 0.0  ;;  %v42_v16 = vmax.f32 %v38_v12, 0.0  ;;  %v43_v17 = vmax.f32 %v39_v13, 0.0 }
   0x9   :  { %44 = vst [vmem:[%s107_s3] sm:$0xff] %v40_v14  ;;  %45 = vst [vmem:[%s107_s3 + $0x8] sm:$0xff] %v41_v15 }
   0xa   :  { %46 = vst [vmem:[%s107_s3 + $0x10] sm:$0xff] %v42_v16  ;;  %47 = vst [vmem:[%s107_s3 + $0x18] sm:$0xff] %v43_v17 }

// kernel: resnet18_forward.54
= control target key start
LH: loop header
LB: loop body
LE: loop exit
PB: predicated region body
PF: predicated region fallthrough
CT: control target
= control target key end

     0   :  { %vm377_vm0 = vcmask 523264   ;;  %s939_s1 = inlined_call_operand.vmem [shape: bf16[576,128], index: 1, kind: input, shape index: {}]   ;;  %s940_s0 = inlined_call_operand.vmem [shape: bf16[32,576], index: 0, kind: input, shape index: {}]   ;;  %s941_s2 = inlined_call_operand.vmem [shape: f32[32,128], index: 2, kind: output, shape index: {0}]   ;;  %s942_s3 = inlined_call_operand.vmem [shape: f32[8,128], index: 3, kind: output, shape index: {1}]   ;;  %s943_s4 = inlined_call_operand.vmem [shape: f32[8,128], index: 4, kind: output, shape index: {2}]  }
   0x1   :  { %v708_v0 = vld [vmem:[%s939_s1 + $0x40] sm:$0xff]   ;;  %v712_v4 = vld [vmem:[%s939_s1 + $0x48] sm:$0xff]   ;;  %v716_v8 = vld [vmem:[%s939_s1 + $0x50] sm:$0xff]  }
   0x2   :  { %v709_v1 = vld [vmem:[%s939_s1 + $0xc0] sm:$0xff]   ;;  %634 = vmatprep.subr.bf16.mxu0 %v708_v0  ;;  %v713_v5 = vld [vmem:[%s939_s1 + $0xc8] sm:$0xff]   ;;  %v717_v9 = vld [vmem:[%s939_s1 + $0xd0] sm:$0xff]  }
   0x3   :  { %v710_v2 = vld [vmem:[%s939_s1] sm:$0xff]   ;;  %662 = vmatprep.subr.bf16.mxu1 %v709_v1  ;;  %v714_v6 = vld [vmem:[%s939_s1 + $0x8] sm:$0xff]   ;;  %v718_v10 = vld [vmem:[%s939_s1 + $0x10] sm:$0xff]  }
   0x4   :  { %v711_v3 = vld [vmem:[%s939_s1 + $0x80] sm:$0xff]   ;;  %635 = vmatpush3.bf16.msra.mxu0 %v710_v2  ;;  %v715_v7 = vld [vmem:[%s939_s1 + $0x88] sm:$0xff]   ;;  %v719_v11 = vld [vmem:[%s939_s1 + $0x90] sm:$0xff]  }
   0x5   :  { %663 = vmatpush3.bf16.msra.mxu1 %v711_v3  ;;  %636 = vmatprep.subr.bf16.mxu0 %v712_v4  ;;  %v720_v12 = vld [vmem:[%s939_s1 + $0x58] sm:$0xff]   ;;  %v724_v16 = vld [vmem:[%s939_s1 + $0x60] sm:$0xff]   ;;  %v728_v20 = vld [vmem:[%s939_s1 + $0x68] sm:$0xff]  }
   0x6   :  { %664 = vmatprep.subr.bf16.mxu1 %v713_v5  ;;  %v721_v13 = vld [vmem:[%s939_s1 + $0xd8] sm:$0xff]   ;;  %v725_v17 = vld [vmem:[%s939_s1 + $0xe0] sm:$0xff]   ;;  %v729_v21 = vld [vmem:[%s939_s1 + $0xe8] sm:$0xff]  }
   0x7   :  { %v722_v14 = vld [vmem:[%s939_s1 + $0x18] sm:$0xff]   ;;  %v726_v18 = vld [vmem:[%s939_s1 + $0x20] sm:$0xff]   ;;  %v730_v22 = vld [vmem:[%s939_s1 + $0x28] sm:$0xff]  }
   0x8   :  { %637 = vmatpush3.bf16.msra.mxu0 %v714_v6  ;;  %v723_v15 = vld [vmem:[%s939_s1 + $0x98] sm:$0xff]   ;;  %v727_v19 = vld [vmem:[%s939_s1 + $0xa0] sm:$0xff]   ;;  %v731_v23 = vld [vmem:[%s939_s1 + $0xa8] sm:$0xff]  }
   0x9   :  { %665 = vmatpush3.bf16.msra.mxu1 %v715_v7  ;;  %638 = vmatprep.subr.bf16.mxu0 %v716_v8  ;;  %v732_v24 = vld [vmem:[%s939_s1 + $0x70] sm:$0xff]   ;;  %v736_v28 = vld [vmem:[%s939_s1 + $0x78] sm:$0xff]   ;;  %v745_v35 = vld [vmem:[%s940_s0 + $0xc] ss:$20 sps:$4 sm:$0xff]  }
   0xa   :  { %666 = vmatprep.subr.bf16.mxu1 %v717_v9  ;;  %v733_v25 = vld [vmem:[%s939_s1 + $0xf0] sm:$0xff]   ;;  %v737_v29 = vld [vmem:[%s939_s1 + $0xf8] sm:$0xff]   ;;  %v746_v36 = vld [vmem:[%s939_s1 + $0x100] sm:$0xff]   ;;  %465 = vmatprep.mubr.bf16.mxu1 %v745_v35 }
   0xb   :  { %v734_v26 = vld [vmem:[%s939_s1 + $0x30] sm:$0xff]   ;;  %v738_v30 = vld [vmem:[%s939_s1 + $0x38] sm:$0xff]   ;;  %v747_v37 = vld [vmem:[%s939_s1 + $0x108] sm:$0xff]  }
   0xc   :  { %639 = vmatpush3.bf16.msra.mxu0 %v718_v10  ;;  %v735_v27 = vld [vmem:[%s939_s1 + $0xb0] sm:$0xff]   ;;  %v739_v31 = vld [vmem:[%s939_s1 + $0xb8] sm:$0xff]   ;;  %v748_v38 = vld [vmem:[%s940_s0 + $0x2c] ss:$20 sps:$4 sm:$0xff]  }
   0xd   :  { %667 = vmatpush3.bf16.msra.mxu1 %v719_v11  ;;  %640 = vmatprep.subr.bf16.mxu0 %v720_v12  ;;  %v740_v32 = vld [vmem:[%s940_s0] ss:$20 sps:$4 sm:$0xff]   ;;  %v742_v33 = vld [vmem:[%s940_s0 + $0x4] ss:$20 sps:$4 sm:$0xff]   ;;  %v743_v34 = vld [vmem:[%s940_s0 + $0x8] ss:$20 sps:$4 sm:$0xff]  }
   0xe   :  { %668 = vmatprep.subr.bf16.mxu1 %v721_v13  ;;  %416 = vmatprep.mubr.bf16.mxu0 %v742_v33  ;;  %v750_v39 = vld [vmem:[%s940_s0 + $0x34] ss:$20 sps:$4 sm:$0xff]   ;;  %v753_v42 = vld [vmem:[%s940_s0 + $0x30] ss:$20 sps:$4 sm:$0xff]   ;;  %v755_v44 = vld [vmem:[%s939_s1 + $0x118] sm:$0xff]  }
   0xf   :  { %v752_v40 = vld [vmem:[%s940_s0 + $0x28] ss:$20 sps:$4 sm:$0xff]   ;;  %v754_v41 = vld [vmem:[%s939_s1 + $0x110] sm:$0xff]   ;;  %v757_v45 = vld [vmem:[%s940_s0 + $0x38] ss:$20 sps:$4 sm:$0xff]  }
  0x10   :  { %641 = vmatpush3.bf16.msra.mxu0 %v722_v14  ;;  %v756_v43 = vld [vmem:[%s940_s0 + $0x10] ss:$20 sps:$4 sm:$0xff]  }
  0x11   :  { %669 = vmatpush3.bf16.msra.mxu1 %v723_v15  ;;  %642 = vmatprep.subr.bf16.mxu0 %v724_v16 }
  0x12   :  { %670 = vmatprep.subr.bf16.mxu1 %v725_v17 }
  0x14   :  { %643 = vmatpush3.bf16.msra.mxu0 %v726_v18 }
  0x15   :  { %671 = vmatpush3.bf16.msra.mxu1 %v727_v19  ;;  %644 = vmatprep.subr.bf16.mxu0 %v728_v20 }
  0x16   :  { %672 = vmatprep.subr.bf16.mxu1 %v729_v21 }
  0x18   :  { %645 = vmatpush3.bf16.msra.mxu0 %v730_v22 }
  0x19   :  { %673 = vmatpush3.bf16.msra.mxu1 %v731_v23  ;;  %646 = vmatprep.subr.bf16.mxu0 %v732_v24 }
  0x1a   :  { %674 = vmatprep.subr.bf16.mxu1 %v733_v25 }
  0x1c   :  { %647 = vmatpush3.bf16.msra.mxu0 %v734_v26 }
  0x1d   :  { %675 = vmatpush3.bf16.msra.mxu1 %v735_v27  ;;  %648 = vmatprep.subr.bf16.mxu0 %v736_v28 }
  0x1e   :  { %676 = vmatprep.subr.bf16.mxu1 %v737_v29 }
  0x20   :  { %649 = vmatpush3.bf16.msra.mxu0 %v738_v30 }
  0x21   :  { %677 = vmatpush3.bf16.msra.mxu1 %v739_v31  ;;  %696 = vmatprep.subr.bf16.mxu0 %v746_v36 }
  0x23   :  { %417 = vmatmul.mubr.bf16.vlgmr.msra.gmra.mrb[0].mxu0 %v740_v32 }
  0x24   :  { %466 = vmatmul.mubr.bf16.vlgmr.msra.gmra.mrb[0].mxu1 %v743_v34  ;;  %697 = vmatpush3.bf16.msra.mxu0 %v746_v36 }
  0x25   :  { %698 = vmatprep.subr.bf16.mxu0 %v747_v37  ;;  %424 = vmatprep.mubr.bf16.mxu0 %v748_v38 }
  0x26   :  { %473 = vmatprep.mubr.bf16.mxu1 %v750_v39 }
  0x28   :  { %699 = vmatpush3.bf16.msra.mxu0 %v747_v37 }
  0x29   :  { %700 = vmatprep.subr.bf16.mxu0 %v754_v41 }
  0x2b   :  { %425 = vmatmul.mubr.bf16.gmra.mrb[4].mxu0 %v752_v40 }
  0x2c   :  { %474 = vmatmul.mubr.bf16.gmra.mrb[4].mxu1 %v753_v42  ;;  %704 = vmatprep.mubr.msk.bf16.mxu0 %vm377_vm0, %v756_v43 }
  0x2d   :  { %701 = vmatpush3.bf16.msra.mxu0 %v754_v41 }
  0x2e   :  { %702 = vmatprep.subr.bf16.mxu0 %v755_v44 }
  0x31   :  { %703 = vmatpush3.bf16.msra.mxu0 %v755_v44 }
  0x34   :  { %705 = vmatmul.mubr.msk.bf16.vlgmr.msra.gmra.mrb[8].mxu0 %vm377_vm0, %v757_v45 }
  0xf6   :  { %v650_v46 = vpop.f32.mrb[0].mxu0 }
  0xf7   :  { %v678_v47 = vpop.f32.mrb[0].mxu1  ;;  %v651_v48 = vpop.f32.mrb[1].mxu0 }
  0xf8   :  { %v652_v49 = vadd.f32 %v651_v48, %v650_v46  ;;  %v679_v50 = vpop.f32.mrb[1].mxu1  ;;  %v653_v51 = vpop.f32.mrb[2].mxu0 }
  0xf9   :  { %v680_v52 = vadd.f32 %v679_v50, %v678_v47  ;;  %v681_v53 = vpop.f32.mrb[2].mxu1  ;;  %v654_v54 = vpop.f32.mrb[3].mxu0 }
  0xfa   :  { %v655_v55 = vadd.f32 %v654_v54, %v653_v51  ;;  %v682_v56 = vpop.f32.mrb[3].mxu1 }
  0xfb   :  { %v683_v57 = vadd.f32 %v682_v56, %v681_v53  ;;  %v468_v58 = vadd.f32 %v680_v52, %v652_v49 }
  0xfd   :  { %v471_v59 = vadd.f32 %v683_v57, %v655_v55 }
  0xfe   :  { %v656_v60 = vpop.f32.mrb[4].mxu0 }
  0xff   :  { %v684_v61 = vpop.f32.mrb[4].mxu1  ;;  %v657_v62 = vpop.f32.mrb[5].mxu0 }
 0x100   :  { %v658_v63 = vadd.f32 %v657_v62, %v656_v60  ;;  %v685_v0 = vpop.f32.mrb[5].mxu1  ;;  %v659_v1 = vpop.f32.mrb[6].mxu0 }
 0x101   :  { %v686_v2 = vadd.f32 %v685_v0, %v684_v61  ;;  %v687_v3 = vpop.f32.mrb[6].mxu1  ;;  %v660_v4 = vpop.f32.mrb[7].mxu0 }
 0x102   :  { %v661_v5 = vadd.f32 %v660_v4, %v659_v1  ;;  %v688_v6 = vpop.f32.mrb[7].mxu1 }
 0x103   :  { %v689_v7 = vadd.f32 %v688_v6, %v687_v3  ;;  %v476_v8 = vadd.f32 %v686_v2, %v658_v63 }
 0x105   :  { %v479_v9 = vadd.f32 %v689_v7, %v661_v5 }
 0x107   :  { %v706_v10 = vpop.f32.mrb[8].mxu0 }
 0x108   :  { %v525_v11 = vadd.f32 %v706_v10, %v476_v8  ;;  %v516_v12 = vpop.f32.mrb[9].mxu0 }
 0x109   :  { %v517_v13 = vadd.f32 %v516_v12, %v468_v58  ;;  %v707_v14 = vpop.f32.mrb[10].mxu0 }
 0x10a   :  { %548 = vst [vmem:[%s941_s2 + $0x10] sm:$0xff] %v525_v11  ;;  %v528_v15 = vadd.f32 %v707_v14, %v479_v9  ;;  %v519_v16 = vpop.f32.mrb[11].mxu0  ;;  %v562_v21 = vmul.f32 %v525_v11, %v525_v11 }
 0x10b   :  { %546 = vst [vmem:[%s941_s2] sm:$0xff] %v517_v13  ;;  %v520_v17 = vadd.f32 %v519_v16, %v471_v59  ;;  %v560_v18 = vmul.f32 %v517_v13, %v517_v13 }
 0x10c   :  { %549 = vst [vmem:[%s941_s2 + $0x18] sm:$0xff] %v528_v15  ;;  %v563_v24 = vmul.f32 %v528_v15, %v528_v15 }
 0x10d   :  { %547 = vst [vmem:[%s941_s2 + $0x8] sm:$0xff] %v520_v17  ;;  %v550_v19 = vadd.f32 %v520_v17, %v517_v13  ;;  %v561_v20 = vmul.f32 %v520_v17, %v520_v17 }
 0x10f   :  { %v551_v22 = vadd.f32 %v550_v19, %v525_v11  ;;  %v564_v23 = vadd.f32 %v561_v20, %v560_v18 }
 0x111   :  { %v552_v25 = vadd.f32 %v551_v22, %v528_v15  ;;  %v565_v26 = vadd.f32 %v564_v23, %v562_v21 }
 0x113   :  { %v553_v27 = vrot.slane %v552_v25, 4  ;;  %v566_v28 = vadd.f32 %v565_v26, %v563_v24 }
 0x115   :  { %v554_v29 = vadd.f32 %v553_v27, %v552_v25  ;;  %v567_v30 = vrot.slane %v566_v28, 4 }
 0x117   :  { %v555_v31 = vrot.slane %v554_v29, 2  ;;  %v568_v32 = vadd.f32 %v567_v30, %v566_v28 }
 0x119   :  { %v556_v33 = vadd.f32 %v555_v31, %v554_v29  ;;  %v569_v34 = vrot.slane %v568_v32, 2 }
 0x11b   :  { %v557_v35 = vrot.slane %v556_v33, 1  ;;  %v570_v36 = vadd.f32 %v569_v34, %v568_v32 }
 0x11d   :  { %v558_v37 = vadd.f32 %v557_v35, %v556_v33  ;;  %v571_v38 = vrot.slane %v570_v36, 1 }
 0x11f   :  { %559 = vst [vmem:[%s942_s3] sm:$0xff] %v558_v37  ;;  %v572_v39 = vadd.f32 %v571_v38, %v570_v36 }
 0x121   :  { %573 = vst [vmem:[%s943_s4] sm:$0xff] %v572_v39 }

// kernel: resnet18_forward.59
= control target key start
LH: loop header
LB: loop body
LE: loop exit
PB: predicated region body
PF: predicated region fallthrough
CT: control target
= control target key end

     0   :  { %s132_s0 = inlined_call_operand.vmem [shape: f32[32,128], index: 0, kind: input, shape index: {}]   ;;  %s133_s1 = inlined_call_operand.vmem [shape: f32[1,128], index: 1, kind: input, shape index: {}]   ;;  %s134_s2 = inlined_call_operand.vmem [shape: f32[1,128], index: 2, kind: input, shape index: {}]   ;;  %s135_s3 = inlined_call_operand.vmem [shape: f32[32,128], index: 3, kind: input, shape index: {}]   ;;  %s136_s4 = inlined_call_operand.vmem [shape: f32[32,128], index: 4, kind: output, shape index: {}]  }
   0x1   :  { %v17_v0 = vld [vmem:[%s132_s0] sm:$0xff]  ;;  %v18_v4 = vld [vmem:[%s132_s0 + $0x8] sm:$0xff]  ;;  %v19_v7 = vld [vmem:[%s132_s0 + $0x10] sm:$0xff] }
   0x2   :  { %v63_v1 = vld [vmem:[%s133_s1] ss:$0 sm:$0xff]  ;;  %v20_v8 = vld [vmem:[%s132_s0 + $0x18] sm:$0xff]  ;;  %v44_v10 = vld [vmem:[%s135_s3 + $0x8] sm:$0xff] }
   0x3   :  { %v64_v2 = vld [vmem:[%s134_s2] ss:$0 sm:$0xff]  ;;  %v28_v3 = vmul.f32 %v63_v1, %v17_v0  ;;  %v29_v6 = vmul.f32 %v63_v1, %v18_v4  ;;  %v30_v11 = vmul.f32 %v63_v1, %v19_v7  ;;  %v31_v12 = vmul.f32 %v63_v1, %v20_v8  ;;  %v45_v14 = vld [vmem:[%s135_s3 + $0x10] sm:$0xff]  ;;  %v46_v15 = vld [vmem:[%s135_s3 + $0x18] sm:$0xff] }
   0x4   :  { %v43_v5 = vld [vmem:[%s135_s3] sm:$0xff] }
   0x5   :  { %v39_v9 = vadd.f32 %v64_v2, %v28_v3  ;;  %v40_v13 = vadd.f32 %v64_v2, %v29_v6  ;;  %v41_v17 = vadd.f32 %v64_v2, %v30_v11  ;;  %v42_v18 = vadd.f32 %v64_v2, %v31_v12 }
   0x7   :  { %v47_v16 = vadd.f32 %v43_v5, %v39_v9  ;;  %v48_v19 = vadd.f32 %v44_v10, %v40_v13  ;;  %v49_v21 = vadd.f32 %v45_v14, %v41_v17  ;;  %v50_v22 = vadd.f32 %v46_v15, %v42_v18 }
   0x9   :  { %v51_v20 = vmax.f32 %v47_v16, 0.0  ;;  %v52_v23 = vmax.f32 %v48_v19, 0.0  ;;  %v53_v24 = vmax.f32 %v49_v21, 0.0  ;;  %v54_v25 = vmax.f32 %v50_v22, 0.0 }
   0xb   :  { %55 = vst [vmem:[%s136_s4] sm:$0xff] %v51_v20  ;;  %56 = vst [vmem:[%s136_s4 + $0x8] sm:$0xff] %v52_v23 }
   0xc   :  { %57 = vst [vmem:[%s136_s4 + $0x10] sm:$0xff] %v53_v24  ;;  %58 = vst [vmem:[%s136_s4 + $0x18] sm:$0xff] %v54_v25 }

// kernel: resnet18_forward.58
= control target key start
LH: loop header
LB: loop body
LE: loop exit
PB: predicated region body
PF: predicated region fallthrough
CT: control target
= control target key end

     0   :  { %s1164_s15 = smov 0   ;;  %s1166_s16 = smov 0   ;;  %s1283_s0 = inlined_call_operand.vmem [shape: bf16[32,1152], index: 0, kind: input, shape index: {}]   ;;  %s1284_s1 = inlined_call_operand.vmem [shape: bf16[1152,128], index: 1, kind: input, shape index: {}]   ;;  %s1285_s2 = inlined_call_operand.vmem [shape: f32[32,128], index: 2, kind: output, shape index: {0}]   ;;  %s1286_s3 = inlined_call_operand.vmem [shape: f32[8,128], index: 3, kind: output, shape index: {1}]   ;;  %s1287_s4 = inlined_call_operand.vmem [shape: f32[8,128], index: 4, kind: output, shape index: {2}]  }
   0x1   :  { %s1168_s17 = smov 0   ;;  %s1170_s18 = smov 0  }
   0x2   :  { %s1172_s19 = smov 0  }
   0x3 LB: > { %s27_s20 = sadd.s32 1, %s1132_s18  ;;  %p50_p1 = scmp.ne.s32.totalorder %s1124_s16, %s1120_s15  ;;  %s1136_s19 = sphi %s1172_s19, %s15_s19   ;;  %s1132_s18 = sphi %s1170_s18, %s1291_s18   ;;  %s1128_s17 = sphi %s1168_s17, %s1290_s17   ;;  %s1124_s16 = sphi %s1166_s16, %s1289_s16   ;;  %s1120_s15 = sphi %s1164_s15, %s1288_s15  }
   0x4   : > { %p28_p0 = scmp.ge.s32.totalorder %s27_s20, 3  ;;  %p51_p2 = scmp.eq.s32.totalorder %s1136_s19, 0 }
   0x5   : > { %s43_s22 = sadd.s32 1, %s1124_s16  ;;  %p914_p5 = scmp.ge.s32.totalorder %s1136_s19, 3 }
   0x6   : > { %s1293_s20 = smov (%p28_p0, %s27_s20), 0  ;;  %p52_p3 = por %p51_p2, %p50_p1 }
   0x7   : > { %s39_s21 = ssub.s32 %s1132_s18, %s1293_s20  ;;  %188 = sbr.rel (%p914_p5) target bundleno = 23 (0x17), region = 16 }
   0x8   : > { %p41_p4 = scmp.eq.s32.totalorder %s39_s21, 0 }
   0xa   : > { %s1199_s23 = scalar_select %p41_p4, %s1124_s16, %s43_s22  }
   0xe   : > { %191 = sbr.rel (!%p52_p3) target bundleno = 23 (0x17), region = 20  ;;  %s193_s24 = sand.u32 (%p52_p3), 1, %s1124_s16  }
   0xf   : > { %s964_s25 = smul.u32 (%p52_p3), 12, %s1132_s18 }
  0x10   : > { %s1023_s26 = smul.u32 (%p52_p3), 48, %s193_s24 }
  0x11   : > { %s201_s29 = scalar_lea.vmem (%p52_p3), %s1283_s0, %s964_s25 }
  0x12   : > { %v216_v0 = vld [vmem:[%s201_s29] sm:$0xff] (%p52_p3)  ;;  %v220_v2 = vld [vmem:[%s201_s29 + $0x48] sm:$0xff] (%p52_p3)  ;;  %s195_s30 = scalar_lea.vmem (%p52_p3), [#allocation3], %s1023_s26  ;;  %v920_v6 = vld [vmem:[%s201_s29 + $0x50] sm:$0xf] (%p52_p3) }
  0x13   : > { %v218_v1 = vld [vmem:[%s201_s29 + $0x24] sm:$0xff] (%p52_p3)  ;;  %217 = vst [vmem:[%s195_s30] sm:$0xff] (%p52_p3), %v216_v0  ;;  %221 = vst [vmem:[%s195_s30 + $0x18] sm:$0xff] (%p52_p3), %v220_v2  ;;  %v222_v3 = vld [vmem:[%s201_s29 + $0x6c] sm:$0xff] (%p52_p3) }
  0x14   : > { %219 = vst [vmem:[%s195_s30 + $0xc] sm:$0xff] (%p52_p3), %v218_v1  ;;  %v916_v4 = vld [vmem:[%s201_s29 + $0x8] sm:$0xf] (%p52_p3)  ;;  %v918_v5 = vld [vmem:[%s201_s29 + $0x2c] sm:$0xf] (%p52_p3)  ;;  %223 = vst [vmem:[%s195_s30 + $0x24] sm:$0xff] (%p52_p3), %v222_v3 }
  0x15   : > { %917 = vst [vmem:[%s195_s30 + $0x8] sm:$0xf] %v916_v4  ;;  %919 = vst [vmem:[%s195_s30 + $0x14] sm:$0xf] %v918_v5  ;;  %v922_v7 = vld [vmem:[%s201_s29 + $0x74] sm:$0xf] }
  0x16   : > { %921 = vst [vmem:[%s195_s30 + $0x20] sm:$0xf] %v920_v6  ;;  %923 = vst [vmem:[%s195_s30 + $0x2c] sm:$0xf] %v922_v7 }
  0x17 PF: > { %p924_p6 = scmp.ge.s32.totalorder %s1136_s19, 1  ;;  %p255_p7 = scmp.lt.s32.totalorder %s1136_s19, 4 }
  0x19   : > { %p256_p8 = pnand %p924_p6, %p255_p7 }
  0x1a   : > { %s262_s5 = sand.u32 (!%p256_p8), 1, %s1120_s15   ;;  %s314_s6 = smul.u32 (!%p256_p8), 48, %s1128_s17 }
  0x1b   : > { %259 = sbr.rel (%p256_p8) target bundleno = 328 (0x148), region = 50  ;;  %p926_p10 = scmp.ne.s32.totalorder (!%p256_p8), %s1128_s17, 0 }
  0x1c   : > { %s1024_s7 = smul.u32 (!%p256_p8), 48, %s262_s5  ;;  %p315_p9 = scmp.lt.s32.totalorder (!%p256_p8), %s314_s6, 143 }
  0x1e   : > { %s1216_s12 = scalar_lea.vmem (!%p256_p8), [#allocation3], %s1024_s7 }
  0x22   : > { %s1295_s6 = smov (!%p315_p9, %s314_s6), 143  ;;  %350 = sbr.rel (%p926_p10) target bundleno = 41 (0x29), region = 58 }
  0x23   : > { %s925_s8 = sshll.u32 %s1295_s6, 2  ;;  %v1138_v8 = vmov (!%p926_p10), 0.0  }
  0x24   : > { %s1214_s11 = scalar_lea.vmem %s1284_s1, %s925_s8  ;;  %351 = vst [vmem:[#allocation2] sm:$0xff] (!%p926_p10), %v1138_v8  ;;  %352 = vst [vmem:[#allocation2 + $0x8] sm:$0xff] (!%p926_p10), %v1138_v8 }
  0x25   : > { %353 = vst [vmem:[#allocation2 + $0x10] sm:$0xff] (!%p926_p10), %v1138_v8  ;;  %354 = vst [vmem:[#allocation2 + $0x18] sm:$0xff] (!%p926_p10), %v1138_v8 }
  0x29 PF: > { %v1066_v9 = vld [vmem:[%s1214_s11 + $0x40] sm:$0xff]   ;;  %v1069_v12 = vld [vmem:[%s1214_s11 + $0x48] sm:$0xff]   ;;  %v1072_v15 = vld [vmem:[%s1214_s11 + $0x50] sm:$0xff]   ;;  %p957_p11 = scmp.ne.s32.totalorder %s1128_s17, 2 }
  0x2a   : > { %v1067_v10 = vld [vmem:[%s1214_s11] sm:$0xff]   ;;  %965 = vmatprep.subr.bf16.mxu0 %v1066_v9  ;;  %v1070_v13 = vld [vmem:[%s1214_s11 + $0x8] sm:$0xff]   ;;  %v1073_v16 = vld [vmem:[%s1214_s11 + $0x10] sm:$0xff]  }
  0x2b   : > { %v1068_v11 = vld [vmem:[%s1214_s11 + $0x80] sm:$0xff]   ;;  %966 = vmatpush3.bf16.msra.mxu0 %v1067_v10  ;;  %v1071_v14 = vld [vmem:[%s1214_s11 + $0x88] sm:$0xff]   ;;  %v1074_v17 = vld [vmem:[%s1214_s11 + $0x90] sm:$0xff]  }
  0x2c   : > { %1003 = vmatprep.subr.bf16.mxu1 %v1068_v11  ;;  %967 = vmatprep.subr.bf16.mxu0 %v1069_v12  ;;  %v1075_v18 = vld [vmem:[%s1214_s11 + $0x58] sm:$0xff]   ;;  %v1078_v21 = vld [vmem:[%s1214_s11 + $0x60] sm:$0xff]   ;;  %v1081_v24 = vld [vmem:[%s1214_s11 + $0x68] sm:$0xff]  }
  0x2d   : > { %1004 = vmatpush3.bf16.msra.mxu1 %v1068_v11  ;;  %v1076_v19 = vld [vmem:[%s1214_s11 + $0x18] sm:$0xff]   ;;  %v1080_v22 = vld [vmem:[%s1214_s11 + $0xa0] sm:$0xff]   ;;  %v1083_v25 = vld [vmem:[%s1214_s11 + $0xa8] sm:$0xff]  }
  0x2e   : > { %1005 = vmatprep.subr.bf16.mxu1 %v1071_v14  ;;  %v1077_v20 = vld [vmem:[%s1214_s11 + $0x98] sm:$0xff]   ;;  %v1079_v23 = vld [vmem:[%s1214_s11 + $0x20] sm:$0xff]   ;;  %v1082_v26 = vld [vmem:[%s1214_s11 + $0x28] sm:$0xff]  }
  0x2f   : > { %968 = vmatpush3.bf16.msra.mxu0 %v1070_v13  ;;  %v1084_v27 = vld [vmem:[%s1214_s11 + $0x70] sm:$0xff]   ;;  %v1087_v30 = vld [vmem:[%s1214_s11 + $0x78] sm:$0xff]   ;;  %v355_v45 = vld [vmem:[#allocation2] sm:$0xff] }
  0x30   : > { %969 = vmatprep.subr.bf16.mxu0 %v1072_v15  ;;  %v1085_v28 = vld [vmem:[%s1214_s11 + $0x30] sm:$0xff]   ;;  %v1089_v31 = vld [vmem:[%s1214_s11 + $0xb8] sm:$0xff]   ;;  %v356_v50 = vld [vmem:[#allocation2 + $0x8] sm:$0xff] }
  0x31   : > { %1006 = vmatpush3.bf16.msra.mxu1 %v1071_v14  ;;  %v1086_v29 = vld [vmem:[%s1214_s11 + $0xb0] sm:$0xff]   ;;  %v1088_v34 = vld [vmem:[%s1214_s11 + $0x38] sm:$0xff]  }
  0x32   : > { %1007 = vmatprep.subr.bf16.mxu1 %v1074_v17  ;;  %v1092_v32 = vld [vmem:[%s1216_s12 + $0x4] ss:$12 sps:$4 sm:$0xff]   ;;  %v1093_v33 = vld [vmem:[%s1216_s12 + $0x8] ss:$12 sps:$4 sm:$0xff]   ;;  %v1090_v35 = vld [vmem:[%s1216_s12] ss:$12 sps:$4 sm:$0xff]  }
  0x33   : > { %970 = vmatpush3.bf16.msra.mxu0 %v1073_v16  ;;  %623 = vmatprep.mubr.bf16.mxu0 %v1092_v32  ;;  %v1095_v36 = vld [vmem:[%s1216_s12 + $0x1c] ss:$12 sps:$4 sm:$0xff]   ;;  %v1094_v37 = vld [vmem:[%s1216_s12 + $0x20] ss:$12 sps:$4 sm:$0xff]   ;;  %v1097_v38 = vld [vmem:[%s1216_s12 + $0x18] ss:$12 sps:$4 sm:$0xff]  }
  0x34   : > { %971 = vmatprep.subr.bf16.mxu0 %v1075_v18  ;;  %1019 = vmatprep.mubr.bf16.mxu1 %v1093_v33  ;;  %v357_v59 = vld [vmem:[#allocation2 + $0x10] sm:$0xff]  ;;  %v358_v63 = vld [vmem:[#allocation2 + $0x18] sm:$0xff] }
  0x35   : > { %1008 = vmatpush3.bf16.msra.mxu1 %v1074_v17 }
  0x36   : > { %1009 = vmatprep.subr.bf16.mxu1 %v1077_v20 }
  0x37   : > { %972 = vmatpush3.bf16.msra.mxu0 %v1076_v19 }
  0x38   : > { %973 = vmatprep.subr.bf16.mxu0 %v1078_v21 }
  0x39   : > { %1010 = vmatpush3.bf16.msra.mxu1 %v1077_v20 }
  0x3a   : > { %1011 = vmatprep.subr.bf16.mxu1 %v1080_v22 }
  0x3b   : > { %974 = vmatpush3.bf16.msra.mxu0 %v1079_v23 }
  0x3c   : > { %975 = vmatprep.subr.bf16.mxu0 %v1081_v24 }
  0x3d   : > { %1012 = vmatpush3.bf16.msra.mxu1 %v1080_v22 }
  0x3e   : > { %1013 = vmatprep.subr.bf16.mxu1 %v1083_v25 }
  0x3f   : > { %976 = vmatpush3.bf16.msra.mxu0 %v1082_v26 }
  0x40   : > { %977 = vmatprep.subr.bf16.mxu0 %v1084_v27 }
  0x41   : > { %1014 = vmatpush3.bf16.msra.mxu1 %v1083_v25 }
  0x42   : > { %1015 = vmatprep.subr.bf16.mxu1 %v1086_v29 }
  0x43   : > { %978 = vmatpush3.bf16.msra.mxu0 %v1085_v28 }
  0x44   : > { %979 = vmatprep.subr.bf16.mxu0 %v1087_v30 }
  0x45   : > { %1016 = vmatpush3.bf16.msra.mxu1 %v1086_v29 }
  0x46   : > { %1017 = vmatprep.subr.bf16.mxu1 %v1089_v31 }
  0x47   : > { %980 = vmatpush3.bf16.msra.mxu0 %v1088_v34 }
  0x49   : > { %1018 = vmatpush3.bf16.msra.mxu1 %v1089_v31 }
  0x4a   : > { %624 = vmatmul.mubr.bf16.vlgmr.msra.gmra.mrb[0].mxu0 %v1090_v35 }
  0x4b   : > { %631 = vmatprep.mubr.bf16.mxu0 %v1095_v36 }
  0x4c   : > { %1020 = vmatmul.mubr.bf16.vlgmr.msra.gmra.mrb[0].mxu1 %v1094_v37 }
  0x52   : > { %632 = vmatmul.mubr.bf16.gmra.mrb[4].mxu0 %v1097_v38 }
 0x11d   : > { %v981_v39 = vpop.f32.mrb[0].mxu0 }
 0x11e   : > { %v982_v40 = vpop.f32.mrb[1].mxu0 }
 0x11f   : > { %v983_v41 = vadd.f32 %v982_v40, %v981_v39  ;;  %v984_v42 = vpop.f32.mrb[2].mxu0  ;;  %v1021_v43 = vpop.f32.mrb[0].mxu1 }
 0x120   : > { %v985_v44 = vpop.f32.mrb[3].mxu0  ;;  %v674_v46 = vpop.f32.mrb[1].mxu1 }
 0x121   : > { %v986_v47 = vadd.f32 %v985_v44, %v984_v42  ;;  %v675_v48 = vadd.f32 %v983_v41, %v674_v46  ;;  %v1022_v49 = vpop.f32.mrb[2].mxu1 }
 0x122   : > { %v677_v51 = vpop.f32.mrb[3].mxu1 }
 0x123   : > { %v689_v52 = vadd.f32 %v675_v48, %v355_v45  ;;  %v678_v53 = vadd.f32 %v986_v47, %v677_v51 }
 0x125   : > { %693 = vst [vmem:[#allocation2] sm:$0xff] %v689_v52  ;;  %v690_v54 = vadd.f32 %v678_v53, %v356_v50  ;;  %v987_v55 = vpop.f32.mrb[4].mxu0 }
 0x126   : > { %v988_v56 = vpop.f32.mrb[5].mxu0 }
 0x127   : > { %694 = vst [vmem:[#allocation2 + $0x8] sm:$0xff] %v690_v54  ;;  %v989_v57 = vadd.f32 %v988_v56, %v987_v55  ;;  %v990_v58 = vpop.f32.mrb[6].mxu0 }
 0x128   : > { %v991_v60 = vpop.f32.mrb[7].mxu0 }
 0x129   : > { %v683_v61 = vadd.f32 %v1021_v43, %v989_v57  ;;  %v992_v62 = vadd.f32 %v991_v60, %v990_v58  ;;  %700 = sbr.rel (%p957_p11) target bundleno = 328 (0x148), region = 62 }
 0x12b   : > { %v691_v0 = vadd.f32 %v683_v61, %v357_v59  ;;  %v686_v1 = vadd.f32 %v1022_v49, %v992_v62 }
 0x12c   : > { %v701_v3 = vld [vmem:[#allocation2] sm:$0xff] (!%p957_p11) }
 0x12d   : > { %695 = vst [vmem:[#allocation2 + $0x10] sm:$0xff] %v691_v0  ;;  %v692_v2 = vadd.f32 %v686_v1, %v358_v63  ;;  %705 = vst [vmem:[%s1285_s2] sm:$0xff] (!%p957_p11), %v701_v3  ;;  %v719_v6 = vmul.f32 (!%p957_p11), %v701_v3, %v701_v3 }
 0x12e   : > { %v702_v4 = vld [vmem:[#allocation2 + $0x8] sm:$0xff] (!%p957_p11) }
 0x12f   : > { %696 = vst [vmem:[#allocation2 + $0x18] sm:$0xff] %v692_v2  ;;  %706 = vst [vmem:[%s1285_s2 + $0x8] sm:$0xff] (!%p957_p11), %v702_v4  ;;  %v709_v7 = vadd.f32 (!%p957_p11), %v702_v4, %v701_v3  ;;  %v720_v8 = vmul.f32 (!%p957_p11), %v702_v4, %v702_v4 }
 0x131   : > { %v723_v11 = vadd.f32 %v720_v8, %v719_v6 }
 0x134   : > { %v703_v5 = vld [vmem:[#allocation2 + $0x10] sm:$0xff] }
 0x135   : > { %707 = vst [vmem:[%s1285_s2 + $0x10] sm:$0xff] %v703_v5  ;;  %v721_v9 = vmul.f32 %v703_v5, %v703_v5  ;;  %v710_v12 = vadd.f32 %v709_v7, %v703_v5 }
 0x136   : > { %v704_v10 = vld [vmem:[#allocation2 + $0x18] sm:$0xff] }
 0x137   : > { %708 = vst [vmem:[%s1285_s2 + $0x18] sm:$0xff] %v704_v10  ;;  %v722_v13 = vmul.f32 %v704_v10, %v704_v10  ;;  %v724_v14 = vadd.f32 %v723_v11, %v721_v9  ;;  %v711_v15 = vadd.f32 %v710_v12, %v704_v10 }
 0x139   : > { %v712_v16 = vrot.slane %v711_v15, 4  ;;  %v725_v17 = vadd.f32 %v724_v14, %v722_v13 }
 0x13b   : > { %v713_v18 = vadd.f32 %v712_v16, %v711_v15  ;;  %v726_v19 = vrot.slane %v725_v17, 4 }
 0x13d   : > { %v714_v20 = vrot.slane %v713_v18, 2  ;;  %v727_v21 = vadd.f32 %v726_v19, %v725_v17 }
 0x13f   : > { %v715_v22 = vadd.f32 %v714_v20, %v713_v18  ;;  %v728_v23 = vrot.slane %v727_v21, 2 }
 0x141   : > { %v716_v24 = vrot.slane %v715_v22, 1  ;;  %v729_v25 = vadd.f32 %v728_v23, %v727_v21 }
 0x143   : > { %v717_v26 = vadd.f32 %v716_v24, %v715_v22  ;;  %v730_v27 = vrot.slane %v729_v25, 1 }
 0x145   : > { %718 = vst [vmem:[%s1286_s3] sm:$0xff] %v717_v26  ;;  %v731_v28 = vadd.f32 %v730_v27, %v729_v25 }
 0x147   : > { %732 = vst [vmem:[%s1287_s4] sm:$0xff] %v731_v28 }
 0x148 PF: > { %s15_s19 = sadd.s32 1, %s1136_s19   ;;  %s1288_s15 = smov %s1124_s16 }
 0x149   : > { %p12_p12 = scmp.ge.s32.totalorder %s15_s19, 5   ;;  %s1289_s16 = smov %s1199_s23 }
 0x14a   : > { %s1290_s17 = smov %s1132_s18  ;;  %s1291_s18 = smov %s1293_s20 }
 0x14b   :  { %14 = sbr.rel (!%p12_p12) target bundleno = 3 (0x3), region = 130 }

// kernel: resnet18_forward.66
= control target key start
LH: loop header
LB: loop body
LE: loop exit
PB: predicated region body
PF: predicated region fallthrough
CT: control target
= control target key end

     0   :  { %v255_v1 = vmov 0   ;;  %s350_s1 = inlined_call_operand.vmem [shape: bf16[128,256], index: 1, kind: input, shape index: {}]   ;;  %s351_s0 = inlined_call_operand.vmem [shape: bf16[8,128], index: 0, kind: input, shape index: {}]   ;;  %s352_s2 = inlined_call_operand.vmem [shape: f32[8,256], index: 2, kind: output, shape index: {0}]   ;;  %s353_s3 = inlined_call_operand.vmem [shape: f32[8,256], index: 3, kind: output, shape index: {1}]   ;;  %s354_s4 = inlined_call_operand.vmem [shape: f32[8,256], index: 4, kind: output, shape index: {2}]  }
   0x1   :  { %v231_v0 = vld [vmem:[%s350_s1 + $0x4] ss:$8 sps:$4 sm:$0xff]   ;;  %152 = vmatprep.mubr.bf16.mxu0 %v255_v1  ;;  %v233_v2 = vld [vmem:[%s350_s1] ss:$8 sps:$4 sm:$0xff]   ;;  %v234_v3 = vld [vmem:[%s350_s1 + $0x14] ss:$8 sps:$4 sm:$0xff]  }
   0x2   :  { %120 = vmatprep.subr.bf16.mxu0 %v231_v0  ;;  %v236_v4 = vld [vmem:[%s350_s1 + $0x10] ss:$8 sps:$4 sm:$0xff]   ;;  %v237_v5 = vld [vmem:[%s350_s1 + $0x24] ss:$8 sps:$4 sm:$0xff]   ;;  %v239_v6 = vld [vmem:[%s350_s1 + $0x20] ss:$8 sps:$4 sm:$0xff]  }
   0x3   :  { %121 = vmatpush1.bf16.msra.mxu0 %v233_v2  ;;  %v240_v7 = vld [vmem:[%s350_s1 + $0x34] ss:$8 sps:$4 sm:$0xff]   ;;  %v242_v8 = vld [vmem:[%s350_s1 + $0x30] ss:$8 sps:$4 sm:$0xff]   ;;  %v243_v9 = vld [vmem:[%s350_s1 + $0x44] ss:$8 sps:$4 sm:$0xff]  }
   0x4   :  { %122 = vmatprep.subr.bf16.mxu0 %v234_v3  ;;  %v245_v10 = vld [vmem:[%s350_s1 + $0x40] ss:$8 sps:$4 sm:$0xff]   ;;  %v246_v11 = vld [vmem:[%s350_s1 + $0x54] ss:$8 sps:$4 sm:$0xff]   ;;  %v248_v12 = vld [vmem:[%s350_s1 + $0x50] ss:$8 sps:$4 sm:$0xff]  }
   0x5   :  { %v249_v13 = vld [vmem:[%s350_s1 + $0x64] ss:$8 sps:$4 sm:$0xff]   ;;  %v251_v14 = vld [vmem:[%s350_s1 + $0x60] ss:$8 sps:$4 sm:$0xff]   ;;  %v252_v15 = vld [vmem:[%s350_s1 + $0x74] ss:$8 sps:$4 sm:$0xff]  }
   0x6   :  { %v254_v16 = vld [vmem:[%s350_s1 + $0x70] ss:$8 sps:$4 sm:$0xff]   ;;  %v23_v17 = vld [vmem:[%s351_s0] sm:$0xf] }
   0x7   :  { %123 = vmatpush1.bf16.msra.mxu0 %v236_v4 }
   0x8   :  { %124 = vmatprep.subr.bf16.mxu0 %v237_v5 }
   0xb   :  { %125 = vmatpush1.bf16.msra.mxu0 %v239_v6 }
   0xc   :  { %126 = vmatprep.subr.bf16.mxu0 %v240_v7 }
   0xf   :  { %127 = vmatpush1.bf16.msra.mxu0 %v242_v8 }
  0x10   :  { %128 = vmatprep.subr.bf16.mxu0 %v243_v9 }
  0x13   :  { %129 = vmatpush1.bf16.msra.mxu0 %v245_v10 }
  0x14   :  { %130 = vmatprep.subr.bf16.mxu0 %v246_v11 }
  0x17   :  { %131 = vmatpush1.bf16.msra.mxu0 %v248_v12 }
  0x18   :  { %132 = vmatprep.subr.bf16.mxu0 %v249_v13 }
  0x1b   :  { %133 = vmatpush1.bf16.msra.mxu0 %v251_v14 }
  0x1c   :  { %134 = vmatprep.subr.bf16.mxu0 %v252_v15 }
  0x1f   :  { %135 = vmatpush1.bf16.msra.mxu0 %v254_v16 }
  0x22   :  { %153 = vmatmul.mubr.bf16.vlgmr.msra.gmra.mrb[0].mxu0 %v23_v17 }
  0xf5   :  { %v154_v18 = vpop.f32.mrb[0].mxu0 }
  0xf6   :  { %170 = vst [vmem:[%s352_s2] sm:$0xff] %v154_v18  ;;  %v172_v19 = vrot.slane %v154_v18, 4  ;;  %v186_v20 = vmul.f32 %v154_v18, %v154_v18  ;;  %v156_v21 = vpop.f32.mrb[1].mxu0 }
  0xf7   :  { %171 = vst [vmem:[%s352_s2 + $0x8] sm:$0xff] %v156_v21  ;;  %v178_v22 = vrot.slane %v156_v21, 4  ;;  %v187_v23 = vmul.f32 %v156_v21, %v156_v21  ;;  %v158_v24 = vpop.f32.mrb[2].mxu0 }
  0xf8   :  { %v173_v25 = vadd.f32 %v172_v19, %v154_v18  ;;  %v188_v26 = vrot.slane %v186_v20, 4  ;;  %v159_v27 = vpop.f32.mrb[3].mxu0 }
  0xf9   :  { %v179_v28 = vadd.f32 %v178_v22, %v156_v21  ;;  %v194_v29 = vrot.slane %v187_v23, 4 }
  0xfa   :  { %v174_v30 = vrot.slane %v173_v25, 2  ;;  %v189_v31 = vadd.f32 %v188_v26, %v186_v20 }
  0xfb   :  { %v180_v32 = vrot.slane %v179_v28, 2  ;;  %v195_v33 = vadd.f32 %v194_v29, %v187_v23 }
  0xfc   :  { %v175_v34 = vadd.f32 %v174_v30, %v173_v25  ;;  %v190_v35 = vrot.slane %v189_v31, 2 }
  0xfd   :  { %v181_v36 = vadd.f32 %v180_v32, %v179_v28  ;;  %v196_v37 = vrot.slane %v195_v33, 2 }
  0xfe   :  { %v176_v38 = vrot.slane %v175_v34, 1  ;;  %v191_v39 = vadd.f32 %v190_v35, %v189_v31 }
  0xff   :  { %v182_v40 = vrot.slane %v181_v36, 1  ;;  %v197_v41 = vadd.f32 %v196_v37, %v195_v33 }
 0x100   :  { %v177_v42 = vadd.f32 %v176_v38, %v175_v34  ;;  %v192_v43 = vrot.slane %v191_v39, 1 }
 0x101   :  { %v183_v44 = vadd.f32 %v182_v40, %v181_v36  ;;  %v198_v45 = vrot.slane %v197_v41, 1 }
 0x102   :  { %184 = vst [vmem:[%s353_s3] sm:$0xff] %v177_v42  ;;  %v193_v46 = vadd.f32 %v192_v43, %v191_v39 }
 0x103   :  { %185 = vst [vmem:[%s353_s3 + $0x8] sm:$0xff] %v183_v44  ;;  %v199_v47 = vadd.f32 %v198_v45, %v197_v41 }
 0x104   :  { %200 = vst [vmem:[%s354_s4] sm:$0xff] %v193_v46 }
 0x105   :  { %201 = vst [vmem:[%s354_s4 + $0x8] sm:$0xff] %v199_v47 }

// kernel: resnet18_forward.67
= control target key start
LH: loop header
LB: loop body
LE: loop exit
PB: predicated region body
PF: predicated region fallthrough
CT: control target
= control target key end

     0   :  { %v18_v0 = vlaneseq  ;;  %s88_s1 = inlined_call_operand.vmem [shape: f32[1,256], index: 1, kind: input, shape index: {}]   ;;  %s89_s2 = inlined_call_operand.vmem [shape: f32[1,256], index: 2, kind: input, shape index: {}]   ;;  %s90_s0 = inlined_call_operand.vmem [shape: f32[8,256], index: 0, kind: input, shape index: {}]   ;;  %s91_s3 = inlined_call_operand.vmem [shape: f32[8,256], index: 3, kind: output, shape index: {}]  }
   0x1   :  { %v16_v2 = vld [vmem:[%s88_s1] sm:$0x3]  ;;  %v15_v7 = vld [vmem:[%s90_s0 + $0x8] sm:$0xff] }
   0x2   :  { %v19_v1 = vshrl.u32 %v18_v0, 7  ;;  %v30_v3 = vld [vmem:[%s89_s2] sm:$0x3] }
   0x3   :  { %v14_v6 = vld [vmem:[%s90_s0] sm:$0xff] }
   0x4   :  { %v20_v4 = vsub.s32 0, %v19_v1  ;;  %v24_v5 = vsub.s32 1, %v19_v1 }
   0x6   :  { %v21_v8 = vrot.slane %v16_v2, %v20_v4  ;;  %v35_v9 = vrot.slane %v30_v3, %v20_v4  ;;  %v25_v10 = vrot.slane %v16_v2, %v24_v5  ;;  %v39_v11 = vrot.slane %v30_v3, %v24_v5 }
   0x8   :  { %v28_v12 = vmul.f32 %v21_v8, %v14_v6  ;;  %v29_v13 = vmul.f32 %v25_v10, %v15_v7 }
   0xa   :  { %v42_v14 = vadd.f32 %v35_v9, %v28_v12  ;;  %v43_v15 = vadd.f32 %v39_v11, %v29_v13 }
   0xc   :  { %44 = vst [vmem:[%s91_s3] sm:$0xff] %v42_v14  ;;  %45 = vst [vmem:[%s91_s3 + $0x8] sm:$0xff] %v43_v15 }

// kernel: resnet18_forward.65
= control target key start
LH: loop header
LB: loop body
LE: loop exit
PB: predicated region body
PF: predicated region fallthrough
CT: control target
= control target key end

     0   :  { %v18_v0 = vlaneseq  ;;  %s90_s1 = inlined_call_operand.vmem [shape: f32[1,256], index: 1, kind: input, shape index: {}]   ;;  %s91_s2 = inlined_call_operand.vmem [shape: f32[1,256], index: 2, kind: input, shape index: {}]   ;;  %s92_s0 = inlined_call_operand.vmem [shape: f32[8,256], index: 0, kind: input, shape index: {}]   ;;  %s93_s3 = inlined_call_operand.vmem [shape: f32[8,256], index: 3, kind: output, shape index: {}]  }
   0x1   :  { %v16_v2 = vld [vmem:[%s90_s1] sm:$0x3]  ;;  %v15_v7 = vld [vmem:[%s92_s0 + $0x8] sm:$0xff] }
   0x2   :  { %v19_v1 = vshrl.u32 %v18_v0, 7  ;;  %v30_v3 = vld [vmem:[%s91_s2] sm:$0x3] }
   0x3   :  { %v14_v6 = vld [vmem:[%s92_s0] sm:$0xff] }
   0x4   :  { %v20_v4 = vsub.s32 0, %v19_v1  ;;  %v24_v5 = vsub.s32 1, %v19_v1 }
   0x6   :  { %v21_v8 = vrot.slane %v16_v2, %v20_v4  ;;  %v35_v9 = vrot.slane %v30_v3, %v20_v4  ;;  %v25_v10 = vrot.slane %v16_v2, %v24_v5  ;;  %v39_v11 = vrot.slane %v30_v3, %v24_v5 }
   0x8   :  { %v28_v12 = vmul.f32 %v21_v8, %v14_v6  ;;  %v29_v13 = vmul.f32 %v25_v10, %v15_v7 }
   0xa   :  { %v42_v14 = vadd.f32 %v35_v9, %v28_v12  ;;  %v43_v15 = vadd.f32 %v39_v11, %v29_v13 }
   0xc   :  { %v44_v16 = vmax.f32 %v42_v14, 0.0  ;;  %v45_v17 = vmax.f32 %v43_v15, 0.0 }
   0xe   :  { %46 = vst [vmem:[%s93_s3] sm:$0xff] %v44_v16  ;;  %47 = vst [vmem:[%s93_s3 + $0x8] sm:$0xff] %v45_v17 }

// kernel: resnet18_forward.64
= control target key start
LH: loop header
LB: loop body
LE: loop exit
PB: predicated region body
PF: predicated region fallthrough
CT: control target
= control target key end

     0   :  { %s1186_s15 = smov 0   ;;  %s1188_s16 = smov 0   ;;  %s1297_s0 = inlined_call_operand.vmem [shape: bf16[8,1152], index: 0, kind: input, shape index: {}]   ;;  %s1298_s1 = inlined_call_operand.vmem [shape: bf16[1152,256], index: 1, kind: input, shape index: {}]   ;;  %s1299_s2 = inlined_call_operand.vmem [shape: f32[8,256], index: 2, kind: output, shape index: {0}]   ;;  %s1300_s3 = inlined_call_operand.vmem [shape: f32[8,256], index: 3, kind: output, shape index: {1}]   ;;  %s1301_s4 = inlined_call_operand.vmem [shape: f32[8,256], index: 4, kind: output, shape index: {2}]  }
   0x1   :  { %s1190_s17 = smov 0  }
   0x2 LB: > { %s27_s18 = sadd.s32 1, %s1153_s16  ;;  %p968_p0 = scmp.ge.s32.totalorder %s1157_s17, 1  ;;  %s1157_s17 = sphi %s1190_s17, %s15_s17   ;;  %s1153_s16 = sphi %s1188_s16, %s1303_s16   ;;  %s1149_s15 = sphi %s1186_s15, %s1302_s15  }
   0x3   : > { %p28_p1 = scmp.ge.s32.totalorder %s27_s18, 3  ;;  %p218_p2 = scmp.lt.s32.totalorder %s1157_s17, 4 }
   0x5   : > { %s1305_s18 = smov (%p28_p1, %s27_s18), 0  ;;  %p219_p3 = pnand %p968_p0, %p218_p2 }
   0x6   : > { %s280_s19 = smul.u32 (!%p219_p3), 3, %s1149_s15  ;;  %p972_p6 = scmp.ne.s32.totalorder (!%p219_p3), %s1149_s15, 0 }
   0x7   : > { %222 = sbr.rel (%p219_p3) target bundleno = 329 (0x149), region = 28 }
   0x8   : > { %s290_s20 = smul.u32 (!%p219_p3), 48, %s1149_s15  ;;  %p283_p4 = scmp.lt.s32.totalorder (!%p219_p3), %s280_s19, 8 }
   0xa   : > { %p292_p5 = scmp.lt.s32.totalorder (!%p219_p3), %s290_s20, 143 }
   0xe   : > { %s1307_s19 = smov (!%p283_p4, %s280_s19), 8  ;;  %s1309_s20 = smov (!%p292_p5, %s290_s20), 143 }
   0xf   : > { %s969_s21 = sshll.u32 %s1307_s19, 2  ;;  %s1033_s25 = sshll.u32 %s1309_s20, 3  ;;  %v1159_v0 = vmov (!%p972_p6), 0.0  }
  0x10   : > { %s1211_s24 = scalar_lea.vmem %s1297_s0, %s969_s21  ;;  %s1216_s28 = scalar_lea.vmem %s1298_s1, %s1033_s25  ;;  %337 = vst [vmem:[#allocation2] sm:$0xff] (!%p972_p6), %v1159_v0  ;;  %338 = vst [vmem:[#allocation2 + $0x8] sm:$0xff] (!%p972_p6), %v1159_v0 }
  0x11   : > { %336 = sbr.rel (%p972_p6) target bundleno = 24 (0x18), region = 32 }
  0x18 PF: > { %v1060_v1 = vld [vmem:[%s1216_s28 + $0x4] ss:$8 sps:$4 sm:$0xff]   ;;  %v1062_v2 = vld [vmem:[%s1216_s28] ss:$8 sps:$4 sm:$0xff]   ;;  %v1160_v3 = vmov 0   ;;  %p1024_p7 = scmp.ne.s32.totalorder %s1149_s15, 2 }
  0x19   : > { %715 = vmatprep.mubr.bf16.mxu1 %v1160_v3  ;;  %642 = vmatprep.subr.bf16.mxu0 %v1060_v1  ;;  %v1063_v4 = vld [vmem:[%s1216_s28 + $0x14] ss:$8 sps:$4 sm:$0xff]   ;;  %v1065_v5 = vld [vmem:[%s1216_s28 + $0x10] ss:$8 sps:$4 sm:$0xff]   ;;  %v1066_v6 = vld [vmem:[%s1216_s28 + $0x24] ss:$8 sps:$4 sm:$0xff]  }
  0x1a   : > { %643 = vmatpush1.bf16.msra.mxu0 %v1062_v2  ;;  %v1068_v7 = vld [vmem:[%s1216_s28 + $0x20] ss:$8 sps:$4 sm:$0xff]   ;;  %v1069_v8 = vld [vmem:[%s1216_s28 + $0x34] ss:$8 sps:$4 sm:$0xff]   ;;  %v1071_v9 = vld [vmem:[%s1216_s28 + $0x30] ss:$8 sps:$4 sm:$0xff]  }
  0x1b   : > { %644 = vmatprep.subr.bf16.mxu0 %v1063_v4  ;;  %v1084_v10 = vld [vmem:[%s1216_s28 + $0x104] ss:$8 sps:$4 sm:$0xff]   ;;  %v1086_v11 = vld [vmem:[%s1216_s28 + $0x100] ss:$8 sps:$4 sm:$0xff]   ;;  %v1090_v13 = vld [vmem:[%s1216_s28 + $0x114] ss:$8 sps:$4 sm:$0xff]  }
  0x1c   : > { %v1072_v12 = vld [vmem:[%s1216_s28 + $0x44] ss:$8 sps:$4 sm:$0xff]   ;;  %683 = vmatprep.subr.bf16.mxu1 %v1084_v10  ;;  %v1092_v14 = vld [vmem:[%s1216_s28 + $0x110] ss:$8 sps:$4 sm:$0xff]   ;;  %v1074_v15 = vld [vmem:[%s1216_s28 + $0x40] ss:$8 sps:$4 sm:$0xff]  }
  0x1d   : > { %684 = vmatpush1.bf16.msra.mxu1 %v1086_v11  ;;  %v1075_v16 = vld [vmem:[%s1216_s28 + $0x54] ss:$8 sps:$4 sm:$0xff]   ;;  %v1096_v17 = vld [vmem:[%s1216_s28 + $0x124] ss:$8 sps:$4 sm:$0xff]   ;;  %v1098_v18 = vld [vmem:[%s1216_s28 + $0x120] ss:$8 sps:$4 sm:$0xff]  }
  0x1e   : > { %645 = vmatpush1.bf16.msra.mxu0 %v1065_v5  ;;  %685 = vmatprep.subr.bf16.mxu1 %v1090_v13  ;;  %v1077_v19 = vld [vmem:[%s1216_s28 + $0x50] ss:$8 sps:$4 sm:$0xff]   ;;  %v1102_v20 = vld [vmem:[%s1216_s28 + $0x134] ss:$8 sps:$4 sm:$0xff]   ;;  %v1078_v21 = vld [vmem:[%s1216_s28 + $0x64] ss:$8 sps:$4 sm:$0xff]  }
  0x1f   : > { %646 = vmatprep.subr.bf16.mxu0 %v1066_v6  ;;  %v1104_v22 = vld [vmem:[%s1216_s28 + $0x130] ss:$8 sps:$4 sm:$0xff]   ;;  %v1080_v23 = vld [vmem:[%s1216_s28 + $0x60] ss:$8 sps:$4 sm:$0xff]   ;;  %v1108_v24 = vld [vmem:[%s1216_s28 + $0x144] ss:$8 sps:$4 sm:$0xff]  }
  0x20   : > { %v1081_v25 = vld [vmem:[%s1216_s28 + $0x74] ss:$8 sps:$4 sm:$0xff]   ;;  %v1110_v26 = vld [vmem:[%s1216_s28 + $0x140] ss:$8 sps:$4 sm:$0xff]   ;;  %v1083_v27 = vld [vmem:[%s1216_s28 + $0x70] ss:$8 sps:$4 sm:$0xff]  }
  0x21   : > { %686 = vmatpush1.bf16.msra.mxu1 %v1092_v14  ;;  %v1114_v28 = vld [vmem:[%s1216_s28 + $0x154] ss:$8 sps:$4 sm:$0xff]   ;;  %v1087_v29 = vld [vmem:[%s1216_s28 + $0x84] ss:$8 sps:$4 sm:$0xff]   ;;  %v1116_v30 = vld [vmem:[%s1216_s28 + $0x150] ss:$8 sps:$4 sm:$0xff]  }
  0x22   : > { %647 = vmatpush1.bf16.msra.mxu0 %v1068_v7  ;;  %687 = vmatprep.subr.bf16.mxu1 %v1096_v17  ;;  %v1089_v31 = vld [vmem:[%s1216_s28 + $0x80] ss:$8 sps:$4 sm:$0xff]   ;;  %v1120_v32 = vld [vmem:[%s1216_s28 + $0x164] ss:$8 sps:$4 sm:$0xff]   ;;  %v1093_v33 = vld [vmem:[%s1216_s28 + $0x94] ss:$8 sps:$4 sm:$0xff]  }
  0x23   : > { %648 = vmatprep.subr.bf16.mxu0 %v1069_v8  ;;  %v341_v34 = vld [vmem:[%s1211_s24] sm:$0xff]  ;;  %v1095_v37 = vld [vmem:[%s1216_s28 + $0x90] ss:$8 sps:$4 sm:$0xff]   ;;  %v1126_v38 = vld [vmem:[%s1216_s28 + $0x174] ss:$8 sps:$4 sm:$0xff]  }
  0x24   : > { %v974_v35 = vcombine.high %v341_v34, %v341_v34  ;;  %v1122_v36 = vld [vmem:[%s1216_s28 + $0x160] ss:$8 sps:$4 sm:$0xff]   ;;  %v1099_v39 = vld [vmem:[%s1216_s28 + $0xa4] ss:$8 sps:$4 sm:$0xff]   ;;  %v1128_v40 = vld [vmem:[%s1216_s28 + $0x170] ss:$8 sps:$4 sm:$0xff]   ;;  %v973_v53 = vcombine.low %v341_v34, %v341_v34 }
  0x25   : > { %688 = vmatpush1.bf16.msra.mxu1 %v1098_v18  ;;  %v1101_v41 = vld [vmem:[%s1216_s28 + $0xa0] ss:$8 sps:$4 sm:$0xff]   ;;  %v1105_v42 = vld [vmem:[%s1216_s28 + $0xb4] ss:$8 sps:$4 sm:$0xff]   ;;  %v1107_v44 = vld [vmem:[%s1216_s28 + $0xb0] ss:$8 sps:$4 sm:$0xff]  }
  0x26   : > { %649 = vmatpush1.bf16.msra.mxu0 %v1071_v9  ;;  %689 = vmatprep.subr.bf16.mxu1 %v1102_v20  ;;  %v1132_v43 = vld [vmem:[%s1211_s24 + $0x8] ss:$0 sps:$4 sm:$0xff]   ;;  %v1111_v45 = vld [vmem:[%s1216_s28 + $0xc4] ss:$8 sps:$4 sm:$0xff]   ;;  %v1117_v47 = vld [vmem:[%s1216_s28 + $0xd4] ss:$8 sps:$4 sm:$0xff]  }
  0x27   : > { %650 = vmatprep.subr.bf16.mxu0 %v1072_v12  ;;  %674 = vmatprep.mubr.bf16.mxu0 %v974_v35  ;;  %v1113_v46 = vld [vmem:[%s1216_s28 + $0xc0] ss:$8 sps:$4 sm:$0xff]   ;;  %v1119_v48 = vld [vmem:[%s1216_s28 + $0xd0] ss:$8 sps:$4 sm:$0xff]   ;;  %v1123_v49 = vld [vmem:[%s1216_s28 + $0xe4] ss:$8 sps:$4 sm:$0xff]  }
  0x28   : > { %v1125_v50 = vld [vmem:[%s1216_s28 + $0xe0] ss:$8 sps:$4 sm:$0xff]   ;;  %v1129_v51 = vld [vmem:[%s1216_s28 + $0xf4] ss:$8 sps:$4 sm:$0xff]   ;;  %v1131_v52 = vld [vmem:[%s1216_s28 + $0xf0] ss:$8 sps:$4 sm:$0xff]  }
  0x29   : > { %690 = vmatpush1.bf16.msra.mxu1 %v1104_v22  ;;  %v339_v58 = vld [vmem:[#allocation2] sm:$0xff]  ;;  %v340_v61 = vld [vmem:[#allocation2 + $0x8] sm:$0xff] }
  0x2a   : > { %651 = vmatpush1.bf16.msra.mxu0 %v1074_v15  ;;  %691 = vmatprep.subr.bf16.mxu1 %v1108_v24 }
  0x2b   : > { %652 = vmatprep.subr.bf16.mxu0 %v1075_v16 }
  0x2d   : > { %692 = vmatpush1.bf16.msra.mxu1 %v1110_v26 }
  0x2e   : > { %653 = vmatpush1.bf16.msra.mxu0 %v1077_v19  ;;  %693 = vmatprep.subr.bf16.mxu1 %v1114_v28 }
  0x2f   : > { %654 = vmatprep.subr.bf16.mxu0 %v1078_v21 }
  0x31   : > { %694 = vmatpush1.bf16.msra.mxu1 %v1116_v30 }
  0x32   : > { %655 = vmatpush1.bf16.msra.mxu0 %v1080_v23  ;;  %695 = vmatprep.subr.bf16.mxu1 %v1120_v32 }
  0x33   : > { %656 = vmatprep.subr.bf16.mxu0 %v1081_v25 }
  0x35   : > { %696 = vmatpush1.bf16.msra.mxu1 %v1122_v36 }
  0x36   : > { %657 = vmatpush1.bf16.msra.mxu0 %v1083_v27  ;;  %697 = vmatprep.subr.bf16.mxu1 %v1126_v38 }
  0x37   : > { %658 = vmatprep.subr.bf16.mxu0 %v1087_v29 }
  0x39   : > { %698 = vmatpush1.bf16.msra.mxu1 %v1128_v40 }
  0x3a   : > { %659 = vmatpush1.bf16.msra.mxu0 %v1089_v31 }
  0x3b   : > { %660 = vmatprep.subr.bf16.mxu0 %v1093_v33 }
  0x3c   : > { %716 = vmatmul.mubr.bf16.vlgmr.msra.gmra.mrb[0].mxu1 %v1132_v43 }
  0x3e   : > { %661 = vmatpush1.bf16.msra.mxu0 %v1095_v37 }
  0x3f   : > { %662 = vmatprep.subr.bf16.mxu0 %v1099_v39 }
  0x42   : > { %663 = vmatpush1.bf16.msra.mxu0 %v1101_v41 }
  0x43   : > { %664 = vmatprep.subr.bf16.mxu0 %v1105_v42 }
  0x46   : > { %665 = vmatpush1.bf16.msra.mxu0 %v1107_v44 }
  0x47   : > { %666 = vmatprep.subr.bf16.mxu0 %v1111_v45 }
  0x4a   : > { %667 = vmatpush1.bf16.msra.mxu0 %v1113_v46 }
  0x4b   : > { %668 = vmatprep.subr.bf16.mxu0 %v1117_v47 }
  0x4e   : > { %669 = vmatpush1.bf16.msra.mxu0 %v1119_v48 }
  0x4f   : > { %670 = vmatprep.subr.bf16.mxu0 %v1123_v49 }
  0x52   : > { %671 = vmatpush1.bf16.msra.mxu0 %v1125_v50 }
  0x53   : > { %672 = vmatprep.subr.bf16.mxu0 %v1129_v51 }
  0x56   : > { %673 = vmatpush1.bf16.msra.mxu0 %v1131_v52 }
  0x59   : > { %675 = vmatmul.mubr.bf16.vlgmr.msra.gmra.mrb[0].mxu0 %v973_v53 }
 0x10f   : > { %v717_v54 = vpop.f32.mrb[0].mxu1 }
 0x110   : > { %v719_v55 = vpop.f32.mrb[1].mxu1 }
 0x111   : > { %v721_v56 = vpop.f32.mrb[2].mxu1 }
 0x112   : > { %v722_v57 = vpop.f32.mrb[3].mxu1 }
 0x12c   : > { %v676_v59 = vpop.f32.mrb[0].mxu0  ;;  %731 = sbr.rel (%p1024_p7) target bundleno = 329 (0x149), region = 36 }
 0x12d   : > { %v718_v60 = vadd.f32 %v717_v54, %v676_v59  ;;  %v678_v62 = vpop.f32.mrb[1].mxu0 }
 0x12e   : > { %v720_v63 = vadd.f32 %v719_v55, %v678_v62  ;;  %v680_v0 = vpop.f32.mrb[2].mxu0 }
 0x12f   : > { %v724_v1 = vadd.f32 %v718_v60, %v339_v58  ;;  %v681_v2 = vpop.f32.mrb[3].mxu0 }
 0x130   : > { %v725_v3 = vadd.f32 %v720_v63, %v340_v61 }
 0x131   : > { %726 = vst [vmem:[#allocation2] sm:$0xff] %v724_v1 }
 0x132   : > { %727 = vst [vmem:[#allocation2 + $0x8] sm:$0xff] %v725_v3 }
 0x138   : > { %v732_v4 = vld [vmem:[#allocation2] sm:$0xff] }
 0x139   : > { %v733_v5 = vld [vmem:[#allocation2 + $0x8] sm:$0xff]  ;;  %734 = vst [vmem:[%s1299_s2] sm:$0xff] %v732_v4  ;;  %v736_v6 = vrot.slane %v732_v4, 4  ;;  %v750_v8 = vmul.f32 %v732_v4, %v732_v4 }
 0x13a   : > { %735 = vst [vmem:[%s1299_s2 + $0x8] sm:$0xff] %v733_v5  ;;  %v742_v7 = vrot.slane %v733_v5, 4  ;;  %v751_v9 = vmul.f32 %v733_v5, %v733_v5 }
 0x13b   : > { %v737_v10 = vadd.f32 %v736_v6, %v732_v4  ;;  %v752_v12 = vrot.slane %v750_v8, 4 }
 0x13c   : > { %v743_v11 = vadd.f32 %v742_v7, %v733_v5  ;;  %v758_v13 = vrot.slane %v751_v9, 4 }
 0x13d   : > { %v738_v14 = vrot.slane %v737_v10, 2  ;;  %v753_v16 = vadd.f32 %v752_v12, %v750_v8 }
 0x13e   : > { %v744_v15 = vrot.slane %v743_v11, 2  ;;  %v759_v17 = vadd.f32 %v758_v13, %v751_v9 }
 0x13f   : > { %v739_v18 = vadd.f32 %v738_v14, %v737_v10  ;;  %v754_v20 = vrot.slane %v753_v16, 2 }
 0x140   : > { %v745_v19 = vadd.f32 %v744_v15, %v743_v11  ;;  %v760_v21 = vrot.slane %v759_v17, 2 }
 0x141   : > { %v740_v22 = vrot.slane %v739_v18, 1  ;;  %v755_v24 = vadd.f32 %v754_v20, %v753_v16 }
 0x142   : > { %v746_v23 = vrot.slane %v745_v19, 1  ;;  %v761_v25 = vadd.f32 %v760_v21, %v759_v17 }
 0x143   : > { %v741_v26 = vadd.f32 %v740_v22, %v739_v18  ;;  %v756_v28 = vrot.slane %v755_v24, 1 }
 0x144   : > { %v747_v27 = vadd.f32 %v746_v23, %v745_v19  ;;  %v762_v29 = vrot.slane %v761_v25, 1 }
 0x145   : > { %748 = vst [vmem:[%s1300_s3] sm:$0xff] %v741_v26  ;;  %v757_v30 = vadd.f32 %v756_v28, %v755_v24 }
 0x146   : > { %749 = vst [vmem:[%s1300_s3 + $0x8] sm:$0xff] %v747_v27  ;;  %v763_v31 = vadd.f32 %v762_v29, %v761_v25 }
 0x147   : > { %764 = vst [vmem:[%s1301_s4] sm:$0xff] %v757_v30 }
 0x148   : > { %765 = vst [vmem:[%s1301_s4 + $0x8] sm:$0xff] %v763_v31 }
 0x149 PF: > { %s15_s17 = sadd.s32 1, %s1157_s17   ;;  %s1302_s15 = smov %s1153_s16 }
 0x14a   : > { %p12_p8 = scmp.ge.s32.totalorder %s15_s17, 5   ;;  %s1303_s16 = smov %s1305_s18 }
 0x14c   :  { %14 = sbr.rel (!%p12_p8) target bundleno = 2 (0x2), region = 93 }

// kernel: resnet18_forward.69
= control target key start
LH: loop header
LB: loop body
LE: loop exit
PB: predicated region body
PF: predicated region fallthrough
CT: control target
= control target key end

     0   :  { %v21_v0 = vlaneseq  ;;  %s108_s1 = inlined_call_operand.vmem [shape: f32[1,256], index: 1, kind: input, shape index: {}]   ;;  %s109_s2 = inlined_call_operand.vmem [shape: f32[1,256], index: 2, kind: input, shape index: {}]   ;;  %s110_s0 = inlined_call_operand.vmem [shape: f32[8,256], index: 0, kind: input, shape index: {}]   ;;  %s111_s3 = inlined_call_operand.vmem [shape: f32[8,256], index: 3, kind: input, shape index: {}]   ;;  %s112_s4 = inlined_call_operand.vmem [shape: f32[8,256], index: 4, kind: output, shape index: {}]  }
   0x1   :  { %v19_v2 = vld [vmem:[%s108_s1] sm:$0x3]  ;;  %v18_v7 = vld [vmem:[%s110_s0 + $0x8] sm:$0xff] }
   0x2   :  { %v22_v1 = vshrl.u32 %v21_v0, 7  ;;  %v33_v3 = vld [vmem:[%s109_s2] sm:$0x3]  ;;  %v48_v15 = vld [vmem:[%s111_s3 + $0x8] sm:$0xff] }
   0x3   :  { %v17_v6 = vld [vmem:[%s110_s0] sm:$0xff] }
   0x4   :  { %v23_v4 = vsub.s32 0, %v22_v1  ;;  %v27_v5 = vsub.s32 1, %v22_v1  ;;  %v47_v14 = vld [vmem:[%s111_s3] sm:$0xff] }
   0x6   :  { %v24_v8 = vrot.slane %v19_v2, %v23_v4  ;;  %v38_v9 = vrot.slane %v33_v3, %v23_v4  ;;  %v28_v10 = vrot.slane %v19_v2, %v27_v5  ;;  %v42_v11 = vrot.slane %v33_v3, %v27_v5 }
   0x8   :  { %v31_v12 = vmul.f32 %v24_v8, %v17_v6  ;;  %v32_v13 = vmul.f32 %v28_v10, %v18_v7 }
   0xa   :  { %v45_v16 = vadd.f32 %v38_v9, %v31_v12  ;;  %v46_v17 = vadd.f32 %v42_v11, %v32_v13 }
   0xc   :  { %v49_v18 = vadd.f32 %v47_v14, %v45_v16  ;;  %v50_v19 = vadd.f32 %v48_v15, %v46_v17 }
   0xe   :  { %v51_v20 = vmax.f32 %v49_v18, 0.0  ;;  %v52_v21 = vmax.f32 %v50_v19, 0.0 }
  0x10   :  { %53 = vst [vmem:[%s112_s4] sm:$0xff] %v51_v20  ;;  %54 = vst [vmem:[%s112_s4 + $0x8] sm:$0xff] %v52_v21 }

// kernel: resnet18_forward.68
= control target key start
LH: loop header
LB: loop body
LE: loop exit
PB: predicated region body
PF: predicated region fallthrough
CT: control target
= control target key end

     0   :  { %s1649_s15 = smov 0   ;;  %s1651_s16 = smov 0   ;;  %s1815_s0 = inlined_call_operand.vmem [shape: bf16[8,2304], index: 0, kind: input, shape index: {}]   ;;  %s1816_s1 = inlined_call_operand.vmem [shape: bf16[2304,256], index: 1, kind: input, shape index: {}]   ;;  %s1817_s2 = inlined_call_operand.vmem [shape: f32[8,256], index: 2, kind: output, shape index: {0}]   ;;  %s1818_s3 = inlined_call_operand.vmem [shape: f32[8,256], index: 3, kind: output, shape index: {1}]   ;;  %s1819_s4 = inlined_call_operand.vmem [shape: f32[8,256], index: 4, kind: output, shape index: {2}]  }
   0x1   :  { %s1653_s17 = smov 0  }
   0x2 LB: > { %s27_s18 = sadd.s32 1, %s1617_s16  ;;  %p1307_p0 = scmp.ge.s32.totalorder %s1621_s17, 1  ;;  %s1621_s17 = sphi %s1653_s17, %s15_s17   ;;  %s1617_s16 = sphi %s1651_s16, %s1821_s16   ;;  %s1613_s15 = sphi %s1649_s15, %s1820_s15  }
   0x3   : > { %p28_p1 = scmp.ge.s32.totalorder %s27_s18, 3  ;;  %p218_p2 = scmp.lt.s32.totalorder %s1621_s17, 4 }
   0x5   : > { %s1823_s18 = smov (%p28_p1, %s27_s18), 0  ;;  %p219_p3 = pnand %p1307_p0, %p218_p2 }
   0x6   : > { %s280_s19 = smul.u32 (!%p219_p3), 6, %s1613_s15  ;;  %p1311_p6 = scmp.ne.s32.totalorder (!%p219_p3), %s1613_s15, 0 }
   0x7   : > { %222 = sbr.rel (%p219_p3) target bundleno = 393 (0x189), region = 28 }
   0x8   : > { %s290_s20 = smul.u32 (!%p219_p3), 96, %s1613_s15  ;;  %p283_p4 = scmp.lt.s32.totalorder (!%p219_p3), %s280_s19, 17 }
   0xa   : > { %p292_p5 = scmp.lt.s32.totalorder (!%p219_p3), %s290_s20, 287 }
   0xe   : > { %s1825_s19 = smov (!%p283_p4, %s280_s19), 17  ;;  %s1827_s20 = smov (!%p292_p5, %s290_s20), 287 }
   0xf   : > { %s1308_s21 = sshll.u32 %s1825_s19, 2  ;;  %s1423_s25 = sshll.u32 %s1827_s20, 3  ;;  %v1623_v0 = vmov (!%p1311_p6), 0.0  }
  0x10   : > { %s1674_s24 = scalar_lea.vmem %s1815_s0, %s1308_s21  ;;  %s1679_s28 = scalar_lea.vmem %s1816_s1, %s1423_s25  ;;  %336 = vst [vmem:[#allocation2] sm:$0xff] (!%p1311_p6), %v1623_v0  ;;  %337 = vst [vmem:[#allocation2 + $0x8] sm:$0xff] (!%p1311_p6), %v1623_v0 }
  0x11   : > { %335 = sbr.rel (%p1311_p6) target bundleno = 24 (0x18), region = 32 }
  0x18 PF: > { %v1449_v1 = vld [vmem:[%s1679_s28 + $0x4] ss:$8 sps:$4 sm:$0xff]   ;;  %v1453_v3 = vld [vmem:[%s1679_s28] ss:$8 sps:$4 sm:$0xff]   ;;  %v1455_v5 = vld [vmem:[%s1679_s28 + $0x14] ss:$8 sps:$4 sm:$0xff]  }
  0x19   : > { %v1451_v2 = vld [vmem:[%s1679_s28 + $0x104] ss:$8 sps:$4 sm:$0xff]   ;;  %940 = vmatprep.subr.bf16.mxu0 %v1449_v1  ;;  %v1454_v4 = vld [vmem:[%s1679_s28 + $0x100] ss:$8 sps:$4 sm:$0xff]   ;;  %v1457_v6 = vld [vmem:[%s1679_s28 + $0x114] ss:$8 sps:$4 sm:$0xff]  }
  0x1a   : > { %981 = vmatprep.subr.bf16.mxu1 %v1451_v2  ;;  %941 = vmatpush1.bf16.msra.mxu0 %v1453_v3  ;;  %v1459_v7 = vld [vmem:[%s1679_s28 + $0x10] ss:$8 sps:$4 sm:$0xff]   ;;  %v1461_v9 = vld [vmem:[%s1679_s28 + $0x24] ss:$8 sps:$4 sm:$0xff]   ;;  %v1465_v11 = vld [vmem:[%s1679_s28 + $0x20] ss:$8 sps:$4 sm:$0xff]  }
  0x1b   : > { %982 = vmatpush1.bf16.msra.mxu1 %v1454_v4  ;;  %942 = vmatprep.subr.bf16.mxu0 %v1455_v5  ;;  %v1460_v8 = vld [vmem:[%s1679_s28 + $0x110] ss:$8 sps:$4 sm:$0xff]   ;;  %v1463_v10 = vld [vmem:[%s1679_s28 + $0x124] ss:$8 sps:$4 sm:$0xff]   ;;  %v1466_v12 = vld [vmem:[%s1679_s28 + $0x120] ss:$8 sps:$4 sm:$0xff]  }
  0x1c   : > { %983 = vmatprep.subr.bf16.mxu1 %v1457_v6  ;;  %v1467_v13 = vld [vmem:[%s1679_s28 + $0x34] ss:$8 sps:$4 sm:$0xff]   ;;  %v1471_v15 = vld [vmem:[%s1679_s28 + $0x30] ss:$8 sps:$4 sm:$0xff]   ;;  %v1473_v17 = vld [vmem:[%s1679_s28 + $0x44] ss:$8 sps:$4 sm:$0xff]  }
  0x1d   : > { %v1469_v14 = vld [vmem:[%s1679_s28 + $0x134] ss:$8 sps:$4 sm:$0xff]   ;;  %v1472_v16 = vld [vmem:[%s1679_s28 + $0x130] ss:$8 sps:$4 sm:$0xff]   ;;  %v1475_v18 = vld [vmem:[%s1679_s28 + $0x144] ss:$8 sps:$4 sm:$0xff]  }
  0x1e   : > { %943 = vmatpush1.bf16.msra.mxu0 %v1459_v7  ;;  %v1477_v19 = vld [vmem:[%s1679_s28 + $0x40] ss:$8 sps:$4 sm:$0xff]   ;;  %v1479_v21 = vld [vmem:[%s1679_s28 + $0x54] ss:$8 sps:$4 sm:$0xff]   ;;  %v1483_v23 = vld [vmem:[%s1679_s28 + $0x50] ss:$8 sps:$4 sm:$0xff]  }
  0x1f   : > { %984 = vmatpush1.bf16.msra.mxu1 %v1460_v8  ;;  %944 = vmatprep.subr.bf16.mxu0 %v1461_v9  ;;  %v1478_v20 = vld [vmem:[%s1679_s28 + $0x140] ss:$8 sps:$4 sm:$0xff]   ;;  %v1481_v22 = vld [vmem:[%s1679_s28 + $0x154] ss:$8 sps:$4 sm:$0xff]   ;;  %v1484_v24 = vld [vmem:[%s1679_s28 + $0x150] ss:$8 sps:$4 sm:$0xff]  }
  0x20   : > { %985 = vmatprep.subr.bf16.mxu1 %v1463_v10  ;;  %v1485_v25 = vld [vmem:[%s1679_s28 + $0x64] ss:$8 sps:$4 sm:$0xff]   ;;  %v1489_v27 = vld [vmem:[%s1679_s28 + $0x60] ss:$8 sps:$4 sm:$0xff]   ;;  %v1491_v29 = vld [vmem:[%s1679_s28 + $0x74] ss:$8 sps:$4 sm:$0xff]  }
  0x21   : > { %v1487_v26 = vld [vmem:[%s1679_s28 + $0x164] ss:$8 sps:$4 sm:$0xff]   ;;  %v1490_v28 = vld [vmem:[%s1679_s28 + $0x160] ss:$8 sps:$4 sm:$0xff]   ;;  %v1493_v30 = vld [vmem:[%s1679_s28 + $0x174] ss:$8 sps:$4 sm:$0xff]  }
  0x22   : > { %945 = vmatpush1.bf16.msra.mxu0 %v1465_v11  ;;  %v1495_v31 = vld [vmem:[%s1679_s28 + $0x70] ss:$8 sps:$4 sm:$0xff]   ;;  %v1497_v33 = vld [vmem:[%s1679_s28 + $0x84] ss:$8 sps:$4 sm:$0xff]   ;;  %v1501_v35 = vld [vmem:[%s1679_s28 + $0x80] ss:$8 sps:$4 sm:$0xff]  }
  0x23   : > { %986 = vmatpush1.bf16.msra.mxu1 %v1466_v12  ;;  %946 = vmatprep.subr.bf16.mxu0 %v1467_v13  ;;  %v1496_v32 = vld [vmem:[%s1679_s28 + $0x170] ss:$8 sps:$4 sm:$0xff]   ;;  %v1499_v34 = vld [vmem:[%s1679_s28 + $0x184] ss:$8 sps:$4 sm:$0xff]   ;;  %v1502_v36 = vld [vmem:[%s1679_s28 + $0x180] ss:$8 sps:$4 sm:$0xff]  }
  0x24   : > { %987 = vmatprep.subr.bf16.mxu1 %v1469_v14  ;;  %v1503_v37 = vld [vmem:[%s1679_s28 + $0x94] ss:$8 sps:$4 sm:$0xff]   ;;  %v1507_v39 = vld [vmem:[%s1679_s28 + $0x90] ss:$8 sps:$4 sm:$0xff]   ;;  %v1509_v41 = vld [vmem:[%s1679_s28 + $0xa4] ss:$8 sps:$4 sm:$0xff]  }
  0x25   : > { %v1505_v38 = vld [vmem:[%s1679_s28 + $0x194] ss:$8 sps:$4 sm:$0xff]   ;;  %v1508_v40 = vld [vmem:[%s1679_s28 + $0x190] ss:$8 sps:$4 sm:$0xff]   ;;  %v1511_v42 = vld [vmem:[%s1679_s28 + $0x1a4] ss:$8 sps:$4 sm:$0xff]  }
  0x26   : > { %947 = vmatpush1.bf16.msra.mxu0 %v1471_v15  ;;  %v1513_v43 = vld [vmem:[%s1679_s28 + $0xa0] ss:$8 sps:$4 sm:$0xff]   ;;  %v1515_v45 = vld [vmem:[%s1679_s28 + $0xb4] ss:$8 sps:$4 sm:$0xff]   ;;  %v1519_v50 = vld [vmem:[%s1679_s28 + $0xb0] ss:$8 sps:$4 sm:$0xff]  }
  0x27   : > { %988 = vmatpush1.bf16.msra.mxu1 %v1472_v16  ;;  %948 = vmatprep.subr.bf16.mxu0 %v1473_v17  ;;  %v1514_v44 = vld [vmem:[%s1679_s28 + $0x1a0] ss:$8 sps:$4 sm:$0xff]   ;;  %v1517_v46 = vld [vmem:[%s1679_s28 + $0x1b4] ss:$8 sps:$4 sm:$0xff]   ;;  %v1520_v51 = vld [vmem:[%s1679_s28 + $0x1b0] ss:$8 sps:$4 sm:$0xff]  }
  0x28   : > { %989 = vmatprep.subr.bf16.mxu1 %v1475_v18  ;;  %v340_v47 = vld [vmem:[%s1674_s24] sm:$0xff]  ;;  %v341_v49 = vld [vmem:[%s1674_s24 + $0x8] sm:$0xff]  ;;  %v1527_v57 = vld [vmem:[%s1679_s28 + $0xd4] ss:$8 sps:$4 sm:$0xff]   ;;  %p1414_p7 = scmp.ne.s32.totalorder %s1613_s15, 2 }
  0x29   : > { %v1313_v48 = vcombine.high %v340_v47, %v340_v47  ;;  %v1315_v52 = vcombine.high %v341_v49, %v341_v49  ;;  %v1521_v53 = vld [vmem:[%s1679_s28 + $0xc4] ss:$8 sps:$4 sm:$0xff]   ;;  %v1525_v55 = vld [vmem:[%s1679_s28 + $0xc0] ss:$8 sps:$4 sm:$0xff]   ;;  %v1529_v58 = vld [vmem:[%s1679_s28 + $0x1d4] ss:$8 sps:$4 sm:$0xff]   ;;  %v1312_v6 = vcombine.low %v340_v47, %v340_v47  ;;  %v1314_v7 = vcombine.low %v341_v49, %v341_v49 }
  0x2a   : > { %949 = vmatpush1.bf16.msra.mxu0 %v1477_v19  ;;  %v1523_v54 = vld [vmem:[%s1679_s28 + $0x1c4] ss:$8 sps:$4 sm:$0xff]   ;;  %v1526_v56 = vld [vmem:[%s1679_s28 + $0x1c0] ss:$8 sps:$4 sm:$0xff]   ;;  %v1531_v59 = vld [vmem:[%s1679_s28 + $0xd0] ss:$8 sps:$4 sm:$0xff]  }
  0x2b   : > { %990 = vmatpush1.bf16.msra.mxu1 %v1478_v20  ;;  %950 = vmatprep.subr.bf16.mxu0 %v1479_v21  ;;  %v1532_v60 = vld [vmem:[%s1679_s28 + $0x1d0] ss:$8 sps:$4 sm:$0xff]   ;;  %v1533_v61 = vld [vmem:[%s1679_s28 + $0xe4] ss:$8 sps:$4 sm:$0xff]   ;;  %v1537_v63 = vld [vmem:[%s1679_s28 + $0xe0] ss:$8 sps:$4 sm:$0xff]  }
  0x2c   : > { %991 = vmatprep.subr.bf16.mxu1 %v1481_v22  ;;  %972 = vmatprep.mubr.bf16.mxu0 %v1313_v48  ;;  %v1535_v62 = vld [vmem:[%s1679_s28 + $0x1e4] ss:$8 sps:$4 sm:$0xff]   ;;  %v1538_v0 = vld [vmem:[%s1679_s28 + $0x1e0] ss:$8 sps:$4 sm:$0xff]   ;;  %v1539_v1 = vld [vmem:[%s1679_s28 + $0xf4] ss:$8 sps:$4 sm:$0xff]  }
  0x2d   : > { %1013 = vmatprep.mubr.bf16.mxu1 %v1315_v52  ;;  %v1541_v2 = vld [vmem:[%s1679_s28 + $0x1f4] ss:$8 sps:$4 sm:$0xff]   ;;  %v1543_v3 = vld [vmem:[%s1679_s28 + $0xf0] ss:$8 sps:$4 sm:$0xff]   ;;  %v1551_v5 = vld [vmem:[%s1679_s28 + $0x204] ss:$8 sps:$4 sm:$0xff]  }
  0x2e   : > { %951 = vmatpush1.bf16.msra.mxu0 %v1483_v23  ;;  %v1544_v4 = vld [vmem:[%s1679_s28 + $0x1f0] ss:$8 sps:$4 sm:$0xff]   ;;  %v1549_v8 = vld [vmem:[%s1679_s28 + $0x200] ss:$8 sps:$4 sm:$0xff]   ;;  %v1554_v10 = vld [vmem:[%s1679_s28 + $0x214] ss:$8 sps:$4 sm:$0xff]  }
  0x2f   : > { %992 = vmatpush1.bf16.msra.mxu1 %v1484_v24  ;;  %952 = vmatprep.subr.bf16.mxu0 %v1485_v25  ;;  %v1751_v9 = vld [vmem:[%s1674_s24 + $0x10] sm:$0xff]  ;;  %v1557_v13 = vld [vmem:[%s1679_s28 + $0x224] ss:$8 sps:$4 sm:$0xff]   ;;  %v1555_v14 = vld [vmem:[%s1679_s28 + $0x220] ss:$8 sps:$4 sm:$0xff]  }
  0x30   : > { %993 = vmatprep.subr.bf16.mxu1 %v1487_v26  ;;  %v1317_v11 = vcombine.high %v1751_v9, %v1751_v9  ;;  %v1552_v12 = vld [vmem:[%s1679_s28 + $0x210] ss:$8 sps:$4 sm:$0xff]   ;;  %v1560_v15 = vld [vmem:[%s1679_s28 + $0x234] ss:$8 sps:$4 sm:$0xff]   ;;  %v1563_v17 = vld [vmem:[%s1679_s28 + $0x244] ss:$8 sps:$4 sm:$0xff]  }
  0x31   : > { %v1558_v16 = vld [vmem:[%s1679_s28 + $0x230] ss:$8 sps:$4 sm:$0xff]   ;;  %v1561_v18 = vld [vmem:[%s1679_s28 + $0x240] ss:$8 sps:$4 sm:$0xff]   ;;  %v1566_v19 = vld [vmem:[%s1679_s28 + $0x254] ss:$8 sps:$4 sm:$0xff]  }
  0x32   : > { %953 = vmatpush1.bf16.msra.mxu0 %v1489_v27  ;;  %v1564_v20 = vld [vmem:[%s1679_s28 + $0x250] ss:$8 sps:$4 sm:$0xff]   ;;  %v1569_v21 = vld [vmem:[%s1679_s28 + $0x264] ss:$8 sps:$4 sm:$0xff]   ;;  %v1567_v22 = vld [vmem:[%s1679_s28 + $0x260] ss:$8 sps:$4 sm:$0xff]  }
  0x33   : > { %994 = vmatpush1.bf16.msra.mxu1 %v1490_v28  ;;  %954 = vmatprep.subr.bf16.mxu0 %v1491_v29  ;;  %v1572_v23 = vld [vmem:[%s1679_s28 + $0x274] ss:$8 sps:$4 sm:$0xff]   ;;  %v1570_v24 = vld [vmem:[%s1679_s28 + $0x270] ss:$8 sps:$4 sm:$0xff]   ;;  %v1575_v25 = vld [vmem:[%s1679_s28 + $0x284] ss:$8 sps:$4 sm:$0xff]  }
  0x34   : > { %995 = vmatprep.subr.bf16.mxu1 %v1493_v30  ;;  %v1573_v26 = vld [vmem:[%s1679_s28 + $0x280] ss:$8 sps:$4 sm:$0xff]   ;;  %v1578_v27 = vld [vmem:[%s1679_s28 + $0x294] ss:$8 sps:$4 sm:$0xff]   ;;  %v1576_v28 = vld [vmem:[%s1679_s28 + $0x290] ss:$8 sps:$4 sm:$0xff]  }
  0x35   : > { %v1581_v29 = vld [vmem:[%s1679_s28 + $0x2a4] ss:$8 sps:$4 sm:$0xff]   ;;  %v1579_v30 = vld [vmem:[%s1679_s28 + $0x2a0] ss:$8 sps:$4 sm:$0xff]  }
  0x36   : > { %955 = vmatpush1.bf16.msra.mxu0 %v1495_v31  ;;  %v1584_v31 = vld [vmem:[%s1679_s28 + $0x2b4] ss:$8 sps:$4 sm:$0xff]   ;;  %v338_v52 = vld [vmem:[#allocation2] sm:$0xff] }
  0x37   : > { %996 = vmatpush1.bf16.msra.mxu1 %v1496_v32  ;;  %956 = vmatprep.subr.bf16.mxu0 %v1497_v33  ;;  %v1582_v32 = vld [vmem:[%s1679_s28 + $0x2b0] ss:$8 sps:$4 sm:$0xff]   ;;  %v1587_v33 = vld [vmem:[%s1679_s28 + $0x2c4] ss:$8 sps:$4 sm:$0xff]  }
  0x38   : > { %997 = vmatprep.subr.bf16.mxu1 %v1499_v34  ;;  %v1585_v34 = vld [vmem:[%s1679_s28 + $0x2c0] ss:$8 sps:$4 sm:$0xff]  }
  0x3a   : > { %957 = vmatpush1.bf16.msra.mxu0 %v1501_v35  ;;  %v1590_v35 = vld [vmem:[%s1679_s28 + $0x2d4] ss:$8 sps:$4 sm:$0xff]  }
  0x3b   : > { %998 = vmatpush1.bf16.msra.mxu1 %v1502_v36  ;;  %958 = vmatprep.subr.bf16.mxu0 %v1503_v37  ;;  %v1588_v36 = vld [vmem:[%s1679_s28 + $0x2d0] ss:$8 sps:$4 sm:$0xff]   ;;  %v1593_v37 = vld [vmem:[%s1679_s28 + $0x2e4] ss:$8 sps:$4 sm:$0xff]  }
  0x3c   : > { %999 = vmatprep.subr.bf16.mxu1 %v1505_v38  ;;  %v1591_v38 = vld [vmem:[%s1679_s28 + $0x2e0] ss:$8 sps:$4 sm:$0xff]  }
  0x3e   : > { %959 = vmatpush1.bf16.msra.mxu0 %v1507_v39  ;;  %v1596_v39 = vld [vmem:[%s1679_s28 + $0x2f4] ss:$8 sps:$4 sm:$0xff]  }
  0x3f   : > { %1000 = vmatpush1.bf16.msra.mxu1 %v1508_v40  ;;  %960 = vmatprep.subr.bf16.mxu0 %v1509_v41  ;;  %v1594_v40 = vld [vmem:[%s1679_s28 + $0x2f0] ss:$8 sps:$4 sm:$0xff]   ;;  %v1316_v41 = vcombine.low %v1751_v9, %v1751_v9 }
  0x40   : > { %1001 = vmatprep.subr.bf16.mxu1 %v1511_v42 }
  0x42   : > { %961 = vmatpush1.bf16.msra.mxu0 %v1513_v43 }
  0x43   : > { %1002 = vmatpush1.bf16.msra.mxu1 %v1514_v44  ;;  %962 = vmatprep.subr.bf16.mxu0 %v1515_v45 }
  0x44   : > { %1003 = vmatprep.subr.bf16.mxu1 %v1517_v46 }
  0x46   : > { %963 = vmatpush1.bf16.msra.mxu0 %v1519_v50 }
  0x47   : > { %1004 = vmatpush1.bf16.msra.mxu1 %v1520_v51  ;;  %964 = vmatprep.subr.bf16.mxu0 %v1521_v53 }
  0x48   : > { %1005 = vmatprep.subr.bf16.mxu1 %v1523_v54 }
  0x4a   : > { %965 = vmatpush1.bf16.msra.mxu0 %v1525_v55  ;;  %v339_v55 = vld [vmem:[#allocation2 + $0x8] sm:$0xff] }
  0x4b   : > { %1006 = vmatpush1.bf16.msra.mxu1 %v1526_v56  ;;  %966 = vmatprep.subr.bf16.mxu0 %v1527_v57 }
  0x4c   : > { %1007 = vmatprep.subr.bf16.mxu1 %v1529_v58 }
  0x4e   : > { %967 = vmatpush1.bf16.msra.mxu0 %v1531_v59 }
  0x4f   : > { %1008 = vmatpush1.bf16.msra.mxu1 %v1532_v60  ;;  %968 = vmatprep.subr.bf16.mxu0 %v1533_v61 }
  0x50   : > { %1009 = vmatprep.subr.bf16.mxu1 %v1535_v62 }
  0x52   : > { %969 = vmatpush1.bf16.msra.mxu0 %v1537_v63 }
  0x53   : > { %1010 = vmatpush1.bf16.msra.mxu1 %v1538_v0  ;;  %970 = vmatprep.subr.bf16.mxu0 %v1539_v1 }
  0x54   : > { %1011 = vmatprep.subr.bf16.mxu1 %v1541_v2 }
  0x56   : > { %971 = vmatpush1.bf16.msra.mxu0 %v1543_v3 }
  0x57   : > { %1012 = vmatpush1.bf16.msra.mxu1 %v1544_v4  ;;  %1022 = vmatprep.subr.bf16.mxu0 %v1551_v5 }
  0x59   : > { %973 = vmatmul.mubr.bf16.vlgmr.msra.gmra.mrb[0].mxu0 %v1312_v6 }
  0x5a   : > { %1014 = vmatmul.mubr.bf16.vlgmr.msra.gmra.mrb[0].mxu1 %v1314_v7  ;;  %1023 = vmatpush1.bf16.msra.mxu0 %v1549_v8 }
  0x5b   : > { %1054 = vmatprep.mubr.bf16.mxu0 %v1317_v11  ;;  %1024 = vmatprep.subr.bf16.mxu0 %v1554_v10 }
  0x5e   : > { %1025 = vmatpush1.bf16.msra.mxu0 %v1552_v12 }
  0x5f   : > { %1026 = vmatprep.subr.bf16.mxu0 %v1557_v13 }
  0x62   : > { %1027 = vmatpush1.bf16.msra.mxu0 %v1555_v14 }
  0x63   : > { %1028 = vmatprep.subr.bf16.mxu0 %v1560_v15 }
  0x66   : > { %1029 = vmatpush1.bf16.msra.mxu0 %v1558_v16 }
  0x67   : > { %1030 = vmatprep.subr.bf16.mxu0 %v1563_v17 }
  0x6a   : > { %1031 = vmatpush1.bf16.msra.mxu0 %v1561_v18 }
  0x6b   : > { %1032 = vmatprep.subr.bf16.mxu0 %v1566_v19 }
  0x6e   : > { %1033 = vmatpush1.bf16.msra.mxu0 %v1564_v20 }
  0x6f   : > { %1034 = vmatprep.subr.bf16.mxu0 %v1569_v21 }
  0x72   : > { %1035 = vmatpush1.bf16.msra.mxu0 %v1567_v22 }
  0x73   : > { %1036 = vmatprep.subr.bf16.mxu0 %v1572_v23 }
  0x76   : > { %1037 = vmatpush1.bf16.msra.mxu0 %v1570_v24 }
  0x77   : > { %1038 = vmatprep.subr.bf16.mxu0 %v1575_v25 }
  0x7a   : > { %1039 = vmatpush1.bf16.msra.mxu0 %v1573_v26 }
  0x7b   : > { %1040 = vmatprep.subr.bf16.mxu0 %v1578_v27 }
  0x7e   : > { %1041 = vmatpush1.bf16.msra.mxu0 %v1576_v28 }
  0x7f   : > { %1042 = vmatprep.subr.bf16.mxu0 %v1581_v29 }
  0x82   : > { %1043 = vmatpush1.bf16.msra.mxu0 %v1579_v30 }
  0x83   : > { %1044 = vmatprep.subr.bf16.mxu0 %v1584_v31 }
  0x86   : > { %1045 = vmatpush1.bf16.msra.mxu0 %v1582_v32 }
  0x87   : > { %1046 = vmatprep.subr.bf16.mxu0 %v1587_v33 }
  0x8a   : > { %1047 = vmatpush1.bf16.msra.mxu0 %v1585_v34 }
  0x8b   : > { %1048 = vmatprep.subr.bf16.mxu0 %v1590_v35 }
  0x8e   : > { %1049 = vmatpush1.bf16.msra.mxu0 %v1588_v36 }
  0x8f   : > { %1050 = vmatprep.subr.bf16.mxu0 %v1593_v37 }
  0x92   : > { %1051 = vmatpush1.bf16.msra.mxu0 %v1591_v38 }
  0x93   : > { %1052 = vmatprep.subr.bf16.mxu0 %v1596_v39 }
  0x96   : > { %1053 = vmatpush1.bf16.msra.mxu0 %v1594_v40 }
  0x99   : > { %1055 = vmatmul.mubr.bf16.vlgmr.msra.gmra.mrb[4].mxu0 %v1316_v41 }
 0x12c   : > { %v974_v42 = vpop.f32.mrb[0].mxu0 }
 0x12d   : > { %v1015_v43 = vpop.f32.mrb[0].mxu1  ;;  %v976_v45 = vpop.f32.mrb[1].mxu0 }
 0x12e   : > { %v1016_v44 = vadd.f32 %v1015_v43, %v974_v42  ;;  %v1017_v46 = vpop.f32.mrb[1].mxu1  ;;  %v978_v48 = vpop.f32.mrb[2].mxu0 }
 0x12f   : > { %v1018_v47 = vadd.f32 %v1017_v46, %v976_v45  ;;  %v1019_v49 = vpop.f32.mrb[2].mxu1  ;;  %v979_v50 = vpop.f32.mrb[3].mxu0 }
 0x130   : > { %v1020_v51 = vpop.f32.mrb[3].mxu1 }
 0x16c   : > { %v1056_v53 = vpop.f32.mrb[4].mxu0  ;;  %1070 = sbr.rel (%p1414_p7) target bundleno = 393 (0x189), region = 36 }
 0x16d   : > { %v1057_v54 = vadd.f32 %v1056_v53, %v1016_v44  ;;  %v1058_v56 = vpop.f32.mrb[5].mxu0 }
 0x16e   : > { %v1059_v57 = vadd.f32 %v1058_v56, %v1018_v47  ;;  %v1060_v58 = vpop.f32.mrb[6].mxu0 }
 0x16f   : > { %v1063_v59 = vadd.f32 %v1057_v54, %v338_v52  ;;  %v1061_v60 = vpop.f32.mrb[7].mxu0 }
 0x170   : > { %v1064_v61 = vadd.f32 %v1059_v57, %v339_v55 }
 0x171   : > { %1065 = vst [vmem:[#allocation2] sm:$0xff] %v1063_v59 }
 0x172   : > { %1066 = vst [vmem:[#allocation2 + $0x8] sm:$0xff] %v1064_v61 }
 0x178   : > { %v1071_v62 = vld [vmem:[#allocation2] sm:$0xff] }
 0x179   : > { %v1072_v63 = vld [vmem:[#allocation2 + $0x8] sm:$0xff]  ;;  %1073 = vst [vmem:[%s1817_s2] sm:$0xff] %v1071_v62  ;;  %v1075_v0 = vrot.slane %v1071_v62, 4  ;;  %v1089_v2 = vmul.f32 %v1071_v62, %v1071_v62 }
 0x17a   : > { %1074 = vst [vmem:[%s1817_s2 + $0x8] sm:$0xff] %v1072_v63  ;;  %v1081_v1 = vrot.slane %v1072_v63, 4  ;;  %v1090_v3 = vmul.f32 %v1072_v63, %v1072_v63 }
 0x17b   : > { %v1076_v4 = vadd.f32 %v1075_v0, %v1071_v62  ;;  %v1091_v6 = vrot.slane %v1089_v2, 4 }
 0x17c   : > { %v1082_v5 = vadd.f32 %v1081_v1, %v1072_v63  ;;  %v1097_v7 = vrot.slane %v1090_v3, 4 }
 0x17d   : > { %v1077_v8 = vrot.slane %v1076_v4, 2  ;;  %v1092_v10 = vadd.f32 %v1091_v6, %v1089_v2 }
 0x17e   : > { %v1083_v9 = vrot.slane %v1082_v5, 2  ;;  %v1098_v11 = vadd.f32 %v1097_v7, %v1090_v3 }
 0x17f   : > { %v1078_v12 = vadd.f32 %v1077_v8, %v1076_v4  ;;  %v1093_v14 = vrot.slane %v1092_v10, 2 }
 0x180   : > { %v1084_v13 = vadd.f32 %v1083_v9, %v1082_v5  ;;  %v1099_v15 = vrot.slane %v1098_v11, 2 }
 0x181   : > { %v1079_v16 = vrot.slane %v1078_v12, 1  ;;  %v1094_v18 = vadd.f32 %v1093_v14, %v1092_v10 }
 0x182   : > { %v1085_v17 = vrot.slane %v1084_v13, 1  ;;  %v1100_v19 = vadd.f32 %v1099_v15, %v1098_v11 }
 0x183   : > { %v1080_v20 = vadd.f32 %v1079_v16, %v1078_v12  ;;  %v1095_v22 = vrot.slane %v1094_v18, 1 }
 0x184   : > { %v1086_v21 = vadd.f32 %v1085_v17, %v1084_v13  ;;  %v1101_v23 = vrot.slane %v1100_v19, 1 }
 0x185   : > { %1087 = vst [vmem:[%s1818_s3] sm:$0xff] %v1080_v20  ;;  %v1096_v24 = vadd.f32 %v1095_v22, %v1094_v18 }
 0x186   : > { %1088 = vst [vmem:[%s1818_s3 + $0x8] sm:$0xff] %v1086_v21  ;;  %v1102_v25 = vadd.f32 %v1101_v23, %v1100_v19 }
 0x187   : > { %1103 = vst [vmem:[%s1819_s4] sm:$0xff] %v1096_v24 }
 0x188   : > { %1104 = vst [vmem:[%s1819_s4 + $0x8] sm:$0xff] %v1102_v25 }
 0x189 PF: > { %s15_s17 = sadd.s32 1, %s1621_s17   ;;  %s1820_s15 = smov %s1617_s16 }
 0x18a   : > { %p12_p8 = scmp.ge.s32.totalorder %s15_s17, 5   ;;  %s1821_s16 = smov %s1823_s18 }
 0x18c   :  { %14 = sbr.rel (!%p12_p8) target bundleno = 2 (0x2), region = 93 }

// kernel: resnet18_forward.76
= control target key start
LH: loop header
LB: loop body
LE: loop exit
PB: predicated region body
PF: predicated region fallthrough
CT: control target
= control target key end

     0   :  { %s1189_s15 = smov 0   ;;  %s1191_s16 = smov 0   ;;  %s1376_s0 = inlined_call_operand.vmem [shape: bf16[8,256], index: 0, kind: input, shape index: {}]   ;;  %s1377_s1 = inlined_call_operand.vmem [shape: bf16[256,512], index: 1, kind: input, shape index: {}]   ;;  %s1378_s2 = inlined_call_operand.vmem [shape: f32[8,512], index: 2, kind: output, shape index: {0}]   ;;  %s1379_s3 = inlined_call_operand.vmem [shape: f32[8,512], index: 3, kind: output, shape index: {1}]   ;;  %s1380_s4 = inlined_call_operand.vmem [shape: f32[8,512], index: 4, kind: output, shape index: {2}]  }
   0x1   :  { %s1193_s17 = smov 0   ;;  %s1195_s18 = smov 0  }
   0x2   :  { %s1197_s19 = smov 0  }
   0x3 LB: > { %s30_s20 = sadd.s32 1, %s1158_s18  ;;  %p78_p1 = scmp.ne.s32.totalorder %s1150_s16, %s1146_s15  ;;  %s1162_s19 = sphi %s1197_s19, %s15_s19   ;;  %s1158_s18 = sphi %s1195_s18, %s1384_s18   ;;  %s1154_s17 = sphi %s1193_s17, %s1383_s17   ;;  %s1150_s16 = sphi %s1191_s16, %s1382_s16   ;;  %s1146_s15 = sphi %s1189_s15, %s1381_s15  }
   0x4   : > { %p32_p0 = scmp.ge.s32.totalorder %s30_s20, 2  ;;  %p79_p2 = scmp.eq.s32.totalorder %s1162_s19, 0 }
   0x5   : > { %s71_s22 = sadd.s32 1, %s1150_s16  ;;  %p985_p5 = scmp.ge.s32.totalorder %s1162_s19, 2 }
   0x6   : > { %s1386_s20 = smov (%p32_p0, %s30_s20), 0  ;;  %p80_p3 = por %p79_p2, %p78_p1 }
   0x7   : > { %s67_s21 = ssub.s32 %s1158_s18, %s1386_s20  ;;  %201 = sbr.rel (%p985_p5) target bundleno = 34 (0x22), region = 20 }
   0x8   : > { %p69_p4 = scmp.eq.s32.totalorder %s67_s21, 0 }
   0xa   : > { %s1224_s23 = scalar_select %p69_p4, %s1150_s16, %s71_s22  }
   0xe   : > { %204 = sbr.rel (!%p80_p3) target bundleno = 34 (0x22), region = 24  ;;  %s206_s24 = sand.u32 (%p80_p3), 1, %s1150_s16  }
   0xf   : > { %s1033_s25 = sshll.u32 (%p80_p3), %s1158_s18, 3  ;;  %s986_s26 = sshll.u32 (%p80_p3), %s206_s24, 8 }
  0x10   : > { %s1232_s29 = scalar_lea.vmem (%p80_p3), %s1377_s1, %s1033_s25  ;;  %s1237_s30 = scalar_lea.vmem (%p80_p3), [#allocation3], %s986_s26 }
  0x11   : > { %v304_v0 = vld [vmem:[%s1232_s29] sm:$0xff] (%p80_p3)  ;;  %v306_v1 = vld [vmem:[%s1232_s29 + $0x10] sm:$0xff] (%p80_p3) }
  0x12   : > { %v308_v2 = vld [vmem:[%s1232_s29 + $0x20] sm:$0xff] (%p80_p3)  ;;  %305 = vst [vmem:[%s1237_s30] sm:$0xff] (%p80_p3), %v304_v0  ;;  %307 = vst [vmem:[%s1237_s30 + $0x8] sm:$0xff] (%p80_p3), %v306_v1  ;;  %v310_v3 = vld [vmem:[%s1232_s29 + $0x30] sm:$0xff] (%p80_p3) }
  0x13   : > { %309 = vst [vmem:[%s1237_s30 + $0x10] sm:$0xff] (%p80_p3), %v308_v2  ;;  %v312_v4 = vld [vmem:[%s1232_s29 + $0x40] sm:$0xff] (%p80_p3)  ;;  %v314_v5 = vld [vmem:[%s1232_s29 + $0x50] sm:$0xff] (%p80_p3)  ;;  %311 = vst [vmem:[%s1237_s30 + $0x18] sm:$0xff] (%p80_p3), %v310_v3 }
  0x14   : > { %313 = vst [vmem:[%s1237_s30 + $0x20] sm:$0xff] (%p80_p3), %v312_v4  ;;  %315 = vst [vmem:[%s1237_s30 + $0x28] sm:$0xff] (%p80_p3), %v314_v5  ;;  %v316_v6 = vld [vmem:[%s1232_s29 + $0x60] sm:$0xff] (%p80_p3)  ;;  %v318_v7 = vld [vmem:[%s1232_s29 + $0x70] sm:$0xff] (%p80_p3) }
  0x15   : > { %v320_v8 = vld [vmem:[%s1232_s29 + $0x80] sm:$0xff]  ;;  %317 = vst [vmem:[%s1237_s30 + $0x30] sm:$0xff] %v316_v6  ;;  %319 = vst [vmem:[%s1237_s30 + $0x38] sm:$0xff] %v318_v7  ;;  %v322_v9 = vld [vmem:[%s1232_s29 + $0x90] sm:$0xff] }
  0x16   : > { %321 = vst [vmem:[%s1237_s30 + $0x40] sm:$0xff] %v320_v8  ;;  %v324_v10 = vld [vmem:[%s1232_s29 + $0xa0] sm:$0xff]  ;;  %v326_v11 = vld [vmem:[%s1232_s29 + $0xb0] sm:$0xff]  ;;  %323 = vst [vmem:[%s1237_s30 + $0x48] sm:$0xff] %v322_v9 }
  0x17   : > { %325 = vst [vmem:[%s1237_s30 + $0x50] sm:$0xff] %v324_v10  ;;  %327 = vst [vmem:[%s1237_s30 + $0x58] sm:$0xff] %v326_v11  ;;  %v328_v12 = vld [vmem:[%s1232_s29 + $0xc0] sm:$0xff]  ;;  %v330_v13 = vld [vmem:[%s1232_s29 + $0xd0] sm:$0xff] }
  0x18   : > { %v332_v14 = vld [vmem:[%s1232_s29 + $0xe0] sm:$0xff]  ;;  %329 = vst [vmem:[%s1237_s30 + $0x60] sm:$0xff] %v328_v12  ;;  %331 = vst [vmem:[%s1237_s30 + $0x68] sm:$0xff] %v330_v13  ;;  %v334_v15 = vld [vmem:[%s1232_s29 + $0xf0] sm:$0xff] }
  0x19   : > { %333 = vst [vmem:[%s1237_s30 + $0x70] sm:$0xff] %v332_v14  ;;  %v336_v16 = vld [vmem:[%s1232_s29 + $0x100] sm:$0xff]  ;;  %v338_v17 = vld [vmem:[%s1232_s29 + $0x110] sm:$0xff]  ;;  %335 = vst [vmem:[%s1237_s30 + $0x78] sm:$0xff] %v334_v15 }
  0x1a   : > { %337 = vst [vmem:[%s1237_s30 + $0x80] sm:$0xff] %v336_v16  ;;  %339 = vst [vmem:[%s1237_s30 + $0x88] sm:$0xff] %v338_v17  ;;  %v340_v18 = vld [vmem:[%s1232_s29 + $0x120] sm:$0xff]  ;;  %v342_v19 = vld [vmem:[%s1232_s29 + $0x130] sm:$0xff] }
  0x1b   : > { %v344_v20 = vld [vmem:[%s1232_s29 + $0x140] sm:$0xff]  ;;  %341 = vst [vmem:[%s1237_s30 + $0x90] sm:$0xff] %v340_v18  ;;  %343 = vst [vmem:[%s1237_s30 + $0x98] sm:$0xff] %v342_v19  ;;  %v346_v21 = vld [vmem:[%s1232_s29 + $0x150] sm:$0xff] }
  0x1c   : > { %345 = vst [vmem:[%s1237_s30 + $0xa0] sm:$0xff] %v344_v20  ;;  %v348_v22 = vld [vmem:[%s1232_s29 + $0x160] sm:$0xff]  ;;  %v350_v23 = vld [vmem:[%s1232_s29 + $0x170] sm:$0xff]  ;;  %347 = vst [vmem:[%s1237_s30 + $0xa8] sm:$0xff] %v346_v21 }
  0x1d   : > { %349 = vst [vmem:[%s1237_s30 + $0xb0] sm:$0xff] %v348_v22  ;;  %351 = vst [vmem:[%s1237_s30 + $0xb8] sm:$0xff] %v350_v23  ;;  %v352_v24 = vld [vmem:[%s1232_s29 + $0x180] sm:$0xff]  ;;  %v354_v25 = vld [vmem:[%s1232_s29 + $0x190] sm:$0xff] }
  0x1e   : > { %v356_v26 = vld [vmem:[%s1232_s29 + $0x1a0] sm:$0xff]  ;;  %353 = vst [vmem:[%s1237_s30 + $0xc0] sm:$0xff] %v352_v24  ;;  %355 = vst [vmem:[%s1237_s30 + $0xc8] sm:$0xff] %v354_v25  ;;  %v358_v27 = vld [vmem:[%s1232_s29 + $0x1b0] sm:$0xff] }
  0x1f   : > { %357 = vst [vmem:[%s1237_s30 + $0xd0] sm:$0xff] %v356_v26  ;;  %v360_v28 = vld [vmem:[%s1232_s29 + $0x1c0] sm:$0xff]  ;;  %v362_v29 = vld [vmem:[%s1232_s29 + $0x1d0] sm:$0xff]  ;;  %359 = vst [vmem:[%s1237_s30 + $0xd8] sm:$0xff] %v358_v27 }
  0x20   : > { %361 = vst [vmem:[%s1237_s30 + $0xe0] sm:$0xff] %v360_v28  ;;  %363 = vst [vmem:[%s1237_s30 + $0xe8] sm:$0xff] %v362_v29  ;;  %v364_v30 = vld [vmem:[%s1232_s29 + $0x1e0] sm:$0xff]  ;;  %v366_v31 = vld [vmem:[%s1232_s29 + $0x1f0] sm:$0xff] }
  0x21   : > { %365 = vst [vmem:[%s1237_s30 + $0xf0] sm:$0xff] %v364_v30  ;;  %367 = vst [vmem:[%s1237_s30 + $0xf8] sm:$0xff] %v366_v31 }
  0x22 PF: > { %p989_p6 = scmp.ge.s32.totalorder %s1162_s19, 1  ;;  %p372_p7 = scmp.lt.s32.totalorder %s1162_s19, 3 }
  0x24   : > { %p373_p8 = pnand %p989_p6, %p372_p7 }
  0x25   : > { %s379_s5 = sand.u32 (!%p373_p8), 1, %s1146_s15   ;;  %v1306_v32 = vld [vmem:[%s1376_s0] sm:$0xff] (!%p373_p8)  ;;  %s991_s10 = sshll.u32 (!%p373_p8), %s1154_s17, 1 }
  0x26   : > { %376 = sbr.rel (%p373_p8) target bundleno = 333 (0x14d), region = 62  ;;  %s990_s8 = sshll.u32 (!%p373_p8), %s379_s5, 8  ;;  %v998_v33 = vcombine.high (!%p373_p8), %v1306_v32, %v1306_v32  ;;  %v997_v2 = vcombine.low (!%p373_p8), %v1306_v32, %v1306_v32 }
  0x27   : > { %s1310_s9 = scalar_lea.vmem (!%p373_p8), [#allocation3], %s990_s8  ;;  %p450_p9 = scmp.lt.s32.totalorder (!%p373_p8), %s991_s10, 3 }
  0x28   : > { %v1074_v34 = vld [vmem:[%s1310_s9 + $0x4] ss:$8 sps:$4 sm:$0xff] (!%p373_p8)   ;;  %717 = vmatprep.mubr.bf16.mxu0 (!%p373_p8), %v998_v33  ;;  %v1076_v35 = vld [vmem:[%s1310_s9] ss:$8 sps:$4 sm:$0xff] (!%p373_p8)   ;;  %v1077_v36 = vld [vmem:[%s1310_s9 + $0x14] ss:$8 sps:$4 sm:$0xff] (!%p373_p8)  }
  0x29   : > { %685 = vmatprep.subr.bf16.mxu0 (!%p373_p8), %v1074_v34  ;;  %v1079_v37 = vld [vmem:[%s1310_s9 + $0x10] ss:$8 sps:$4 sm:$0xff] (!%p373_p8)   ;;  %v1080_v38 = vld [vmem:[%s1310_s9 + $0x24] ss:$8 sps:$4 sm:$0xff] (!%p373_p8)   ;;  %v1082_v39 = vld [vmem:[%s1310_s9 + $0x20] ss:$8 sps:$4 sm:$0xff] (!%p373_p8)  }
  0x2a   : > { %686 = vmatpush1.bf16.msra.mxu0 (!%p373_p8), %v1076_v35  ;;  %v1083_v40 = vld [vmem:[%s1310_s9 + $0x34] ss:$8 sps:$4 sm:$0xff] (!%p373_p8)   ;;  %v1085_v41 = vld [vmem:[%s1310_s9 + $0x30] ss:$8 sps:$4 sm:$0xff] (!%p373_p8)   ;;  %v1086_v42 = vld [vmem:[%s1310_s9 + $0x44] ss:$8 sps:$4 sm:$0xff] (!%p373_p8)  }
  0x2b   : > { %687 = vmatprep.subr.bf16.mxu0 (!%p373_p8), %v1077_v36  ;;  %v1088_v43 = vld [vmem:[%s1310_s9 + $0x40] ss:$8 sps:$4 sm:$0xff] (!%p373_p8)   ;;  %v1089_v44 = vld [vmem:[%s1310_s9 + $0x54] ss:$8 sps:$4 sm:$0xff] (!%p373_p8)   ;;  %v1091_v45 = vld [vmem:[%s1310_s9 + $0x50] ss:$8 sps:$4 sm:$0xff] (!%p373_p8)  }
  0x2c   : > { %v1092_v46 = vld [vmem:[%s1310_s9 + $0x64] ss:$8 sps:$4 sm:$0xff] (!%p373_p8)   ;;  %v1094_v47 = vld [vmem:[%s1310_s9 + $0x60] ss:$8 sps:$4 sm:$0xff] (!%p373_p8)   ;;  %v1095_v48 = vld [vmem:[%s1310_s9 + $0x74] ss:$8 sps:$4 sm:$0xff] (!%p373_p8)  }
  0x2d   : > { %v1097_v49 = vld [vmem:[%s1310_s9 + $0x70] ss:$8 sps:$4 sm:$0xff]   ;;  %v1098_v50 = vld [vmem:[%s1310_s9 + $0x84] ss:$8 sps:$4 sm:$0xff]   ;;  %v1100_v51 = vld [vmem:[%s1310_s9 + $0x80] ss:$8 sps:$4 sm:$0xff]  }
  0x2e   : > { %688 = vmatpush1.bf16.msra.mxu0 %v1079_v37  ;;  %v1101_v52 = vld [vmem:[%s1310_s9 + $0x94] ss:$8 sps:$4 sm:$0xff]   ;;  %v1103_v53 = vld [vmem:[%s1310_s9 + $0x90] ss:$8 sps:$4 sm:$0xff]   ;;  %v1104_v54 = vld [vmem:[%s1310_s9 + $0xa4] ss:$8 sps:$4 sm:$0xff]  }
  0x2f   : > { %689 = vmatprep.subr.bf16.mxu0 %v1080_v38  ;;  %v1106_v55 = vld [vmem:[%s1310_s9 + $0xa0] ss:$8 sps:$4 sm:$0xff]   ;;  %v1107_v56 = vld [vmem:[%s1310_s9 + $0xb4] ss:$8 sps:$4 sm:$0xff]   ;;  %v1109_v57 = vld [vmem:[%s1310_s9 + $0xb0] ss:$8 sps:$4 sm:$0xff]  }
  0x30   : > { %v1110_v58 = vld [vmem:[%s1310_s9 + $0xc4] ss:$8 sps:$4 sm:$0xff]   ;;  %v1112_v59 = vld [vmem:[%s1310_s9 + $0xc0] ss:$8 sps:$4 sm:$0xff]   ;;  %v1113_v60 = vld [vmem:[%s1310_s9 + $0xd4] ss:$8 sps:$4 sm:$0xff]  }
  0x31   : > { %v1115_v61 = vld [vmem:[%s1310_s9 + $0xd0] ss:$8 sps:$4 sm:$0xff]   ;;  %v1116_v62 = vld [vmem:[%s1310_s9 + $0xe4] ss:$8 sps:$4 sm:$0xff]   ;;  %v1118_v63 = vld [vmem:[%s1310_s9 + $0xe0] ss:$8 sps:$4 sm:$0xff]  }
  0x32   : > { %690 = vmatpush1.bf16.msra.mxu0 %v1082_v39  ;;  %v1119_v0 = vld [vmem:[%s1310_s9 + $0xf4] ss:$8 sps:$4 sm:$0xff]   ;;  %v1121_v1 = vld [vmem:[%s1310_s9 + $0xf0] ss:$8 sps:$4 sm:$0xff]   ;;  %s1388_s10 = smov (!%p450_p9, %s991_s10), 3 }
  0x33   : > { %691 = vmatprep.subr.bf16.mxu0 %v1083_v40  ;;  %s1347_s11 = sshll.u32 %s1388_s10, 3 }
  0x34   : > { %s455_s14 = scalar_lea.vmem %s1378_s2, %s1347_s11  ;;  %s465_s21 = scalar_lea.vmem %s1379_s3, %s1347_s11 }
  0x35   : > { %s475_s25 = scalar_lea.vmem %s1380_s4, %s1347_s11 }
  0x36   : > { %692 = vmatpush1.bf16.msra.mxu0 %v1085_v41 }
  0x37   : > { %693 = vmatprep.subr.bf16.mxu0 %v1086_v42 }
  0x3a   : > { %694 = vmatpush1.bf16.msra.mxu0 %v1088_v43 }
  0x3b   : > { %695 = vmatprep.subr.bf16.mxu0 %v1089_v44 }
  0x3e   : > { %696 = vmatpush1.bf16.msra.mxu0 %v1091_v45 }
  0x3f   : > { %697 = vmatprep.subr.bf16.mxu0 %v1092_v46 }
  0x42   : > { %698 = vmatpush1.bf16.msra.mxu0 %v1094_v47 }
  0x43   : > { %699 = vmatprep.subr.bf16.mxu0 %v1095_v48 }
  0x46   : > { %700 = vmatpush1.bf16.msra.mxu0 %v1097_v49 }
  0x47   : > { %701 = vmatprep.subr.bf16.mxu0 %v1098_v50 }
  0x4a   : > { %702 = vmatpush1.bf16.msra.mxu0 %v1100_v51 }
  0x4b   : > { %703 = vmatprep.subr.bf16.mxu0 %v1101_v52 }
  0x4e   : > { %704 = vmatpush1.bf16.msra.mxu0 %v1103_v53 }
  0x4f   : > { %705 = vmatprep.subr.bf16.mxu0 %v1104_v54 }
  0x52   : > { %706 = vmatpush1.bf16.msra.mxu0 %v1106_v55 }
  0x53   : > { %707 = vmatprep.subr.bf16.mxu0 %v1107_v56 }
  0x56   : > { %708 = vmatpush1.bf16.msra.mxu0 %v1109_v57 }
  0x57   : > { %709 = vmatprep.subr.bf16.mxu0 %v1110_v58 }
  0x5a   : > { %710 = vmatpush1.bf16.msra.mxu0 %v1112_v59 }
  0x5b   : > { %711 = vmatprep.subr.bf16.mxu0 %v1113_v60 }
  0x5e   : > { %712 = vmatpush1.bf16.msra.mxu0 %v1115_v61 }
  0x5f   : > { %713 = vmatprep.subr.bf16.mxu0 %v1116_v62 }
  0x62   : > { %714 = vmatpush1.bf16.msra.mxu0 %v1118_v63 }
  0x63   : > { %715 = vmatprep.subr.bf16.mxu0 %v1119_v0 }
  0x66   : > { %716 = vmatpush1.bf16.msra.mxu0 %v1121_v1 }
  0x69   : > { %718 = vmatmul.mubr.bf16.vlgmr.msra.gmra.mrb[0].mxu0 %v997_v2 }
 0x13c   : > { %v719_v3 = vpop.f32.mrb[0].mxu0 }
 0x13d   : > { %735 = vst [vmem:[%s455_s14] sm:$0xff] %v719_v3  ;;  %v737_v4 = vrot.slane %v719_v3, 4  ;;  %v751_v5 = vmul.f32 %v719_v3, %v719_v3  ;;  %v721_v6 = vpop.f32.mrb[1].mxu0 }
 0x13e   : > { %736 = vst [vmem:[%s455_s14 + $0x8] sm:$0xff] %v721_v6  ;;  %v743_v7 = vrot.slane %v721_v6, 4  ;;  %v752_v8 = vmul.f32 %v721_v6, %v721_v6  ;;  %v723_v9 = vpop.f32.mrb[2].mxu0 }
 0x13f   : > { %v738_v10 = vadd.f32 %v737_v4, %v719_v3  ;;  %v753_v11 = vrot.slane %v751_v5, 4  ;;  %v724_v12 = vpop.f32.mrb[3].mxu0 }
 0x140   : > { %v744_v13 = vadd.f32 %v743_v7, %v721_v6  ;;  %v759_v14 = vrot.slane %v752_v8, 4 }
 0x141   : > { %v739_v15 = vrot.slane %v738_v10, 2  ;;  %v754_v16 = vadd.f32 %v753_v11, %v751_v5 }
 0x142   : > { %v745_v17 = vrot.slane %v744_v13, 2  ;;  %v760_v18 = vadd.f32 %v759_v14, %v752_v8 }
 0x143   : > { %v740_v19 = vadd.f32 %v739_v15, %v738_v10  ;;  %v755_v20 = vrot.slane %v754_v16, 2 }
 0x144   : > { %v746_v21 = vadd.f32 %v745_v17, %v744_v13  ;;  %v761_v22 = vrot.slane %v760_v18, 2 }
 0x145   : > { %v741_v23 = vrot.slane %v740_v19, 1  ;;  %v756_v24 = vadd.f32 %v755_v20, %v754_v16 }
 0x146   : > { %v747_v25 = vrot.slane %v746_v21, 1  ;;  %v762_v26 = vadd.f32 %v761_v22, %v760_v18 }
 0x147   : > { %v742_v27 = vadd.f32 %v741_v23, %v740_v19  ;;  %v757_v28 = vrot.slane %v756_v24, 1 }
 0x148   : > { %v748_v29 = vadd.f32 %v747_v25, %v746_v21  ;;  %v763_v30 = vrot.slane %v762_v26, 1 }
 0x149   : > { %749 = vst [vmem:[%s465_s21] sm:$0xff] %v742_v27  ;;  %v758_v31 = vadd.f32 %v757_v28, %v756_v24 }
 0x14a   : > { %750 = vst [vmem:[%s465_s21 + $0x8] sm:$0xff] %v748_v29  ;;  %v764_v32 = vadd.f32 %v763_v30, %v762_v26 }
 0x14b   : > { %765 = vst [vmem:[%s475_s25] sm:$0xff] %v758_v31 }
 0x14c   : > { %766 = vst [vmem:[%s475_s25 + $0x8] sm:$0xff] %v764_v32 }
 0x14d PF: > { %s15_s19 = sadd.s32 1, %s1162_s19   ;;  %s1381_s15 = smov %s1150_s16 }
 0x14e   : > { %p12_p10 = scmp.ge.s32.totalorder %s15_s19, 4   ;;  %s1382_s16 = smov %s1224_s23 }
 0x14f   : > { %s1383_s17 = smov %s1158_s18  ;;  %s1384_s18 = smov %s1386_s20 }
 0x150   :  { %14 = sbr.rel (!%p12_p10) target bundleno = 3 (0x3), region = 136 }

// kernel: resnet18_forward.77
= control target key start
LH: loop header
LB: loop body
LE: loop exit
PB: predicated region body
PF: predicated region fallthrough
CT: control target
= control target key end

     0   :  { %v17_v0 = vlaneseq  ;;  %v95_v1 = vmov 1983009808   ;;  %s128_s1 = inlined_call_operand.vmem [shape: f32[1,512], index: 1, kind: input, shape index: {}]   ;;  %s129_s2 = inlined_call_operand.vmem [shape: f32[1,512], index: 2, kind: input, shape index: {}]   ;;  %s130_s0 = inlined_call_operand.vmem [shape: f32[2,512], index: 0, kind: input, shape index: {}]   ;;  %s131_s3 = inlined_call_operand.vmem [shape: f32[2,512], index: 3, kind: output, shape index: {}]  }
   0x1   :  { %v36_v2 = vunpack.c.l.s4 %v95_v1  ;;  %v15_v4 = vld [vmem:[%s128_s1] sm:$0xf] }
   0x2   :  { %v18_v3 = vshrl.u32 %v17_v0, 7  ;;  %v52_v10 = vld [vmem:[%s129_s2] sm:$0xf] }
   0x3   :  { %v37_v5 = vunpack.c.0.s8 %v36_v2  ;;  %v14_v26 = vld [vmem:[%s130_s0] sm:$0xff] }
   0x4   :  { %v19_v6 = vsub.s32 0, %v18_v3  ;;  %v23_v7 = vsub.s32 1, %v18_v3  ;;  %v27_v8 = vsub.s32 2, %v18_v3  ;;  %v31_v9 = vsub.s32 3, %v18_v3 }
   0x5   :  { %v40_v11 = vsub.s32 %v37_v5, %v18_v3 }
   0x6   :  { %v20_v12 = vrot.slane %v15_v4, %v19_v6  ;;  %v24_v13 = vrot.slane %v15_v4, %v23_v7  ;;  %v28_v14 = vrot.slane %v15_v4, %v27_v8  ;;  %v32_v15 = vrot.slane %v15_v4, %v31_v9 }
   0x7   :  { %v57_v16 = vrot.slane %v52_v10, %v19_v6  ;;  %v61_v17 = vrot.slane %v52_v10, %v23_v7  ;;  %v65_v18 = vrot.slane %v52_v10, %v27_v8  ;;  %v69_v19 = vrot.slane %v52_v10, %v31_v9 }
   0x8   :  { %v33_v20 = vcombine.low %v20_v12, %v24_v13  ;;  %v34_v21 = vcombine.low %v28_v14, %v32_v15 }
   0x9   :  { %v70_v22 = vcombine.low %v57_v16, %v61_v17  ;;  %v71_v23 = vcombine.low %v65_v18, %v69_v19 }
   0xa   :  { %v41_v24 = vrot.slane %v33_v20, %v40_v11  ;;  %v48_v25 = vrot.slane %v34_v21, %v40_v11 }
   0xb   :  { %v78_v27 = vrot.slane %v70_v22, %v40_v11  ;;  %v85_v28 = vrot.slane %v71_v23, %v40_v11 }
   0xc   :  { %v49_v29 = vcombine.low %v41_v24, %v48_v25 }
   0xd   :  { %v86_v30 = vcombine.low %v78_v27, %v85_v28 }
   0xe   :  { %v51_v31 = vmul.f32 %v49_v29, %v14_v26 }
  0x10   :  { %v88_v32 = vadd.f32 %v86_v30, %v51_v31 }
  0x12   :  { %89 = vst [vmem:[%s131_s3] sm:$0xff] %v88_v32 }

// kernel: resnet18_forward.75
= control target key start
LH: loop header
LB: loop body
LE: loop exit
PB: predicated region body
PF: predicated region fallthrough
CT: control target
= control target key end

     0   :  { %v17_v0 = vlaneseq  ;;  %v96_v1 = vmov 1983009808   ;;  %s129_s1 = inlined_call_operand.vmem [shape: f32[1,512], index: 1, kind: input, shape index: {}]   ;;  %s130_s2 = inlined_call_operand.vmem [shape: f32[1,512], index: 2, kind: input, shape index: {}]   ;;  %s131_s0 = inlined_call_operand.vmem [shape: f32[2,512], index: 0, kind: input, shape index: {}]   ;;  %s132_s3 = inlined_call_operand.vmem [shape: f32[2,512], index: 3, kind: output, shape index: {}]  }
   0x1   :  { %v36_v2 = vunpack.c.l.s4 %v96_v1  ;;  %v15_v4 = vld [vmem:[%s129_s1] sm:$0xf] }
   0x2   :  { %v18_v3 = vshrl.u32 %v17_v0, 7  ;;  %v52_v10 = vld [vmem:[%s130_s2] sm:$0xf] }
   0x3   :  { %v37_v5 = vunpack.c.0.s8 %v36_v2  ;;  %v14_v26 = vld [vmem:[%s131_s0] sm:$0xff] }
   0x4   :  { %v19_v6 = vsub.s32 0, %v18_v3  ;;  %v23_v7 = vsub.s32 1, %v18_v3  ;;  %v27_v8 = vsub.s32 2, %v18_v3  ;;  %v31_v9 = vsub.s32 3, %v18_v3 }
   0x5   :  { %v40_v11 = vsub.s32 %v37_v5, %v18_v3 }
   0x6   :  { %v20_v12 = vrot.slane %v15_v4, %v19_v6  ;;  %v24_v13 = vrot.slane %v15_v4, %v23_v7  ;;  %v28_v14 = vrot.slane %v15_v4, %v27_v8  ;;  %v32_v15 = vrot.slane %v15_v4, %v31_v9 }
   0x7   :  { %v57_v16 = vrot.slane %v52_v10, %v19_v6  ;;  %v61_v17 = vrot.slane %v52_v10, %v23_v7  ;;  %v65_v18 = vrot.slane %v52_v10, %v27_v8  ;;  %v69_v19 = vrot.slane %v52_v10, %v31_v9 }
   0x8   :  { %v33_v20 = vcombine.low %v20_v12, %v24_v13  ;;  %v34_v21 = vcombine.low %v28_v14, %v32_v15 }
   0x9   :  { %v70_v22 = vcombine.low %v57_v16, %v61_v17  ;;  %v71_v23 = vcombine.low %v65_v18, %v69_v19 }
   0xa   :  { %v41_v24 = vrot.slane %v33_v20, %v40_v11  ;;  %v48_v25 = vrot.slane %v34_v21, %v40_v11 }
   0xb   :  { %v78_v27 = vrot.slane %v70_v22, %v40_v11  ;;  %v85_v28 = vrot.slane %v71_v23, %v40_v11 }
   0xc   :  { %v49_v29 = vcombine.low %v41_v24, %v48_v25 }
   0xd   :  { %v86_v30 = vcombine.low %v78_v27, %v85_v28 }
   0xe   :  { %v51_v31 = vmul.f32 %v49_v29, %v14_v26 }
  0x10   :  { %v88_v32 = vadd.f32 %v86_v30, %v51_v31 }
  0x12   :  { %v89_v33 = vmax.f32 %v88_v32, 0.0 }
  0x14   :  { %90 = vst [vmem:[%s132_s3] sm:$0xff] %v89_v33 }

// kernel: resnet18_forward.74
= control target key start
LH: loop header
LB: loop body
LE: loop exit
PB: predicated region body
PF: predicated region fallthrough
CT: control target
= control target key end

     0   :  { %s2133_s15 = smov 0   ;;  %s2135_s16 = smov 0   ;;  %s2550_s0 = inlined_call_operand.vmem [shape: bf16[8,2304], index: 0, kind: input, shape index: {}]   ;;  %s2551_s1 = inlined_call_operand.vmem [shape: bf16[2304,512], index: 1, kind: input, shape index: {}]   ;;  %s2552_s2 = inlined_call_operand.vmem [shape: f32[8,512], index: 2, kind: output, shape index: {0}]   ;;  %s2553_s3 = inlined_call_operand.vmem [shape: f32[8,512], index: 3, kind: output, shape index: {1}]   ;;  %s2554_s4 = inlined_call_operand.vmem [shape: f32[8,512], index: 4, kind: output, shape index: {2}]  }
   0x1   :  { %s2137_s17 = smov 0   ;;  %s2139_s18 = smov 0  }
   0x2   :  { %s2141_s19 = smov 0   ;;  %s2143_s20 = smov 0  }
   0x3   :  { %s2145_s21 = smov 0  }
   0x4 LB: > { %s27_s22 = sadd.s32 1, %s2097_s19  ;;  %s30_s23 = sadd.s32 1, %s2101_s20  ;;  %s2105_s21 = sphi %s2145_s21, %s15_s21   ;;  %s2101_s20 = sphi %s2143_s20, %s2560_s20   ;;  %s2097_s19 = sphi %s2141_s19, %s2559_s19   ;;  %s2093_s18 = sphi %s2139_s18, %s2558_s18   ;;  %s2089_s17 = sphi %s2137_s17, %s2557_s17   ;;  %s2085_s16 = sphi %s2135_s16, %s2556_s16   ;;  %s2081_s15 = sphi %s2133_s15, %s2555_s15  }
   0x5   : > { %p28_p0 = scmp.ge.s32.totalorder %s27_s22, 3  ;;  %p78_p1 = scmp.ne.s32.totalorder %s2085_s16, %s2081_s15 }
   0x6   : > { %p79_p2 = scmp.eq.s32.totalorder %s2105_s21, 0  ;;  %s71_s27 = sadd.s32 1, %s2085_s16 }
   0x7   : > { %s2562_s22 = smov (%p28_p0, %s27_s22), 0  ;;  %s2564_s23 = smov (!%p28_p0, %s30_s23), %s2101_s20 }
   0x8   : > { %p80_p3 = por %p79_p2, %p78_p1  ;;  %p32_p4 = scmp.ge.s32.totalorder %s2564_s23, 2 }
   0x9   : > { %s66_s24 = ssub.s32 %s2097_s19, %s2562_s22  ;;  %p1723_p6 = scmp.ge.s32.totalorder %s2105_s21, 6 }
   0xa   : > { %s2566_s23 = smov (%p32_p4, %s2564_s23), 0 }
   0xb   : > { %s67_s25 = ssub.s32 %s2101_s20, %s2566_s23  ;;  %188 = sbr.rel (%p1723_p6) target bundleno = 74 (0x4a), region = 16 }
   0xc   : > { %s68_s26 = sor.u32 %s67_s25, %s66_s24 }
   0xd   : > { %p69_p5 = scmp.eq.s32.totalorder %s68_s26, 0 }
   0xf   : > { %s2184_s28 = scalar_select %p69_p5, %s2085_s16, %s71_s27  }
  0x12   : > { %204 = sbr.rel (!%p80_p3) target bundleno = 74 (0x4a), region = 24  ;;  %s206_s29 = sand.u32 (%p80_p3), 1, %s2085_s16  }
  0x13   : > { %s1842_s30 = smul.u32 (%p80_p3), 768, %s206_s29  ;;  %s1724_s5 = sshll.u32 (%p80_p3), %s2101_s20, 1 }
  0x14   : > { %s1841_s6 = smul.u32 (%p80_p3), 384, %s2097_s19 }
  0x15   : > { %s2198_s12 = scalar_lea.vmem (%p80_p3), [#allocation3], %s1842_s30 }
  0x16   : > { %s212_s7 = sadd.s32 (%p80_p3), %s1841_s6, %s1724_s5 }
  0x17   : > { %s1726_s8 = sshll.u32 (%p80_p3), %s212_s7, 2 }
  0x18   : > { %s2193_s11 = scalar_lea.vmem (%p80_p3), %s2551_s1, %s1726_s8 }
  0x19   : > { %v432_v0 = vld [vmem:[%s2193_s11] sm:$0xff]  ;;  %v434_v1 = vld [vmem:[%s2193_s11 + $0x10] sm:$0xff] }
  0x1a   : > { %v436_v2 = vld [vmem:[%s2193_s11 + $0x20] sm:$0xff]  ;;  %433 = vst [vmem:[%s2198_s12] sm:$0xff] %v432_v0  ;;  %435 = vst [vmem:[%s2198_s12 + $0x8] sm:$0xff] %v434_v1  ;;  %v438_v3 = vld [vmem:[%s2193_s11 + $0x30] sm:$0xff] }
  0x1b   : > { %437 = vst [vmem:[%s2198_s12 + $0x10] sm:$0xff] %v436_v2  ;;  %v440_v4 = vld [vmem:[%s2193_s11 + $0x40] sm:$0xff]  ;;  %v442_v5 = vld [vmem:[%s2193_s11 + $0x50] sm:$0xff]  ;;  %439 = vst [vmem:[%s2198_s12 + $0x18] sm:$0xff] %v438_v3 }
  0x1c   : > { %441 = vst [vmem:[%s2198_s12 + $0x20] sm:$0xff] %v440_v4  ;;  %443 = vst [vmem:[%s2198_s12 + $0x28] sm:$0xff] %v442_v5  ;;  %v444_v6 = vld [vmem:[%s2193_s11 + $0x60] sm:$0xff]  ;;  %v446_v7 = vld [vmem:[%s2193_s11 + $0x70] sm:$0xff] }
  0x1d   : > { %v448_v8 = vld [vmem:[%s2193_s11 + $0x80] sm:$0xff]  ;;  %445 = vst [vmem:[%s2198_s12 + $0x30] sm:$0xff] %v444_v6  ;;  %447 = vst [vmem:[%s2198_s12 + $0x38] sm:$0xff] %v446_v7  ;;  %v450_v9 = vld [vmem:[%s2193_s11 + $0x90] sm:$0xff] }
  0x1e   : > { %449 = vst [vmem:[%s2198_s12 + $0x40] sm:$0xff] %v448_v8  ;;  %v452_v10 = vld [vmem:[%s2193_s11 + $0xa0] sm:$0xff]  ;;  %v454_v11 = vld [vmem:[%s2193_s11 + $0xb0] sm:$0xff]  ;;  %451 = vst [vmem:[%s2198_s12 + $0x48] sm:$0xff] %v450_v9 }
  0x1f   : > { %453 = vst [vmem:[%s2198_s12 + $0x50] sm:$0xff] %v452_v10  ;;  %455 = vst [vmem:[%s2198_s12 + $0x58] sm:$0xff] %v454_v11  ;;  %v456_v12 = vld [vmem:[%s2193_s11 + $0xc0] sm:$0xff]  ;;  %v458_v13 = vld [vmem:[%s2193_s11 + $0xd0] sm:$0xff] }
  0x20   : > { %v460_v14 = vld [vmem:[%s2193_s11 + $0xe0] sm:$0xff]  ;;  %457 = vst [vmem:[%s2198_s12 + $0x60] sm:$0xff] %v456_v12  ;;  %459 = vst [vmem:[%s2198_s12 + $0x68] sm:$0xff] %v458_v13  ;;  %v462_v15 = vld [vmem:[%s2193_s11 + $0xf0] sm:$0xff] }
  0x21   : > { %461 = vst [vmem:[%s2198_s12 + $0x70] sm:$0xff] %v460_v14  ;;  %v464_v16 = vld [vmem:[%s2193_s11 + $0x100] sm:$0xff]  ;;  %v466_v17 = vld [vmem:[%s2193_s11 + $0x110] sm:$0xff]  ;;  %463 = vst [vmem:[%s2198_s12 + $0x78] sm:$0xff] %v462_v15 }
  0x22   : > { %465 = vst [vmem:[%s2198_s12 + $0x80] sm:$0xff] %v464_v16  ;;  %467 = vst [vmem:[%s2198_s12 + $0x88] sm:$0xff] %v466_v17  ;;  %v468_v18 = vld [vmem:[%s2193_s11 + $0x120] sm:$0xff]  ;;  %v470_v19 = vld [vmem:[%s2193_s11 + $0x130] sm:$0xff] }
  0x23   : > { %v472_v20 = vld [vmem:[%s2193_s11 + $0x140] sm:$0xff]  ;;  %469 = vst [vmem:[%s2198_s12 + $0x90] sm:$0xff] %v468_v18  ;;  %471 = vst [vmem:[%s2198_s12 + $0x98] sm:$0xff] %v470_v19  ;;  %v474_v21 = vld [vmem:[%s2193_s11 + $0x150] sm:$0xff] }
  0x24   : > { %473 = vst [vmem:[%s2198_s12 + $0xa0] sm:$0xff] %v472_v20  ;;  %v476_v22 = vld [vmem:[%s2193_s11 + $0x160] sm:$0xff]  ;;  %v478_v23 = vld [vmem:[%s2193_s11 + $0x170] sm:$0xff]  ;;  %475 = vst [vmem:[%s2198_s12 + $0xa8] sm:$0xff] %v474_v21 }
  0x25   : > { %477 = vst [vmem:[%s2198_s12 + $0xb0] sm:$0xff] %v476_v22  ;;  %479 = vst [vmem:[%s2198_s12 + $0xb8] sm:$0xff] %v478_v23  ;;  %v480_v24 = vld [vmem:[%s2193_s11 + $0x180] sm:$0xff]  ;;  %v482_v25 = vld [vmem:[%s2193_s11 + $0x190] sm:$0xff] }
  0x26   : > { %v484_v26 = vld [vmem:[%s2193_s11 + $0x1a0] sm:$0xff]  ;;  %481 = vst [vmem:[%s2198_s12 + $0xc0] sm:$0xff] %v480_v24  ;;  %483 = vst [vmem:[%s2198_s12 + $0xc8] sm:$0xff] %v482_v25  ;;  %v486_v27 = vld [vmem:[%s2193_s11 + $0x1b0] sm:$0xff] }
  0x27   : > { %485 = vst [vmem:[%s2198_s12 + $0xd0] sm:$0xff] %v484_v26  ;;  %v488_v28 = vld [vmem:[%s2193_s11 + $0x1c0] sm:$0xff]  ;;  %v490_v29 = vld [vmem:[%s2193_s11 + $0x1d0] sm:$0xff]  ;;  %487 = vst [vmem:[%s2198_s12 + $0xd8] sm:$0xff] %v486_v27 }
  0x28   : > { %489 = vst [vmem:[%s2198_s12 + $0xe0] sm:$0xff] %v488_v28  ;;  %491 = vst [vmem:[%s2198_s12 + $0xe8] sm:$0xff] %v490_v29  ;;  %v492_v30 = vld [vmem:[%s2193_s11 + $0x1e0] sm:$0xff]  ;;  %v494_v31 = vld [vmem:[%s2193_s11 + $0x1f0] sm:$0xff] }
  0x29   : > { %v496_v32 = vld [vmem:[%s2193_s11 + $0x200] sm:$0xff]  ;;  %493 = vst [vmem:[%s2198_s12 + $0xf0] sm:$0xff] %v492_v30  ;;  %495 = vst [vmem:[%s2198_s12 + $0xf8] sm:$0xff] %v494_v31  ;;  %v498_v33 = vld [vmem:[%s2193_s11 + $0x210] sm:$0xff] }
  0x2a   : > { %497 = vst [vmem:[%s2198_s12 + $0x100] sm:$0xff] %v496_v32  ;;  %v500_v34 = vld [vmem:[%s2193_s11 + $0x220] sm:$0xff]  ;;  %v502_v35 = vld [vmem:[%s2193_s11 + $0x230] sm:$0xff]  ;;  %499 = vst [vmem:[%s2198_s12 + $0x108] sm:$0xff] %v498_v33 }
  0x2b   : > { %501 = vst [vmem:[%s2198_s12 + $0x110] sm:$0xff] %v500_v34  ;;  %503 = vst [vmem:[%s2198_s12 + $0x118] sm:$0xff] %v502_v35  ;;  %v504_v36 = vld [vmem:[%s2193_s11 + $0x240] sm:$0xff]  ;;  %v506_v37 = vld [vmem:[%s2193_s11 + $0x250] sm:$0xff] }
  0x2c   : > { %v508_v38 = vld [vmem:[%s2193_s11 + $0x260] sm:$0xff]  ;;  %505 = vst [vmem:[%s2198_s12 + $0x120] sm:$0xff] %v504_v36  ;;  %507 = vst [vmem:[%s2198_s12 + $0x128] sm:$0xff] %v506_v37  ;;  %v510_v39 = vld [vmem:[%s2193_s11 + $0x270] sm:$0xff] }
  0x2d   : > { %509 = vst [vmem:[%s2198_s12 + $0x130] sm:$0xff] %v508_v38  ;;  %v512_v40 = vld [vmem:[%s2193_s11 + $0x280] sm:$0xff]  ;;  %v514_v41 = vld [vmem:[%s2193_s11 + $0x290] sm:$0xff]  ;;  %511 = vst [vmem:[%s2198_s12 + $0x138] sm:$0xff] %v510_v39 }
  0x2e   : > { %513 = vst [vmem:[%s2198_s12 + $0x140] sm:$0xff] %v512_v40  ;;  %515 = vst [vmem:[%s2198_s12 + $0x148] sm:$0xff] %v514_v41  ;;  %v516_v42 = vld [vmem:[%s2193_s11 + $0x2a0] sm:$0xff]  ;;  %v518_v43 = vld [vmem:[%s2193_s11 + $0x2b0] sm:$0xff] }
  0x2f   : > { %v520_v44 = vld [vmem:[%s2193_s11 + $0x2c0] sm:$0xff]  ;;  %517 = vst [vmem:[%s2198_s12 + $0x150] sm:$0xff] %v516_v42  ;;  %519 = vst [vmem:[%s2198_s12 + $0x158] sm:$0xff] %v518_v43  ;;  %v522_v45 = vld [vmem:[%s2193_s11 + $0x2d0] sm:$0xff] }
  0x30   : > { %521 = vst [vmem:[%s2198_s12 + $0x160] sm:$0xff] %v520_v44  ;;  %v524_v46 = vld [vmem:[%s2193_s11 + $0x2e0] sm:$0xff]  ;;  %v526_v47 = vld [vmem:[%s2193_s11 + $0x2f0] sm:$0xff]  ;;  %523 = vst [vmem:[%s2198_s12 + $0x168] sm:$0xff] %v522_v45 }
  0x31   : > { %525 = vst [vmem:[%s2198_s12 + $0x170] sm:$0xff] %v524_v46  ;;  %527 = vst [vmem:[%s2198_s12 + $0x178] sm:$0xff] %v526_v47  ;;  %v528_v48 = vld [vmem:[%s2193_s11 + $0x300] sm:$0xff]  ;;  %v530_v49 = vld [vmem:[%s2193_s11 + $0x310] sm:$0xff] }
  0x32   : > { %v532_v50 = vld [vmem:[%s2193_s11 + $0x320] sm:$0xff]  ;;  %529 = vst [vmem:[%s2198_s12 + $0x180] sm:$0xff] %v528_v48  ;;  %531 = vst [vmem:[%s2198_s12 + $0x188] sm:$0xff] %v530_v49  ;;  %v534_v51 = vld [vmem:[%s2193_s11 + $0x330] sm:$0xff] }
  0x33   : > { %533 = vst [vmem:[%s2198_s12 + $0x190] sm:$0xff] %v532_v50  ;;  %v536_v52 = vld [vmem:[%s2193_s11 + $0x340] sm:$0xff]  ;;  %v538_v53 = vld [vmem:[%s2193_s11 + $0x350] sm:$0xff]  ;;  %535 = vst [vmem:[%s2198_s12 + $0x198] sm:$0xff] %v534_v51 }
  0x34   : > { %537 = vst [vmem:[%s2198_s12 + $0x1a0] sm:$0xff] %v536_v52  ;;  %539 = vst [vmem:[%s2198_s12 + $0x1a8] sm:$0xff] %v538_v53  ;;  %v540_v54 = vld [vmem:[%s2193_s11 + $0x360] sm:$0xff]  ;;  %v542_v55 = vld [vmem:[%s2193_s11 + $0x370] sm:$0xff] }
  0x35   : > { %v544_v56 = vld [vmem:[%s2193_s11 + $0x380] sm:$0xff]  ;;  %541 = vst [vmem:[%s2198_s12 + $0x1b0] sm:$0xff] %v540_v54  ;;  %543 = vst [vmem:[%s2198_s12 + $0x1b8] sm:$0xff] %v542_v55  ;;  %v546_v57 = vld [vmem:[%s2193_s11 + $0x390] sm:$0xff] }
  0x36   : > { %545 = vst [vmem:[%s2198_s12 + $0x1c0] sm:$0xff] %v544_v56  ;;  %v548_v58 = vld [vmem:[%s2193_s11 + $0x3a0] sm:$0xff]  ;;  %v550_v59 = vld [vmem:[%s2193_s11 + $0x3b0] sm:$0xff]  ;;  %547 = vst [vmem:[%s2198_s12 + $0x1c8] sm:$0xff] %v546_v57 }
  0x37   : > { %549 = vst [vmem:[%s2198_s12 + $0x1d0] sm:$0xff] %v548_v58  ;;  %551 = vst [vmem:[%s2198_s12 + $0x1d8] sm:$0xff] %v550_v59  ;;  %v552_v60 = vld [vmem:[%s2193_s11 + $0x3c0] sm:$0xff]  ;;  %v554_v61 = vld [vmem:[%s2193_s11 + $0x3d0] sm:$0xff] }
  0x38   : > { %v556_v62 = vld [vmem:[%s2193_s11 + $0x3e0] sm:$0xff]  ;;  %553 = vst [vmem:[%s2198_s12 + $0x1e0] sm:$0xff] %v552_v60  ;;  %555 = vst [vmem:[%s2198_s12 + $0x1e8] sm:$0xff] %v554_v61  ;;  %v558_v63 = vld [vmem:[%s2193_s11 + $0x3f0] sm:$0xff] }
  0x39   : > { %557 = vst [vmem:[%s2198_s12 + $0x1f0] sm:$0xff] %v556_v62  ;;  %v560_v0 = vld [vmem:[%s2193_s11 + $0x400] sm:$0xff]  ;;  %v562_v1 = vld [vmem:[%s2193_s11 + $0x410] sm:$0xff]  ;;  %559 = vst [vmem:[%s2198_s12 + $0x1f8] sm:$0xff] %v558_v63 }
  0x3a   : > { %561 = vst [vmem:[%s2198_s12 + $0x200] sm:$0xff] %v560_v0  ;;  %563 = vst [vmem:[%s2198_s12 + $0x208] sm:$0xff] %v562_v1  ;;  %v564_v2 = vld [vmem:[%s2193_s11 + $0x420] sm:$0xff]  ;;  %v566_v3 = vld [vmem:[%s2193_s11 + $0x430] sm:$0xff] }
  0x3b   : > { %v568_v4 = vld [vmem:[%s2193_s11 + $0x440] sm:$0xff]  ;;  %565 = vst [vmem:[%s2198_s12 + $0x210] sm:$0xff] %v564_v2  ;;  %567 = vst [vmem:[%s2198_s12 + $0x218] sm:$0xff] %v566_v3  ;;  %v570_v5 = vld [vmem:[%s2193_s11 + $0x450] sm:$0xff] }
  0x3c   : > { %569 = vst [vmem:[%s2198_s12 + $0x220] sm:$0xff] %v568_v4  ;;  %v572_v6 = vld [vmem:[%s2193_s11 + $0x460] sm:$0xff]  ;;  %v574_v7 = vld [vmem:[%s2193_s11 + $0x470] sm:$0xff]  ;;  %571 = vst [vmem:[%s2198_s12 + $0x228] sm:$0xff] %v570_v5 }
  0x3d   : > { %573 = vst [vmem:[%s2198_s12 + $0x230] sm:$0xff] %v572_v6  ;;  %575 = vst [vmem:[%s2198_s12 + $0x238] sm:$0xff] %v574_v7  ;;  %v576_v8 = vld [vmem:[%s2193_s11 + $0x480] sm:$0xff]  ;;  %v578_v9 = vld [vmem:[%s2193_s11 + $0x490] sm:$0xff] }
  0x3e   : > { %v580_v10 = vld [vmem:[%s2193_s11 + $0x4a0] sm:$0xff]  ;;  %577 = vst [vmem:[%s2198_s12 + $0x240] sm:$0xff] %v576_v8  ;;  %579 = vst [vmem:[%s2198_s12 + $0x248] sm:$0xff] %v578_v9  ;;  %v582_v11 = vld [vmem:[%s2193_s11 + $0x4b0] sm:$0xff] }
  0x3f   : > { %581 = vst [vmem:[%s2198_s12 + $0x250] sm:$0xff] %v580_v10  ;;  %v584_v12 = vld [vmem:[%s2193_s11 + $0x4c0] sm:$0xff]  ;;  %v586_v13 = vld [vmem:[%s2193_s11 + $0x4d0] sm:$0xff]  ;;  %583 = vst [vmem:[%s2198_s12 + $0x258] sm:$0xff] %v582_v11 }
  0x40   : > { %585 = vst [vmem:[%s2198_s12 + $0x260] sm:$0xff] %v584_v12  ;;  %587 = vst [vmem:[%s2198_s12 + $0x268] sm:$0xff] %v586_v13  ;;  %v588_v14 = vld [vmem:[%s2193_s11 + $0x4e0] sm:$0xff]  ;;  %v590_v15 = vld [vmem:[%s2193_s11 + $0x4f0] sm:$0xff] }
  0x41   : > { %v592_v16 = vld [vmem:[%s2193_s11 + $0x500] sm:$0xff]  ;;  %589 = vst [vmem:[%s2198_s12 + $0x270] sm:$0xff] %v588_v14  ;;  %591 = vst [vmem:[%s2198_s12 + $0x278] sm:$0xff] %v590_v15  ;;  %v594_v17 = vld [vmem:[%s2193_s11 + $0x510] sm:$0xff] }
  0x42   : > { %593 = vst [vmem:[%s2198_s12 + $0x280] sm:$0xff] %v592_v16  ;;  %v596_v18 = vld [vmem:[%s2193_s11 + $0x520] sm:$0xff]  ;;  %v598_v19 = vld [vmem:[%s2193_s11 + $0x530] sm:$0xff]  ;;  %595 = vst [vmem:[%s2198_s12 + $0x288] sm:$0xff] %v594_v17 }
  0x43   : > { %597 = vst [vmem:[%s2198_s12 + $0x290] sm:$0xff] %v596_v18  ;;  %599 = vst [vmem:[%s2198_s12 + $0x298] sm:$0xff] %v598_v19  ;;  %v600_v20 = vld [vmem:[%s2193_s11 + $0x540] sm:$0xff]  ;;  %v602_v21 = vld [vmem:[%s2193_s11 + $0x550] sm:$0xff] }
  0x44   : > { %v604_v22 = vld [vmem:[%s2193_s11 + $0x560] sm:$0xff]  ;;  %601 = vst [vmem:[%s2198_s12 + $0x2a0] sm:$0xff] %v600_v20  ;;  %603 = vst [vmem:[%s2198_s12 + $0x2a8] sm:$0xff] %v602_v21  ;;  %v606_v23 = vld [vmem:[%s2193_s11 + $0x570] sm:$0xff] }
  0x45   : > { %605 = vst [vmem:[%s2198_s12 + $0x2b0] sm:$0xff] %v604_v22  ;;  %v608_v24 = vld [vmem:[%s2193_s11 + $0x580] sm:$0xff]  ;;  %v610_v25 = vld [vmem:[%s2193_s11 + $0x590] sm:$0xff]  ;;  %607 = vst [vmem:[%s2198_s12 + $0x2b8] sm:$0xff] %v606_v23 }
  0x46   : > { %609 = vst [vmem:[%s2198_s12 + $0x2c0] sm:$0xff] %v608_v24  ;;  %611 = vst [vmem:[%s2198_s12 + $0x2c8] sm:$0xff] %v610_v25  ;;  %v612_v26 = vld [vmem:[%s2193_s11 + $0x5a0] sm:$0xff]  ;;  %v614_v27 = vld [vmem:[%s2193_s11 + $0x5b0] sm:$0xff] }
  0x47   : > { %v616_v28 = vld [vmem:[%s2193_s11 + $0x5c0] sm:$0xff]  ;;  %613 = vst [vmem:[%s2198_s12 + $0x2d0] sm:$0xff] %v612_v26  ;;  %615 = vst [vmem:[%s2198_s12 + $0x2d8] sm:$0xff] %v614_v27  ;;  %v618_v29 = vld [vmem:[%s2193_s11 + $0x5d0] sm:$0xff] }
  0x48   : > { %617 = vst [vmem:[%s2198_s12 + $0x2e0] sm:$0xff] %v616_v28  ;;  %v620_v30 = vld [vmem:[%s2193_s11 + $0x5e0] sm:$0xff]  ;;  %v622_v31 = vld [vmem:[%s2193_s11 + $0x5f0] sm:$0xff]  ;;  %619 = vst [vmem:[%s2198_s12 + $0x2e8] sm:$0xff] %v618_v29 }
  0x49   : > { %621 = vst [vmem:[%s2198_s12 + $0x2f0] sm:$0xff] %v620_v30  ;;  %623 = vst [vmem:[%s2198_s12 + $0x2f8] sm:$0xff] %v622_v31 }
  0x4a PF: > { %p1727_p7 = scmp.ge.s32.totalorder %s2105_s21, 1  ;;  %p628_p8 = scmp.lt.s32.totalorder %s2105_s21, 7 }
  0x4c   : > { %p629_p9 = pnand %p1727_p7, %p628_p8 }
  0x4d   : > { %s635_s13 = sand.u32 (!%p629_p9), 1, %s2081_s15   ;;  %s691_s14 = smul.u32 (!%p629_p9), 6, %s2089_s17 }
  0x4e   : > { %632 = sbr.rel (%p629_p9) target bundleno = 465 (0x1d1), region = 62  ;;  %s1729_s25 = sshll.u32 (!%p629_p9), %s2093_s18, 1 }
  0x4f   : > { %s1843_s24 = smul.u32 (!%p629_p9), 768, %s635_s13  ;;  %p694_p10 = scmp.lt.s32.totalorder (!%p629_p9), %s691_s14, 17 }
  0x50   : > { %p706_p11 = scmp.lt.s32.totalorder (!%p629_p9), %s1729_s25, 3  ;;  %p1735_p12 = scmp.ne.s32.totalorder (!%p629_p9), %s2089_s17, 0 }
  0x51   : > { %s2414_s13 = scalar_lea.vmem (!%p629_p9), [#allocation3], %s1843_s24 }
  0x55   : > { %s2568_s14 = smov (!%p694_p10, %s691_s14), 17  ;;  %s2570_s25 = smov (!%p706_p11, %s1729_s25), 3 }
  0x56   : > { %s1728_s26 = sshll.u32 %s2568_s14, 2  ;;  %s1730_s5 = sshll.u32 %s2570_s25, 3  ;;  %v2107_v32 = vmov (!%p1735_p12), 0.0  }
  0x57   : > { %s2397_s30 = scalar_lea.vmem %s2550_s0, %s1728_s26  ;;  %s2402_s8 = scalar_lea.vmem %s2552_s2, %s1730_s5  ;;  %737 = vst [vmem:[#allocation2] sm:$0xff] (!%p1735_p12), %v2107_v32  ;;  %738 = vst [vmem:[#allocation2 + $0x8] sm:$0xff] (!%p1735_p12), %v2107_v32 }
  0x58   : > { %s2407_s18 = scalar_lea.vmem %s2553_s3, %s1730_s5  ;;  %s2412_s12 = scalar_lea.vmem %s2554_s4, %s1730_s5 }
  0x59   : > { %736 = sbr.rel (%p1735_p12) target bundleno = 96 (0x60), region = 70 }
  0x60 PF: > { %v1901_v33 = vld [vmem:[%s2414_s13 + $0x4] ss:$8 sps:$4 sm:$0xff]   ;;  %v1905_v35 = vld [vmem:[%s2414_s13] ss:$8 sps:$4 sm:$0xff]   ;;  %v1907_v37 = vld [vmem:[%s2414_s13 + $0x14] ss:$8 sps:$4 sm:$0xff]  }
  0x61   : > { %v1903_v34 = vld [vmem:[%s2414_s13 + $0x104] ss:$8 sps:$4 sm:$0xff]   ;;  %1341 = vmatprep.subr.bf16.mxu0 %v1901_v33  ;;  %v1906_v36 = vld [vmem:[%s2414_s13 + $0x100] ss:$8 sps:$4 sm:$0xff]   ;;  %v1909_v38 = vld [vmem:[%s2414_s13 + $0x114] ss:$8 sps:$4 sm:$0xff]  }
  0x62   : > { %1382 = vmatprep.subr.bf16.mxu1 %v1903_v34  ;;  %1342 = vmatpush1.bf16.msra.mxu0 %v1905_v35  ;;  %v1911_v39 = vld [vmem:[%s2414_s13 + $0x10] ss:$8 sps:$4 sm:$0xff]   ;;  %v1913_v41 = vld [vmem:[%s2414_s13 + $0x24] ss:$8 sps:$4 sm:$0xff]   ;;  %v1917_v43 = vld [vmem:[%s2414_s13 + $0x20] ss:$8 sps:$4 sm:$0xff]  }
  0x63   : > { %1383 = vmatpush1.bf16.msra.mxu1 %v1906_v36  ;;  %1343 = vmatprep.subr.bf16.mxu0 %v1907_v37  ;;  %v1912_v40 = vld [vmem:[%s2414_s13 + $0x110] ss:$8 sps:$4 sm:$0xff]   ;;  %v1915_v42 = vld [vmem:[%s2414_s13 + $0x124] ss:$8 sps:$4 sm:$0xff]   ;;  %v1918_v44 = vld [vmem:[%s2414_s13 + $0x120] ss:$8 sps:$4 sm:$0xff]  }
  0x64   : > { %1384 = vmatprep.subr.bf16.mxu1 %v1909_v38  ;;  %v1919_v45 = vld [vmem:[%s2414_s13 + $0x34] ss:$8 sps:$4 sm:$0xff]   ;;  %v1923_v47 = vld [vmem:[%s2414_s13 + $0x30] ss:$8 sps:$4 sm:$0xff]   ;;  %v1925_v49 = vld [vmem:[%s2414_s13 + $0x44] ss:$8 sps:$4 sm:$0xff]  }
  0x65   : > { %v1921_v46 = vld [vmem:[%s2414_s13 + $0x134] ss:$8 sps:$4 sm:$0xff]   ;;  %v1924_v48 = vld [vmem:[%s2414_s13 + $0x130] ss:$8 sps:$4 sm:$0xff]   ;;  %v1927_v50 = vld [vmem:[%s2414_s13 + $0x144] ss:$8 sps:$4 sm:$0xff]  }
  0x66   : > { %1344 = vmatpush1.bf16.msra.mxu0 %v1911_v39  ;;  %v1929_v51 = vld [vmem:[%s2414_s13 + $0x40] ss:$8 sps:$4 sm:$0xff]   ;;  %v1931_v53 = vld [vmem:[%s2414_s13 + $0x54] ss:$8 sps:$4 sm:$0xff]   ;;  %v1935_v55 = vld [vmem:[%s2414_s13 + $0x50] ss:$8 sps:$4 sm:$0xff]  }
  0x67   : > { %1385 = vmatpush1.bf16.msra.mxu1 %v1912_v40  ;;  %1345 = vmatprep.subr.bf16.mxu0 %v1913_v41  ;;  %v1930_v52 = vld [vmem:[%s2414_s13 + $0x140] ss:$8 sps:$4 sm:$0xff]   ;;  %v1933_v54 = vld [vmem:[%s2414_s13 + $0x154] ss:$8 sps:$4 sm:$0xff]   ;;  %v1936_v56 = vld [vmem:[%s2414_s13 + $0x150] ss:$8 sps:$4 sm:$0xff]  }
  0x68   : > { %1386 = vmatprep.subr.bf16.mxu1 %v1915_v42  ;;  %v1937_v57 = vld [vmem:[%s2414_s13 + $0x64] ss:$8 sps:$4 sm:$0xff]   ;;  %v1941_v59 = vld [vmem:[%s2414_s13 + $0x60] ss:$8 sps:$4 sm:$0xff]   ;;  %v1943_v61 = vld [vmem:[%s2414_s13 + $0x74] ss:$8 sps:$4 sm:$0xff]  }
  0x69   : > { %v1939_v58 = vld [vmem:[%s2414_s13 + $0x164] ss:$8 sps:$4 sm:$0xff]   ;;  %v1942_v60 = vld [vmem:[%s2414_s13 + $0x160] ss:$8 sps:$4 sm:$0xff]   ;;  %v1945_v62 = vld [vmem:[%s2414_s13 + $0x174] ss:$8 sps:$4 sm:$0xff]  }
  0x6a   : > { %1346 = vmatpush1.bf16.msra.mxu0 %v1917_v43  ;;  %v1947_v63 = vld [vmem:[%s2414_s13 + $0x70] ss:$8 sps:$4 sm:$0xff]   ;;  %v1949_v1 = vld [vmem:[%s2414_s13 + $0x84] ss:$8 sps:$4 sm:$0xff]   ;;  %v1953_v3 = vld [vmem:[%s2414_s13 + $0x80] ss:$8 sps:$4 sm:$0xff]  }
  0x6b   : > { %1387 = vmatpush1.bf16.msra.mxu1 %v1918_v44  ;;  %1347 = vmatprep.subr.bf16.mxu0 %v1919_v45  ;;  %v1948_v0 = vld [vmem:[%s2414_s13 + $0x170] ss:$8 sps:$4 sm:$0xff]   ;;  %v1951_v2 = vld [vmem:[%s2414_s13 + $0x184] ss:$8 sps:$4 sm:$0xff]   ;;  %v1954_v4 = vld [vmem:[%s2414_s13 + $0x180] ss:$8 sps:$4 sm:$0xff]  }
  0x6c   : > { %1388 = vmatprep.subr.bf16.mxu1 %v1921_v46  ;;  %v1955_v5 = vld [vmem:[%s2414_s13 + $0x94] ss:$8 sps:$4 sm:$0xff]   ;;  %v1959_v7 = vld [vmem:[%s2414_s13 + $0x90] ss:$8 sps:$4 sm:$0xff]   ;;  %v1961_v9 = vld [vmem:[%s2414_s13 + $0xa4] ss:$8 sps:$4 sm:$0xff]  }
  0x6d   : > { %v1957_v6 = vld [vmem:[%s2414_s13 + $0x194] ss:$8 sps:$4 sm:$0xff]   ;;  %v1960_v8 = vld [vmem:[%s2414_s13 + $0x190] ss:$8 sps:$4 sm:$0xff]   ;;  %v1963_v10 = vld [vmem:[%s2414_s13 + $0x1a4] ss:$8 sps:$4 sm:$0xff]  }
  0x6e   : > { %1348 = vmatpush1.bf16.msra.mxu0 %v1923_v47  ;;  %v1965_v11 = vld [vmem:[%s2414_s13 + $0xa0] ss:$8 sps:$4 sm:$0xff]   ;;  %v1967_v13 = vld [vmem:[%s2414_s13 + $0xb4] ss:$8 sps:$4 sm:$0xff]   ;;  %v1971_v18 = vld [vmem:[%s2414_s13 + $0xb0] ss:$8 sps:$4 sm:$0xff]  }
  0x6f   : > { %1389 = vmatpush1.bf16.msra.mxu1 %v1924_v48  ;;  %1349 = vmatprep.subr.bf16.mxu0 %v1925_v49  ;;  %v1966_v12 = vld [vmem:[%s2414_s13 + $0x1a0] ss:$8 sps:$4 sm:$0xff]   ;;  %v1969_v14 = vld [vmem:[%s2414_s13 + $0x1b4] ss:$8 sps:$4 sm:$0xff]   ;;  %v1972_v19 = vld [vmem:[%s2414_s13 + $0x1b0] ss:$8 sps:$4 sm:$0xff]  }
  0x70   : > { %1390 = vmatprep.subr.bf16.mxu1 %v1927_v50  ;;  %v741_v15 = vld [vmem:[%s2397_s30] sm:$0xff]  ;;  %v742_v17 = vld [vmem:[%s2397_s30 + $0x8] sm:$0xff]  ;;  %v1973_v21 = vld [vmem:[%s2414_s13 + $0xc4] ss:$8 sps:$4 sm:$0xff]   ;;  %p1838_p13 = scmp.ne.s32.totalorder %s2089_s17, 2 }
  0x71   : > { %v1737_v16 = vcombine.high %v741_v15, %v741_v15  ;;  %v1739_v20 = vcombine.high %v742_v17, %v742_v17  ;;  %v1975_v22 = vld [vmem:[%s2414_s13 + $0x1c4] ss:$8 sps:$4 sm:$0xff]   ;;  %v1977_v23 = vld [vmem:[%s2414_s13 + $0xc0] ss:$8 sps:$4 sm:$0xff]   ;;  %v1979_v25 = vld [vmem:[%s2414_s13 + $0xd4] ss:$8 sps:$4 sm:$0xff]   ;;  %v1736_v38 = vcombine.low %v741_v15, %v741_v15  ;;  %v1738_v39 = vcombine.low %v742_v17, %v742_v17 }
  0x72   : > { %1350 = vmatpush1.bf16.msra.mxu0 %v1929_v51  ;;  %v1978_v24 = vld [vmem:[%s2414_s13 + $0x1c0] ss:$8 sps:$4 sm:$0xff]   ;;  %v1981_v26 = vld [vmem:[%s2414_s13 + $0x1d4] ss:$8 sps:$4 sm:$0xff]   ;;  %v1983_v27 = vld [vmem:[%s2414_s13 + $0xd0] ss:$8 sps:$4 sm:$0xff]  }
  0x73   : > { %1391 = vmatpush1.bf16.msra.mxu1 %v1930_v52  ;;  %1351 = vmatprep.subr.bf16.mxu0 %v1931_v53  ;;  %v1984_v28 = vld [vmem:[%s2414_s13 + $0x1d0] ss:$8 sps:$4 sm:$0xff]   ;;  %v1985_v29 = vld [vmem:[%s2414_s13 + $0xe4] ss:$8 sps:$4 sm:$0xff]   ;;  %v1989_v31 = vld [vmem:[%s2414_s13 + $0xe0] ss:$8 sps:$4 sm:$0xff]  }
  0x74   : > { %1392 = vmatprep.subr.bf16.mxu1 %v1933_v54  ;;  %1373 = vmatprep.mubr.bf16.mxu0 %v1737_v16  ;;  %v1987_v30 = vld [vmem:[%s2414_s13 + $0x1e4] ss:$8 sps:$4 sm:$0xff]   ;;  %v1990_v32 = vld [vmem:[%s2414_s13 + $0x1e0] ss:$8 sps:$4 sm:$0xff]   ;;  %v1991_v33 = vld [vmem:[%s2414_s13 + $0xf4] ss:$8 sps:$4 sm:$0xff]  }
  0x75   : > { %1414 = vmatprep.mubr.bf16.mxu1 %v1739_v20  ;;  %v1993_v34 = vld [vmem:[%s2414_s13 + $0x1f4] ss:$8 sps:$4 sm:$0xff]   ;;  %v1995_v35 = vld [vmem:[%s2414_s13 + $0xf0] ss:$8 sps:$4 sm:$0xff]   ;;  %v2003_v37 = vld [vmem:[%s2414_s13 + $0x204] ss:$8 sps:$4 sm:$0xff]  }
  0x76   : > { %1352 = vmatpush1.bf16.msra.mxu0 %v1935_v55  ;;  %v1996_v36 = vld [vmem:[%s2414_s13 + $0x1f0] ss:$8 sps:$4 sm:$0xff]   ;;  %v2001_v40 = vld [vmem:[%s2414_s13 + $0x200] ss:$8 sps:$4 sm:$0xff]   ;;  %v2006_v42 = vld [vmem:[%s2414_s13 + $0x214] ss:$8 sps:$4 sm:$0xff]  }
  0x77   : > { %1393 = vmatpush1.bf16.msra.mxu1 %v1936_v56  ;;  %1353 = vmatprep.subr.bf16.mxu0 %v1937_v57  ;;  %v2486_v41 = vld [vmem:[%s2397_s30 + $0x10] sm:$0xff]  ;;  %v2004_v44 = vld [vmem:[%s2414_s13 + $0x210] ss:$8 sps:$4 sm:$0xff]   ;;  %v2012_v47 = vld [vmem:[%s2414_s13 + $0x234] ss:$8 sps:$4 sm:$0xff]  }
  0x78   : > { %1394 = vmatprep.subr.bf16.mxu1 %v1939_v58  ;;  %v1741_v43 = vcombine.high %v2486_v41, %v2486_v41  ;;  %v2009_v45 = vld [vmem:[%s2414_s13 + $0x224] ss:$8 sps:$4 sm:$0xff]   ;;  %v2007_v46 = vld [vmem:[%s2414_s13 + $0x220] ss:$8 sps:$4 sm:$0xff]   ;;  %v2010_v48 = vld [vmem:[%s2414_s13 + $0x230] ss:$8 sps:$4 sm:$0xff]  }
  0x79   : > { %v2015_v49 = vld [vmem:[%s2414_s13 + $0x244] ss:$8 sps:$4 sm:$0xff]   ;;  %v2013_v50 = vld [vmem:[%s2414_s13 + $0x240] ss:$8 sps:$4 sm:$0xff]   ;;  %v2018_v51 = vld [vmem:[%s2414_s13 + $0x254] ss:$8 sps:$4 sm:$0xff]  }
  0x7a   : > { %1354 = vmatpush1.bf16.msra.mxu0 %v1941_v59  ;;  %v2016_v52 = vld [vmem:[%s2414_s13 + $0x250] ss:$8 sps:$4 sm:$0xff]   ;;  %v2021_v53 = vld [vmem:[%s2414_s13 + $0x264] ss:$8 sps:$4 sm:$0xff]   ;;  %v2019_v54 = vld [vmem:[%s2414_s13 + $0x260] ss:$8 sps:$4 sm:$0xff]  }
  0x7b   : > { %1395 = vmatpush1.bf16.msra.mxu1 %v1942_v60  ;;  %1355 = vmatprep.subr.bf16.mxu0 %v1943_v61  ;;  %v2024_v55 = vld [vmem:[%s2414_s13 + $0x274] ss:$8 sps:$4 sm:$0xff]   ;;  %v2022_v56 = vld [vmem:[%s2414_s13 + $0x270] ss:$8 sps:$4 sm:$0xff]   ;;  %v2027_v57 = vld [vmem:[%s2414_s13 + $0x284] ss:$8 sps:$4 sm:$0xff]  }
  0x7c   : > { %1396 = vmatprep.subr.bf16.mxu1 %v1945_v62  ;;  %v2025_v58 = vld [vmem:[%s2414_s13 + $0x280] ss:$8 sps:$4 sm:$0xff]   ;;  %v2030_v59 = vld [vmem:[%s2414_s13 + $0x294] ss:$8 sps:$4 sm:$0xff]   ;;  %v2028_v60 = vld [vmem:[%s2414_s13 + $0x290] ss:$8 sps:$4 sm:$0xff]  }
  0x7d   : > { %v2033_v61 = vld [vmem:[%s2414_s13 + $0x2a4] ss:$8 sps:$4 sm:$0xff]   ;;  %v2031_v62 = vld [vmem:[%s2414_s13 + $0x2a0] ss:$8 sps:$4 sm:$0xff]   ;;  %v739_v20 = vld [vmem:[#allocation2] sm:$0xff] }
  0x7e   : > { %1356 = vmatpush1.bf16.msra.mxu0 %v1947_v63  ;;  %v2036_v63 = vld [vmem:[%s2414_s13 + $0x2b4] ss:$8 sps:$4 sm:$0xff]  }
  0x7f   : > { %1397 = vmatpush1.bf16.msra.mxu1 %v1948_v0  ;;  %1357 = vmatprep.subr.bf16.mxu0 %v1949_v1  ;;  %v2034_v0 = vld [vmem:[%s2414_s13 + $0x2b0] ss:$8 sps:$4 sm:$0xff]   ;;  %v2039_v1 = vld [vmem:[%s2414_s13 + $0x2c4] ss:$8 sps:$4 sm:$0xff]  }
  0x80   : > { %1398 = vmatprep.subr.bf16.mxu1 %v1951_v2  ;;  %v2037_v2 = vld [vmem:[%s2414_s13 + $0x2c0] ss:$8 sps:$4 sm:$0xff]  }
  0x82   : > { %1358 = vmatpush1.bf16.msra.mxu0 %v1953_v3  ;;  %v2042_v3 = vld [vmem:[%s2414_s13 + $0x2d4] ss:$8 sps:$4 sm:$0xff]  }
  0x83   : > { %1399 = vmatpush1.bf16.msra.mxu1 %v1954_v4  ;;  %1359 = vmatprep.subr.bf16.mxu0 %v1955_v5  ;;  %v2040_v4 = vld [vmem:[%s2414_s13 + $0x2d0] ss:$8 sps:$4 sm:$0xff]   ;;  %v2045_v5 = vld [vmem:[%s2414_s13 + $0x2e4] ss:$8 sps:$4 sm:$0xff]  }
  0x84   : > { %1400 = vmatprep.subr.bf16.mxu1 %v1957_v6  ;;  %v2043_v6 = vld [vmem:[%s2414_s13 + $0x2e0] ss:$8 sps:$4 sm:$0xff]  }
  0x86   : > { %1360 = vmatpush1.bf16.msra.mxu0 %v1959_v7  ;;  %v2048_v7 = vld [vmem:[%s2414_s13 + $0x2f4] ss:$8 sps:$4 sm:$0xff]  }
  0x87   : > { %1401 = vmatpush1.bf16.msra.mxu1 %v1960_v8  ;;  %1361 = vmatprep.subr.bf16.mxu0 %v1961_v9  ;;  %v2046_v8 = vld [vmem:[%s2414_s13 + $0x2f0] ss:$8 sps:$4 sm:$0xff]   ;;  %v1740_v9 = vcombine.low %v2486_v41, %v2486_v41 }
  0x88   : > { %1402 = vmatprep.subr.bf16.mxu1 %v1963_v10 }
  0x8a   : > { %1362 = vmatpush1.bf16.msra.mxu0 %v1965_v11 }
  0x8b   : > { %1403 = vmatpush1.bf16.msra.mxu1 %v1966_v12  ;;  %1363 = vmatprep.subr.bf16.mxu0 %v1967_v13 }
  0x8c   : > { %1404 = vmatprep.subr.bf16.mxu1 %v1969_v14 }
  0x8e   : > { %1364 = vmatpush1.bf16.msra.mxu0 %v1971_v18 }
  0x8f   : > { %1405 = vmatpush1.bf16.msra.mxu1 %v1972_v19  ;;  %1365 = vmatprep.subr.bf16.mxu0 %v1973_v21 }
  0x90   : > { %1406 = vmatprep.subr.bf16.mxu1 %v1975_v22 }
  0x92   : > { %1366 = vmatpush1.bf16.msra.mxu0 %v1977_v23  ;;  %v740_v23 = vld [vmem:[#allocation2 + $0x8] sm:$0xff] }
  0x93   : > { %1407 = vmatpush1.bf16.msra.mxu1 %v1978_v24  ;;  %1367 = vmatprep.subr.bf16.mxu0 %v1979_v25 }
  0x94   : > { %1408 = vmatprep.subr.bf16.mxu1 %v1981_v26 }
  0x96   : > { %1368 = vmatpush1.bf16.msra.mxu0 %v1983_v27 }
  0x97   : > { %1409 = vmatpush1.bf16.msra.mxu1 %v1984_v28  ;;  %1369 = vmatprep.subr.bf16.mxu0 %v1985_v29 }
  0x98   : > { %1410 = vmatprep.subr.bf16.mxu1 %v1987_v30 }
  0x9a   : > { %1370 = vmatpush1.bf16.msra.mxu0 %v1989_v31 }
  0x9b   : > { %1411 = vmatpush1.bf16.msra.mxu1 %v1990_v32  ;;  %1371 = vmatprep.subr.bf16.mxu0 %v1991_v33 }
  0x9c   : > { %1412 = vmatprep.subr.bf16.mxu1 %v1993_v34 }
  0x9e   : > { %1372 = vmatpush1.bf16.msra.mxu0 %v1995_v35 }
  0x9f   : > { %1413 = vmatpush1.bf16.msra.mxu1 %v1996_v36  ;;  %1423 = vmatprep.subr.bf16.mxu0 %v2003_v37 }
  0xa1   : > { %1374 = vmatmul.mubr.bf16.vlgmr.msra.gmra.mrb[0].mxu0 %v1736_v38 }
  0xa2   : > { %1415 = vmatmul.mubr.bf16.vlgmr.msra.gmra.mrb[0].mxu1 %v1738_v39  ;;  %1424 = vmatpush1.bf16.msra.mxu0 %v2001_v40 }
  0xa3   : > { %1455 = vmatprep.mubr.bf16.mxu0 %v1741_v43  ;;  %1425 = vmatprep.subr.bf16.mxu0 %v2006_v42 }
  0xa6   : > { %1426 = vmatpush1.bf16.msra.mxu0 %v2004_v44 }
  0xa7   : > { %1427 = vmatprep.subr.bf16.mxu0 %v2009_v45 }
  0xaa   : > { %1428 = vmatpush1.bf16.msra.mxu0 %v2007_v46 }
  0xab   : > { %1429 = vmatprep.subr.bf16.mxu0 %v2012_v47 }
  0xae   : > { %1430 = vmatpush1.bf16.msra.mxu0 %v2010_v48 }
  0xaf   : > { %1431 = vmatprep.subr.bf16.mxu0 %v2015_v49 }
  0xb2   : > { %1432 = vmatpush1.bf16.msra.mxu0 %v2013_v50 }
  0xb3   : > { %1433 = vmatprep.subr.bf16.mxu0 %v2018_v51 }
  0xb6   : > { %1434 = vmatpush1.bf16.msra.mxu0 %v2016_v52 }
  0xb7   : > { %1435 = vmatprep.subr.bf16.mxu0 %v2021_v53 }
  0xba   : > { %1436 = vmatpush1.bf16.msra.mxu0 %v2019_v54 }
  0xbb   : > { %1437 = vmatprep.subr.bf16.mxu0 %v2024_v55 }
  0xbe   : > { %1438 = vmatpush1.bf16.msra.mxu0 %v2022_v56 }
  0xbf   : > { %1439 = vmatprep.subr.bf16.mxu0 %v2027_v57 }
  0xc2   : > { %1440 = vmatpush1.bf16.msra.mxu0 %v2025_v58 }
  0xc3   : > { %1441 = vmatprep.subr.bf16.mxu0 %v2030_v59 }
  0xc6   : > { %1442 = vmatpush1.bf16.msra.mxu0 %v2028_v60 }
  0xc7   : > { %1443 = vmatprep.subr.bf16.mxu0 %v2033_v61 }
  0xca   : > { %1444 = vmatpush1.bf16.msra.mxu0 %v2031_v62 }
  0xcb   : > { %1445 = vmatprep.subr.bf16.mxu0 %v2036_v63 }
  0xce   : > { %1446 = vmatpush1.bf16.msra.mxu0 %v2034_v0 }
  0xcf   : > { %1447 = vmatprep.subr.bf16.mxu0 %v2039_v1 }
  0xd2   : > { %1448 = vmatpush1.bf16.msra.mxu0 %v2037_v2 }
  0xd3   : > { %1449 = vmatprep.subr.bf16.mxu0 %v2042_v3 }
  0xd6   : > { %1450 = vmatpush1.bf16.msra.mxu0 %v2040_v4 }
  0xd7   : > { %1451 = vmatprep.subr.bf16.mxu0 %v2045_v5 }
  0xda   : > { %1452 = vmatpush1.bf16.msra.mxu0 %v2043_v6 }
  0xdb   : > { %1453 = vmatprep.subr.bf16.mxu0 %v2048_v7 }
  0xde   : > { %1454 = vmatpush1.bf16.msra.mxu0 %v2046_v8 }
  0xe1   : > { %1456 = vmatmul.mubr.bf16.vlgmr.msra.gmra.mrb[4].mxu0 %v1740_v9 }
 0x174   : > { %v1375_v10 = vpop.f32.mrb[0].mxu0 }
 0x175   : > { %v1416_v11 = vpop.f32.mrb[0].mxu1  ;;  %v1377_v13 = vpop.f32.mrb[1].mxu0 }
 0x176   : > { %v1417_v12 = vadd.f32 %v1416_v11, %v1375_v10  ;;  %v1418_v14 = vpop.f32.mrb[1].mxu1  ;;  %v1379_v16 = vpop.f32.mrb[2].mxu0 }
 0x177   : > { %v1419_v15 = vadd.f32 %v1418_v14, %v1377_v13  ;;  %v1420_v17 = vpop.f32.mrb[2].mxu1  ;;  %v1380_v18 = vpop.f32.mrb[3].mxu0 }
 0x178   : > { %v1421_v19 = vpop.f32.mrb[3].mxu1 }
 0x1b4   : > { %v1457_v21 = vpop.f32.mrb[4].mxu0  ;;  %1471 = sbr.rel (%p1838_p13) target bundleno = 465 (0x1d1), region = 74 }
 0x1b5   : > { %v1458_v22 = vadd.f32 %v1457_v21, %v1417_v12  ;;  %v1459_v24 = vpop.f32.mrb[5].mxu0 }
 0x1b6   : > { %v1460_v25 = vadd.f32 %v1459_v24, %v1419_v15  ;;  %v1461_v26 = vpop.f32.mrb[6].mxu0 }
 0x1b7   : > { %v1464_v27 = vadd.f32 %v1458_v22, %v739_v20  ;;  %v1462_v28 = vpop.f32.mrb[7].mxu0 }
 0x1b8   : > { %v1465_v29 = vadd.f32 %v1460_v25, %v740_v23 }
 0x1b9   : > { %1466 = vst [vmem:[#allocation2] sm:$0xff] %v1464_v27 }
 0x1ba   : > { %1467 = vst [vmem:[#allocation2 + $0x8] sm:$0xff] %v1465_v29 }
 0x1c0   : > { %v1472_v30 = vld [vmem:[#allocation2] sm:$0xff] }
 0x1c1   : > { %v1473_v31 = vld [vmem:[#allocation2 + $0x8] sm:$0xff]  ;;  %1474 = vst [vmem:[%s2402_s8] sm:$0xff] %v1472_v30  ;;  %v1476_v32 = vrot.slane %v1472_v30, 4  ;;  %v1490_v33 = vmul.f32 %v1472_v30, %v1472_v30 }
 0x1c2   : > { %v1482_v34 = vrot.slane %v1473_v31, 4  ;;  %v1491_v35 = vmul.f32 %v1473_v31, %v1473_v31  ;;  %1475 = vst [vmem:[%s2402_s8 + $0x8] sm:$0xff] %v1473_v31 }
 0x1c3   : > { %v1477_v36 = vadd.f32 %v1476_v32, %v1472_v30  ;;  %v1492_v37 = vrot.slane %v1490_v33, 4 }
 0x1c4   : > { %v1483_v38 = vadd.f32 %v1482_v34, %v1473_v31  ;;  %v1498_v39 = vrot.slane %v1491_v35, 4 }
 0x1c5   : > { %v1478_v40 = vrot.slane %v1477_v36, 2  ;;  %v1493_v41 = vadd.f32 %v1492_v37, %v1490_v33 }
 0x1c6   : > { %v1484_v42 = vrot.slane %v1483_v38, 2  ;;  %v1499_v43 = vadd.f32 %v1498_v39, %v1491_v35 }
 0x1c7   : > { %v1479_v44 = vadd.f32 %v1478_v40, %v1477_v36  ;;  %v1494_v45 = vrot.slane %v1493_v41, 2 }
 0x1c8   : > { %v1485_v46 = vadd.f32 %v1484_v42, %v1483_v38  ;;  %v1500_v47 = vrot.slane %v1499_v43, 2 }
 0x1c9   : > { %v1480_v48 = vrot.slane %v1479_v44, 1  ;;  %v1495_v49 = vadd.f32 %v1494_v45, %v1493_v41 }
 0x1ca   : > { %v1486_v50 = vrot.slane %v1485_v46, 1  ;;  %v1501_v51 = vadd.f32 %v1500_v47, %v1499_v43 }
 0x1cb   : > { %v1481_v52 = vadd.f32 %v1480_v48, %v1479_v44  ;;  %v1496_v53 = vrot.slane %v1495_v49, 1 }
 0x1cc   : > { %v1487_v54 = vadd.f32 %v1486_v50, %v1485_v46  ;;  %v1502_v55 = vrot.slane %v1501_v51, 1 }
 0x1cd   : > { %1488 = vst [vmem:[%s2407_s18] sm:$0xff] %v1481_v52  ;;  %v1497_v56 = vadd.f32 %v1496_v53, %v1495_v49 }
 0x1ce   : > { %v1503_v57 = vadd.f32 %v1502_v55, %v1501_v51  ;;  %1489 = vst [vmem:[%s2407_s18 + $0x8] sm:$0xff] %v1487_v54 }
 0x1cf   : > { %1504 = vst [vmem:[%s2412_s12] sm:$0xff] %v1497_v56 }
 0x1d0   : > { %1505 = vst [vmem:[%s2412_s12 + $0x8] sm:$0xff] %v1503_v57 }
 0x1d1 PF: > { %s15_s21 = sadd.s32 1, %s2105_s21   ;;  %s2555_s15 = smov %s2085_s16 }
 0x1d2   : > { %p12_p0 = scmp.ge.s32.totalorder %s15_s21, 8   ;;  %s2556_s16 = smov %s2184_s28 }
 0x1d3   : > { %s2557_s17 = smov %s2097_s19  ;;  %s2558_s18 = smov %s2101_s20 }
 0x1d4   : > { %s2559_s19 = smov %s2562_s22  ;;  %s2560_s20 = smov %s2566_s23 }
 0x1d5   :  { %14 = sbr.rel (!%p12_p0) target bundleno = 4 (0x4), region = 136 }

// kernel: resnet18_forward.78
= control target key start
LH: loop header
LB: loop body
LE: loop exit
PB: predicated region body
PF: predicated region fallthrough
CT: control target
= control target key end

     0   :  { %s2133_s15 = smov 0   ;;  %s2135_s16 = smov 0   ;;  %s2550_s0 = inlined_call_operand.vmem [shape: bf16[8,4608], index: 0, kind: input, shape index: {}]   ;;  %s2551_s1 = inlined_call_operand.vmem [shape: bf16[4608,512], index: 1, kind: input, shape index: {}]   ;;  %s2552_s2 = inlined_call_operand.vmem [shape: f32[8,512], index: 2, kind: output, shape index: {0}]   ;;  %s2553_s3 = inlined_call_operand.vmem [shape: f32[8,512], index: 3, kind: output, shape index: {1}]   ;;  %s2554_s4 = inlined_call_operand.vmem [shape: f32[8,512], index: 4, kind: output, shape index: {2}]  }
   0x1   :  { %s2137_s17 = smov 0   ;;  %s2139_s18 = smov 0  }
   0x2   :  { %s2141_s19 = smov 0   ;;  %s2143_s20 = smov 0  }
   0x3   :  { %s2145_s21 = smov 0  }
   0x4 LB: > { %s27_s22 = sadd.s32 1, %s2097_s19  ;;  %s30_s23 = sadd.s32 1, %s2101_s20  ;;  %s2105_s21 = sphi %s2145_s21, %s15_s21   ;;  %s2101_s20 = sphi %s2143_s20, %s2560_s20   ;;  %s2097_s19 = sphi %s2141_s19, %s2559_s19   ;;  %s2093_s18 = sphi %s2139_s18, %s2558_s18   ;;  %s2089_s17 = sphi %s2137_s17, %s2557_s17   ;;  %s2085_s16 = sphi %s2135_s16, %s2556_s16   ;;  %s2081_s15 = sphi %s2133_s15, %s2555_s15  }
   0x5   : > { %p28_p0 = scmp.ge.s32.totalorder %s27_s22, 6  ;;  %p78_p1 = scmp.ne.s32.totalorder %s2085_s16, %s2081_s15 }
   0x6   : > { %p79_p2 = scmp.eq.s32.totalorder %s2105_s21, 0  ;;  %s71_s27 = sadd.s32 1, %s2085_s16 }
   0x7   : > { %s2562_s22 = smov (%p28_p0, %s27_s22), 0  ;;  %s2564_s23 = smov (!%p28_p0, %s30_s23), %s2101_s20 }
   0x8   : > { %p80_p3 = por %p79_p2, %p78_p1  ;;  %p32_p4 = scmp.ge.s32.totalorder %s2564_s23, 2 }
   0x9   : > { %s66_s24 = ssub.s32 %s2097_s19, %s2562_s22  ;;  %p1723_p6 = scmp.ge.s32.totalorder %s2105_s21, 12 }
   0xa   : > { %s2566_s23 = smov (%p32_p4, %s2564_s23), 0 }
   0xb   : > { %s67_s25 = ssub.s32 %s2101_s20, %s2566_s23  ;;  %188 = sbr.rel (%p1723_p6) target bundleno = 74 (0x4a), region = 16 }
   0xc   : > { %s68_s26 = sor.u32 %s67_s25, %s66_s24 }
   0xd   : > { %p69_p5 = scmp.eq.s32.totalorder %s68_s26, 0 }
   0xf   : > { %s2184_s28 = scalar_select %p69_p5, %s2085_s16, %s71_s27  }
  0x12   : > { %204 = sbr.rel (!%p80_p3) target bundleno = 74 (0x4a), region = 24  ;;  %s206_s29 = sand.u32 (%p80_p3), 1, %s2085_s16  }
  0x13   : > { %s1842_s30 = smul.u32 (%p80_p3), 768, %s206_s29  ;;  %s1724_s5 = sshll.u32 (%p80_p3), %s2101_s20, 1 }
  0x14   : > { %s1841_s6 = smul.u32 (%p80_p3), 384, %s2097_s19 }
  0x15   : > { %s2198_s12 = scalar_lea.vmem (%p80_p3), [#allocation3], %s1842_s30 }
  0x16   : > { %s212_s7 = sadd.s32 (%p80_p3), %s1841_s6, %s1724_s5 }
  0x17   : > { %s1726_s8 = sshll.u32 (%p80_p3), %s212_s7, 2 }
  0x18   : > { %s2193_s11 = scalar_lea.vmem (%p80_p3), %s2551_s1, %s1726_s8 }
  0x19   : > { %v432_v0 = vld [vmem:[%s2193_s11] sm:$0xff]  ;;  %v434_v1 = vld [vmem:[%s2193_s11 + $0x10] sm:$0xff] }
  0x1a   : > { %v436_v2 = vld [vmem:[%s2193_s11 + $0x20] sm:$0xff]  ;;  %433 = vst [vmem:[%s2198_s12] sm:$0xff] %v432_v0  ;;  %435 = vst [vmem:[%s2198_s12 + $0x8] sm:$0xff] %v434_v1  ;;  %v438_v3 = vld [vmem:[%s2193_s11 + $0x30] sm:$0xff] }
  0x1b   : > { %437 = vst [vmem:[%s2198_s12 + $0x10] sm:$0xff] %v436_v2  ;;  %v440_v4 = vld [vmem:[%s2193_s11 + $0x40] sm:$0xff]  ;;  %v442_v5 = vld [vmem:[%s2193_s11 + $0x50] sm:$0xff]  ;;  %439 = vst [vmem:[%s2198_s12 + $0x18] sm:$0xff] %v438_v3 }
  0x1c   : > { %441 = vst [vmem:[%s2198_s12 + $0x20] sm:$0xff] %v440_v4  ;;  %443 = vst [vmem:[%s2198_s12 + $0x28] sm:$0xff] %v442_v5  ;;  %v444_v6 = vld [vmem:[%s2193_s11 + $0x60] sm:$0xff]  ;;  %v446_v7 = vld [vmem:[%s2193_s11 + $0x70] sm:$0xff] }
  0x1d   : > { %v448_v8 = vld [vmem:[%s2193_s11 + $0x80] sm:$0xff]  ;;  %445 = vst [vmem:[%s2198_s12 + $0x30] sm:$0xff] %v444_v6  ;;  %447 = vst [vmem:[%s2198_s12 + $0x38] sm:$0xff] %v446_v7  ;;  %v450_v9 = vld [vmem:[%s2193_s11 + $0x90] sm:$0xff] }
  0x1e   : > { %449 = vst [vmem:[%s2198_s12 + $0x40] sm:$0xff] %v448_v8  ;;  %v452_v10 = vld [vmem:[%s2193_s11 + $0xa0] sm:$0xff]  ;;  %v454_v11 = vld [vmem:[%s2193_s11 + $0xb0] sm:$0xff]  ;;  %451 = vst [vmem:[%s2198_s12 + $0x48] sm:$0xff] %v450_v9 }
  0x1f   : > { %453 = vst [vmem:[%s2198_s12 + $0x50] sm:$0xff] %v452_v10  ;;  %455 = vst [vmem:[%s2198_s12 + $0x58] sm:$0xff] %v454_v11  ;;  %v456_v12 = vld [vmem:[%s2193_s11 + $0xc0] sm:$0xff]  ;;  %v458_v13 = vld [vmem:[%s2193_s11 + $0xd0] sm:$0xff] }
  0x20   : > { %v460_v14 = vld [vmem:[%s2193_s11 + $0xe0] sm:$0xff]  ;;  %457 = vst [vmem:[%s2198_s12 + $0x60] sm:$0xff] %v456_v12  ;;  %459 = vst [vmem:[%s2198_s12 + $0x68] sm:$0xff] %v458_v13  ;;  %v462_v15 = vld [vmem:[%s2193_s11 + $0xf0] sm:$0xff] }
  0x21   : > { %461 = vst [vmem:[%s2198_s12 + $0x70] sm:$0xff] %v460_v14  ;;  %v464_v16 = vld [vmem:[%s2193_s11 + $0x100] sm:$0xff]  ;;  %v466_v17 = vld [vmem:[%s2193_s11 + $0x110] sm:$0xff]  ;;  %463 = vst [vmem:[%s2198_s12 + $0x78] sm:$0xff] %v462_v15 }
  0x22   : > { %465 = vst [vmem:[%s2198_s12 + $0x80] sm:$0xff] %v464_v16  ;;  %467 = vst [vmem:[%s2198_s12 + $0x88] sm:$0xff] %v466_v17  ;;  %v468_v18 = vld [vmem:[%s2193_s11 + $0x120] sm:$0xff]  ;;  %v470_v19 = vld [vmem:[%s2193_s11 + $0x130] sm:$0xff] }
  0x23   : > { %v472_v20 = vld [vmem:[%s2193_s11 + $0x140] sm:$0xff]  ;;  %469 = vst [vmem:[%s2198_s12 + $0x90] sm:$0xff] %v468_v18  ;;  %471 = vst [vmem:[%s2198_s12 + $0x98] sm:$0xff] %v470_v19  ;;  %v474_v21 = vld [vmem:[%s2193_s11 + $0x150] sm:$0xff] }
  0x24   : > { %473 = vst [vmem:[%s2198_s12 + $0xa0] sm:$0xff] %v472_v20  ;;  %v476_v22 = vld [vmem:[%s2193_s11 + $0x160] sm:$0xff]  ;;  %v478_v23 = vld [vmem:[%s2193_s11 + $0x170] sm:$0xff]  ;;  %475 = vst [vmem:[%s2198_s12 + $0xa8] sm:$0xff] %v474_v21 }
  0x25   : > { %477 = vst [vmem:[%s2198_s12 + $0xb0] sm:$0xff] %v476_v22  ;;  %479 = vst [vmem:[%s2198_s12 + $0xb8] sm:$0xff] %v478_v23  ;;  %v480_v24 = vld [vmem:[%s2193_s11 + $0x180] sm:$0xff]  ;;  %v482_v25 = vld [vmem:[%s2193_s11 + $0x190] sm:$0xff] }
  0x26   : > { %v484_v26 = vld [vmem:[%s2193_s11 + $0x1a0] sm:$0xff]  ;;  %481 = vst [vmem:[%s2198_s12 + $0xc0] sm:$0xff] %v480_v24  ;;  %483 = vst [vmem:[%s2198_s12 + $0xc8] sm:$0xff] %v482_v25  ;;  %v486_v27 = vld [vmem:[%s2193_s11 + $0x1b0] sm:$0xff] }
  0x27   : > { %485 = vst [vmem:[%s2198_s12 + $0xd0] sm:$0xff] %v484_v26  ;;  %v488_v28 = vld [vmem:[%s2193_s11 + $0x1c0] sm:$0xff]  ;;  %v490_v29 = vld [vmem:[%s2193_s11 + $0x1d0] sm:$0xff]  ;;  %487 = vst [vmem:[%s2198_s12 + $0xd8] sm:$0xff] %v486_v27 }
  0x28   : > { %489 = vst [vmem:[%s2198_s12 + $0xe0] sm:$0xff] %v488_v28  ;;  %491 = vst [vmem:[%s2198_s12 + $0xe8] sm:$0xff] %v490_v29  ;;  %v492_v30 = vld [vmem:[%s2193_s11 + $0x1e0] sm:$0xff]  ;;  %v494_v31 = vld [vmem:[%s2193_s11 + $0x1f0] sm:$0xff] }
  0x29   : > { %v496_v32 = vld [vmem:[%s2193_s11 + $0x200] sm:$0xff]  ;;  %493 = vst [vmem:[%s2198_s12 + $0xf0] sm:$0xff] %v492_v30  ;;  %495 = vst [vmem:[%s2198_s12 + $0xf8] sm:$0xff] %v494_v31  ;;  %v498_v33 = vld [vmem:[%s2193_s11 + $0x210] sm:$0xff] }
  0x2a   : > { %497 = vst [vmem:[%s2198_s12 + $0x100] sm:$0xff] %v496_v32  ;;  %v500_v34 = vld [vmem:[%s2193_s11 + $0x220] sm:$0xff]  ;;  %v502_v35 = vld [vmem:[%s2193_s11 + $0x230] sm:$0xff]  ;;  %499 = vst [vmem:[%s2198_s12 + $0x108] sm:$0xff] %v498_v33 }
  0x2b   : > { %501 = vst [vmem:[%s2198_s12 + $0x110] sm:$0xff] %v500_v34  ;;  %503 = vst [vmem:[%s2198_s12 + $0x118] sm:$0xff] %v502_v35  ;;  %v504_v36 = vld [vmem:[%s2193_s11 + $0x240] sm:$0xff]  ;;  %v506_v37 = vld [vmem:[%s2193_s11 + $0x250] sm:$0xff] }
  0x2c   : > { %v508_v38 = vld [vmem:[%s2193_s11 + $0x260] sm:$0xff]  ;;  %505 = vst [vmem:[%s2198_s12 + $0x120] sm:$0xff] %v504_v36  ;;  %507 = vst [vmem:[%s2198_s12 + $0x128] sm:$0xff] %v506_v37  ;;  %v510_v39 = vld [vmem:[%s2193_s11 + $0x270] sm:$0xff] }
  0x2d   : > { %509 = vst [vmem:[%s2198_s12 + $0x130] sm:$0xff] %v508_v38  ;;  %v512_v40 = vld [vmem:[%s2193_s11 + $0x280] sm:$0xff]  ;;  %v514_v41 = vld [vmem:[%s2193_s11 + $0x290] sm:$0xff]  ;;  %511 = vst [vmem:[%s2198_s12 + $0x138] sm:$0xff] %v510_v39 }
  0x2e   : > { %513 = vst [vmem:[%s2198_s12 + $0x140] sm:$0xff] %v512_v40  ;;  %515 = vst [vmem:[%s2198_s12 + $0x148] sm:$0xff] %v514_v41  ;;  %v516_v42 = vld [vmem:[%s2193_s11 + $0x2a0] sm:$0xff]  ;;  %v518_v43 = vld [vmem:[%s2193_s11 + $0x2b0] sm:$0xff] }
  0x2f   : > { %v520_v44 = vld [vmem:[%s2193_s11 + $0x2c0] sm:$0xff]  ;;  %517 = vst [vmem:[%s2198_s12 + $0x150] sm:$0xff] %v516_v42  ;;  %519 = vst [vmem:[%s2198_s12 + $0x158] sm:$0xff] %v518_v43  ;;  %v522_v45 = vld [vmem:[%s2193_s11 + $0x2d0] sm:$0xff] }
  0x30   : > { %521 = vst [vmem:[%s2198_s12 + $0x160] sm:$0xff] %v520_v44  ;;  %v524_v46 = vld [vmem:[%s2193_s11 + $0x2e0] sm:$0xff]  ;;  %v526_v47 = vld [vmem:[%s2193_s11 + $0x2f0] sm:$0xff]  ;;  %523 = vst [vmem:[%s2198_s12 + $0x168] sm:$0xff] %v522_v45 }
  0x31   : > { %525 = vst [vmem:[%s2198_s12 + $0x170] sm:$0xff] %v524_v46  ;;  %527 = vst [vmem:[%s2198_s12 + $0x178] sm:$0xff] %v526_v47  ;;  %v528_v48 = vld [vmem:[%s2193_s11 + $0x300] sm:$0xff]  ;;  %v530_v49 = vld [vmem:[%s2193_s11 + $0x310] sm:$0xff] }
  0x32   : > { %v532_v50 = vld [vmem:[%s2193_s11 + $0x320] sm:$0xff]  ;;  %529 = vst [vmem:[%s2198_s12 + $0x180] sm:$0xff] %v528_v48  ;;  %531 = vst [vmem:[%s2198_s12 + $0x188] sm:$0xff] %v530_v49  ;;  %v534_v51 = vld [vmem:[%s2193_s11 + $0x330] sm:$0xff] }
  0x33   : > { %533 = vst [vmem:[%s2198_s12 + $0x190] sm:$0xff] %v532_v50  ;;  %v536_v52 = vld [vmem:[%s2193_s11 + $0x340] sm:$0xff]  ;;  %v538_v53 = vld [vmem:[%s2193_s11 + $0x350] sm:$0xff]  ;;  %535 = vst [vmem:[%s2198_s12 + $0x198] sm:$0xff] %v534_v51 }
  0x34   : > { %537 = vst [vmem:[%s2198_s12 + $0x1a0] sm:$0xff] %v536_v52  ;;  %539 = vst [vmem:[%s2198_s12 + $0x1a8] sm:$0xff] %v538_v53  ;;  %v540_v54 = vld [vmem:[%s2193_s11 + $0x360] sm:$0xff]  ;;  %v542_v55 = vld [vmem:[%s2193_s11 + $0x370] sm:$0xff] }
  0x35   : > { %v544_v56 = vld [vmem:[%s2193_s11 + $0x380] sm:$0xff]  ;;  %541 = vst [vmem:[%s2198_s12 + $0x1b0] sm:$0xff] %v540_v54  ;;  %543 = vst [vmem:[%s2198_s12 + $0x1b8] sm:$0xff] %v542_v55  ;;  %v546_v57 = vld [vmem:[%s2193_s11 + $0x390] sm:$0xff] }
  0x36   : > { %545 = vst [vmem:[%s2198_s12 + $0x1c0] sm:$0xff] %v544_v56  ;;  %v548_v58 = vld [vmem:[%s2193_s11 + $0x3a0] sm:$0xff]  ;;  %v550_v59 = vld [vmem:[%s2193_s11 + $0x3b0] sm:$0xff]  ;;  %547 = vst [vmem:[%s2198_s12 + $0x1c8] sm:$0xff] %v546_v57 }
  0x37   : > { %549 = vst [vmem:[%s2198_s12 + $0x1d0] sm:$0xff] %v548_v58  ;;  %551 = vst [vmem:[%s2198_s12 + $0x1d8] sm:$0xff] %v550_v59  ;;  %v552_v60 = vld [vmem:[%s2193_s11 + $0x3c0] sm:$0xff]  ;;  %v554_v61 = vld [vmem:[%s2193_s11 + $0x3d0] sm:$0xff] }
  0x38   : > { %v556_v62 = vld [vmem:[%s2193_s11 + $0x3e0] sm:$0xff]  ;;  %553 = vst [vmem:[%s2198_s12 + $0x1e0] sm:$0xff] %v552_v60  ;;  %555 = vst [vmem:[%s2198_s12 + $0x1e8] sm:$0xff] %v554_v61  ;;  %v558_v63 = vld [vmem:[%s2193_s11 + $0x3f0] sm:$0xff] }
  0x39   : > { %557 = vst [vmem:[%s2198_s12 + $0x1f0] sm:$0xff] %v556_v62  ;;  %v560_v0 = vld [vmem:[%s2193_s11 + $0x400] sm:$0xff]  ;;  %v562_v1 = vld [vmem:[%s2193_s11 + $0x410] sm:$0xff]  ;;  %559 = vst [vmem:[%s2198_s12 + $0x1f8] sm:$0xff] %v558_v63 }
  0x3a   : > { %561 = vst [vmem:[%s2198_s12 + $0x200] sm:$0xff] %v560_v0  ;;  %563 = vst [vmem:[%s2198_s12 + $0x208] sm:$0xff] %v562_v1  ;;  %v564_v2 = vld [vmem:[%s2193_s11 + $0x420] sm:$0xff]  ;;  %v566_v3 = vld [vmem:[%s2193_s11 + $0x430] sm:$0xff] }
  0x3b   : > { %v568_v4 = vld [vmem:[%s2193_s11 + $0x440] sm:$0xff]  ;;  %565 = vst [vmem:[%s2198_s12 + $0x210] sm:$0xff] %v564_v2  ;;  %567 = vst [vmem:[%s2198_s12 + $0x218] sm:$0xff] %v566_v3  ;;  %v570_v5 = vld [vmem:[%s2193_s11 + $0x450] sm:$0xff] }
  0x3c   : > { %569 = vst [vmem:[%s2198_s12 + $0x220] sm:$0xff] %v568_v4  ;;  %v572_v6 = vld [vmem:[%s2193_s11 + $0x460] sm:$0xff]  ;;  %v574_v7 = vld [vmem:[%s2193_s11 + $0x470] sm:$0xff]  ;;  %571 = vst [vmem:[%s2198_s12 + $0x228] sm:$0xff] %v570_v5 }
  0x3d   : > { %573 = vst [vmem:[%s2198_s12 + $0x230] sm:$0xff] %v572_v6  ;;  %575 = vst [vmem:[%s2198_s12 + $0x238] sm:$0xff] %v574_v7  ;;  %v576_v8 = vld [vmem:[%s2193_s11 + $0x480] sm:$0xff]  ;;  %v578_v9 = vld [vmem:[%s2193_s11 + $0x490] sm:$0xff] }
  0x3e   : > { %v580_v10 = vld [vmem:[%s2193_s11 + $0x4a0] sm:$0xff]  ;;  %577 = vst [vmem:[%s2198_s12 + $0x240] sm:$0xff] %v576_v8  ;;  %579 = vst [vmem:[%s2198_s12 + $0x248] sm:$0xff] %v578_v9  ;;  %v582_v11 = vld [vmem:[%s2193_s11 + $0x4b0] sm:$0xff] }
  0x3f   : > { %581 = vst [vmem:[%s2198_s12 + $0x250] sm:$0xff] %v580_v10  ;;  %v584_v12 = vld [vmem:[%s2193_s11 + $0x4c0] sm:$0xff]  ;;  %v586_v13 = vld [vmem:[%s2193_s11 + $0x4d0] sm:$0xff]  ;;  %583 = vst [vmem:[%s2198_s12 + $0x258] sm:$0xff] %v582_v11 }
  0x40   : > { %585 = vst [vmem:[%s2198_s12 + $0x260] sm:$0xff] %v584_v12  ;;  %587 = vst [vmem:[%s2198_s12 + $0x268] sm:$0xff] %v586_v13  ;;  %v588_v14 = vld [vmem:[%s2193_s11 + $0x4e0] sm:$0xff]  ;;  %v590_v15 = vld [vmem:[%s2193_s11 + $0x4f0] sm:$0xff] }
  0x41   : > { %v592_v16 = vld [vmem:[%s2193_s11 + $0x500] sm:$0xff]  ;;  %589 = vst [vmem:[%s2198_s12 + $0x270] sm:$0xff] %v588_v14  ;;  %591 = vst [vmem:[%s2198_s12 + $0x278] sm:$0xff] %v590_v15  ;;  %v594_v17 = vld [vmem:[%s2193_s11 + $0x510] sm:$0xff] }
  0x42   : > { %593 = vst [vmem:[%s2198_s12 + $0x280] sm:$0xff] %v592_v16  ;;  %v596_v18 = vld [vmem:[%s2193_s11 + $0x520] sm:$0xff]  ;;  %v598_v19 = vld [vmem:[%s2193_s11 + $0x530] sm:$0xff]  ;;  %595 = vst [vmem:[%s2198_s12 + $0x288] sm:$0xff] %v594_v17 }
  0x43   : > { %597 = vst [vmem:[%s2198_s12 + $0x290] sm:$0xff] %v596_v18  ;;  %599 = vst [vmem:[%s2198_s12 + $0x298] sm:$0xff] %v598_v19  ;;  %v600_v20 = vld [vmem:[%s2193_s11 + $0x540] sm:$0xff]  ;;  %v602_v21 = vld [vmem:[%s2193_s11 + $0x550] sm:$0xff] }
  0x44   : > { %v604_v22 = vld [vmem:[%s2193_s11 + $0x560] sm:$0xff]  ;;  %601 = vst [vmem:[%s2198_s12 + $0x2a0] sm:$0xff] %v600_v20  ;;  %603 = vst [vmem:[%s2198_s12 + $0x2a8] sm:$0xff] %v602_v21  ;;  %v606_v23 = vld [vmem:[%s2193_s11 + $0x570] sm:$0xff] }
  0x45   : > { %605 = vst [vmem:[%s2198_s12 + $0x2b0] sm:$0xff] %v604_v22  ;;  %v608_v24 = vld [vmem:[%s2193_s11 + $0x580] sm:$0xff]  ;;  %v610_v25 = vld [vmem:[%s2193_s11 + $0x590] sm:$0xff]  ;;  %607 = vst [vmem:[%s2198_s12 + $0x2b8] sm:$0xff] %v606_v23 }
  0x46   : > { %609 = vst [vmem:[%s2198_s12 + $0x2c0] sm:$0xff] %v608_v24  ;;  %611 = vst [vmem:[%s2198_s12 + $0x2c8] sm:$0xff] %v610_v25  ;;  %v612_v26 = vld [vmem:[%s2193_s11 + $0x5a0] sm:$0xff]  ;;  %v614_v27 = vld [vmem:[%s2193_s11 + $0x5b0] sm:$0xff] }
  0x47   : > { %v616_v28 = vld [vmem:[%s2193_s11 + $0x5c0] sm:$0xff]  ;;  %613 = vst [vmem:[%s2198_s12 + $0x2d0] sm:$0xff] %v612_v26  ;;  %615 = vst [vmem:[%s2198_s12 + $0x2d8] sm:$0xff] %v614_v27  ;;  %v618_v29 = vld [vmem:[%s2193_s11 + $0x5d0] sm:$0xff] }
  0x48   : > { %617 = vst [vmem:[%s2198_s12 + $0x2e0] sm:$0xff] %v616_v28  ;;  %v620_v30 = vld [vmem:[%s2193_s11 + $0x5e0] sm:$0xff]  ;;  %v622_v31 = vld [vmem:[%s2193_s11 + $0x5f0] sm:$0xff]  ;;  %619 = vst [vmem:[%s2198_s12 + $0x2e8] sm:$0xff] %v618_v29 }
  0x49   : > { %621 = vst [vmem:[%s2198_s12 + $0x2f0] sm:$0xff] %v620_v30  ;;  %623 = vst [vmem:[%s2198_s12 + $0x2f8] sm:$0xff] %v622_v31 }
  0x4a PF: > { %p1727_p7 = scmp.ge.s32.totalorder %s2105_s21, 1  ;;  %p628_p8 = scmp.lt.s32.totalorder %s2105_s21, 13 }
  0x4c   : > { %p629_p9 = pnand %p1727_p7, %p628_p8 }
  0x4d   : > { %s635_s13 = sand.u32 (!%p629_p9), 1, %s2081_s15   ;;  %s691_s14 = smul.u32 (!%p629_p9), 6, %s2089_s17 }
  0x4e   : > { %632 = sbr.rel (%p629_p9) target bundleno = 465 (0x1d1), region = 62  ;;  %s1729_s25 = sshll.u32 (!%p629_p9), %s2093_s18, 1 }
  0x4f   : > { %s1843_s24 = smul.u32 (!%p629_p9), 768, %s635_s13  ;;  %p694_p10 = scmp.lt.s32.totalorder (!%p629_p9), %s691_s14, 35 }
  0x50   : > { %p706_p11 = scmp.lt.s32.totalorder (!%p629_p9), %s1729_s25, 3  ;;  %p1735_p12 = scmp.ne.s32.totalorder (!%p629_p9), %s2089_s17, 0 }
  0x51   : > { %s2414_s13 = scalar_lea.vmem (!%p629_p9), [#allocation3], %s1843_s24 }
  0x55   : > { %s2568_s14 = smov (!%p694_p10, %s691_s14), 35  ;;  %s2570_s25 = smov (!%p706_p11, %s1729_s25), 3 }
  0x56   : > { %s1728_s26 = sshll.u32 %s2568_s14, 2  ;;  %s1730_s5 = sshll.u32 %s2570_s25, 3  ;;  %v2107_v32 = vmov (!%p1735_p12), 0.0  }
  0x57   : > { %s2397_s30 = scalar_lea.vmem %s2550_s0, %s1728_s26  ;;  %s2402_s8 = scalar_lea.vmem %s2552_s2, %s1730_s5  ;;  %737 = vst [vmem:[#allocation2] sm:$0xff] (!%p1735_p12), %v2107_v32  ;;  %738 = vst [vmem:[#allocation2 + $0x8] sm:$0xff] (!%p1735_p12), %v2107_v32 }
  0x58   : > { %s2407_s18 = scalar_lea.vmem %s2553_s3, %s1730_s5  ;;  %s2412_s12 = scalar_lea.vmem %s2554_s4, %s1730_s5 }
  0x59   : > { %736 = sbr.rel (%p1735_p12) target bundleno = 96 (0x60), region = 70 }
  0x60 PF: > { %v1901_v33 = vld [vmem:[%s2414_s13 + $0x4] ss:$8 sps:$4 sm:$0xff]   ;;  %v1905_v35 = vld [vmem:[%s2414_s13] ss:$8 sps:$4 sm:$0xff]   ;;  %v1907_v37 = vld [vmem:[%s2414_s13 + $0x14] ss:$8 sps:$4 sm:$0xff]  }
  0x61   : > { %v1903_v34 = vld [vmem:[%s2414_s13 + $0x104] ss:$8 sps:$4 sm:$0xff]   ;;  %1341 = vmatprep.subr.bf16.mxu0 %v1901_v33  ;;  %v1906_v36 = vld [vmem:[%s2414_s13 + $0x100] ss:$8 sps:$4 sm:$0xff]   ;;  %v1909_v38 = vld [vmem:[%s2414_s13 + $0x114] ss:$8 sps:$4 sm:$0xff]  }
  0x62   : > { %1382 = vmatprep.subr.bf16.mxu1 %v1903_v34  ;;  %1342 = vmatpush1.bf16.msra.mxu0 %v1905_v35  ;;  %v1911_v39 = vld [vmem:[%s2414_s13 + $0x10] ss:$8 sps:$4 sm:$0xff]   ;;  %v1913_v41 = vld [vmem:[%s2414_s13 + $0x24] ss:$8 sps:$4 sm:$0xff]   ;;  %v1917_v43 = vld [vmem:[%s2414_s13 + $0x20] ss:$8 sps:$4 sm:$0xff]  }
  0x63   : > { %1383 = vmatpush1.bf16.msra.mxu1 %v1906_v36  ;;  %1343 = vmatprep.subr.bf16.mxu0 %v1907_v37  ;;  %v1912_v40 = vld [vmem:[%s2414_s13 + $0x110] ss:$8 sps:$4 sm:$0xff]   ;;  %v1915_v42 = vld [vmem:[%s2414_s13 + $0x124] ss:$8 sps:$4 sm:$0xff]   ;;  %v1918_v44 = vld [vmem:[%s2414_s13 + $0x120] ss:$8 sps:$4 sm:$0xff]  }
  0x64   : > { %1384 = vmatprep.subr.bf16.mxu1 %v1909_v38  ;;  %v1919_v45 = vld [vmem:[%s2414_s13 + $0x34] ss:$8 sps:$4 sm:$0xff]   ;;  %v1923_v47 = vld [vmem:[%s2414_s13 + $0x30] ss:$8 sps:$4 sm:$0xff]   ;;  %v1925_v49 = vld [vmem:[%s2414_s13 + $0x44] ss:$8 sps:$4 sm:$0xff]  }
  0x65   : > { %v1921_v46 = vld [vmem:[%s2414_s13 + $0x134] ss:$8 sps:$4 sm:$0xff]   ;;  %v1924_v48 = vld [vmem:[%s2414_s13 + $0x130] ss:$8 sps:$4 sm:$0xff]   ;;  %v1927_v50 = vld [vmem:[%s2414_s13 + $0x144] ss:$8 sps:$4 sm:$0xff]  }
  0x66   : > { %1344 = vmatpush1.bf16.msra.mxu0 %v1911_v39  ;;  %v1929_v51 = vld [vmem:[%s2414_s13 + $0x40] ss:$8 sps:$4 sm:$0xff]   ;;  %v1931_v53 = vld [vmem:[%s2414_s13 + $0x54] ss:$8 sps:$4 sm:$0xff]   ;;  %v1935_v55 = vld [vmem:[%s2414_s13 + $0x50] ss:$8 sps:$4 sm:$0xff]  }
  0x67   : > { %1385 = vmatpush1.bf16.msra.mxu1 %v1912_v40  ;;  %1345 = vmatprep.subr.bf16.mxu0 %v1913_v41  ;;  %v1930_v52 = vld [vmem:[%s2414_s13 + $0x140] ss:$8 sps:$4 sm:$0xff]   ;;  %v1933_v54 = vld [vmem:[%s2414_s13 + $0x154] ss:$8 sps:$4 sm:$0xff]   ;;  %v1936_v56 = vld [vmem:[%s2414_s13 + $0x150] ss:$8 sps:$4 sm:$0xff]  }
  0x68   : > { %1386 = vmatprep.subr.bf16.mxu1 %v1915_v42  ;;  %v1937_v57 = vld [vmem:[%s2414_s13 + $0x64] ss:$8 sps:$4 sm:$0xff]   ;;  %v1941_v59 = vld [vmem:[%s2414_s13 + $0x60] ss:$8 sps:$4 sm:$0xff]   ;;  %v1943_v61 = vld [vmem:[%s2414_s13 + $0x74] ss:$8 sps:$4 sm:$0xff]  }
  0x69   : > { %v1939_v58 = vld [vmem:[%s2414_s13 + $0x164] ss:$8 sps:$4 sm:$0xff]   ;;  %v1942_v60 = vld [vmem:[%s2414_s13 + $0x160] ss:$8 sps:$4 sm:$0xff]   ;;  %v1945_v62 = vld [vmem:[%s2414_s13 + $0x174] ss:$8 sps:$4 sm:$0xff]  }
  0x6a   : > { %1346 = vmatpush1.bf16.msra.mxu0 %v1917_v43  ;;  %v1947_v63 = vld [vmem:[%s2414_s13 + $0x70] ss:$8 sps:$4 sm:$0xff]   ;;  %v1949_v1 = vld [vmem:[%s2414_s13 + $0x84] ss:$8 sps:$4 sm:$0xff]   ;;  %v1953_v3 = vld [vmem:[%s2414_s13 + $0x80] ss:$8 sps:$4 sm:$0xff]  }
  0x6b   : > { %1387 = vmatpush1.bf16.msra.mxu1 %v1918_v44  ;;  %1347 = vmatprep.subr.bf16.mxu0 %v1919_v45  ;;  %v1948_v0 = vld [vmem:[%s2414_s13 + $0x170] ss:$8 sps:$4 sm:$0xff]   ;;  %v1951_v2 = vld [vmem:[%s2414_s13 + $0x184] ss:$8 sps:$4 sm:$0xff]   ;;  %v1954_v4 = vld [vmem:[%s2414_s13 + $0x180] ss:$8 sps:$4 sm:$0xff]  }
  0x6c   : > { %1388 = vmatprep.subr.bf16.mxu1 %v1921_v46  ;;  %v1955_v5 = vld [vmem:[%s2414_s13 + $0x94] ss:$8 sps:$4 sm:$0xff]   ;;  %v1959_v7 = vld [vmem:[%s2414_s13 + $0x90] ss:$8 sps:$4 sm:$0xff]   ;;  %v1961_v9 = vld [vmem:[%s2414_s13 + $0xa4] ss:$8 sps:$4 sm:$0xff]  }
  0x6d   : > { %v1957_v6 = vld [vmem:[%s2414_s13 + $0x194] ss:$8 sps:$4 sm:$0xff]   ;;  %v1960_v8 = vld [vmem:[%s2414_s13 + $0x190] ss:$8 sps:$4 sm:$0xff]   ;;  %v1963_v10 = vld [vmem:[%s2414_s13 + $0x1a4] ss:$8 sps:$4 sm:$0xff]  }
  0x6e   : > { %1348 = vmatpush1.bf16.msra.mxu0 %v1923_v47  ;;  %v1965_v11 = vld [vmem:[%s2414_s13 + $0xa0] ss:$8 sps:$4 sm:$0xff]   ;;  %v1967_v13 = vld [vmem:[%s2414_s13 + $0xb4] ss:$8 sps:$4 sm:$0xff]   ;;  %v1971_v18 = vld [vmem:[%s2414_s13 + $0xb0] ss:$8 sps:$4 sm:$0xff]  }
  0x6f   : > { %1389 = vmatpush1.bf16.msra.mxu1 %v1924_v48  ;;  %1349 = vmatprep.subr.bf16.mxu0 %v1925_v49  ;;  %v1966_v12 = vld [vmem:[%s2414_s13 + $0x1a0] ss:$8 sps:$4 sm:$0xff]   ;;  %v1969_v14 = vld [vmem:[%s2414_s13 + $0x1b4] ss:$8 sps:$4 sm:$0xff]   ;;  %v1972_v19 = vld [vmem:[%s2414_s13 + $0x1b0] ss:$8 sps:$4 sm:$0xff]  }
  0x70   : > { %1390 = vmatprep.subr.bf16.mxu1 %v1927_v50  ;;  %v741_v15 = vld [vmem:[%s2397_s30] sm:$0xff]  ;;  %v742_v17 = vld [vmem:[%s2397_s30 + $0x8] sm:$0xff]  ;;  %v1973_v21 = vld [vmem:[%s2414_s13 + $0xc4] ss:$8 sps:$4 sm:$0xff]   ;;  %p1838_p13 = scmp.ne.s32.totalorder %s2089_s17, 5 }
  0x71   : > { %v1737_v16 = vcombine.high %v741_v15, %v741_v15  ;;  %v1739_v20 = vcombine.high %v742_v17, %v742_v17  ;;  %v1975_v22 = vld [vmem:[%s2414_s13 + $0x1c4] ss:$8 sps:$4 sm:$0xff]   ;;  %v1977_v23 = vld [vmem:[%s2414_s13 + $0xc0] ss:$8 sps:$4 sm:$0xff]   ;;  %v1979_v25 = vld [vmem:[%s2414_s13 + $0xd4] ss:$8 sps:$4 sm:$0xff]   ;;  %v1736_v38 = vcombine.low %v741_v15, %v741_v15  ;;  %v1738_v39 = vcombine.low %v742_v17, %v742_v17 }
  0x72   : > { %1350 = vmatpush1.bf16.msra.mxu0 %v1929_v51  ;;  %v1978_v24 = vld [vmem:[%s2414_s13 + $0x1c0] ss:$8 sps:$4 sm:$0xff]   ;;  %v1981_v26 = vld [vmem:[%s2414_s13 + $0x1d4] ss:$8 sps:$4 sm:$0xff]   ;;  %v1983_v27 = vld [vmem:[%s2414_s13 + $0xd0] ss:$8 sps:$4 sm:$0xff]  }
  0x73   : > { %1391 = vmatpush1.bf16.msra.mxu1 %v1930_v52  ;;  %1351 = vmatprep.subr.bf16.mxu0 %v1931_v53  ;;  %v1984_v28 = vld [vmem:[%s2414_s13 + $0x1d0] ss:$8 sps:$4 sm:$0xff]   ;;  %v1985_v29 = vld [vmem:[%s2414_s13 + $0xe4] ss:$8 sps:$4 sm:$0xff]   ;;  %v1989_v31 = vld [vmem:[%s2414_s13 + $0xe0] ss:$8 sps:$4 sm:$0xff]  }
  0x74   : > { %1392 = vmatprep.subr.bf16.mxu1 %v1933_v54  ;;  %1373 = vmatprep.mubr.bf16.mxu0 %v1737_v16  ;;  %v1987_v30 = vld [vmem:[%s2414_s13 + $0x1e4] ss:$8 sps:$4 sm:$0xff]   ;;  %v1990_v32 = vld [vmem:[%s2414_s13 + $0x1e0] ss:$8 sps:$4 sm:$0xff]   ;;  %v1991_v33 = vld [vmem:[%s2414_s13 + $0xf4] ss:$8 sps:$4 sm:$0xff]  }
  0x75   : > { %1414 = vmatprep.mubr.bf16.mxu1 %v1739_v20  ;;  %v1993_v34 = vld [vmem:[%s2414_s13 + $0x1f4] ss:$8 sps:$4 sm:$0xff]   ;;  %v1995_v35 = vld [vmem:[%s2414_s13 + $0xf0] ss:$8 sps:$4 sm:$0xff]   ;;  %v2003_v37 = vld [vmem:[%s2414_s13 + $0x204] ss:$8 sps:$4 sm:$0xff]  }
  0x76   : > { %1352 = vmatpush1.bf16.msra.mxu0 %v1935_v55  ;;  %v1996_v36 = vld [vmem:[%s2414_s13 + $0x1f0] ss:$8 sps:$4 sm:$0xff]   ;;  %v2001_v40 = vld [vmem:[%s2414_s13 + $0x200] ss:$8 sps:$4 sm:$0xff]   ;;  %v2006_v42 = vld [vmem:[%s2414_s13 + $0x214] ss:$8 sps:$4 sm:$0xff]  }
  0x77   : > { %1393 = vmatpush1.bf16.msra.mxu1 %v1936_v56  ;;  %1353 = vmatprep.subr.bf16.mxu0 %v1937_v57  ;;  %v2486_v41 = vld [vmem:[%s2397_s30 + $0x10] sm:$0xff]  ;;  %v2004_v44 = vld [vmem:[%s2414_s13 + $0x210] ss:$8 sps:$4 sm:$0xff]   ;;  %v2012_v47 = vld [vmem:[%s2414_s13 + $0x234] ss:$8 sps:$4 sm:$0xff]  }
  0x78   : > { %1394 = vmatprep.subr.bf16.mxu1 %v1939_v58  ;;  %v1741_v43 = vcombine.high %v2486_v41, %v2486_v41  ;;  %v2009_v45 = vld [vmem:[%s2414_s13 + $0x224] ss:$8 sps:$4 sm:$0xff]   ;;  %v2007_v46 = vld [vmem:[%s2414_s13 + $0x220] ss:$8 sps:$4 sm:$0xff]   ;;  %v2010_v48 = vld [vmem:[%s2414_s13 + $0x230] ss:$8 sps:$4 sm:$0xff]  }
  0x79   : > { %v2015_v49 = vld [vmem:[%s2414_s13 + $0x244] ss:$8 sps:$4 sm:$0xff]   ;;  %v2013_v50 = vld [vmem:[%s2414_s13 + $0x240] ss:$8 sps:$4 sm:$0xff]   ;;  %v2018_v51 = vld [vmem:[%s2414_s13 + $0x254] ss:$8 sps:$4 sm:$0xff]  }
  0x7a   : > { %1354 = vmatpush1.bf16.msra.mxu0 %v1941_v59  ;;  %v2016_v52 = vld [vmem:[%s2414_s13 + $0x250] ss:$8 sps:$4 sm:$0xff]   ;;  %v2021_v53 = vld [vmem:[%s2414_s13 + $0x264] ss:$8 sps:$4 sm:$0xff]   ;;  %v2019_v54 = vld [vmem:[%s2414_s13 + $0x260] ss:$8 sps:$4 sm:$0xff]  }
  0x7b   : > { %1395 = vmatpush1.bf16.msra.mxu1 %v1942_v60  ;;  %1355 = vmatprep.subr.bf16.mxu0 %v1943_v61  ;;  %v2024_v55 = vld [vmem:[%s2414_s13 + $0x274] ss:$8 sps:$4 sm:$0xff]   ;;  %v2022_v56 = vld [vmem:[%s2414_s13 + $0x270] ss:$8 sps:$4 sm:$0xff]   ;;  %v2027_v57 = vld [vmem:[%s2414_s13 + $0x284] ss:$8 sps:$4 sm:$0xff]  }
  0x7c   : > { %1396 = vmatprep.subr.bf16.mxu1 %v1945_v62  ;;  %v2025_v58 = vld [vmem:[%s2414_s13 + $0x280] ss:$8 sps:$4 sm:$0xff]   ;;  %v2030_v59 = vld [vmem:[%s2414_s13 + $0x294] ss:$8 sps:$4 sm:$0xff]   ;;  %v2028_v60 = vld [vmem:[%s2414_s13 + $0x290] ss:$8 sps:$4 sm:$0xff]  }
  0x7d   : > { %v2033_v61 = vld [vmem:[%s2414_s13 + $0x2a4] ss:$8 sps:$4 sm:$0xff]   ;;  %v2031_v62 = vld [vmem:[%s2414_s13 + $0x2a0] ss:$8 sps:$4 sm:$0xff]   ;;  %v739_v20 = vld [vmem:[#allocation2] sm:$0xff] }
  0x7e   : > { %1356 = vmatpush1.bf16.msra.mxu0 %v1947_v63  ;;  %v2036_v63 = vld [vmem:[%s2414_s13 + $0x2b4] ss:$8 sps:$4 sm:$0xff]  }
  0x7f   : > { %1397 = vmatpush1.bf16.msra.mxu1 %v1948_v0  ;;  %1357 = vmatprep.subr.bf16.mxu0 %v1949_v1  ;;  %v2034_v0 = vld [vmem:[%s2414_s13 + $0x2b0] ss:$8 sps:$4 sm:$0xff]   ;;  %v2039_v1 = vld [vmem:[%s2414_s13 + $0x2c4] ss:$8 sps:$4 sm:$0xff]  }
  0x80   : > { %1398 = vmatprep.subr.bf16.mxu1 %v1951_v2  ;;  %v2037_v2 = vld [vmem:[%s2414_s13 + $0x2c0] ss:$8 sps:$4 sm:$0xff]  }
  0x82   : > { %1358 = vmatpush1.bf16.msra.mxu0 %v1953_v3  ;;  %v2042_v3 = vld [vmem:[%s2414_s13 + $0x2d4] ss:$8 sps:$4 sm:$0xff]  }
  0x83   : > { %1399 = vmatpush1.bf16.msra.mxu1 %v1954_v4  ;;  %1359 = vmatprep.subr.bf16.mxu0 %v1955_v5  ;;  %v2040_v4 = vld [vmem:[%s2414_s13 + $0x2d0] ss:$8 sps:$4 sm:$0xff]   ;;  %v2045_v5 = vld [vmem:[%s2414_s13 + $0x2e4] ss:$8 sps:$4 sm:$0xff]  }
  0x84   : > { %1400 = vmatprep.subr.bf16.mxu1 %v1957_v6  ;;  %v2043_v6 = vld [vmem:[%s2414_s13 + $0x2e0] ss:$8 sps:$4 sm:$0xff]  }
  0x86   : > { %1360 = vmatpush1.bf16.msra.mxu0 %v1959_v7  ;;  %v2048_v7 = vld [vmem:[%s2414_s13 + $0x2f4] ss:$8 sps:$4 sm:$0xff]  }
  0x87   : > { %1401 = vmatpush1.bf16.msra.mxu1 %v1960_v8  ;;  %1361 = vmatprep.subr.bf16.mxu0 %v1961_v9  ;;  %v2046_v8 = vld [vmem:[%s2414_s13 + $0x2f0] ss:$8 sps:$4 sm:$0xff]   ;;  %v1740_v9 = vcombine.low %v2486_v41, %v2486_v41 }
  0x88   : > { %1402 = vmatprep.subr.bf16.mxu1 %v1963_v10 }
  0x8a   : > { %1362 = vmatpush1.bf16.msra.mxu0 %v1965_v11 }
  0x8b   : > { %1403 = vmatpush1.bf16.msra.mxu1 %v1966_v12  ;;  %1363 = vmatprep.subr.bf16.mxu0 %v1967_v13 }
  0x8c   : > { %1404 = vmatprep.subr.bf16.mxu1 %v1969_v14 }
  0x8e   : > { %1364 = vmatpush1.bf16.msra.mxu0 %v1971_v18 }
  0x8f   : > { %1405 = vmatpush1.bf16.msra.mxu1 %v1972_v19  ;;  %1365 = vmatprep.subr.bf16.mxu0 %v1973_v21 }
  0x90   : > { %1406 = vmatprep.subr.bf16.mxu1 %v1975_v22 }
  0x92   : > { %1366 = vmatpush1.bf16.msra.mxu0 %v1977_v23  ;;  %v740_v23 = vld [vmem:[#allocation2 + $0x8] sm:$0xff] }
  0x93   : > { %1407 = vmatpush1.bf16.msra.mxu1 %v1978_v24  ;;  %1367 = vmatprep.subr.bf16.mxu0 %v1979_v25 }
  0x94   : > { %1408 = vmatprep.subr.bf16.mxu1 %v1981_v26 }
  0x96   : > { %1368 = vmatpush1.bf16.msra.mxu0 %v1983_v27 }
  0x97   : > { %1409 = vmatpush1.bf16.msra.mxu1 %v1984_v28  ;;  %1369 = vmatprep.subr.bf16.mxu0 %v1985_v29 }
  0x98   : > { %1410 = vmatprep.subr.bf16.mxu1 %v1987_v30 }
  0x9a   : > { %1370 = vmatpush1.bf16.msra.mxu0 %v1989_v31 }
  0x9b   : > { %1411 = vmatpush1.bf16.msra.mxu1 %v1990_v32  ;;  %1371 = vmatprep.subr.bf16.mxu0 %v1991_v33 }
  0x9c   : > { %1412 = vmatprep.subr.bf16.mxu1 %v1993_v34 }
  0x9e   : > { %1372 = vmatpush1.bf16.msra.mxu0 %v1995_v35 }
  0x9f   : > { %1413 = vmatpush1.bf16.msra.mxu1 %v1996_v36  ;;  %1423 = vmatprep.subr.bf16.mxu0 %v2003_v37 }
  0xa1   : > { %1374 = vmatmul.mubr.bf16.vlgmr.msra.gmra.mrb[0].mxu0 %v1736_v38 }
  0xa2   : > { %1415 = vmatmul.mubr.bf16.vlgmr.msra.gmra.mrb[0].mxu1 %v1738_v39  ;;  %1424 = vmatpush1.bf16.msra.mxu0 %v2001_v40 }
  0xa3   : > { %1455 = vmatprep.mubr.bf16.mxu0 %v1741_v43  ;;  %1425 = vmatprep.subr.bf16.mxu0 %v2006_v42 }
  0xa6   : > { %1426 = vmatpush1.bf16.msra.mxu0 %v2004_v44 }
  0xa7   : > { %1427 = vmatprep.subr.bf16.mxu0 %v2009_v45 }
  0xaa   : > { %1428 = vmatpush1.bf16.msra.mxu0 %v2007_v46 }
  0xab   : > { %1429 = vmatprep.subr.bf16.mxu0 %v2012_v47 }
  0xae   : > { %1430 = vmatpush1.bf16.msra.mxu0 %v2010_v48 }
  0xaf   : > { %1431 = vmatprep.subr.bf16.mxu0 %v2015_v49 }
  0xb2   : > { %1432 = vmatpush1.bf16.msra.mxu0 %v2013_v50 }
  0xb3   : > { %1433 = vmatprep.subr.bf16.mxu0 %v2018_v51 }
  0xb6   : > { %1434 = vmatpush1.bf16.msra.mxu0 %v2016_v52 }
  0xb7   : > { %1435 = vmatprep.subr.bf16.mxu0 %v2021_v53 }
  0xba   : > { %1436 = vmatpush1.bf16.msra.mxu0 %v2019_v54 }
  0xbb   : > { %1437 = vmatprep.subr.bf16.mxu0 %v2024_v55 }
  0xbe   : > { %1438 = vmatpush1.bf16.msra.mxu0 %v2022_v56 }
  0xbf   : > { %1439 = vmatprep.subr.bf16.mxu0 %v2027_v57 }
  0xc2   : > { %1440 = vmatpush1.bf16.msra.mxu0 %v2025_v58 }
  0xc3   : > { %1441 = vmatprep.subr.bf16.mxu0 %v2030_v59 }
  0xc6   : > { %1442 = vmatpush1.bf16.msra.mxu0 %v2028_v60 }
  0xc7   : > { %1443 = vmatprep.subr.bf16.mxu0 %v2033_v61 }
  0xca   : > { %1444 = vmatpush1.bf16.msra.mxu0 %v2031_v62 }
  0xcb   : > { %1445 = vmatprep.subr.bf16.mxu0 %v2036_v63 }
  0xce   : > { %1446 = vmatpush1.bf16.msra.mxu0 %v2034_v0 }
  0xcf   : > { %1447 = vmatprep.subr.bf16.mxu0 %v2039_v1 }
  0xd2   : > { %1448 = vmatpush1.bf16.msra.mxu0 %v2037_v2 }
  0xd3   : > { %1449 = vmatprep.subr.bf16.mxu0 %v2042_v3 }
  0xd6   : > { %1450 = vmatpush1.bf16.msra.mxu0 %v2040_v4 }
  0xd7   : > { %1451 = vmatprep.subr.bf16.mxu0 %v2045_v5 }
  0xda   : > { %1452 = vmatpush1.bf16.msra.mxu0 %v2043_v6 }
  0xdb   : > { %1453 = vmatprep.subr.bf16.mxu0 %v2048_v7 }
  0xde   : > { %1454 = vmatpush1.bf16.msra.mxu0 %v2046_v8 }
  0xe1   : > { %1456 = vmatmul.mubr.bf16.vlgmr.msra.gmra.mrb[4].mxu0 %v1740_v9 }
 0x174   : > { %v1375_v10 = vpop.f32.mrb[0].mxu0 }
 0x175   : > { %v1416_v11 = vpop.f32.mrb[0].mxu1  ;;  %v1377_v13 = vpop.f32.mrb[1].mxu0 }
 0x176   : > { %v1417_v12 = vadd.f32 %v1416_v11, %v1375_v10  ;;  %v1418_v14 = vpop.f32.mrb[1].mxu1  ;;  %v1379_v16 = vpop.f32.mrb[2].mxu0 }
 0x177   : > { %v1419_v15 = vadd.f32 %v1418_v14, %v1377_v13  ;;  %v1420_v17 = vpop.f32.mrb[2].mxu1  ;;  %v1380_v18 = vpop.f32.mrb[3].mxu0 }
 0x178   : > { %v1421_v19 = vpop.f32.mrb[3].mxu1 }
 0x1b4   : > { %v1457_v21 = vpop.f32.mrb[4].mxu0  ;;  %1471 = sbr.rel (%p1838_p13) target bundleno = 465 (0x1d1), region = 74 }
 0x1b5   : > { %v1458_v22 = vadd.f32 %v1457_v21, %v1417_v12  ;;  %v1459_v24 = vpop.f32.mrb[5].mxu0 }
 0x1b6   : > { %v1460_v25 = vadd.f32 %v1459_v24, %v1419_v15  ;;  %v1461_v26 = vpop.f32.mrb[6].mxu0 }
 0x1b7   : > { %v1464_v27 = vadd.f32 %v1458_v22, %v739_v20  ;;  %v1462_v28 = vpop.f32.mrb[7].mxu0 }
 0x1b8   : > { %v1465_v29 = vadd.f32 %v1460_v25, %v740_v23 }
 0x1b9   : > { %1466 = vst [vmem:[#allocation2] sm:$0xff] %v1464_v27 }
 0x1ba   : > { %1467 = vst [vmem:[#allocation2 + $0x8] sm:$0xff] %v1465_v29 }
 0x1c0   : > { %v1472_v30 = vld [vmem:[#allocation2] sm:$0xff] }
 0x1c1   : > { %v1473_v31 = vld [vmem:[#allocation2 + $0x8] sm:$0xff]  ;;  %1474 = vst [vmem:[%s2402_s8] sm:$0xff] %v1472_v30  ;;  %v1476_v32 = vrot.slane %v1472_v30, 4  ;;  %v1490_v33 = vmul.f32 %v1472_v30, %v1472_v30 }
 0x1c2   : > { %v1482_v34 = vrot.slane %v1473_v31, 4  ;;  %v1491_v35 = vmul.f32 %v1473_v31, %v1473_v31  ;;  %1475 = vst [vmem:[%s2402_s8 + $0x8] sm:$0xff] %v1473_v31 }
 0x1c3   : > { %v1477_v36 = vadd.f32 %v1476_v32, %v1472_v30  ;;  %v1492_v37 = vrot.slane %v1490_v33, 4 }
 0x1c4   : > { %v1483_v38 = vadd.f32 %v1482_v34, %v1473_v31  ;;  %v1498_v39 = vrot.slane %v1491_v35, 4 }
 0x1c5   : > { %v1478_v40 = vrot.slane %v1477_v36, 2  ;;  %v1493_v41 = vadd.f32 %v1492_v37, %v1490_v33 }
 0x1c6   : > { %v1484_v42 = vrot.slane %v1483_v38, 2  ;;  %v1499_v43 = vadd.f32 %v1498_v39, %v1491_v35 }
 0x1c7   : > { %v1479_v44 = vadd.f32 %v1478_v40, %v1477_v36  ;;  %v1494_v45 = vrot.slane %v1493_v41, 2 }
 0x1c8   : > { %v1485_v46 = vadd.f32 %v1484_v42, %v1483_v38  ;;  %v1500_v47 = vrot.slane %v1499_v43, 2 }
 0x1c9   : > { %v1480_v48 = vrot.slane %v1479_v44, 1  ;;  %v1495_v49 = vadd.f32 %v1494_v45, %v1493_v41 }
 0x1ca   : > { %v1486_v50 = vrot.slane %v1485_v46, 1  ;;  %v1501_v51 = vadd.f32 %v1500_v47, %v1499_v43 }
 0x1cb   : > { %v1481_v52 = vadd.f32 %v1480_v48, %v1479_v44  ;;  %v1496_v53 = vrot.slane %v1495_v49, 1 }
 0x1cc   : > { %v1487_v54 = vadd.f32 %v1486_v50, %v1485_v46  ;;  %v1502_v55 = vrot.slane %v1501_v51, 1 }
 0x1cd   : > { %1488 = vst [vmem:[%s2407_s18] sm:$0xff] %v1481_v52  ;;  %v1497_v56 = vadd.f32 %v1496_v53, %v1495_v49 }
 0x1ce   : > { %v1503_v57 = vadd.f32 %v1502_v55, %v1501_v51  ;;  %1489 = vst [vmem:[%s2407_s18 + $0x8] sm:$0xff] %v1487_v54 }
 0x1cf   : > { %1504 = vst [vmem:[%s2412_s12] sm:$0xff] %v1497_v56 }
 0x1d0   : > { %1505 = vst [vmem:[%s2412_s12 + $0x8] sm:$0xff] %v1503_v57 }
 0x1d1 PF: > { %s15_s21 = sadd.s32 1, %s2105_s21   ;;  %s2555_s15 = smov %s2085_s16 }
 0x1d2   : > { %p12_p0 = scmp.ge.s32.totalorder %s15_s21, 14   ;;  %s2556_s16 = smov %s2184_s28 }
 0x1d3   : > { %s2557_s17 = smov %s2097_s19  ;;  %s2558_s18 = smov %s2101_s20 }
 0x1d4   : > { %s2559_s19 = smov %s2562_s22  ;;  %s2560_s20 = smov %s2566_s23 }
 0x1d5   :  { %14 = sbr.rel (!%p12_p0) target bundleno = 4 (0x4), region = 136 }

// kernel: resnet18_forward.79
= control target key start
LH: loop header
LB: loop body
LE: loop exit
PB: predicated region body
PF: predicated region fallthrough
CT: control target
= control target key end

     0   :  { %v20_v0 = vlaneseq  ;;  %v101_v1 = vmov 1983009808   ;;  %s142_s1 = inlined_call_operand.vmem [shape: f32[1,512], index: 1, kind: input, shape index: {}]   ;;  %s143_s2 = inlined_call_operand.vmem [shape: f32[1,512], index: 2, kind: input, shape index: {}]   ;;  %s144_s0 = inlined_call_operand.vmem [shape: f32[2,512], index: 0, kind: input, shape index: {}]   ;;  %s145_s3 = inlined_call_operand.vmem [shape: f32[2,512], index: 3, kind: input, shape index: {}]   ;;  %s146_s4 = inlined_call_operand.vmem [shape: f32[2,512], index: 4, kind: output, shape index: {}]  }
   0x1   :  { %v39_v2 = vunpack.c.l.s4 %v101_v1  ;;  %v18_v4 = vld [vmem:[%s142_s1] sm:$0xf] }
   0x2   :  { %v21_v3 = vshrl.u32 %v20_v0, 7  ;;  %v55_v10 = vld [vmem:[%s143_s2] sm:$0xf] }
   0x3   :  { %v40_v5 = vunpack.c.0.s8 %v39_v2  ;;  %v17_v26 = vld [vmem:[%s144_s0] sm:$0xff] }
   0x4   :  { %v22_v6 = vsub.s32 0, %v21_v3  ;;  %v26_v7 = vsub.s32 1, %v21_v3  ;;  %v30_v8 = vsub.s32 2, %v21_v3  ;;  %v34_v9 = vsub.s32 3, %v21_v3  ;;  %v92_v32 = vld [vmem:[%s145_s3] sm:$0xff] }
   0x5   :  { %v43_v11 = vsub.s32 %v40_v5, %v21_v3 }
   0x6   :  { %v23_v12 = vrot.slane %v18_v4, %v22_v6  ;;  %v27_v13 = vrot.slane %v18_v4, %v26_v7  ;;  %v31_v14 = vrot.slane %v18_v4, %v30_v8  ;;  %v35_v15 = vrot.slane %v18_v4, %v34_v9 }
   0x7   :  { %v60_v16 = vrot.slane %v55_v10, %v22_v6  ;;  %v64_v17 = vrot.slane %v55_v10, %v26_v7  ;;  %v68_v18 = vrot.slane %v55_v10, %v30_v8  ;;  %v72_v19 = vrot.slane %v55_v10, %v34_v9 }
   0x8   :  { %v36_v20 = vcombine.low %v23_v12, %v27_v13  ;;  %v37_v21 = vcombine.low %v31_v14, %v35_v15 }
   0x9   :  { %v73_v22 = vcombine.low %v60_v16, %v64_v17  ;;  %v74_v23 = vcombine.low %v68_v18, %v72_v19 }
   0xa   :  { %v44_v24 = vrot.slane %v36_v20, %v43_v11  ;;  %v51_v25 = vrot.slane %v37_v21, %v43_v11 }
   0xb   :  { %v81_v27 = vrot.slane %v73_v22, %v43_v11  ;;  %v88_v28 = vrot.slane %v74_v23, %v43_v11 }
   0xc   :  { %v52_v29 = vcombine.low %v44_v24, %v51_v25 }
   0xd   :  { %v89_v30 = vcombine.low %v81_v27, %v88_v28 }
   0xe   :  { %v54_v31 = vmul.f32 %v52_v29, %v17_v26 }
  0x10   :  { %v91_v33 = vadd.f32 %v89_v30, %v54_v31 }
  0x12   :  { %v93_v34 = vadd.f32 %v92_v32, %v91_v33 }
  0x14   :  { %v94_v35 = vmax.f32 %v93_v34, 0.0 }
  0x16   :  { %95 = vst [vmem:[%s146_s4] sm:$0xff] %v94_v35 }

// kernel: resnet18_forward.84
= control target key start
LH: loop header
LB: loop body
LE: loop exit
PB: predicated region body
PF: predicated region fallthrough
CT: control target
= control target key end

     0   :  { %s193_s6 = smov 0   ;;  %s213_s0 = inlined_call_operand.vmem [shape: f32[2,1,512], index: 0, kind: input, shape index: {}]   ;;  %s214_s1 = inlined_call_operand.vmem [shape: f32[2,1,512], index: 1, kind: output, shape index: {}]  }
   0x1 LB: > { %s172_s7 = sadd.s32 4294967295, %s195_s6   ;;  %p176_p0 = scmp.ge.s32.totalorder %s195_s6, 1  ;;  %s195_s6 = sphi %s193_s6, %s11_s6  }
   0x2   : > { %p86_p1 = scmp.lt.s32.totalorder %s195_s6, 3 }
   0x4   : > { %p87_p2 = pnand %p176_p0, %p86_p1 }
   0x5   : > { %p104_p3 = scmp.lt.s32.totalorder (!%p87_p2), %s172_s7, 1  ;;  %v114_v0 = vlaneseq (!%p87_p2) }
   0x6   : > { %90 = sbr.rel (%p87_p2) target bundleno = 18 (0x12), region = 24 }
   0x7   : > { %vm116_vm0 = vcmp.lt.s32.totalorder (!%p87_p2), %v114_v0, 512 }
   0xd   : > { %s216_s7 = smov (!%p104_p3, %s172_s7), 1 }
   0xe   : > { %s177_s8 = sshll.u32 %s216_s7, 2 }
   0xf   : > { %s107_s11 = scalar_lea.vmem %s213_s0, %s177_s8  ;;  %s111_s14 = scalar_lea.vmem %s214_s1, %s177_s8 }
  0x10   : > { %v112_v1 = vld [vmem:[%s107_s11] sm:$0xf] }
  0x11   : > { %118 = vst.msk [vmem:[%s111_s14] sm:$0xf] %vm116_vm0, %v112_v1 }
  0x12 PF: > { %s11_s6 = sadd.s32 1, %s195_s6  }
  0x13   : > { %p8_p4 = scmp.ge.s32.totalorder %s11_s6, 4  }
  0x15   :  { %10 = sbr.rel (!%p8_p4) target bundleno = 1 (0x1), region = 54 }

// kernel: resnet18_forward.85
= control target key start
LH: loop header
LB: loop body
LE: loop exit
PB: predicated region body
PF: predicated region fallthrough
CT: control target
= control target key end

     0   :  { %vm19_vm0 = vcmask 80896   ;;  %v512_v38 = vmov 0.0   ;;  %s644_s1 = inlined_call_operand.vmem [shape: bf16[512,10], index: 1, kind: input, shape index: {}]   ;;  %s645_s0 = inlined_call_operand.vmem [shape: bf16[8,512], index: 0, kind: input, shape index: {}]   ;;  %s646_s2 = inlined_call_operand.vmem [shape: f32[1,10], index: 2, kind: input, shape index: {}]   ;;  %s647_s3 = inlined_call_operand.vmem [shape: f32[8,10], index: 3, kind: output, shape index: {}]  }
   0x1   :  { %v476_v0 = vld [vmem:[%s644_s1 + $0x40] sm:$0xff]   ;;  %v480_v4 = vld [vmem:[%s644_s1 + $0x48] sm:$0xff]   ;;  %v484_v8 = vld [vmem:[%s644_s1 + $0x50] sm:$0xff]   ;;  %20 = vst.msk [vmem:[#allocation2] sm:$0xff] %vm19_vm0, %v512_v38 }
   0x2   :  { %v477_v1 = vld [vmem:[%s644_s1 + $0xc0] sm:$0xff]   ;;  %431 = vmatprep.subr.bf16.mxu0 %v476_v0  ;;  %v481_v5 = vld [vmem:[%s644_s1 + $0xc8] sm:$0xff]   ;;  %v485_v9 = vld [vmem:[%s644_s1 + $0xd0] sm:$0xff]  }
   0x3   :  { %v478_v2 = vld [vmem:[%s644_s1] sm:$0xff]   ;;  %453 = vmatprep.subr.bf16.mxu1 %v477_v1  ;;  %v482_v6 = vld [vmem:[%s644_s1 + $0x8] sm:$0xff]   ;;  %v486_v10 = vld [vmem:[%s644_s1 + $0x10] sm:$0xff]  }
   0x4   :  { %v479_v3 = vld [vmem:[%s644_s1 + $0x80] sm:$0xff]   ;;  %432 = vmatpush3.bf16.msra.mxu0 %v478_v2  ;;  %v483_v7 = vld [vmem:[%s644_s1 + $0x88] sm:$0xff]   ;;  %v487_v11 = vld [vmem:[%s644_s1 + $0x90] sm:$0xff]  }
   0x5   :  { %454 = vmatpush3.bf16.msra.mxu1 %v479_v3  ;;  %433 = vmatprep.subr.bf16.mxu0 %v480_v4  ;;  %v488_v12 = vld [vmem:[%s644_s1 + $0x58] sm:$0xff]   ;;  %v492_v16 = vld [vmem:[%s644_s1 + $0x60] sm:$0xff]   ;;  %v496_v20 = vld [vmem:[%s644_s1 + $0x68] sm:$0xff]  }
   0x6   :  { %455 = vmatprep.subr.bf16.mxu1 %v481_v5  ;;  %v489_v13 = vld [vmem:[%s644_s1 + $0xd8] sm:$0xff]   ;;  %v493_v17 = vld [vmem:[%s644_s1 + $0xe0] sm:$0xff]   ;;  %v497_v21 = vld [vmem:[%s644_s1 + $0xe8] sm:$0xff]  }
   0x7   :  { %v490_v14 = vld [vmem:[%s644_s1 + $0x18] sm:$0xff]   ;;  %v494_v18 = vld [vmem:[%s644_s1 + $0x20] sm:$0xff]   ;;  %v498_v22 = vld [vmem:[%s644_s1 + $0x28] sm:$0xff]  }
   0x8   :  { %434 = vmatpush3.bf16.msra.mxu0 %v482_v6  ;;  %v491_v15 = vld [vmem:[%s644_s1 + $0x98] sm:$0xff]   ;;  %v495_v19 = vld [vmem:[%s644_s1 + $0xa0] sm:$0xff]   ;;  %v499_v23 = vld [vmem:[%s644_s1 + $0xa8] sm:$0xff]  }
   0x9   :  { %456 = vmatpush3.bf16.msra.mxu1 %v483_v7  ;;  %435 = vmatprep.subr.bf16.mxu0 %v484_v8  ;;  %v500_v24 = vld [vmem:[%s644_s1 + $0x70] sm:$0xff]   ;;  %v504_v28 = vld [vmem:[%s644_s1 + $0x78] sm:$0xff]   ;;  %v22_v32 = vld [vmem:[%s645_s0] sm:$0xff] }
   0xa   :  { %457 = vmatprep.subr.bf16.mxu1 %v485_v9  ;;  %v501_v25 = vld [vmem:[%s644_s1 + $0xf0] sm:$0xff]   ;;  %v505_v29 = vld [vmem:[%s644_s1 + $0xf8] sm:$0xff]   ;;  %v23_v33 = vld [vmem:[%s645_s0 + $0x8] sm:$0xff]  ;;  %v394_v34 = vcombine.low %v22_v32, %v22_v32  ;;  %v395_v35 = vcombine.high %v22_v32, %v22_v32 }
   0xb   :  { %v502_v26 = vld [vmem:[%s644_s1 + $0x30] sm:$0xff]   ;;  %v506_v30 = vld [vmem:[%s644_s1 + $0x38] sm:$0xff]   ;;  %v396_v36 = vcombine.low %v23_v33, %v23_v33  ;;  %v397_v37 = vcombine.high %v23_v33, %v23_v33  ;;  %v21_v47 = vld [vmem:[#allocation2] sm:$0xff] }
   0xc   :  { %436 = vmatpush3.bf16.msra.mxu0 %v486_v10  ;;  %v503_v27 = vld [vmem:[%s644_s1 + $0xb0] sm:$0xff]   ;;  %v507_v31 = vld [vmem:[%s644_s1 + $0xb8] sm:$0xff]   ;;  %326 = vmatprep.mubr.bf16.mxu0 %v395_v35  ;;  %v430_v52 = vld [vmem:[%s646_s2] ss:$0 sm:$0xff] }
   0xd   :  { %458 = vmatpush3.bf16.msra.mxu1 %v487_v11  ;;  %437 = vmatprep.subr.bf16.mxu0 %v488_v12 }
   0xe   :  { %459 = vmatprep.subr.bf16.mxu1 %v489_v13  ;;  %366 = vmatprep.mubr.bf16.mxu1 %v397_v37 }
  0x10   :  { %438 = vmatpush3.bf16.msra.mxu0 %v490_v14 }
  0x11   :  { %460 = vmatpush3.bf16.msra.mxu1 %v491_v15  ;;  %439 = vmatprep.subr.bf16.mxu0 %v492_v16 }
  0x12   :  { %461 = vmatprep.subr.bf16.mxu1 %v493_v17 }
  0x14   :  { %440 = vmatpush3.bf16.msra.mxu0 %v494_v18 }
  0x15   :  { %462 = vmatpush3.bf16.msra.mxu1 %v495_v19  ;;  %441 = vmatprep.subr.bf16.mxu0 %v496_v20 }
  0x16   :  { %463 = vmatprep.subr.bf16.mxu1 %v497_v21 }
  0x18   :  { %442 = vmatpush3.bf16.msra.mxu0 %v498_v22 }
  0x19   :  { %464 = vmatpush3.bf16.msra.mxu1 %v499_v23  ;;  %443 = vmatprep.subr.bf16.mxu0 %v500_v24 }
  0x1a   :  { %465 = vmatprep.subr.bf16.mxu1 %v501_v25 }
  0x1c   :  { %444 = vmatpush3.bf16.msra.mxu0 %v502_v26 }
  0x1d   :  { %466 = vmatpush3.bf16.msra.mxu1 %v503_v27  ;;  %445 = vmatprep.subr.bf16.mxu0 %v504_v28 }
  0x1e   :  { %467 = vmatprep.subr.bf16.mxu1 %v505_v29 }
  0x20   :  { %446 = vmatpush3.bf16.msra.mxu0 %v506_v30 }
  0x21   :  { %468 = vmatpush3.bf16.msra.mxu1 %v507_v31 }
  0x23   :  { %327 = vmatmul.mubr.bf16.vlgmr.msra.gmra.mrb[0].mxu0 %v394_v34 }
  0x24   :  { %367 = vmatmul.mubr.bf16.vlgmr.msra.gmra.mrb[0].mxu1 %v396_v36 }
  0xf6   :  { %v447_v39 = vpop.f32.mrb[0].mxu0 }
  0xf7   :  { %v469_v40 = vpop.f32.mrb[0].mxu1  ;;  %v448_v41 = vpop.f32.mrb[1].mxu0 }
  0xf8   :  { %v470_v42 = vpop.f32.mrb[1].mxu1  ;;  %v449_v43 = vadd.f32 %v448_v41, %v447_v39  ;;  %v450_v45 = vpop.f32.mrb[2].mxu0 }
  0xf9   :  { %v471_v44 = vadd.f32 %v470_v42, %v469_v40  ;;  %v472_v46 = vpop.f32.mrb[2].mxu1  ;;  %v451_v48 = vpop.f32.mrb[3].mxu0 }
  0xfa   :  { %v473_v49 = vpop.f32.mrb[3].mxu1 }
  0xfb   :  { %v369_v50 = vadd.f32 %v471_v44, %v449_v43 }
  0xfd   :  { %v374_v51 = vadd.f32 %v369_v50, %v21_v47 }
  0xff   :  { %376 = vst.msk [vmem:[#allocation2] sm:$0xff] %vm19_vm0, %v374_v51 }
 0x106   :  { %v380_v53 = vld [vmem:[#allocation2] sm:$0xff] }
 0x107   :  { %v388_v54 = vadd.f32 %v430_v52, %v380_v53 }
 0x109   :  { %389 = vst.msk [vmem:[%s647_s3] sm:$0xff] %vm19_vm0, %v388_v54 }

</bundles_post_ra>
